<compile_context>
chip_gen: v7x
topology: tpu7x:2x2x1
jax: 0.10.0
libtpu: 0.0.40
codegen_flags: <defaults>
</compile_context>

<pallas_src>
import functools

import jax
import jax.numpy as jnp
from jax.experimental import pallas as pl
from jax.experimental.pallas import tpu as pltpu


LN_EPS = 1e-5


# ----------------------------- in-kernel helpers -----------------------------

def _softmax_last_approx(x):
    # attention-prob softmax: approx reciprocal goes to the EUP slot (free-ish)
    x = x - jnp.max(x, axis=-1, keepdims=True)
    e = jnp.exp(x)
    return e * pl.reciprocal(jnp.sum(e, axis=-1, keepdims=True), approx=True)


def _mha(xq, xkv, wqkv_ref, bqkv_ref, wo_ref, bo_ref, *, nhead, scale):
    """Multi-head attention on f32 values: (Sq, D) x (Sk, D) -> (Sq, D).

    Pre-packed per-head weights:
      wqkv: (3*H, D, Dh)  -- q heads, then k heads, then v heads
      bqkv: (3*H, 1, Dh)
      wo:   (H, Dh, D)    -- rows h*Dh:(h+1)*Dh of the out-proj weight
      bo:   (1, D)
    Only full-block matmuls + static leading-axis ref indexing are used, so the
    kernel needs no reshapes / lane slices; the score matmul (Sq, Sk) and the
    out-proj contribution (Sq, D) keep the lane axis reasonably dense.
    """
    out = None
    for h in range(nhead):
        qh = jnp.dot(xq, wqkv_ref[h],
                     preferred_element_type=jnp.float32) + bqkv_ref[h]
        kh = jnp.dot(xkv, wqkv_ref[nhead + h],
                     preferred_element_type=jnp.float32) + bqkv_ref[nhead + h]
        vh = jnp.dot(xkv, wqkv_ref[2 * nhead + h],
                     preferred_element_type=jnp.float32) + bqkv_ref[2 * nhead + h]
        # scores = qh @ kh^T  (contract the Dh axis of both operands)
        s = jax.lax.dot_general(qh, kh, (((1,), (1,)), ((), ())),
                                preferred_element_type=jnp.float32) * scale
        p = _softmax_last_approx(s)                                  # (Sq, Sk)
        oh = jnp.dot(p, vh, preferred_element_type=jnp.float32)      # (Sq, Dh)
        c = jnp.dot(oh, wo_ref[h], preferred_element_type=jnp.float32)  # (Sq, D)
        out = c if out is None else out + c
    return out + bo_ref[...]


def _add_layernorm(x, y, g_ref, b_ref, eps):
    # fused residual add + LayerNorm over the feature axis
    z = x + y
    mu = jnp.mean(z, axis=-1, keepdims=True)
    var = jnp.mean(jnp.square(z - mu), axis=-1, keepdims=True)
    return (z - mu) * jax.lax.rsqrt(var + eps) * g_ref[...] + b_ref[...]


def _ffn(x, w1_ref, b1_ref, w2_ref, b2_ref):
    h = jnp.dot(x, w1_ref[...], preferred_element_type=jnp.float32) + b1_ref[...]
    h = jnp.maximum(h, 0.0)
    return jnp.dot(h, w2_ref[...], preferred_element_type=jnp.float32) + b2_ref[...]


# ------------------------------- fused kernels -------------------------------

def _encoder_layer_kernel(x_ref, wqkv_ref, bqkv_ref, wo_ref, bo_ref,
                          g1_ref, be1_ref, w1_ref, bf1_ref, w2_ref, bf2_ref,
                          g2_ref, be2_ref, o_ref, *, nhead, scale, eps):
    # post-norm encoder layer (torch norm_first=False); dropout = identity
    x = x_ref[0].astype(jnp.float32)                                   # (S, D)
    attn = _mha(x, x, wqkv_ref, bqkv_ref, wo_ref, bo_ref,
                nhead=nhead, scale=scale)
    h = _add_layernorm(x, attn, g1_ref, be1_ref, eps)
    ff = _ffn(h, w1_ref, bf1_ref, w2_ref, bf2_ref)
    y = _add_layernorm(h, ff, g2_ref, be2_ref, eps)
    o_ref[0] = y.astype(o_ref.dtype)


def _decoder_layer_kernel(y_ref, mem_ref,
                          sa_wqkv, sa_bqkv, sa_wo, sa_bo, g1_ref, be1_ref,
                          ca_wqkv, ca_bqkv, ca_wo, ca_bo, g2_ref, be2_ref,
                          w1_ref, bf1_ref, w2_ref, bf2_ref, g3_ref, be3_ref,
                          o_ref, *, nhead, scale, eps):
    y = y_ref[0].astype(jnp.float32)                                   # (T, D)
    mem = mem_ref[0].astype(jnp.float32)                               # (S, D)
    a = _mha(y, y, sa_wqkv, sa_bqkv, sa_wo, sa_bo, nhead=nhead, scale=scale)
    y = _add_layernorm(y, a, g1_ref, be1_ref, eps)
    a = _mha(y, mem, ca_wqkv, ca_bqkv, ca_wo, ca_bo, nhead=nhead, scale=scale)
    y = _add_layernorm(y, a, g2_ref, be2_ref, eps)
    f = _ffn(y, w1_ref, bf1_ref, w2_ref, bf2_ref)
    y = _add_layernorm(y, f, g3_ref, be3_ref, eps)
    o_ref[0] = y.astype(o_ref.dtype)


def _layernorm_kernel(x_ref, g_ref, b_ref, o_ref, *, eps):
    x = x_ref[0].astype(jnp.float32)
    mu = jnp.mean(x, axis=-1, keepdims=True)
    var = jnp.mean(jnp.square(x - mu), axis=-1, keepdims=True)
    o_ref[0] = ((x - mu) * jax.lax.rsqrt(var + eps) * g_ref[...]
                + b_ref[...]).astype(o_ref.dtype)


def _norm_fc_softmax_kernel(y_ref, g_ref, b_ref, w_ref, fb_ref, o_ref, *, eps):
    # fused: final decoder LayerNorm -> fc (vocab padded to 128 lanes) -> softmax
    y = y_ref[0].astype(jnp.float32)                                   # (T, D)
    mu = jnp.mean(y, axis=-1, keepdims=True)
    var = jnp.mean(jnp.square(y - mu), axis=-1, keepdims=True)
    yn = (y - mu) * jax.lax.rsqrt(var + eps) * g_ref[...] + b_ref[...]
    logits = jnp.dot(yn, w_ref[...], preferred_element_type=jnp.float32) + fb_ref[...]
    # padded columns carry a -1e30 bias -> exp == 0, so row sums only cover the
    # real vocab.  Exact divide here keeps output probabilities faithful.
    logits = logits - jnp.max(logits, axis=-1, keepdims=True)
    e = jnp.exp(logits)
    o_ref[0] = (e / jnp.sum(e, axis=-1, keepdims=True)).astype(o_ref.dtype)


# ----------------------------- pallas_call wrappers ---------------------------

def _full_spec(shape):
    zeros = (0,) * len(shape)
    return pl.BlockSpec(shape, lambda b: zeros)


def encoder_layer(x, p, *, nhead, eps=LN_EPS):
    B, S, D = x.shape
    dh = D // nhead
    dff = p["w1"].shape[1]
    scale = 1.0 / float(dh) ** 0.5
    kernel = functools.partial(_encoder_layer_kernel, nhead=nhead, scale=scale, eps=eps)
    in_specs = [
        pl.BlockSpec((1, S, D), lambda b: (b, 0, 0)),          # x
        _full_spec((3 * nhead, D, dh)),                        # sa_wqkv
        _full_spec((3 * nhead, 1, dh)),                        # sa_bqkv
        _full_spec((nhead, dh, D)),                            # sa_wo
        _full_spec((1, D)),                                    # sa_bo
        _full_spec((1, D)), _full_spec((1, D)),                # g1, be1
        _full_spec((D, dff)), _full_spec((1, dff)),            # w1, bf1
        _full_spec((dff, D)), _full_spec((1, D)),              # w2, bf2
        _full_spec((1, D)), _full_spec((1, D)),                # g2, be2
    ]
    return pl.pallas_call(
        kernel,
        out_shape=jax.ShapeDtypeStruct((B, S, D), x.dtype),
        grid=(B,),
        in_specs=in_specs,
        out_specs=pl.BlockSpec((1, S, D), lambda b: (b, 0, 0)),
        compiler_params=pltpu.CompilerParams(dimension_semantics=("parallel",)),
    )(x, p["sa_wqkv"], p["sa_bqkv"], p["sa_wo"], p["sa_bo"],
      p["g1"], p["be1"], p["w1"], p["bf1"], p["w2"], p["bf2"],
      p["g2"], p["be2"])


def decoder_layer(y, mem, p, *, nhead, eps=LN_EPS):
    B, T, D = y.shape
    S = mem.shape[1]
    dh = D // nhead
    dff = p["w1"].shape[1]
    scale = 1.0 / float(dh) ** 0.5
    kernel = functools.partial(_decoder_layer_kernel, nhead=nhead, scale=scale, eps=eps)
    in_specs = [
        pl.BlockSpec((1, T, D), lambda b: (b, 0, 0)),          # y
        pl.BlockSpec((1, S, D), lambda b: (b, 0, 0)),          # mem
        _full_spec((3 * nhead, D, dh)), _full_spec((3 * nhead, 1, dh)),
        _full_spec((nhead, dh, D)), _full_spec((1, D)),        # self-attn
        _full_spec((1, D)), _full_spec((1, D)),                # g1, be1
        _full_spec((3 * nhead, D, dh)), _full_spec((3 * nhead, 1, dh)),
        _full_spec((nhead, dh, D)), _full_spec((1, D)),        # cross-attn
        _full_spec((1, D)), _full_spec((1, D)),                # g2, be2
        _full_spec((D, dff)), _full_spec((1, dff)),            # w1, bf1
        _full_spec((dff, D)), _full_spec((1, D)),              # w2, bf2
        _full_spec((1, D)), _full_spec((1, D)),                # g3, be3
    ]
    return pl.pallas_call(
        kernel,
        out_shape=jax.ShapeDtypeStruct((B, T, D), y.dtype),
        grid=(B,),
        in_specs=in_specs,
        out_specs=pl.BlockSpec((1, T, D), lambda b: (b, 0, 0)),
        compiler_params=pltpu.CompilerParams(dimension_semantics=("parallel",)),
    )(y, mem,
      p["sa_wqkv"], p["sa_bqkv"], p["sa_wo"], p["sa_bo"], p["g1"], p["be1"],
      p["ca_wqkv"], p["ca_bqkv"], p["ca_wo"], p["ca_bo"], p["g2"], p["be2"],
      p["w1"], p["bf1"], p["w2"], p["bf2"], p["g3"], p["be3"])


def pallas_layernorm(x, g, b, eps=LN_EPS):
    # x: (B, S, D); g, b already shaped (1, D); one full (S, D) slab per grid step
    B, S, D = x.shape
    return pl.pallas_call(
        functools.partial(_layernorm_kernel, eps=eps),
        out_shape=jax.ShapeDtypeStruct((B, S, D), x.dtype),
        grid=(B,),
        in_specs=[pl.BlockSpec((1, S, D), lambda b_: (b_, 0, 0)),
                  _full_spec((1, D)), _full_spec((1, D))],
        out_specs=pl.BlockSpec((1, S, D), lambda b_: (b_, 0, 0)),
        compiler_params=pltpu.CompilerParams(dimension_semantics=("parallel",)),
    )(x, g, b)


def final_norm_fc_softmax(y, g, b, w_pad, b_pad, eps=LN_EPS):
    # y: (B, T, D); w_pad: (D, Vp); b_pad: (1, Vp)  (Vp multiple of 128)
    B, T, D = y.shape
    Vp = w_pad.shape[1]
    return pl.pallas_call(
        functools.partial(_norm_fc_softmax_kernel, eps=eps),
        out_shape=jax.ShapeDtypeStruct((B, T, Vp), y.dtype),
        grid=(B,),
        in_specs=[pl.BlockSpec((1, T, D), lambda b_: (b_, 0, 0)),
                  _full_spec((1, D)), _full_spec((1, D)),
                  _full_spec((D, Vp)), _full_spec((1, Vp))],
        out_specs=pl.BlockSpec((1, T, Vp), lambda b_: (b_, 0, 0)),
        compiler_params=pltpu.CompilerParams(dimension_semantics=("parallel",)),
    )(y, g, b, w_pad, b_pad)


# --------------------------------- forward -----------------------------------

def model_forward(params, src_tokens, tgt_tokens, *, nhead, vocab_size):
    # block_embedding gather + positional add are glue (plain JAX, fused by XLA)
    src = jnp.take(params["emb"], src_tokens, axis=0) + params["pos_src"][None]
    tgt = jnp.take(params["emb"], tgt_tokens, axis=0) + params["pos_tgt"][None]
    # TODO(synk): PositionalEmbedding3D source was not provided; approximated by
    # deterministic per-position tables over the flattened 3D src/tgt volumes.
    # dropout -> identity (inference)

    x = src
    for lp in params["enc_layers"]:
        x = encoder_layer(x, lp, nhead=nhead)
    mem = pallas_layernorm(x, params["enc_norm_g"], params["enc_norm_b"])

    y = tgt
    for lp in params["dec_layers"]:
        y = decoder_layer(y, mem, lp, nhead=nhead)

    probs_padded = final_norm_fc_softmax(
        y, params["dec_norm_g"], params["dec_norm_b"],
        params["fc_w_pad"], params["fc_b_pad"])
    return probs_padded[:, :, :vocab_size]


# ------------------------------ parameter init --------------------------------

def init_raw_params(key, vocab_size, d_model, nhead, n_enc, n_dec, d_ff,
                    src_len, tgt_len):
    keys = iter(jax.random.split(key, 256))

    def w(shape, scale=0.02):
        return (scale * jax.random.normal(next(keys), shape)).astype(jnp.float32)

    zeros = lambda n: jnp.zeros((n,), jnp.float32)
    ones = lambda n: jnp.ones((n,), jnp.float32)

    def attn():
        return {"wq": w((d_model, d_model)), "bq": zeros(d_model),
                "wk": w((d_model, d_model)), "bk": zeros(d_model),
                "wv": w((d_model, d_model)), "bv": zeros(d_model),
                "wo": w((d_model, d_model)), "bo": zeros(d_model)}

    norm = lambda: {"g": ones(d_model), "b": zeros(d_model)}

    def enc_layer():
        return {"self_attn": attn(), "norm1": norm(),
                "lin1_w": w((d_model, d_ff)), "lin1_b": zeros(d_ff),
                "lin2_w": w((d_ff, d_model)), "lin2_b": zeros(d_model),
                "norm2": norm()}

    def dec_layer():
        return {"self_attn": attn(), "norm1": norm(),
                "cross_attn": attn(), "norm2": norm(),
                "lin1_w": w((d_model, d_ff)), "lin1_b": zeros(d_ff),
                "lin2_w": w((d_ff, d_model)), "lin2_b": zeros(d_model),
                "norm3": norm()}

    return {
        "emb": w((vocab_size, d_model), 1.0),
        "pos_src": w((src_len, d_model), 0.1),
        "pos_tgt": w((tgt_len, d_model), 0.1),
        "enc_layers": [enc_layer() for _ in range(n_enc)],
        "dec_layers": [dec_layer() for _ in range(n_dec)],
        "enc_norm": norm(), "dec_norm": norm(),
        "fc_w": w((d_model, vocab_size)), "fc_b": zeros(vocab_size),
    }


def _pack_attn(raw, nhead):
    # pack per-head weights so the fused kernels never need lane slicing/reshape
    D = raw["wq"].shape[0]
    dh = D // nhead
    cols = lambda wm: jnp.stack([wm[:, h * dh:(h + 1) * dh] for h in range(nhead)], 0)
    bias = lambda bv: jnp.stack([bv[h * dh:(h + 1) * dh].reshape(1, dh)
                                 for h in range(nhead)], 0)
    return {
        "wqkv": jnp.concatenate([cols(raw["wq"]), cols(raw["wk"]), cols(raw["wv"])], 0),
        "bqkv": jnp.concatenate([bias(raw["bq"]), bias(raw["bk"]), bias(raw["bv"])], 0),
        "wo": jnp.stack([raw["wo"][h * dh:(h + 1) * dh, :] for h in range(nhead)], 0),
        "bo": raw["bo"].reshape(1, D),
    }


def _row(v):
    return v.reshape(1, -1)


def pack_params(raw, nhead, lane_pad=128):
    D, V = raw["fc_w"].shape
    Vp = max(lane_pad, ((V + lane_pad - 1) // lane_pad) * lane_pad)

    def enc_layer(lp):
        p = {"sa_" + k: v for k, v in _pack_attn(lp["self_attn"], nhead).items()}
        p.update({"g1": _row(lp["norm1"]["g"]), "be1": _row(lp["norm1"]["b"]),
                  "w1": lp["lin1_w"], "bf1": _row(lp["lin1_b"]),
                  "w2": lp["lin2_w"], "bf2": _row(lp["lin2_b"]),
                  "g2": _row(lp["norm2"]["g"]), "be2": _row(lp["norm2"]["b"])})
        return p

    def dec_layer(lp):
        p = {"sa_" + k: v for k, v in _pack_attn(lp["self_attn"], nhead).items()}
        p.update({"ca_" + k: v for k, v in _pack_attn(lp["cross_attn"], nhead).items()})
        p.update({"g1": _row(lp["norm1"]["g"]), "be1": _row(lp["norm1"]["b"]),
                  "g2": _row(lp["norm2"]["g"]), "be2": _row(lp["norm2"]["b"]),
                  "w1": lp["lin1_w"], "bf1": _row(lp["lin1_b"]),
                  "w2": lp["lin2_w"], "bf2": _row(lp["lin2_b"]),
                  "g3": _row(lp["norm3"]["g"]), "be3": _row(lp["norm3"]["b"])})
        return p

    fc_w_pad = jnp.zeros((D, Vp), jnp.float32).at[:, :V].set(raw["fc_w"])
    fc_b_pad = jnp.full((1, Vp), -1e30, jnp.float32).at[0, :V].set(raw["fc_b"])

    return {
        "emb": raw["emb"], "pos_src": raw["pos_src"], "pos_tgt": raw["pos_tgt"],
        "enc_layers": [enc_layer(lp) for lp in raw["enc_layers"]],
        "dec_layers": [dec_layer(lp) for lp in raw["dec_layers"]],
        "enc_norm_g": _row(raw["enc_norm"]["g"]), "enc_norm_b": _row(raw["enc_norm"]["b"]),
        "dec_norm_g": _row(raw["dec_norm"]["g"]), "dec_norm_b": _row(raw["dec_norm"]["b"]),
        "fc_w_pad": fc_w_pad, "fc_b_pad": fc_b_pad,
    }


# ----------------------------------- main -------------------------------------

if __name__ == "__main__":
    vocab_size = 50
    d_model = 32
    nhead = 4
    num_encoder_layers = 2
    num_decoder_layers = 2
    dim_feed_forward = 64
    src_shape = (4, 4, 4)     # 64 source positions (flattened 3D volume)
    tgt_shape = (2, 2, 2)     # 8 target positions
    batch = 2

    src_len = src_shape[0] * src_shape[1] * src_shape[2]
    tgt_len = tgt_shape[0] * tgt_shape[1] * tgt_shape[2]

    key = jax.random.PRNGKey(0)
    kp, ks, kt = jax.random.split(key, 3)
    raw = init_raw_params(kp, vocab_size, d_model, nhead,
                          num_encoder_layers, num_decoder_layers,
                          dim_feed_forward, src_len, tgt_len)
    params = pack_params(raw, nhead)

    src_tokens = jax.random.randint(ks, (batch, src_len), 0, vocab_size,
                                    dtype=jnp.int32)
    tgt_tokens = jax.random.randint(kt, (batch, tgt_len), 0, vocab_size,
                                    dtype=jnp.int32)

    fwd = jax.jit(functools.partial(model_forward, nhead=nhead,
                                    vocab_size=vocab_size))
    out = fwd(params, src_tokens, tgt_tokens)
    out = jax.block_until_ready(out)

    assert out.shape == (batch, tgt_len, vocab_size), out.shape
    # probabilities: rows of the softmax output should sum to ~1
    row_sums = jnp.sum(out, axis=-1)
    assert bool(jnp.all(jnp.abs(row_sums - 1.0) < 1e-4)), row_sums
    assert bool(jnp.all(out >= 0.0))
    print("KERNEL_OK")
</pallas_src>

<mosaic_0001>
module attributes {stable_mosaic.version = 11 : i64} {
  func.func @_encoder_layer_kernel(%arg0: i32, %arg1: memref<1x64x32xf32, #tpu.memory_space<vmem>>, %arg2: memref<12x32x8xf32, #tpu.memory_space<vmem>>, %arg3: memref<12x1x8xf32, #tpu.memory_space<vmem>>, %arg4: memref<4x8x32xf32, #tpu.memory_space<vmem>>, %arg5: memref<1x32xf32, #tpu.memory_space<vmem>>, %arg6: memref<1x32xf32, #tpu.memory_space<vmem>>, %arg7: memref<1x32xf32, #tpu.memory_space<vmem>>, %arg8: memref<32x64xf32, #tpu.memory_space<vmem>>, %arg9: memref<1x64xf32, #tpu.memory_space<vmem>>, %arg10: memref<64x32xf32, #tpu.memory_space<vmem>>, %arg11: memref<1x32xf32, #tpu.memory_space<vmem>>, %arg12: memref<1x32xf32, #tpu.memory_space<vmem>>, %arg13: memref<1x32xf32, #tpu.memory_space<vmem>>, %arg14: memref<1x64x32xf32, #tpu.memory_space<vmem>>) attributes {dimension_semantics = [#tpu.dimension_semantics<parallel>], iteration_bounds = array<i64: 2>, scalar_prefetch = 0 : i64, scratch_operands = 0 : i64, tpu.core_type = #tpu.core_type<tc>, window_params = [{transform_indices = @transform_0, window_bounds = array<i64: 1, 64, 32>}, {pipeline_mode = #tpu.pipeline_mode<synchronous>, transform_indices = @transform_1, window_bounds = array<i64: 12, 32, 8>}, {pipeline_mode = #tpu.pipeline_mode<synchronous>, transform_indices = @transform_2, window_bounds = array<i64: 12, 1, 8>}, {pipeline_mode = #tpu.pipeline_mode<synchronous>, transform_indices = @transform_3, window_bounds = array<i64: 4, 8, 32>}, {pipeline_mode = #tpu.pipeline_mode<synchronous>, transform_indices = @transform_4, window_bounds = array<i64: 1, 32>}, {pipeline_mode = #tpu.pipeline_mode<synchronous>, transform_indices = @transform_5, window_bounds = array<i64: 1, 32>}, {pipeline_mode = #tpu.pipeline_mode<synchronous>, transform_indices = @transform_6, window_bounds = array<i64: 1, 32>}, {pipeline_mode = #tpu.pipeline_mode<synchronous>, transform_indices = @transform_7, window_bounds = array<i64: 32, 64>}, {pipeline_mode = #tpu.pipeline_mode<synchronous>, transform_indices = @transform_8, window_bounds = array<i64: 1, 64>}, {pipeline_mode = #tpu.pipeline_mode<synchronous>, transform_indices = @transform_9, window_bounds = array<i64: 64, 32>}, {pipeline_mode = #tpu.pipeline_mode<synchronous>, transform_indices = @transform_10, window_bounds = array<i64: 1, 32>}, {pipeline_mode = #tpu.pipeline_mode<synchronous>, transform_indices = @transform_11, window_bounds = array<i64: 1, 32>}, {pipeline_mode = #tpu.pipeline_mode<synchronous>, transform_indices = @transform_12, window_bounds = array<i64: 1, 32>}, {transform_indices = @transform_13, window_bounds = array<i64: 1, 64, 32>}]} {
    %c0 = arith.constant 0 : index
    %c0_0 = arith.constant 0 : index
    %c0_1 = arith.constant 0 : index
    %0 = vector.load %arg1[%c0, %c0_0, %c0_1] : memref<1x64x32xf32, #tpu.memory_space<vmem>>, vector<1x64x32xf32>
    %1 = vector.shape_cast %0 : vector<1x64x32xf32> to vector<64x32xf32>
    %c0_2 = arith.constant 0 : index
    %c0_3 = arith.constant 0 : index
    %c0_4 = arith.constant 0 : index
    %2 = vector.load %arg2[%c0_2, %c0_3, %c0_4] : memref<12x32x8xf32, #tpu.memory_space<vmem>>, vector<1x32x8xf32>
    %3 = vector.shape_cast %2 : vector<1x32x8xf32> to vector<32x8xf32>
    %cst = arith.constant dense<0.000000e+00> : vector<64x8xf32>
    %4 = tpu.matmul %1, %3, %cst {dimension_numbers = #tpu.dot_dimension_numbers<[1], [0], [0], [1], [0, 0, 1, 1], [], []>} : vector<64x32xf32>, vector<32x8xf32>, vector<64x8xf32> -> vector<64x8xf32>
    %c0_5 = arith.constant 0 : index
    %c0_6 = arith.constant 0 : index
    %c0_7 = arith.constant 0 : index
    %5 = vector.load %arg3[%c0_5, %c0_6, %c0_7] : memref<12x1x8xf32, #tpu.memory_space<vmem>>, vector<1x1x8xf32>
    %6 = vector.shape_cast %5 : vector<1x1x8xf32> to vector<1x8xf32>
    %7 = vector.broadcast %6 : vector<1x8xf32> to vector<64x8xf32>
    %8 = arith.addf %4, %7 : vector<64x8xf32>
    %c4 = arith.constant 4 : index
    %c0_8 = arith.constant 0 : index
    %c0_9 = arith.constant 0 : index
    %9 = vector.load %arg2[%c4, %c0_8, %c0_9] : memref<12x32x8xf32, #tpu.memory_space<vmem>>, vector<1x32x8xf32>
    %10 = vector.shape_cast %9 : vector<1x32x8xf32> to vector<32x8xf32>
    %cst_10 = arith.constant dense<0.000000e+00> : vector<64x8xf32>
    %11 = tpu.matmul %1, %10, %cst_10 {dimension_numbers = #tpu.dot_dimension_numbers<[1], [0], [0], [1], [0, 0, 1, 1], [], []>} : vector<64x32xf32>, vector<32x8xf32>, vector<64x8xf32> -> vector<64x8xf32>
    %c4_11 = arith.constant 4 : index
    %c0_12 = arith.constant 0 : index
    %c0_13 = arith.constant 0 : index
    %12 = vector.load %arg3[%c4_11, %c0_12, %c0_13] : memref<12x1x8xf32, #tpu.memory_space<vmem>>, vector<1x1x8xf32>
    %13 = vector.shape_cast %12 : vector<1x1x8xf32> to vector<1x8xf32>
    %14 = vector.broadcast %13 : vector<1x8xf32> to vector<64x8xf32>
    %15 = arith.addf %11, %14 : vector<64x8xf32>
    %c8 = arith.constant 8 : index
    %c0_14 = arith.constant 0 : index
    %c0_15 = arith.constant 0 : index
    %16 = vector.load %arg2[%c8, %c0_14, %c0_15] : memref<12x32x8xf32, #tpu.memory_space<vmem>>, vector<1x32x8xf32>
    %17 = vector.shape_cast %16 : vector<1x32x8xf32> to vector<32x8xf32>
    %cst_16 = arith.constant dense<0.000000e+00> : vector<64x8xf32>
    %18 = tpu.matmul %1, %17, %cst_16 {dimension_numbers = #tpu.dot_dimension_numbers<[1], [0], [0], [1], [0, 0, 1, 1], [], []>} : vector<64x32xf32>, vector<32x8xf32>, vector<64x8xf32> -> vector<64x8xf32>
    %c8_17 = arith.constant 8 : index
    %c0_18 = arith.constant 0 : index
    %c0_19 = arith.constant 0 : index
    %19 = vector.load %arg3[%c8_17, %c0_18, %c0_19] : memref<12x1x8xf32, #tpu.memory_space<vmem>>, vector<1x1x8xf32>
    %20 = vector.shape_cast %19 : vector<1x1x8xf32> to vector<1x8xf32>
    %21 = vector.broadcast %20 : vector<1x8xf32> to vector<64x8xf32>
    %22 = arith.addf %18, %21 : vector<64x8xf32>
    %cst_20 = arith.constant dense<0.000000e+00> : vector<64x64xf32>
    %23 = tpu.matmul %8, %15, %cst_20 {dimension_numbers = #tpu.dot_dimension_numbers<[1], [1], [0], [0], [0, 0, 1, 0], [], []>} : vector<64x8xf32>, vector<64x8xf32>, vector<64x64xf32> -> vector<64x64xf32>
    %cst_21 = arith.constant 0.353553385 : f32
    %24 = vector.broadcast %cst_21 : f32 to vector<64x64xf32>
    %25 = arith.mulf %23, %24 : vector<64x64xf32>
    %cst_22 = arith.constant dense<0xFF800000> : vector<64xf32>
    %26 = vector.multi_reduction <maximumf>, %25, %cst_22 [1] : vector<64x64xf32> to vector<64xf32>
    %27 = vector.shape_cast %26 : vector<64xf32> to vector<64x1xf32>
    %28 = vector.broadcast %27 : vector<64x1xf32> to vector<64x64xf32>
    %29 = arith.subf %25, %28 : vector<64x64xf32>
    %30 = math.exp %29 : vector<64x64xf32>
    %cst_23 = arith.constant dense<0.000000e+00> : vector<64xf32>
    %31 = vector.multi_reduction <add>, %30, %cst_23 [1] : vector<64x64xf32> to vector<64xf32>
    %32 = vector.shape_cast %31 : vector<64xf32> to vector<64x1xf32>
    %33 = tpu.reciprocal %32 {approx = true} : vector<64x1xf32> -> vector<64x1xf32>
    %34 = vector.broadcast %33 : vector<64x1xf32> to vector<64x64xf32>
    %35 = arith.mulf %30, %34 : vector<64x64xf32>
    %cst_24 = arith.constant dense<0.000000e+00> : vector<64x8xf32>
    %36 = tpu.matmul %35, %22, %cst_24 {dimension_numbers = #tpu.dot_dimension_numbers<[1], [0], [0], [1], [0, 0, 1, 1], [], []>} : vector<64x64xf32>, vector<64x8xf32>, vector<64x8xf32> -> vector<64x8xf32>
    %c0_25 = arith.constant 0 : index
    %c0_26 = arith.constant 0 : index
    %c0_27 = arith.constant 0 : index
    %37 = vector.load %arg4[%c0_25, %c0_26, %c0_27] : memref<4x8x32xf32, #tpu.memory_space<vmem>>, vector<1x8x32xf32>
    %38 = vector.shape_cast %37 : vector<1x8x32xf32> to vector<8x32xf32>
    %cst_28 = arith.constant dense<0.000000e+00> : vector<64x32xf32>
    %39 = tpu.matmul %36, %38, %cst_28 {dimension_numbers = #tpu.dot_dimension_numbers<[1], [0], [0], [1], [0, 0, 1, 1], [], []>} : vector<64x8xf32>, vector<8x32xf32>, vector<64x32xf32> -> vector<64x32xf32>
    %c1 = arith.constant 1 : index
    %c0_29 = arith.constant 0 : index
    %c0_30 = arith.constant 0 : index
    %40 = vector.load %arg2[%c1, %c0_29, %c0_30] : memref<12x32x8xf32, #tpu.memory_space<vmem>>, vector<1x32x8xf32>
    %41 = vector.shape_cast %40 : vector<1x32x8xf32> to vector<32x8xf32>
    %cst_31 = arith.constant dense<0.000000e+00> : vector<64x8xf32>
    %42 = tpu.matmul %1, %41, %cst_31 {dimension_numbers = #tpu.dot_dimension_numbers<[1], [0], [0], [1], [0, 0, 1, 1], [], []>} : vector<64x32xf32>, vector<32x8xf32>, vector<64x8xf32> -> vector<64x8xf32>
    %c1_32 = arith.constant 1 : index
    %c0_33 = arith.constant 0 : index
    %c0_34 = arith.constant 0 : index
    %43 = vector.load %arg3[%c1_32, %c0_33, %c0_34] : memref<12x1x8xf32, #tpu.memory_space<vmem>>, vector<1x1x8xf32>
    %44 = vector.shape_cast %43 : vector<1x1x8xf32> to vector<1x8xf32>
    %45 = vector.broadcast %44 : vector<1x8xf32> to vector<64x8xf32>
    %46 = arith.addf %42, %45 : vector<64x8xf32>
    %c5 = arith.constant 5 : index
    %c0_35 = arith.constant 0 : index
    %c0_36 = arith.constant 0 : index
    %47 = vector.load %arg2[%c5, %c0_35, %c0_36] : memref<12x32x8xf32, #tpu.memory_space<vmem>>, vector<1x32x8xf32>
    %48 = vector.shape_cast %47 : vector<1x32x8xf32> to vector<32x8xf32>
    %cst_37 = arith.constant dense<0.000000e+00> : vector<64x8xf32>
    %49 = tpu.matmul %1, %48, %cst_37 {dimension_numbers = #tpu.dot_dimension_numbers<[1], [0], [0], [1], [0, 0, 1, 1], [], []>} : vector<64x32xf32>, vector<32x8xf32>, vector<64x8xf32> -> vector<64x8xf32>
    %c5_38 = arith.constant 5 : index
    %c0_39 = arith.constant 0 : index
    %c0_40 = arith.constant 0 : index
    %50 = vector.load %arg3[%c5_38, %c0_39, %c0_40] : memref<12x1x8xf32, #tpu.memory_space<vmem>>, vector<1x1x8xf32>
    %51 = vector.shape_cast %50 : vector<1x1x8xf32> to vector<1x8xf32>
    %52 = vector.broadcast %51 : vector<1x8xf32> to vector<64x8xf32>
    %53 = arith.addf %49, %52 : vector<64x8xf32>
    %c9 = arith.constant 9 : index
    %c0_41 = arith.constant 0 : index
    %c0_42 = arith.constant 0 : index
    %54 = vector.load %arg2[%c9, %c0_41, %c0_42] : memref<12x32x8xf32, #tpu.memory_space<vmem>>, vector<1x32x8xf32>
    %55 = vector.shape_cast %54 : vector<1x32x8xf32> to vector<32x8xf32>
    %cst_43 = arith.constant dense<0.000000e+00> : vector<64x8xf32>
    %56 = tpu.matmul %1, %55, %cst_43 {dimension_numbers = #tpu.dot_dimension_numbers<[1], [0], [0], [1], [0, 0, 1, 1], [], []>} : vector<64x32xf32>, vector<32x8xf32>, vector<64x8xf32> -> vector<64x8xf32>
    %c9_44 = arith.constant 9 : index
    %c0_45 = arith.constant 0 : index
    %c0_46 = arith.constant 0 : index
    %57 = vector.load %arg3[%c9_44, %c0_45, %c0_46] : memref<12x1x8xf32, #tpu.memory_space<vmem>>, vector<1x1x8xf32>
    %58 = vector.shape_cast %57 : vector<1x1x8xf32> to vector<1x8xf32>
    %59 = vector.broadcast %58 : vector<1x8xf32> to vector<64x8xf32>
    %60 = arith.addf %56, %59 : vector<64x8xf32>
    %cst_47 = arith.constant dense<0.000000e+00> : vector<64x64xf32>
    %61 = tpu.matmul %46, %53, %cst_47 {dimension_numbers = #tpu.dot_dimension_numbers<[1], [1], [0], [0], [0, 0, 1, 0], [], []>} : vector<64x8xf32>, vector<64x8xf32>, vector<64x64xf32> -> vector<64x64xf32>
    %cst_48 = arith.constant 0.353553385 : f32
    %62 = vector.broadcast %cst_48 : f32 to vector<64x64xf32>
    %63 = arith.mulf %61, %62 : vector<64x64xf32>
    %cst_49 = arith.constant dense<0xFF800000> : vector<64xf32>
    %64 = vector.multi_reduction <maximumf>, %63, %cst_49 [1] : vector<64x64xf32> to vector<64xf32>
    %65 = vector.shape_cast %64 : vector<64xf32> to vector<64x1xf32>
    %66 = vector.broadcast %65 : vector<64x1xf32> to vector<64x64xf32>
    %67 = arith.subf %63, %66 : vector<64x64xf32>
    %68 = math.exp %67 : vector<64x64xf32>
    %cst_50 = arith.constant dense<0.000000e+00> : vector<64xf32>
    %69 = vector.multi_reduction <add>, %68, %cst_50 [1] : vector<64x64xf32> to vector<64xf32>
    %70 = vector.shape_cast %69 : vector<64xf32> to vector<64x1xf32>
    %71 = tpu.reciprocal %70 {approx = true} : vector<64x1xf32> -> vector<64x1xf32>
    %72 = vector.broadcast %71 : vector<64x1xf32> to vector<64x64xf32>
    %73 = arith.mulf %68, %72 : vector<64x64xf32>
    %cst_51 = arith.constant dense<0.000000e+00> : vector<64x8xf32>
    %74 = tpu.matmul %73, %60, %cst_51 {dimension_numbers = #tpu.dot_dimension_numbers<[1], [0], [0], [1], [0, 0, 1, 1], [], []>} : vector<64x64xf32>, vector<64x8xf32>, vector<64x8xf32> -> vector<64x8xf32>
    %c1_52 = arith.constant 1 : index
    %c0_53 = arith.constant 0 : index
    %c0_54 = arith.constant 0 : index
    %75 = vector.load %arg4[%c1_52, %c0_53, %c0_54] : memref<4x8x32xf32, #tpu.memory_space<vmem>>, vector<1x8x32xf32>
    %76 = vector.shape_cast %75 : vector<1x8x32xf32> to vector<8x32xf32>
    %cst_55 = arith.constant dense<0.000000e+00> : vector<64x32xf32>
    %77 = tpu.matmul %74, %76, %cst_55 {dimension_numbers = #tpu.dot_dimension_numbers<[1], [0], [0], [1], [0, 0, 1, 1], [], []>} : vector<64x8xf32>, vector<8x32xf32>, vector<64x32xf32> -> vector<64x32xf32>
    %78 = arith.addf %39, %77 : vector<64x32xf32>
    %c2 = arith.constant 2 : index
    %c0_56 = arith.constant 0 : index
    %c0_57 = arith.constant 0 : index
    %79 = vector.load %arg2[%c2, %c0_56, %c0_57] : memref<12x32x8xf32, #tpu.memory_space<vmem>>, vector<1x32x8xf32>
    %80 = vector.shape_cast %79 : vector<1x32x8xf32> to vector<32x8xf32>
    %cst_58 = arith.constant dense<0.000000e+00> : vector<64x8xf32>
    %81 = tpu.matmul %1, %80, %cst_58 {dimension_numbers = #tpu.dot_dimension_numbers<[1], [0], [0], [1], [0, 0, 1, 1], [], []>} : vector<64x32xf32>, vector<32x8xf32>, vector<64x8xf32> -> vector<64x8xf32>
    %c2_59 = arith.constant 2 : index
    %c0_60 = arith.constant 0 : index
    %c0_61 = arith.constant 0 : index
    %82 = vector.load %arg3[%c2_59, %c0_60, %c0_61] : memref<12x1x8xf32, #tpu.memory_space<vmem>>, vector<1x1x8xf32>
    %83 = vector.shape_cast %82 : vector<1x1x8xf32> to vector<1x8xf32>
    %84 = vector.broadcast %83 : vector<1x8xf32> to vector<64x8xf32>
    %85 = arith.addf %81, %84 : vector<64x8xf32>
    %c6 = arith.constant 6 : index
    %c0_62 = arith.constant 0 : index
    %c0_63 = arith.constant 0 : index
    %86 = vector.load %arg2[%c6, %c0_62, %c0_63] : memref<12x32x8xf32, #tpu.memory_space<vmem>>, vector<1x32x8xf32>
    %87 = vector.shape_cast %86 : vector<1x32x8xf32> to vector<32x8xf32>
    %cst_64 = arith.constant dense<0.000000e+00> : vector<64x8xf32>
    %88 = tpu.matmul %1, %87, %cst_64 {dimension_numbers = #tpu.dot_dimension_numbers<[1], [0], [0], [1], [0, 0, 1, 1], [], []>} : vector<64x32xf32>, vector<32x8xf32>, vector<64x8xf32> -> vector<64x8xf32>
    %c6_65 = arith.constant 6 : index
    %c0_66 = arith.constant 0 : index
    %c0_67 = arith.constant 0 : index
    %89 = vector.load %arg3[%c6_65, %c0_66, %c0_67] : memref<12x1x8xf32, #tpu.memory_space<vmem>>, vector<1x1x8xf32>
    %90 = vector.shape_cast %89 : vector<1x1x8xf32> to vector<1x8xf32>
    %91 = vector.broadcast %90 : vector<1x8xf32> to vector<64x8xf32>
    %92 = arith.addf %88, %91 : vector<64x8xf32>
    %c10 = arith.constant 10 : index
    %c0_68 = arith.constant 0 : index
    %c0_69 = arith.constant 0 : index
    %93 = vector.load %arg2[%c10, %c0_68, %c0_69] : memref<12x32x8xf32, #tpu.memory_space<vmem>>, vector<1x32x8xf32>
    %94 = vector.shape_cast %93 : vector<1x32x8xf32> to vector<32x8xf32>
    %cst_70 = arith.constant dense<0.000000e+00> : vector<64x8xf32>
    %95 = tpu.matmul %1, %94, %cst_70 {dimension_numbers = #tpu.dot_dimension_numbers<[1], [0], [0], [1], [0, 0, 1, 1], [], []>} : vector<64x32xf32>, vector<32x8xf32>, vector<64x8xf32> -> vector<64x8xf32>
    %c10_71 = arith.constant 10 : index
    %c0_72 = arith.constant 0 : index
    %c0_73 = arith.constant 0 : index
    %96 = vector.load %arg3[%c10_71, %c0_72, %c0_73] : memref<12x1x8xf32, #tpu.memory_space<vmem>>, vector<1x1x8xf32>
    %97 = vector.shape_cast %96 : vector<1x1x8xf32> to vector<1x8xf32>
    %98 = vector.broadcast %97 : vector<1x8xf32> to vector<64x8xf32>
    %99 = arith.addf %95, %98 : vector<64x8xf32>
    %cst_74 = arith.constant dense<0.000000e+00> : vector<64x64xf32>
    %100 = tpu.matmul %85, %92, %cst_74 {dimension_numbers = #tpu.dot_dimension_numbers<[1], [1], [0], [0], [0, 0, 1, 0], [], []>} : vector<64x8xf32>, vector<64x8xf32>, vector<64x64xf32> -> vector<64x64xf32>
    %cst_75 = arith.constant 0.353553385 : f32
    %101 = vector.broadcast %cst_75 : f32 to vector<64x64xf32>
    %102 = arith.mulf %100, %101 : vector<64x64xf32>
    %cst_76 = arith.constant dense<0xFF800000> : vector<64xf32>
    %103 = vector.multi_reduction <maximumf>, %102, %cst_76 [1] : vector<64x64xf32> to vector<64xf32>
    %104 = vector.shape_cast %103 : vector<64xf32> to vector<64x1xf32>
    %105 = vector.broadcast %104 : vector<64x1xf32> to vector<64x64xf32>
    %106 = arith.subf %102, %105 : vector<64x64xf32>
    %107 = math.exp %106 : vector<64x64xf32>
    %cst_77 = arith.constant dense<0.000000e+00> : vector<64xf32>
    %108 = vector.multi_reduction <add>, %107, %cst_77 [1] : vector<64x64xf32> to vector<64xf32>
    %109 = vector.shape_cast %108 : vector<64xf32> to vector<64x1xf32>
    %110 = tpu.reciprocal %109 {approx = true} : vector<64x1xf32> -> vector<64x1xf32>
    %111 = vector.broadcast %110 : vector<64x1xf32> to vector<64x64xf32>
    %112 = arith.mulf %107, %111 : vector<64x64xf32>
    %cst_78 = arith.constant dense<0.000000e+00> : vector<64x8xf32>
    %113 = tpu.matmul %112, %99, %cst_78 {dimension_numbers = #tpu.dot_dimension_numbers<[1], [0], [0], [1], [0, 0, 1, 1], [], []>} : vector<64x64xf32>, vector<64x8xf32>, vector<64x8xf32> -> vector<64x8xf32>
    %c2_79 = arith.constant 2 : index
    %c0_80 = arith.constant 0 : index
    %c0_81 = arith.constant 0 : index
    %114 = vector.load %arg4[%c2_79, %c0_80, %c0_81] : memref<4x8x32xf32, #tpu.memory_space<vmem>>, vector<1x8x32xf32>
    %115 = vector.shape_cast %114 : vector<1x8x32xf32> to vector<8x32xf32>
    %cst_82 = arith.constant dense<0.000000e+00> : vector<64x32xf32>
    %116 = tpu.matmul %113, %115, %cst_82 {dimension_numbers = #tpu.dot_dimension_numbers<[1], [0], [0], [1], [0, 0, 1, 1], [], []>} : vector<64x8xf32>, vector<8x32xf32>, vector<64x32xf32> -> vector<64x32xf32>
    %117 = arith.addf %78, %116 : vector<64x32xf32>
    %c3 = arith.constant 3 : index
    %c0_83 = arith.constant 0 : index
    %c0_84 = arith.constant 0 : index
    %118 = vector.load %arg2[%c3, %c0_83, %c0_84] : memref<12x32x8xf32, #tpu.memory_space<vmem>>, vector<1x32x8xf32>
    %119 = vector.shape_cast %118 : vector<1x32x8xf32> to vector<32x8xf32>
    %cst_85 = arith.constant dense<0.000000e+00> : vector<64x8xf32>
    %120 = tpu.matmul %1, %119, %cst_85 {dimension_numbers = #tpu.dot_dimension_numbers<[1], [0], [0], [1], [0, 0, 1, 1], [], []>} : vector<64x32xf32>, vector<32x8xf32>, vector<64x8xf32> -> vector<64x8xf32>
    %c3_86 = arith.constant 3 : index
    %c0_87 = arith.constant 0 : index
    %c0_88 = arith.constant 0 : index
    %121 = vector.load %arg3[%c3_86, %c0_87, %c0_88] : memref<12x1x8xf32, #tpu.memory_space<vmem>>, vector<1x1x8xf32>
    %122 = vector.shape_cast %121 : vector<1x1x8xf32> to vector<1x8xf32>
    %123 = vector.broadcast %122 : vector<1x8xf32> to vector<64x8xf32>
    %124 = arith.addf %120, %123 : vector<64x8xf32>
    %c7 = arith.constant 7 : index
    %c0_89 = arith.constant 0 : index
    %c0_90 = arith.constant 0 : index
    %125 = vector.load %arg2[%c7, %c0_89, %c0_90] : memref<12x32x8xf32, #tpu.memory_space<vmem>>, vector<1x32x8xf32>
    %126 = vector.shape_cast %125 : vector<1x32x8xf32> to vector<32x8xf32>
    %cst_91 = arith.constant dense<0.000000e+00> : vector<64x8xf32>
    %127 = tpu.matmul %1, %126, %cst_91 {dimension_numbers = #tpu.dot_dimension_numbers<[1], [0], [0], [1], [0, 0, 1, 1], [], []>} : vector<64x32xf32>, vector<32x8xf32>, vector<64x8xf32> -> vector<64x8xf32>
    %c7_92 = arith.constant 7 : index
    %c0_93 = arith.constant 0 : index
    %c0_94 = arith.constant 0 : index
    %128 = vector.load %arg3[%c7_92, %c0_93, %c0_94] : memref<12x1x8xf32, #tpu.memory_space<vmem>>, vector<1x1x8xf32>
    %129 = vector.shape_cast %128 : vector<1x1x8xf32> to vector<1x8xf32>
    %130 = vector.broadcast %129 : vector<1x8xf32> to vector<64x8xf32>
    %131 = arith.addf %127, %130 : vector<64x8xf32>
    %c11 = arith.constant 11 : index
    %c0_95 = arith.constant 0 : index
    %c0_96 = arith.constant 0 : index
    %132 = vector.load %arg2[%c11, %c0_95, %c0_96] : memref<12x32x8xf32, #tpu.memory_space<vmem>>, vector<1x32x8xf32>
    %133 = vector.shape_cast %132 : vector<1x32x8xf32> to vector<32x8xf32>
    %cst_97 = arith.constant dense<0.000000e+00> : vector<64x8xf32>
    %134 = tpu.matmul %1, %133, %cst_97 {dimension_numbers = #tpu.dot_dimension_numbers<[1], [0], [0], [1], [0, 0, 1, 1], [], []>} : vector<64x32xf32>, vector<32x8xf32>, vector<64x8xf32> -> vector<64x8xf32>
    %c11_98 = arith.constant 11 : index
    %c0_99 = arith.constant 0 : index
    %c0_100 = arith.constant 0 : index
    %135 = vector.load %arg3[%c11_98, %c0_99, %c0_100] : memref<12x1x8xf32, #tpu.memory_space<vmem>>, vector<1x1x8xf32>
    %136 = vector.shape_cast %135 : vector<1x1x8xf32> to vector<1x8xf32>
    %137 = vector.broadcast %136 : vector<1x8xf32> to vector<64x8xf32>
    %138 = arith.addf %134, %137 : vector<64x8xf32>
    %cst_101 = arith.constant dense<0.000000e+00> : vector<64x64xf32>
    %139 = tpu.matmul %124, %131, %cst_101 {dimension_numbers = #tpu.dot_dimension_numbers<[1], [1], [0], [0], [0, 0, 1, 0], [], []>} : vector<64x8xf32>, vector<64x8xf32>, vector<64x64xf32> -> vector<64x64xf32>
    %cst_102 = arith.constant 0.353553385 : f32
    %140 = vector.broadcast %cst_102 : f32 to vector<64x64xf32>
    %141 = arith.mulf %139, %140 : vector<64x64xf32>
    %cst_103 = arith.constant dense<0xFF800000> : vector<64xf32>
    %142 = vector.multi_reduction <maximumf>, %141, %cst_103 [1] : vector<64x64xf32> to vector<64xf32>
    %143 = vector.shape_cast %142 : vector<64xf32> to vector<64x1xf32>
    %144 = vector.broadcast %143 : vector<64x1xf32> to vector<64x64xf32>
    %145 = arith.subf %141, %144 : vector<64x64xf32>
    %146 = math.exp %145 : vector<64x64xf32>
    %cst_104 = arith.constant dense<0.000000e+00> : vector<64xf32>
    %147 = vector.multi_reduction <add>, %146, %cst_104 [1] : vector<64x64xf32> to vector<64xf32>
    %148 = vector.shape_cast %147 : vector<64xf32> to vector<64x1xf32>
    %149 = tpu.reciprocal %148 {approx = true} : vector<64x1xf32> -> vector<64x1xf32>
    %150 = vector.broadcast %149 : vector<64x1xf32> to vector<64x64xf32>
    %151 = arith.mulf %146, %150 : vector<64x64xf32>
    %cst_105 = arith.constant dense<0.000000e+00> : vector<64x8xf32>
    %152 = tpu.matmul %151, %138, %cst_105 {dimension_numbers = #tpu.dot_dimension_numbers<[1], [0], [0], [1], [0, 0, 1, 1], [], []>} : vector<64x64xf32>, vector<64x8xf32>, vector<64x8xf32> -> vector<64x8xf32>
    %c3_106 = arith.constant 3 : index
    %c0_107 = arith.constant 0 : index
    %c0_108 = arith.constant 0 : index
    %153 = vector.load %arg4[%c3_106, %c0_107, %c0_108] : memref<4x8x32xf32, #tpu.memory_space<vmem>>, vector<1x8x32xf32>
    %154 = vector.shape_cast %153 : vector<1x8x32xf32> to vector<8x32xf32>
    %cst_109 = arith.constant dense<0.000000e+00> : vector<64x32xf32>
    %155 = tpu.matmul %152, %154, %cst_109 {dimension_numbers = #tpu.dot_dimension_numbers<[1], [0], [0], [1], [0, 0, 1, 1], [], []>} : vector<64x8xf32>, vector<8x32xf32>, vector<64x32xf32> -> vector<64x32xf32>
    %156 = arith.addf %117, %155 : vector<64x32xf32>
    %c0_110 = arith.constant 0 : index
    %c0_111 = arith.constant 0 : index
    %157 = vector.load %arg5[%c0_110, %c0_111] : memref<1x32xf32, #tpu.memory_space<vmem>>, vector<1x32xf32>
    %158 = vector.broadcast %157 : vector<1x32xf32> to vector<64x32xf32>
    %159 = arith.addf %156, %158 : vector<64x32xf32>
    %160 = arith.addf %1, %159 : vector<64x32xf32>
    %cst_112 = arith.constant dense<0.000000e+00> : vector<64xf32>
    %161 = vector.multi_reduction <add>, %160, %cst_112 [1] : vector<64x32xf32> to vector<64xf32>
    %162 = vector.shape_cast %161 : vector<64xf32> to vector<64x1xf32>
    %cst_113 = arith.constant 3.200000e+01 : f32
    %163 = vector.broadcast %cst_113 : f32 to vector<64x1xf32>
    %164 = arith.divf %162, %163 : vector<64x1xf32>
    %165 = vector.broadcast %164 : vector<64x1xf32> to vector<64x32xf32>
    %166 = arith.subf %160, %165 : vector<64x32xf32>
    %167 = arith.mulf %166, %166 : vector<64x32xf32>
    %cst_114 = arith.constant dense<0.000000e+00> : vector<64xf32>
    %168 = vector.multi_reduction <add>, %167, %cst_114 [1] : vector<64x32xf32> to vector<64xf32>
    %169 = vector.shape_cast %168 : vector<64xf32> to vector<64x1xf32>
    %cst_115 = arith.constant 3.200000e+01 : f32
    %170 = vector.broadcast %cst_115 : f32 to vector<64x1xf32>
    %171 = arith.divf %169, %170 : vector<64x1xf32>
    %172 = vector.broadcast %164 : vector<64x1xf32> to vector<64x32xf32>
    %173 = arith.subf %160, %172 : vector<64x32xf32>
    %cst_116 = arith.constant 9.99999974E-6 : f32
    %174 = vector.broadcast %cst_116 : f32 to vector<64x1xf32>
    %175 = arith.addf %171, %174 : vector<64x1xf32>
    %176 = math.rsqrt %175 : vector<64x1xf32>
    %177 = vector.broadcast %176 : vector<64x1xf32> to vector<64x32xf32>
    %178 = arith.mulf %173, %177 : vector<64x32xf32>
    %c0_117 = arith.constant 0 : index
    %c0_118 = arith.constant 0 : index
    %179 = vector.load %arg6[%c0_117, %c0_118] : memref<1x32xf32, #tpu.memory_space<vmem>>, vector<1x32xf32>
    %180 = vector.broadcast %179 : vector<1x32xf32> to vector<64x32xf32>
    %181 = arith.mulf %178, %180 : vector<64x32xf32>
    %c0_119 = arith.constant 0 : index
    %c0_120 = arith.constant 0 : index
    %182 = vector.load %arg7[%c0_119, %c0_120] : memref<1x32xf32, #tpu.memory_space<vmem>>, vector<1x32xf32>
    %183 = vector.broadcast %182 : vector<1x32xf32> to vector<64x32xf32>
    %184 = arith.addf %181, %183 : vector<64x32xf32>
    %c0_121 = arith.constant 0 : index
    %c0_122 = arith.constant 0 : index
    %185 = vector.load %arg8[%c0_121, %c0_122] : memref<32x64xf32, #tpu.memory_space<vmem>>, vector<32x64xf32>
    %cst_123 = arith.constant dense<0.000000e+00> : vector<64x64xf32>
    %186 = tpu.matmul %184, %185, %cst_123 {dimension_numbers = #tpu.dot_dimension_numbers<[1], [0], [0], [1], [0, 0, 1, 1], [], []>} : vector<64x32xf32>, vector<32x64xf32>, vector<64x64xf32> -> vector<64x64xf32>
    %c0_124 = arith.constant 0 : index
    %c0_125 = arith.constant 0 : index
    %187 = vector.load %arg9[%c0_124, %c0_125] : memref<1x64xf32, #tpu.memory_space<vmem>>, vector<1x64xf32>
    %188 = vector.broadcast %187 : vector<1x64xf32> to vector<64x64xf32>
    %189 = arith.addf %186, %188 : vector<64x64xf32>
    %cst_126 = arith.constant 0.000000e+00 : f32
    %190 = vector.broadcast %cst_126 : f32 to vector<64x64xf32>
    %191 = arith.maximumf %189, %190 : vector<64x64xf32>
    %c0_127 = arith.constant 0 : index
    %c0_128 = arith.constant 0 : index
    %192 = vector.load %arg10[%c0_127, %c0_128] : memref<64x32xf32, #tpu.memory_space<vmem>>, vector<64x32xf32>
    %cst_129 = arith.constant dense<0.000000e+00> : vector<64x32xf32>
    %193 = tpu.matmul %191, %192, %cst_129 {dimension_numbers = #tpu.dot_dimension_numbers<[1], [0], [0], [1], [0, 0, 1, 1], [], []>} : vector<64x64xf32>, vector<64x32xf32>, vector<64x32xf32> -> vector<64x32xf32>
    %c0_130 = arith.constant 0 : index
    %c0_131 = arith.constant 0 : index
    %194 = vector.load %arg11[%c0_130, %c0_131] : memref<1x32xf32, #tpu.memory_space<vmem>>, vector<1x32xf32>
    %195 = vector.broadcast %194 : vector<1x32xf32> to vector<64x32xf32>
    %196 = arith.addf %193, %195 : vector<64x32xf32>
    %197 = arith.addf %184, %196 : vector<64x32xf32>
    %cst_132 = arith.constant dense<0.000000e+00> : vector<64xf32>
    %198 = vector.multi_reduction <add>, %197, %cst_132 [1] : vector<64x32xf32> to vector<64xf32>
    %199 = vector.shape_cast %198 : vector<64xf32> to vector<64x1xf32>
    %cst_133 = arith.constant 3.200000e+01 : f32
    %200 = vector.broadcast %cst_133 : f32 to vector<64x1xf32>
    %201 = arith.divf %199, %200 : vector<64x1xf32>
    %202 = vector.broadcast %201 : vector<64x1xf32> to vector<64x32xf32>
    %203 = arith.subf %197, %202 : vector<64x32xf32>
    %204 = arith.mulf %203, %203 : vector<64x32xf32>
    %cst_134 = arith.constant dense<0.000000e+00> : vector<64xf32>
    %205 = vector.multi_reduction <add>, %204, %cst_134 [1] : vector<64x32xf32> to vector<64xf32>
    %206 = vector.shape_cast %205 : vector<64xf32> to vector<64x1xf32>
    %cst_135 = arith.constant 3.200000e+01 : f32
    %207 = vector.broadcast %cst_135 : f32 to vector<64x1xf32>
    %208 = arith.divf %206, %207 : vector<64x1xf32>
    %209 = vector.broadcast %201 : vector<64x1xf32> to vector<64x32xf32>
    %210 = arith.subf %197, %209 : vector<64x32xf32>
    %cst_136 = arith.constant 9.99999974E-6 : f32
    %211 = vector.broadcast %cst_136 : f32 to vector<64x1xf32>
    %212 = arith.addf %208, %211 : vector<64x1xf32>
    %213 = math.rsqrt %212 : vector<64x1xf32>
    %214 = vector.broadcast %213 : vector<64x1xf32> to vector<64x32xf32>
    %215 = arith.mulf %210, %214 : vector<64x32xf32>
    %c0_137 = arith.constant 0 : index
    %c0_138 = arith.constant 0 : index
    %216 = vector.load %arg12[%c0_137, %c0_138] : memref<1x32xf32, #tpu.memory_space<vmem>>, vector<1x32xf32>
    %217 = vector.broadcast %216 : vector<1x32xf32> to vector<64x32xf32>
    %218 = arith.mulf %215, %217 : vector<64x32xf32>
    %c0_139 = arith.constant 0 : index
    %c0_140 = arith.constant 0 : index
    %219 = vector.load %arg13[%c0_139, %c0_140] : memref<1x32xf32, #tpu.memory_space<vmem>>, vector<1x32xf32>
    %220 = vector.broadcast %219 : vector<1x32xf32> to vector<64x32xf32>
    %221 = arith.addf %218, %220 : vector<64x32xf32>
    %c0_141 = arith.constant 0 : index
    %c0_142 = arith.constant 0 : index
    %c0_143 = arith.constant 0 : index
    %222 = vector.load %arg14[%c0_141, %c0_142, %c0_143] : memref<1x64x32xf32, #tpu.memory_space<vmem>>, vector<1x64x32xf32>
    %223 = vector.shape_cast %222 : vector<1x64x32xf32> to vector<64x32xf32>
    %224 = vector.shape_cast %221 : vector<64x32xf32> to vector<1x64x32xf32>
    tpu.vector_store %arg14[%c0_141, %c0_142, %c0_143], %224 {strides = array<i32>} : memref<1x64x32xf32, #tpu.memory_space<vmem>>, vector<1x64x32xf32>,
    return
  }
  func.func @transform_0(%arg0: i32) -> (i32, i32, i32) {
    %c0_i32 = arith.constant 0 : i32
    %c0_i32_0 = arith.constant 0 : i32
    %c0_i32_1 = arith.constant 0 : i32
    return %arg0, %c0_i32, %c0_i32_0 : i32, i32, i32
  }
  func.func @transform_1(%arg0: i32) -> (i32, i32, i32) {
    %c0_i32 = arith.constant 0 : i32
    %c0_i32_0 = arith.constant 0 : i32
    %c0_i32_1 = arith.constant 0 : i32
    %c0_i32_2 = arith.constant 0 : i32
    return %c0_i32, %c0_i32_0, %c0_i32_1 : i32, i32, i32
  }
  func.func @transform_2(%arg0: i32) -> (i32, i32, i32) {
    %c0_i32 = arith.constant 0 : i32
    %c0_i32_0 = arith.constant 0 : i32
    %c0_i32_1 = arith.constant 0 : i32
    %c0_i32_2 = arith.constant 0 : i32
    return %c0_i32, %c0_i32_0, %c0_i32_1 : i32, i32, i32
  }
  func.func @transform_3(%arg0: i32) -> (i32, i32, i32) {
    %c0_i32 = arith.constant 0 : i32
    %c0_i32_0 = arith.constant 0 : i32
    %c0_i32_1 = arith.constant 0 : i32
    %c0_i32_2 = arith.constant 0 : i32
    return %c0_i32, %c0_i32_0, %c0_i32_1 : i32, i32, i32
  }
  func.func @transform_4(%arg0: i32) -> (i32, i32) {
    %c0_i32 = arith.constant 0 : i32
    %c0_i32_0 = arith.constant 0 : i32
    %c0_i32_1 = arith.constant 0 : i32
    return %c0_i32, %c0_i32_0 : i32, i32
  }
  func.func @transform_5(%arg0: i32) -> (i32, i32) {
    %c0_i32 = arith.constant 0 : i32
    %c0_i32_0 = arith.constant 0 : i32
    %c0_i32_1 = arith.constant 0 : i32
    return %c0_i32, %c0_i32_0 : i32, i32
  }
  func.func @transform_6(%arg0: i32) -> (i32, i32) {
    %c0_i32 = arith.constant 0 : i32
    %c0_i32_0 = arith.constant 0 : i32
    %c0_i32_1 = arith.constant 0 : i32
    return %c0_i32, %c0_i32_0 : i32, i32
  }
  func.func @transform_7(%arg0: i32) -> (i32, i32) {
    %c0_i32 = arith.constant 0 : i32
    %c0_i32_0 = arith.constant 0 : i32
    %c0_i32_1 = arith.constant 0 : i32
    return %c0_i32, %c0_i32_0 : i32, i32
  }
  func.func @transform_8(%arg0: i32) -> (i32, i32) {
    %c0_i32 = arith.constant 0 : i32
    %c0_i32_0 = arith.constant 0 : i32
    %c0_i32_1 = arith.constant 0 : i32
    return %c0_i32, %c0_i32_0 : i32, i32
  }
  func.func @transform_9(%arg0: i32) -> (i32, i32) {
    %c0_i32 = arith.constant 0 : i32
    %c0_i32_0 = arith.constant 0 : i32
    %c0_i32_1 = arith.constant 0 : i32
    return %c0_i32, %c0_i32_0 : i32, i32
  }
  func.func @transform_10(%arg0: i32) -> (i32, i32) {
    %c0_i32 = arith.constant 0 : i32
    %c0_i32_0 = arith.constant 0 : i32
    %c0_i32_1 = arith.constant 0 : i32
    return %c0_i32, %c0_i32_0 : i32, i32
  }
  func.func @transform_11(%arg0: i32) -> (i32, i32) {
    %c0_i32 = arith.constant 0 : i32
    %c0_i32_0 = arith.constant 0 : i32
    %c0_i32_1 = arith.constant 0 : i32
    return %c0_i32, %c0_i32_0 : i32, i32
  }
  func.func @transform_12(%arg0: i32) -> (i32, i32) {
    %c0_i32 = arith.constant 0 : i32
    %c0_i32_0 = arith.constant 0 : i32
    %c0_i32_1 = arith.constant 0 : i32
    return %c0_i32, %c0_i32_0 : i32, i32
  }
  func.func @transform_13(%arg0: i32) -> (i32, i32, i32) {
    %c0_i32 = arith.constant 0 : i32
    %c0_i32_0 = arith.constant 0 : i32
    %c0_i32_1 = arith.constant 0 : i32
    return %arg0, %c0_i32, %c0_i32_0 : i32, i32, i32
  }
}

module attributes {stable_mosaic.version = 11 : i64} {
  func.func @_layernorm_kernel(%arg0: i32, %arg1: memref<1x64x32xf32, #tpu.memory_space<vmem>>, %arg2: memref<1x32xf32, #tpu.memory_space<vmem>>, %arg3: memref<1x32xf32, #tpu.memory_space<vmem>>, %arg4: memref<1x64x32xf32, #tpu.memory_space<vmem>>) attributes {dimension_semantics = [#tpu.dimension_semantics<parallel>], iteration_bounds = array<i64: 2>, scalar_prefetch = 0 : i64, scratch_operands = 0 : i64, tpu.core_type = #tpu.core_type<tc>, window_params = [{transform_indices = @transform_0, window_bounds = array<i64: 1, 64, 32>}, {pipeline_mode = #tpu.pipeline_mode<synchronous>, transform_indices = @transform_1, window_bounds = array<i64: 1, 32>}, {pipeline_mode = #tpu.pipeline_mode<synchronous>, transform_indices = @transform_2, window_bounds = array<i64: 1, 32>}, {transform_indices = @transform_3, window_bounds = array<i64: 1, 64, 32>}]} {
    %c0 = arith.constant 0 : index
    %c0_0 = arith.constant 0 : index
    %c0_1 = arith.constant 0 : index
    %0 = vector.load %arg1[%c0, %c0_0, %c0_1] : memref<1x64x32xf32, #tpu.memory_space<vmem>>, vector<1x64x32xf32>
    %1 = vector.shape_cast %0 : vector<1x64x32xf32> to vector<64x32xf32>
    %cst = arith.constant dense<0.000000e+00> : vector<64xf32>
    %2 = vector.multi_reduction <add>, %1, %cst [1] : vector<64x32xf32> to vector<64xf32>
    %3 = vector.shape_cast %2 : vector<64xf32> to vector<64x1xf32>
    %cst_2 = arith.constant 3.200000e+01 : f32
    %4 = vector.broadcast %cst_2 : f32 to vector<64x1xf32>
    %5 = arith.divf %3, %4 : vector<64x1xf32>
    %6 = vector.broadcast %5 : vector<64x1xf32> to vector<64x32xf32>
    %7 = arith.subf %1, %6 : vector<64x32xf32>
    %8 = arith.mulf %7, %7 : vector<64x32xf32>
    %cst_3 = arith.constant dense<0.000000e+00> : vector<64xf32>
    %9 = vector.multi_reduction <add>, %8, %cst_3 [1] : vector<64x32xf32> to vector<64xf32>
    %10 = vector.shape_cast %9 : vector<64xf32> to vector<64x1xf32>
    %cst_4 = arith.constant 3.200000e+01 : f32
    %11 = vector.broadcast %cst_4 : f32 to vector<64x1xf32>
    %12 = arith.divf %10, %11 : vector<64x1xf32>
    %13 = vector.broadcast %5 : vector<64x1xf32> to vector<64x32xf32>
    %14 = arith.subf %1, %13 : vector<64x32xf32>
    %cst_5 = arith.constant 9.99999974E-6 : f32
    %15 = vector.broadcast %cst_5 : f32 to vector<64x1xf32>
    %16 = arith.addf %12, %15 : vector<64x1xf32>
    %17 = math.rsqrt %16 : vector<64x1xf32>
    %18 = vector.broadcast %17 : vector<64x1xf32> to vector<64x32xf32>
    %19 = arith.mulf %14, %18 : vector<64x32xf32>
    %c0_6 = arith.constant 0 : index
    %c0_7 = arith.constant 0 : index
    %20 = vector.load %arg2[%c0_6, %c0_7] : memref<1x32xf32, #tpu.memory_space<vmem>>, vector<1x32xf32>
    %21 = vector.broadcast %20 : vector<1x32xf32> to vector<64x32xf32>
    %22 = arith.mulf %19, %21 : vector<64x32xf32>
    %c0_8 = arith.constant 0 : index
    %c0_9 = arith.constant 0 : index
    %23 = vector.load %arg3[%c0_8, %c0_9] : memref<1x32xf32, #tpu.memory_space<vmem>>, vector<1x32xf32>
    %24 = vector.broadcast %23 : vector<1x32xf32> to vector<64x32xf32>
    %25 = arith.addf %22, %24 : vector<64x32xf32>
    %c0_10 = arith.constant 0 : index
    %c0_11 = arith.constant 0 : index
    %c0_12 = arith.constant 0 : index
    %26 = vector.load %arg4[%c0_10, %c0_11, %c0_12] : memref<1x64x32xf32, #tpu.memory_space<vmem>>, vector<1x64x32xf32>
    %27 = vector.shape_cast %26 : vector<1x64x32xf32> to vector<64x32xf32>
    %28 = vector.shape_cast %25 : vector<64x32xf32> to vector<1x64x32xf32>
    tpu.vector_store %arg4[%c0_10, %c0_11, %c0_12], %28 {strides = array<i32>} : memref<1x64x32xf32, #tpu.memory_space<vmem>>, vector<1x64x32xf32>,
    return
  }
  func.func @transform_0(%arg0: i32) -> (i32, i32, i32) {
    %c0_i32 = arith.constant 0 : i32
    %c0_i32_0 = arith.constant 0 : i32
    %c0_i32_1 = arith.constant 0 : i32
    return %arg0, %c0_i32, %c0_i32_0 : i32, i32, i32
  }
  func.func @transform_1(%arg0: i32) -> (i32, i32) {
    %c0_i32 = arith.constant 0 : i32
    %c0_i32_0 = arith.constant 0 : i32
    %c0_i32_1 = arith.constant 0 : i32
    return %c0_i32, %c0_i32_0 : i32, i32
  }
  func.func @transform_2(%arg0: i32) -> (i32, i32) {
    %c0_i32 = arith.constant 0 : i32
    %c0_i32_0 = arith.constant 0 : i32
    %c0_i32_1 = arith.constant 0 : i32
    return %c0_i32, %c0_i32_0 : i32, i32
  }
  func.func @transform_3(%arg0: i32) -> (i32, i32, i32) {
    %c0_i32 = arith.constant 0 : i32
    %c0_i32_0 = arith.constant 0 : i32
    %c0_i32_1 = arith.constant 0 : i32
    return %arg0, %c0_i32, %c0_i32_0 : i32, i32, i32
  }
}

module attributes {stable_mosaic.version = 11 : i64} {
  func.func @_norm_fc_softmax_kernel(%arg0: i32, %arg1: memref<1x8x32xf32, #tpu.memory_space<vmem>>, %arg2: memref<1x32xf32, #tpu.memory_space<vmem>>, %arg3: memref<1x32xf32, #tpu.memory_space<vmem>>, %arg4: memref<32x128xf32, #tpu.memory_space<vmem>>, %arg5: memref<1x128xf32, #tpu.memory_space<vmem>>, %arg6: memref<1x8x128xf32, #tpu.memory_space<vmem>>) attributes {dimension_semantics = [#tpu.dimension_semantics<parallel>], iteration_bounds = array<i64: 2>, scalar_prefetch = 0 : i64, scratch_operands = 0 : i64, tpu.core_type = #tpu.core_type<tc>, window_params = [{transform_indices = @transform_0, window_bounds = array<i64: 1, 8, 32>}, {pipeline_mode = #tpu.pipeline_mode<synchronous>, transform_indices = @transform_1, window_bounds = array<i64: 1, 32>}, {pipeline_mode = #tpu.pipeline_mode<synchronous>, transform_indices = @transform_2, window_bounds = array<i64: 1, 32>}, {pipeline_mode = #tpu.pipeline_mode<synchronous>, transform_indices = @transform_3, window_bounds = array<i64: 32, 128>}, {pipeline_mode = #tpu.pipeline_mode<synchronous>, transform_indices = @transform_4, window_bounds = array<i64: 1, 128>}, {transform_indices = @transform_5, window_bounds = array<i64: 1, 8, 128>}]} {
    %c0 = arith.constant 0 : index
    %c0_0 = arith.constant 0 : index
    %c0_1 = arith.constant 0 : index
    %0 = vector.load %arg1[%c0, %c0_0, %c0_1] : memref<1x8x32xf32, #tpu.memory_space<vmem>>, vector<1x8x32xf32>
    %1 = vector.shape_cast %0 : vector<1x8x32xf32> to vector<8x32xf32>
    %cst = arith.constant dense<0.000000e+00> : vector<8xf32>
    %2 = vector.multi_reduction <add>, %1, %cst [1] : vector<8x32xf32> to vector<8xf32>
    %3 = vector.shape_cast %2 : vector<8xf32> to vector<8x1xf32>
    %cst_2 = arith.constant 3.200000e+01 : f32
    %4 = vector.broadcast %cst_2 : f32 to vector<8x1xf32>
    %5 = arith.divf %3, %4 : vector<8x1xf32>
    %6 = vector.broadcast %5 : vector<8x1xf32> to vector<8x32xf32>
    %7 = arith.subf %1, %6 : vector<8x32xf32>
    %8 = arith.mulf %7, %7 : vector<8x32xf32>
    %cst_3 = arith.constant dense<0.000000e+00> : vector<8xf32>
    %9 = vector.multi_reduction <add>, %8, %cst_3 [1] : vector<8x32xf32> to vector<8xf32>
    %10 = vector.shape_cast %9 : vector<8xf32> to vector<8x1xf32>
    %cst_4 = arith.constant 3.200000e+01 : f32
    %11 = vector.broadcast %cst_4 : f32 to vector<8x1xf32>
    %12 = arith.divf %10, %11 : vector<8x1xf32>
    %13 = vector.broadcast %5 : vector<8x1xf32> to vector<8x32xf32>
    %14 = arith.subf %1, %13 : vector<8x32xf32>
    %cst_5 = arith.constant 9.99999974E-6 : f32
    %15 = vector.broadcast %cst_5 : f32 to vector<8x1xf32>
    %16 = arith.addf %12, %15 : vector<8x1xf32>
    %17 = math.rsqrt %16 : vector<8x1xf32>
    %18 = vector.broadcast %17 : vector<8x1xf32> to vector<8x32xf32>
    %19 = arith.mulf %14, %18 : vector<8x32xf32>
    %c0_6 = arith.constant 0 : index
    %c0_7 = arith.constant 0 : index
    %20 = vector.load %arg2[%c0_6, %c0_7] : memref<1x32xf32, #tpu.memory_space<vmem>>, vector<1x32xf32>
    %21 = vector.broadcast %20 : vector<1x32xf32> to vector<8x32xf32>
    %22 = arith.mulf %19, %21 : vector<8x32xf32>
    %c0_8 = arith.constant 0 : index
    %c0_9 = arith.constant 0 : index
    %23 = vector.load %arg3[%c0_8, %c0_9] : memref<1x32xf32, #tpu.memory_space<vmem>>, vector<1x32xf32>
    %24 = vector.broadcast %23 : vector<1x32xf32> to vector<8x32xf32>
    %25 = arith.addf %22, %24 : vector<8x32xf32>
    %c0_10 = arith.constant 0 : index
    %c0_11 = arith.constant 0 : index
    %26 = vector.load %arg4[%c0_10, %c0_11] : memref<32x128xf32, #tpu.memory_space<vmem>>, vector<32x128xf32>
    %cst_12 = arith.constant dense<0.000000e+00> : vector<8x128xf32>
    %27 = tpu.matmul %25, %26, %cst_12 {dimension_numbers = #tpu.dot_dimension_numbers<[1], [0], [0], [1], [0, 0, 1, 1], [], []>} : vector<8x32xf32>, vector<32x128xf32>, vector<8x128xf32> -> vector<8x128xf32>
    %c0_13 = arith.constant 0 : index
    %c0_14 = arith.constant 0 : index
    %28 = vector.load %arg5[%c0_13, %c0_14] : memref<1x128xf32, #tpu.memory_space<vmem>>, vector<1x128xf32>
    %29 = vector.broadcast %28 : vector<1x128xf32> to vector<8x128xf32>
    %30 = arith.addf %27, %29 : vector<8x128xf32>
    %cst_15 = arith.constant dense<0xFF800000> : vector<8xf32>
    %31 = vector.multi_reduction <maximumf>, %30, %cst_15 [1] : vector<8x128xf32> to vector<8xf32>
    %32 = vector.shape_cast %31 : vector<8xf32> to vector<8x1xf32>
    %33 = vector.broadcast %32 : vector<8x1xf32> to vector<8x128xf32>
    %34 = arith.subf %30, %33 : vector<8x128xf32>
    %35 = math.exp %34 : vector<8x128xf32>
    %cst_16 = arith.constant dense<0.000000e+00> : vector<8xf32>
    %36 = vector.multi_reduction <add>, %35, %cst_16 [1] : vector<8x128xf32> to vector<8xf32>
    %37 = vector.shape_cast %36 : vector<8xf32> to vector<8x1xf32>
    %38 = vector.broadcast %37 : vector<8x1xf32> to vector<8x128xf32>
    %39 = arith.divf %35, %38 : vector<8x128xf32>
    %c0_17 = arith.constant 0 : index
    %c0_18 = arith.constant 0 : index
    %c0_19 = arith.constant 0 : index
    %40 = vector.load %arg6[%c0_17, %c0_18, %c0_19] : memref<1x8x128xf32, #tpu.memory_space<vmem>>, vector<1x8x128xf32>
    %41 = vector.shape_cast %40 : vector<1x8x128xf32> to vector<8x128xf32>
    %42 = vector.shape_cast %39 : vector<8x128xf32> to vector<1x8x128xf32>
    tpu.vector_store %arg6[%c0_17, %c0_18, %c0_19], %42 {strides = array<i32>} : memref<1x8x128xf32, #tpu.memory_space<vmem>>, vector<1x8x128xf32>,
    return
  }
  func.func @transform_0(%arg0: i32) -> (i32, i32, i32) {
    %c0_i32 = arith.constant 0 : i32
    %c0_i32_0 = arith.constant 0 : i32
    %c0_i32_1 = arith.constant 0 : i32
    return %arg0, %c0_i32, %c0_i32_0 : i32, i32, i32
  }
  func.func @transform_1(%arg0: i32) -> (i32, i32) {
    %c0_i32 = arith.constant 0 : i32
    %c0_i32_0 = arith.constant 0 : i32
    %c0_i32_1 = arith.constant 0 : i32
    return %c0_i32, %c0_i32_0 : i32, i32
  }
  func.func @transform_2(%arg0: i32) -> (i32, i32) {
    %c0_i32 = arith.constant 0 : i32
    %c0_i32_0 = arith.constant 0 : i32
    %c0_i32_1 = arith.constant 0 : i32
    return %c0_i32, %c0_i32_0 : i32, i32
  }
  func.func @transform_3(%arg0: i32) -> (i32, i32) {
    %c0_i32 = arith.constant 0 : i32
    %c0_i32_0 = arith.constant 0 : i32
    %c0_i32_1 = arith.constant 0 : i32
    return %c0_i32, %c0_i32_0 : i32, i32
  }
  func.func @transform_4(%arg0: i32) -> (i32, i32) {
    %c0_i32 = arith.constant 0 : i32
    %c0_i32_0 = arith.constant 0 : i32
    %c0_i32_1 = arith.constant 0 : i32
    return %c0_i32, %c0_i32_0 : i32, i32
  }
  func.func @transform_5(%arg0: i32) -> (i32, i32, i32) {
    %c0_i32 = arith.constant 0 : i32
    %c0_i32_0 = arith.constant 0 : i32
    %c0_i32_1 = arith.constant 0 : i32
    return %arg0, %c0_i32, %c0_i32_0 : i32, i32, i32
  }
}

module attributes {stable_mosaic.version = 11 : i64} {
  func.func @_decoder_layer_kernel(%arg0: i32, %arg1: memref<1x8x32xf32, #tpu.memory_space<vmem>>, %arg2: memref<1x64x32xf32, #tpu.memory_space<vmem>>, %arg3: memref<12x32x8xf32, #tpu.memory_space<vmem>>, %arg4: memref<12x1x8xf32, #tpu.memory_space<vmem>>, %arg5: memref<4x8x32xf32, #tpu.memory_space<vmem>>, %arg6: memref<1x32xf32, #tpu.memory_space<vmem>>, %arg7: memref<1x32xf32, #tpu.memory_space<vmem>>, %arg8: memref<1x32xf32, #tpu.memory_space<vmem>>, %arg9: memref<12x32x8xf32, #tpu.memory_space<vmem>>, %arg10: memref<12x1x8xf32, #tpu.memory_space<vmem>>, %arg11: memref<4x8x32xf32, #tpu.memory_space<vmem>>, %arg12: memref<1x32xf32, #tpu.memory_space<vmem>>, %arg13: memref<1x32xf32, #tpu.memory_space<vmem>>, %arg14: memref<1x32xf32, #tpu.memory_space<vmem>>, %arg15: memref<32x64xf32, #tpu.memory_space<vmem>>, %arg16: memref<1x64xf32, #tpu.memory_space<vmem>>, %arg17: memref<64x32xf32, #tpu.memory_space<vmem>>, %arg18: memref<1x32xf32, #tpu.memory_space<vmem>>, %arg19: memref<1x32xf32, #tpu.memory_space<vmem>>, %arg20: memref<1x32xf32, #tpu.memory_space<vmem>>, %arg21: memref<1x8x32xf32, #tpu.memory_space<vmem>>) attributes {dimension_semantics = [#tpu.dimension_semantics<parallel>], iteration_bounds = array<i64: 2>, scalar_prefetch = 0 : i64, scratch_operands = 0 : i64, tpu.core_type = #tpu.core_type<tc>, window_params = [{transform_indices = @transform_0, window_bounds = array<i64: 1, 8, 32>}, {transform_indices = @transform_1, window_bounds = array<i64: 1, 64, 32>}, {pipeline_mode = #tpu.pipeline_mode<synchronous>, transform_indices = @transform_2, window_bounds = array<i64: 12, 32, 8>}, {pipeline_mode = #tpu.pipeline_mode<synchronous>, transform_indices = @transform_3, window_bounds = array<i64: 12, 1, 8>}, {pipeline_mode = #tpu.pipeline_mode<synchronous>, transform_indices = @transform_4, window_bounds = array<i64: 4, 8, 32>}, {pipeline_mode = #tpu.pipeline_mode<synchronous>, transform_indices = @transform_5, window_bounds = array<i64: 1, 32>}, {pipeline_mode = #tpu.pipeline_mode<synchronous>, transform_indices = @transform_6, window_bounds = array<i64: 1, 32>}, {pipeline_mode = #tpu.pipeline_mode<synchronous>, transform_indices = @transform_7, window_bounds = array<i64: 1, 32>}, {pipeline_mode = #tpu.pipeline_mode<synchronous>, transform_indices = @transform_8, window_bounds = array<i64: 12, 32, 8>}, {pipeline_mode = #tpu.pipeline_mode<synchronous>, transform_indices = @transform_9, window_bounds = array<i64: 12, 1, 8>}, {pipeline_mode = #tpu.pipeline_mode<synchronous>, transform_indices = @transform_10, window_bounds = array<i64: 4, 8, 32>}, {pipeline_mode = #tpu.pipeline_mode<synchronous>, transform_indices = @transform_11, window_bounds = array<i64: 1, 32>}, {pipeline_mode = #tpu.pipeline_mode<synchronous>, transform_indices = @transform_12, window_bounds = array<i64: 1, 32>}, {pipeline_mode = #tpu.pipeline_mode<synchronous>, transform_indices = @transform_13, window_bounds = array<i64: 1, 32>}, {pipeline_mode = #tpu.pipeline_mode<synchronous>, transform_indices = @transform_14, window_bounds = array<i64: 32, 64>}, {pipeline_mode = #tpu.pipeline_mode<synchronous>, transform_indices = @transform_15, window_bounds = array<i64: 1, 64>}, {pipeline_mode = #tpu.pipeline_mode<synchronous>, transform_indices = @transform_16, window_bounds = array<i64: 64, 32>}, {pipeline_mode = #tpu.pipeline_mode<synchronous>, transform_indices = @transform_17, window_bounds = array<i64: 1, 32>}, {pipeline_mode = #tpu.pipeline_mode<synchronous>, transform_indices = @transform_18, window_bounds = array<i64: 1, 32>}, {pipeline_mode = #tpu.pipeline_mode<synchronous>, transform_indices = @transform_19, window_bounds = array<i64: 1, 32>}, {transform_indices = @transform_20, window_bounds = array<i64: 1, 8, 32>}]} {
    %c0 = arith.constant 0 : index
    %c0_0 = arith.constant 0 : index
    %c0_1 = arith.constant 0 : index
    %0 = vector.load %arg1[%c0, %c0_0, %c0_1] : memref<1x8x32xf32, #tpu.memory_space<vmem>>, vector<1x8x32xf32>
    %1 = vector.shape_cast %0 : vector<1x8x32xf32> to vector<8x32xf32>
    %c0_2 = arith.constant 0 : index
    %c0_3 = arith.constant 0 : index
    %c0_4 = arith.constant 0 : index
    %2 = vector.load %arg2[%c0_2, %c0_3, %c0_4] : memref<1x64x32xf32, #tpu.memory_space<vmem>>, vector<1x64x32xf32>
    %3 = vector.shape_cast %2 : vector<1x64x32xf32> to vector<64x32xf32>
    %c0_5 = arith.constant 0 : index
    %c0_6 = arith.constant 0 : index
    %c0_7 = arith.constant 0 : index
    %4 = vector.load %arg3[%c0_5, %c0_6, %c0_7] : memref<12x32x8xf32, #tpu.memory_space<vmem>>, vector<1x32x8xf32>
    %5 = vector.shape_cast %4 : vector<1x32x8xf32> to vector<32x8xf32>
    %cst = arith.constant dense<0.000000e+00> : vector<8x8xf32>
    %6 = tpu.matmul %1, %5, %cst {dimension_numbers = #tpu.dot_dimension_numbers<[1], [0], [0], [1], [0, 0, 1, 1], [], []>} : vector<8x32xf32>, vector<32x8xf32>, vector<8x8xf32> -> vector<8x8xf32>
    %c0_8 = arith.constant 0 : index
    %c0_9 = arith.constant 0 : index
    %c0_10 = arith.constant 0 : index
    %7 = vector.load %arg4[%c0_8, %c0_9, %c0_10] : memref<12x1x8xf32, #tpu.memory_space<vmem>>, vector<1x1x8xf32>
    %8 = vector.shape_cast %7 : vector<1x1x8xf32> to vector<1x8xf32>
    %9 = vector.broadcast %8 : vector<1x8xf32> to vector<8x8xf32>
    %10 = arith.addf %6, %9 : vector<8x8xf32>
    %c4 = arith.constant 4 : index
    %c0_11 = arith.constant 0 : index
    %c0_12 = arith.constant 0 : index
    %11 = vector.load %arg3[%c4, %c0_11, %c0_12] : memref<12x32x8xf32, #tpu.memory_space<vmem>>, vector<1x32x8xf32>
    %12 = vector.shape_cast %11 : vector<1x32x8xf32> to vector<32x8xf32>
    %cst_13 = arith.constant dense<0.000000e+00> : vector<8x8xf32>
    %13 = tpu.matmul %1, %12, %cst_13 {dimension_numbers = #tpu.dot_dimension_numbers<[1], [0], [0], [1], [0, 0, 1, 1], [], []>} : vector<8x32xf32>, vector<32x8xf32>, vector<8x8xf32> -> vector<8x8xf32>
    %c4_14 = arith.constant 4 : index
    %c0_15 = arith.constant 0 : index
    %c0_16 = arith.constant 0 : index
    %14 = vector.load %arg4[%c4_14, %c0_15, %c0_16] : memref<12x1x8xf32, #tpu.memory_space<vmem>>, vector<1x1x8xf32>
    %15 = vector.shape_cast %14 : vector<1x1x8xf32> to vector<1x8xf32>
    %16 = vector.broadcast %15 : vector<1x8xf32> to vector<8x8xf32>
    %17 = arith.addf %13, %16 : vector<8x8xf32>
    %c8 = arith.constant 8 : index
    %c0_17 = arith.constant 0 : index
    %c0_18 = arith.constant 0 : index
    %18 = vector.load %arg3[%c8, %c0_17, %c0_18] : memref<12x32x8xf32, #tpu.memory_space<vmem>>, vector<1x32x8xf32>
    %19 = vector.shape_cast %18 : vector<1x32x8xf32> to vector<32x8xf32>
    %cst_19 = arith.constant dense<0.000000e+00> : vector<8x8xf32>
    %20 = tpu.matmul %1, %19, %cst_19 {dimension_numbers = #tpu.dot_dimension_numbers<[1], [0], [0], [1], [0, 0, 1, 1], [], []>} : vector<8x32xf32>, vector<32x8xf32>, vector<8x8xf32> -> vector<8x8xf32>
    %c8_20 = arith.constant 8 : index
    %c0_21 = arith.constant 0 : index
    %c0_22 = arith.constant 0 : index
    %21 = vector.load %arg4[%c8_20, %c0_21, %c0_22] : memref<12x1x8xf32, #tpu.memory_space<vmem>>, vector<1x1x8xf32>
    %22 = vector.shape_cast %21 : vector<1x1x8xf32> to vector<1x8xf32>
    %23 = vector.broadcast %22 : vector<1x8xf32> to vector<8x8xf32>
    %24 = arith.addf %20, %23 : vector<8x8xf32>
    %cst_23 = arith.constant dense<0.000000e+00> : vector<8x8xf32>
    %25 = tpu.matmul %10, %17, %cst_23 {dimension_numbers = #tpu.dot_dimension_numbers<[1], [1], [0], [0], [0, 0, 1, 0], [], []>} : vector<8x8xf32>, vector<8x8xf32>, vector<8x8xf32> -> vector<8x8xf32>
    %cst_24 = arith.constant 0.353553385 : f32
    %26 = vector.broadcast %cst_24 : f32 to vector<8x8xf32>
    %27 = arith.mulf %25, %26 : vector<8x8xf32>
    %cst_25 = arith.constant dense<0xFF800000> : vector<8xf32>
    %28 = vector.multi_reduction <maximumf>, %27, %cst_25 [1] : vector<8x8xf32> to vector<8xf32>
    %29 = vector.shape_cast %28 : vector<8xf32> to vector<8x1xf32>
    %30 = vector.broadcast %29 : vector<8x1xf32> to vector<8x8xf32>
    %31 = arith.subf %27, %30 : vector<8x8xf32>
    %32 = math.exp %31 : vector<8x8xf32>
    %cst_26 = arith.constant dense<0.000000e+00> : vector<8xf32>
    %33 = vector.multi_reduction <add>, %32, %cst_26 [1] : vector<8x8xf32> to vector<8xf32>
    %34 = vector.shape_cast %33 : vector<8xf32> to vector<8x1xf32>
    %35 = tpu.reciprocal %34 {approx = true} : vector<8x1xf32> -> vector<8x1xf32>
    %36 = vector.broadcast %35 : vector<8x1xf32> to vector<8x8xf32>
    %37 = arith.mulf %32, %36 : vector<8x8xf32>
    %cst_27 = arith.constant dense<0.000000e+00> : vector<8x8xf32>
    %38 = tpu.matmul %37, %24, %cst_27 {dimension_numbers = #tpu.dot_dimension_numbers<[1], [0], [0], [1], [0, 0, 1, 1], [], []>} : vector<8x8xf32>, vector<8x8xf32>, vector<8x8xf32> -> vector<8x8xf32>
    %c0_28 = arith.constant 0 : index
    %c0_29 = arith.constant 0 : index
    %c0_30 = arith.constant 0 : index
    %39 = vector.load %arg5[%c0_28, %c0_29, %c0_30] : memref<4x8x32xf32, #tpu.memory_space<vmem>>, vector<1x8x32xf32>
    %40 = vector.shape_cast %39 : vector<1x8x32xf32> to vector<8x32xf32>
    %cst_31 = arith.constant dense<0.000000e+00> : vector<8x32xf32>
    %41 = tpu.matmul %38, %40, %cst_31 {dimension_numbers = #tpu.dot_dimension_numbers<[1], [0], [0], [1], [0, 0, 1, 1], [], []>} : vector<8x8xf32>, vector<8x32xf32>, vector<8x32xf32> -> vector<8x32xf32>
    %c1 = arith.constant 1 : index
    %c0_32 = arith.constant 0 : index
    %c0_33 = arith.constant 0 : index
    %42 = vector.load %arg3[%c1, %c0_32, %c0_33] : memref<12x32x8xf32, #tpu.memory_space<vmem>>, vector<1x32x8xf32>
    %43 = vector.shape_cast %42 : vector<1x32x8xf32> to vector<32x8xf32>
    %cst_34 = arith.constant dense<0.000000e+00> : vector<8x8xf32>
    %44 = tpu.matmul %1, %43, %cst_34 {dimension_numbers = #tpu.dot_dimension_numbers<[1], [0], [0], [1], [0, 0, 1, 1], [], []>} : vector<8x32xf32>, vector<32x8xf32>, vector<8x8xf32> -> vector<8x8xf32>
    %c1_35 = arith.constant 1 : index
    %c0_36 = arith.constant 0 : index
    %c0_37 = arith.constant 0 : index
    %45 = vector.load %arg4[%c1_35, %c0_36, %c0_37] : memref<12x1x8xf32, #tpu.memory_space<vmem>>, vector<1x1x8xf32>
    %46 = vector.shape_cast %45 : vector<1x1x8xf32> to vector<1x8xf32>
    %47 = vector.broadcast %46 : vector<1x8xf32> to vector<8x8xf32>
    %48 = arith.addf %44, %47 : vector<8x8xf32>
    %c5 = arith.constant 5 : index
    %c0_38 = arith.constant 0 : index
    %c0_39 = arith.constant 0 : index
    %49 = vector.load %arg3[%c5, %c0_38, %c0_39] : memref<12x32x8xf32, #tpu.memory_space<vmem>>, vector<1x32x8xf32>
    %50 = vector.shape_cast %49 : vector<1x32x8xf32> to vector<32x8xf32>
    %cst_40 = arith.constant dense<0.000000e+00> : vector<8x8xf32>
    %51 = tpu.matmul %1, %50, %cst_40 {dimension_numbers = #tpu.dot_dimension_numbers<[1], [0], [0], [1], [0, 0, 1, 1], [], []>} : vector<8x32xf32>, vector<32x8xf32>, vector<8x8xf32> -> vector<8x8xf32>
    %c5_41 = arith.constant 5 : index
    %c0_42 = arith.constant 0 : index
    %c0_43 = arith.constant 0 : index
    %52 = vector.load %arg4[%c5_41, %c0_42, %c0_43] : memref<12x1x8xf32, #tpu.memory_space<vmem>>, vector<1x1x8xf32>
    %53 = vector.shape_cast %52 : vector<1x1x8xf32> to vector<1x8xf32>
    %54 = vector.broadcast %53 : vector<1x8xf32> to vector<8x8xf32>
    %55 = arith.addf %51, %54 : vector<8x8xf32>
    %c9 = arith.constant 9 : index
    %c0_44 = arith.constant 0 : index
    %c0_45 = arith.constant 0 : index
    %56 = vector.load %arg3[%c9, %c0_44, %c0_45] : memref<12x32x8xf32, #tpu.memory_space<vmem>>, vector<1x32x8xf32>
    %57 = vector.shape_cast %56 : vector<1x32x8xf32> to vector<32x8xf32>
    %cst_46 = arith.constant dense<0.000000e+00> : vector<8x8xf32>
    %58 = tpu.matmul %1, %57, %cst_46 {dimension_numbers = #tpu.dot_dimension_numbers<[1], [0], [0], [1], [0, 0, 1, 1], [], []>} : vector<8x32xf32>, vector<32x8xf32>, vector<8x8xf32> -> vector<8x8xf32>
    %c9_47 = arith.constant 9 : index
    %c0_48 = arith.constant 0 : index
    %c0_49 = arith.constant 0 : index
    %59 = vector.load %arg4[%c9_47, %c0_48, %c0_49] : memref<12x1x8xf32, #tpu.memory_space<vmem>>, vector<1x1x8xf32>
    %60 = vector.shape_cast %59 : vector<1x1x8xf32> to vector<1x8xf32>
    %61 = vector.broadcast %60 : vector<1x8xf32> to vector<8x8xf32>
    %62 = arith.addf %58, %61 : vector<8x8xf32>
    %cst_50 = arith.constant dense<0.000000e+00> : vector<8x8xf32>
    %63 = tpu.matmul %48, %55, %cst_50 {dimension_numbers = #tpu.dot_dimension_numbers<[1], [1], [0], [0], [0, 0, 1, 0], [], []>} : vector<8x8xf32>, vector<8x8xf32>, vector<8x8xf32> -> vector<8x8xf32>
    %cst_51 = arith.constant 0.353553385 : f32
    %64 = vector.broadcast %cst_51 : f32 to vector<8x8xf32>
    %65 = arith.mulf %63, %64 : vector<8x8xf32>
    %cst_52 = arith.constant dense<0xFF800000> : vector<8xf32>
    %66 = vector.multi_reduction <maximumf>, %65, %cst_52 [1] : vector<8x8xf32> to vector<8xf32>
    %67 = vector.shape_cast %66 : vector<8xf32> to vector<8x1xf32>
    %68 = vector.broadcast %67 : vector<8x1xf32> to vector<8x8xf32>
    %69 = arith.subf %65, %68 : vector<8x8xf32>
    %70 = math.exp %69 : vector<8x8xf32>
    %cst_53 = arith.constant dense<0.000000e+00> : vector<8xf32>
    %71 = vector.multi_reduction <add>, %70, %cst_53 [1] : vector<8x8xf32> to vector<8xf32>
    %72 = vector.shape_cast %71 : vector<8xf32> to vector<8x1xf32>
    %73 = tpu.reciprocal %72 {approx = true} : vector<8x1xf32> -> vector<8x1xf32>
    %74 = vector.broadcast %73 : vector<8x1xf32> to vector<8x8xf32>
    %75 = arith.mulf %70, %74 : vector<8x8xf32>
    %cst_54 = arith.constant dense<0.000000e+00> : vector<8x8xf32>
    %76 = tpu.matmul %75, %62, %cst_54 {dimension_numbers = #tpu.dot_dimension_numbers<[1], [0], [0], [1], [0, 0, 1, 1], [], []>} : vector<8x8xf32>, vector<8x8xf32>, vector<8x8xf32> -> vector<8x8xf32>
    %c1_55 = arith.constant 1 : index
    %c0_56 = arith.constant 0 : index
    %c0_57 = arith.constant 0 : index
    %77 = vector.load %arg5[%c1_55, %c0_56, %c0_57] : memref<4x8x32xf32, #tpu.memory_space<vmem>>, vector<1x8x32xf32>
    %78 = vector.shape_cast %77 : vector<1x8x32xf32> to vector<8x32xf32>
    %cst_58 = arith.constant dense<0.000000e+00> : vector<8x32xf32>
    %79 = tpu.matmul %76, %78, %cst_58 {dimension_numbers = #tpu.dot_dimension_numbers<[1], [0], [0], [1], [0, 0, 1, 1], [], []>} : vector<8x8xf32>, vector<8x32xf32>, vector<8x32xf32> -> vector<8x32xf32>
    %80 = arith.addf %41, %79 : vector<8x32xf32>
    %c2 = arith.constant 2 : index
    %c0_59 = arith.constant 0 : index
    %c0_60 = arith.constant 0 : index
    %81 = vector.load %arg3[%c2, %c0_59, %c0_60] : memref<12x32x8xf32, #tpu.memory_space<vmem>>, vector<1x32x8xf32>
    %82 = vector.shape_cast %81 : vector<1x32x8xf32> to vector<32x8xf32>
    %cst_61 = arith.constant dense<0.000000e+00> : vector<8x8xf32>
    %83 = tpu.matmul %1, %82, %cst_61 {dimension_numbers = #tpu.dot_dimension_numbers<[1], [0], [0], [1], [0, 0, 1, 1], [], []>} : vector<8x32xf32>, vector<32x8xf32>, vector<8x8xf32> -> vector<8x8xf32>
    %c2_62 = arith.constant 2 : index
    %c0_63 = arith.constant 0 : index
    %c0_64 = arith.constant 0 : index
    %84 = vector.load %arg4[%c2_62, %c0_63, %c0_64] : memref<12x1x8xf32, #tpu.memory_space<vmem>>, vector<1x1x8xf32>
    %85 = vector.shape_cast %84 : vector<1x1x8xf32> to vector<1x8xf32>
    %86 = vector.broadcast %85 : vector<1x8xf32> to vector<8x8xf32>
    %87 = arith.addf %83, %86 : vector<8x8xf32>
    %c6 = arith.constant 6 : index
    %c0_65 = arith.constant 0 : index
    %c0_66 = arith.constant 0 : index
    %88 = vector.load %arg3[%c6, %c0_65, %c0_66] : memref<12x32x8xf32, #tpu.memory_space<vmem>>, vector<1x32x8xf32>
    %89 = vector.shape_cast %88 : vector<1x32x8xf32> to vector<32x8xf32>
    %cst_67 = arith.constant dense<0.000000e+00> : vector<8x8xf32>
    %90 = tpu.matmul %1, %89, %cst_67 {dimension_numbers = #tpu.dot_dimension_numbers<[1], [0], [0], [1], [0, 0, 1, 1], [], []>} : vector<8x32xf32>, vector<32x8xf32>, vector<8x8xf32> -> vector<8x8xf32>
    %c6_68 = arith.constant 6 : index
    %c0_69 = arith.constant 0 : index
    %c0_70 = arith.constant 0 : index
    %91 = vector.load %arg4[%c6_68, %c0_69, %c0_70] : memref<12x1x8xf32, #tpu.memory_space<vmem>>, vector<1x1x8xf32>
    %92 = vector.shape_cast %91 : vector<1x1x8xf32> to vector<1x8xf32>
    %93 = vector.broadcast %92 : vector<1x8xf32> to vector<8x8xf32>
    %94 = arith.addf %90, %93 : vector<8x8xf32>
    %c10 = arith.constant 10 : index
    %c0_71 = arith.constant 0 : index
    %c0_72 = arith.constant 0 : index
    %95 = vector.load %arg3[%c10, %c0_71, %c0_72] : memref<12x32x8xf32, #tpu.memory_space<vmem>>, vector<1x32x8xf32>
    %96 = vector.shape_cast %95 : vector<1x32x8xf32> to vector<32x8xf32>
    %cst_73 = arith.constant dense<0.000000e+00> : vector<8x8xf32>
    %97 = tpu.matmul %1, %96, %cst_73 {dimension_numbers = #tpu.dot_dimension_numbers<[1], [0], [0], [1], [0, 0, 1, 1], [], []>} : vector<8x32xf32>, vector<32x8xf32>, vector<8x8xf32> -> vector<8x8xf32>
    %c10_74 = arith.constant 10 : index
    %c0_75 = arith.constant 0 : index
    %c0_76 = arith.constant 0 : index
    %98 = vector.load %arg4[%c10_74, %c0_75, %c0_76] : memref<12x1x8xf32, #tpu.memory_space<vmem>>, vector<1x1x8xf32>
    %99 = vector.shape_cast %98 : vector<1x1x8xf32> to vector<1x8xf32>
    %100 = vector.broadcast %99 : vector<1x8xf32> to vector<8x8xf32>
    %101 = arith.addf %97, %100 : vector<8x8xf32>
    %cst_77 = arith.constant dense<0.000000e+00> : vector<8x8xf32>
    %102 = tpu.matmul %87, %94, %cst_77 {dimension_numbers = #tpu.dot_dimension_numbers<[1], [1], [0], [0], [0, 0, 1, 0], [], []>} : vector<8x8xf32>, vector<8x8xf32>, vector<8x8xf32> -> vector<8x8xf32>
    %cst_78 = arith.constant 0.353553385 : f32
    %103 = vector.broadcast %cst_78 : f32 to vector<8x8xf32>
    %104 = arith.mulf %102, %103 : vector<8x8xf32>
    %cst_79 = arith.constant dense<0xFF800000> : vector<8xf32>
    %105 = vector.multi_reduction <maximumf>, %104, %cst_79 [1] : vector<8x8xf32> to vector<8xf32>
    %106 = vector.shape_cast %105 : vector<8xf32> to vector<8x1xf32>
    %107 = vector.broadcast %106 : vector<8x1xf32> to vector<8x8xf32>
    %108 = arith.subf %104, %107 : vector<8x8xf32>
    %109 = math.exp %108 : vector<8x8xf32>
    %cst_80 = arith.constant dense<0.000000e+00> : vector<8xf32>
    %110 = vector.multi_reduction <add>, %109, %cst_80 [1] : vector<8x8xf32> to vector<8xf32>
    %111 = vector.shape_cast %110 : vector<8xf32> to vector<8x1xf32>
    %112 = tpu.reciprocal %111 {approx = true} : vector<8x1xf32> -> vector<8x1xf32>
    %113 = vector.broadcast %112 : vector<8x1xf32> to vector<8x8xf32>
    %114 = arith.mulf %109, %113 : vector<8x8xf32>
    %cst_81 = arith.constant dense<0.000000e+00> : vector<8x8xf32>
    %115 = tpu.matmul %114, %101, %cst_81 {dimension_numbers = #tpu.dot_dimension_numbers<[1], [0], [0], [1], [0, 0, 1, 1], [], []>} : vector<8x8xf32>, vector<8x8xf32>, vector<8x8xf32> -> vector<8x8xf32>
    %c2_82 = arith.constant 2 : index
    %c0_83 = arith.constant 0 : index
    %c0_84 = arith.constant 0 : index
    %116 = vector.load %arg5[%c2_82, %c0_83, %c0_84] : memref<4x8x32xf32, #tpu.memory_space<vmem>>, vector<1x8x32xf32>
    %117 = vector.shape_cast %116 : vector<1x8x32xf32> to vector<8x32xf32>
    %cst_85 = arith.constant dense<0.000000e+00> : vector<8x32xf32>
    %118 = tpu.matmul %115, %117, %cst_85 {dimension_numbers = #tpu.dot_dimension_numbers<[1], [0], [0], [1], [0, 0, 1, 1], [], []>} : vector<8x8xf32>, vector<8x32xf32>, vector<8x32xf32> -> vector<8x32xf32>
    %119 = arith.addf %80, %118 : vector<8x32xf32>
    %c3 = arith.constant 3 : index
    %c0_86 = arith.constant 0 : index
    %c0_87 = arith.constant 0 : index
    %120 = vector.load %arg3[%c3, %c0_86, %c0_87] : memref<12x32x8xf32, #tpu.memory_space<vmem>>, vector<1x32x8xf32>
    %121 = vector.shape_cast %120 : vector<1x32x8xf32> to vector<32x8xf32>
    %cst_88 = arith.constant dense<0.000000e+00> : vector<8x8xf32>
    %122 = tpu.matmul %1, %121, %cst_88 {dimension_numbers = #tpu.dot_dimension_numbers<[1], [0], [0], [1], [0, 0, 1, 1], [], []>} : vector<8x32xf32>, vector<32x8xf32>, vector<8x8xf32> -> vector<8x8xf32>
    %c3_89 = arith.constant 3 : index
    %c0_90 = arith.constant 0 : index
    %c0_91 = arith.constant 0 : index
    %123 = vector.load %arg4[%c3_89, %c0_90, %c0_91] : memref<12x1x8xf32, #tpu.memory_space<vmem>>, vector<1x1x8xf32>
    %124 = vector.shape_cast %123 : vector<1x1x8xf32> to vector<1x8xf32>
    %125 = vector.broadcast %124 : vector<1x8xf32> to vector<8x8xf32>
    %126 = arith.addf %122, %125 : vector<8x8xf32>
    %c7 = arith.constant 7 : index
    %c0_92 = arith.constant 0 : index
    %c0_93 = arith.constant 0 : index
    %127 = vector.load %arg3[%c7, %c0_92, %c0_93] : memref<12x32x8xf32, #tpu.memory_space<vmem>>, vector<1x32x8xf32>
    %128 = vector.shape_cast %127 : vector<1x32x8xf32> to vector<32x8xf32>
    %cst_94 = arith.constant dense<0.000000e+00> : vector<8x8xf32>
    %129 = tpu.matmul %1, %128, %cst_94 {dimension_numbers = #tpu.dot_dimension_numbers<[1], [0], [0], [1], [0, 0, 1, 1], [], []>} : vector<8x32xf32>, vector<32x8xf32>, vector<8x8xf32> -> vector<8x8xf32>
    %c7_95 = arith.constant 7 : index
    %c0_96 = arith.constant 0 : index
    %c0_97 = arith.constant 0 : index
    %130 = vector.load %arg4[%c7_95, %c0_96, %c0_97] : memref<12x1x8xf32, #tpu.memory_space<vmem>>, vector<1x1x8xf32>
    %131 = vector.shape_cast %130 : vector<1x1x8xf32> to vector<1x8xf32>
    %132 = vector.broadcast %131 : vector<1x8xf32> to vector<8x8xf32>
    %133 = arith.addf %129, %132 : vector<8x8xf32>
    %c11 = arith.constant 11 : index
    %c0_98 = arith.constant 0 : index
    %c0_99 = arith.constant 0 : index
    %134 = vector.load %arg3[%c11, %c0_98, %c0_99] : memref<12x32x8xf32, #tpu.memory_space<vmem>>, vector<1x32x8xf32>
    %135 = vector.shape_cast %134 : vector<1x32x8xf32> to vector<32x8xf32>
    %cst_100 = arith.constant dense<0.000000e+00> : vector<8x8xf32>
    %136 = tpu.matmul %1, %135, %cst_100 {dimension_numbers = #tpu.dot_dimension_numbers<[1], [0], [0], [1], [0, 0, 1, 1], [], []>} : vector<8x32xf32>, vector<32x8xf32>, vector<8x8xf32> -> vector<8x8xf32>
    %c11_101 = arith.constant 11 : index
    %c0_102 = arith.constant 0 : index
    %c0_103 = arith.constant 0 : index
    %137 = vector.load %arg4[%c11_101, %c0_102, %c0_103] : memref<12x1x8xf32, #tpu.memory_space<vmem>>, vector<1x1x8xf32>
    %138 = vector.shape_cast %137 : vector<1x1x8xf32> to vector<1x8xf32>
    %139 = vector.broadcast %138 : vector<1x8xf32> to vector<8x8xf32>
    %140 = arith.addf %136, %139 : vector<8x8xf32>
    %cst_104 = arith.constant dense<0.000000e+00> : vector<8x8xf32>
    %141 = tpu.matmul %126, %133, %cst_104 {dimension_numbers = #tpu.dot_dimension_numbers<[1], [1], [0], [0], [0, 0, 1, 0], [], []>} : vector<8x8xf32>, vector<8x8xf32>, vector<8x8xf32> -> vector<8x8xf32>
    %cst_105 = arith.constant 0.353553385 : f32
    %142 = vector.broadcast %cst_105 : f32 to vector<8x8xf32>
    %143 = arith.mulf %141, %142 : vector<8x8xf32>
    %cst_106 = arith.constant dense<0xFF800000> : vector<8xf32>
    %144 = vector.multi_reduction <maximumf>, %143, %cst_106 [1] : vector<8x8xf32> to vector<8xf32>
    %145 = vector.shape_cast %144 : vector<8xf32> to vector<8x1xf32>
    %146 = vector.broadcast %145 : vector<8x1xf32> to vector<8x8xf32>
    %147 = arith.subf %143, %146 : vector<8x8xf32>
    %148 = math.exp %147 : vector<8x8xf32>
    %cst_107 = arith.constant dense<0.000000e+00> : vector<8xf32>
    %149 = vector.multi_reduction <add>, %148, %cst_107 [1] : vector<8x8xf32> to vector<8xf32>
    %150 = vector.shape_cast %149 : vector<8xf32> to vector<8x1xf32>
    %151 = tpu.reciprocal %150 {approx = true} : vector<8x1xf32> -> vector<8x1xf32>
    %152 = vector.broadcast %151 : vector<8x1xf32> to vector<8x8xf32>
    %153 = arith.mulf %148, %152 : vector<8x8xf32>
    %cst_108 = arith.constant dense<0.000000e+00> : vector<8x8xf32>
    %154 = tpu.matmul %153, %140, %cst_108 {dimension_numbers = #tpu.dot_dimension_numbers<[1], [0], [0], [1], [0, 0, 1, 1], [], []>} : vector<8x8xf32>, vector<8x8xf32>, vector<8x8xf32> -> vector<8x8xf32>
    %c3_109 = arith.constant 3 : index
    %c0_110 = arith.constant 0 : index
    %c0_111 = arith.constant 0 : index
    %155 = vector.load %arg5[%c3_109, %c0_110, %c0_111] : memref<4x8x32xf32, #tpu.memory_space<vmem>>, vector<1x8x32xf32>
    %156 = vector.shape_cast %155 : vector<1x8x32xf32> to vector<8x32xf32>
    %cst_112 = arith.constant dense<0.000000e+00> : vector<8x32xf32>
    %157 = tpu.matmul %154, %156, %cst_112 {dimension_numbers = #tpu.dot_dimension_numbers<[1], [0], [0], [1], [0, 0, 1, 1], [], []>} : vector<8x8xf32>, vector<8x32xf32>, vector<8x32xf32> -> vector<8x32xf32>
    %158 = arith.addf %119, %157 : vector<8x32xf32>
    %c0_113 = arith.constant 0 : index
    %c0_114 = arith.constant 0 : index
    %159 = vector.load %arg6[%c0_113, %c0_114] : memref<1x32xf32, #tpu.memory_space<vmem>>, vector<1x32xf32>
    %160 = vector.broadcast %159 : vector<1x32xf32> to vector<8x32xf32>
    %161 = arith.addf %158, %160 : vector<8x32xf32>
    %162 = arith.addf %1, %161 : vector<8x32xf32>
    %cst_115 = arith.constant dense<0.000000e+00> : vector<8xf32>
    %163 = vector.multi_reduction <add>, %162, %cst_115 [1] : vector<8x32xf32> to vector<8xf32>
    %164 = vector.shape_cast %163 : vector<8xf32> to vector<8x1xf32>
    %cst_116 = arith.constant 3.200000e+01 : f32
    %165 = vector.broadcast %cst_116 : f32 to vector<8x1xf32>
    %166 = arith.divf %164, %165 : vector<8x1xf32>
    %167 = vector.broadcast %166 : vector<8x1xf32> to vector<8x32xf32>
    %168 = arith.subf %162, %167 : vector<8x32xf32>
    %169 = arith.mulf %168, %168 : vector<8x32xf32>
    %cst_117 = arith.constant dense<0.000000e+00> : vector<8xf32>
    %170 = vector.multi_reduction <add>, %169, %cst_117 [1] : vector<8x32xf32> to vector<8xf32>
    %171 = vector.shape_cast %170 : vector<8xf32> to vector<8x1xf32>
    %cst_118 = arith.constant 3.200000e+01 : f32
    %172 = vector.broadcast %cst_118 : f32 to vector<8x1xf32>
    %173 = arith.divf %171, %172 : vector<8x1xf32>
    %174 = vector.broadcast %166 : vector<8x1xf32> to vector<8x32xf32>
    %175 = arith.subf %162, %174 : vector<8x32xf32>
    %cst_119 = arith.constant 9.99999974E-6 : f32
    %176 = vector.broadcast %cst_119 : f32 to vector<8x1xf32>
    %177 = arith.addf %173, %176 : vector<8x1xf32>
    %178 = math.rsqrt %177 : vector<8x1xf32>
    %179 = vector.broadcast %178 : vector<8x1xf32> to vector<8x32xf32>
    %180 = arith.mulf %175, %179 : vector<8x32xf32>
    %c0_120 = arith.constant 0 : index
    %c0_121 = arith.constant 0 : index
    %181 = vector.load %arg7[%c0_120, %c0_121] : memref<1x32xf32, #tpu.memory_space<vmem>>, vector<1x32xf32>
    %182 = vector.broadcast %181 : vector<1x32xf32> to vector<8x32xf32>
    %183 = arith.mulf %180, %182 : vector<8x32xf32>
    %c0_122 = arith.constant 0 : index
    %c0_123 = arith.constant 0 : index
    %184 = vector.load %arg8[%c0_122, %c0_123] : memref<1x32xf32, #tpu.memory_space<vmem>>, vector<1x32xf32>
    %185 = vector.broadcast %184 : vector<1x32xf32> to vector<8x32xf32>
    %186 = arith.addf %183, %185 : vector<8x32xf32>
    %c0_124 = arith.constant 0 : index
    %c0_125 = arith.constant 0 : index
    %c0_126 = arith.constant 0 : index
    %187 = vector.load %arg9[%c0_124, %c0_125, %c0_126] : memref<12x32x8xf32, #tpu.memory_space<vmem>>, vector<1x32x8xf32>
    %188 = vector.shape_cast %187 : vector<1x32x8xf32> to vector<32x8xf32>
    %cst_127 = arith.constant dense<0.000000e+00> : vector<8x8xf32>
    %189 = tpu.matmul %186, %188, %cst_127 {dimension_numbers = #tpu.dot_dimension_numbers<[1], [0], [0], [1], [0, 0, 1, 1], [], []>} : vector<8x32xf32>, vector<32x8xf32>, vector<8x8xf32> -> vector<8x8xf32>
    %c0_128 = arith.constant 0 : index
    %c0_129 = arith.constant 0 : index
    %c0_130 = arith.constant 0 : index
    %190 = vector.load %arg10[%c0_128, %c0_129, %c0_130] : memref<12x1x8xf32, #tpu.memory_space<vmem>>, vector<1x1x8xf32>
    %191 = vector.shape_cast %190 : vector<1x1x8xf32> to vector<1x8xf32>
    %192 = vector.broadcast %191 : vector<1x8xf32> to vector<8x8xf32>
    %193 = arith.addf %189, %192 : vector<8x8xf32>
    %c4_131 = arith.constant 4 : index
    %c0_132 = arith.constant 0 : index
    %c0_133 = arith.constant 0 : index
    %194 = vector.load %arg9[%c4_131, %c0_132, %c0_133] : memref<12x32x8xf32, #tpu.memory_space<vmem>>, vector<1x32x8xf32>
    %195 = vector.shape_cast %194 : vector<1x32x8xf32> to vector<32x8xf32>
    %cst_134 = arith.constant dense<0.000000e+00> : vector<64x8xf32>
    %196 = tpu.matmul %3, %195, %cst_134 {dimension_numbers = #tpu.dot_dimension_numbers<[1], [0], [0], [1], [0, 0, 1, 1], [], []>} : vector<64x32xf32>, vector<32x8xf32>, vector<64x8xf32> -> vector<64x8xf32>
    %c4_135 = arith.constant 4 : index
    %c0_136 = arith.constant 0 : index
    %c0_137 = arith.constant 0 : index
    %197 = vector.load %arg10[%c4_135, %c0_136, %c0_137] : memref<12x1x8xf32, #tpu.memory_space<vmem>>, vector<1x1x8xf32>
    %198 = vector.shape_cast %197 : vector<1x1x8xf32> to vector<1x8xf32>
    %199 = vector.broadcast %198 : vector<1x8xf32> to vector<64x8xf32>
    %200 = arith.addf %196, %199 : vector<64x8xf32>
    %c8_138 = arith.constant 8 : index
    %c0_139 = arith.constant 0 : index
    %c0_140 = arith.constant 0 : index
    %201 = vector.load %arg9[%c8_138, %c0_139, %c0_140] : memref<12x32x8xf32, #tpu.memory_space<vmem>>, vector<1x32x8xf32>
    %202 = vector.shape_cast %201 : vector<1x32x8xf32> to vector<32x8xf32>
    %cst_141 = arith.constant dense<0.000000e+00> : vector<64x8xf32>
    %203 = tpu.matmul %3, %202, %cst_141 {dimension_numbers = #tpu.dot_dimension_numbers<[1], [0], [0], [1], [0, 0, 1, 1], [], []>} : vector<64x32xf32>, vector<32x8xf32>, vector<64x8xf32> -> vector<64x8xf32>
    %c8_142 = arith.constant 8 : index
    %c0_143 = arith.constant 0 : index
    %c0_144 = arith.constant 0 : index
    %204 = vector.load %arg10[%c8_142, %c0_143, %c0_144] : memref<12x1x8xf32, #tpu.memory_space<vmem>>, vector<1x1x8xf32>
    %205 = vector.shape_cast %204 : vector<1x1x8xf32> to vector<1x8xf32>
    %206 = vector.broadcast %205 : vector<1x8xf32> to vector<64x8xf32>
    %207 = arith.addf %203, %206 : vector<64x8xf32>
    %cst_145 = arith.constant dense<0.000000e+00> : vector<8x64xf32>
    %208 = tpu.matmul %193, %200, %cst_145 {dimension_numbers = #tpu.dot_dimension_numbers<[1], [1], [0], [0], [0, 0, 1, 0], [], []>} : vector<8x8xf32>, vector<64x8xf32>, vector<8x64xf32> -> vector<8x64xf32>
    %cst_146 = arith.constant 0.353553385 : f32
    %209 = vector.broadcast %cst_146 : f32 to vector<8x64xf32>
    %210 = arith.mulf %208, %209 : vector<8x64xf32>
    %cst_147 = arith.constant dense<0xFF800000> : vector<8xf32>
    %211 = vector.multi_reduction <maximumf>, %210, %cst_147 [1] : vector<8x64xf32> to vector<8xf32>
    %212 = vector.shape_cast %211 : vector<8xf32> to vector<8x1xf32>
    %213 = vector.broadcast %212 : vector<8x1xf32> to vector<8x64xf32>
    %214 = arith.subf %210, %213 : vector<8x64xf32>
    %215 = math.exp %214 : vector<8x64xf32>
    %cst_148 = arith.constant dense<0.000000e+00> : vector<8xf32>
    %216 = vector.multi_reduction <add>, %215, %cst_148 [1] : vector<8x64xf32> to vector<8xf32>
    %217 = vector.shape_cast %216 : vector<8xf32> to vector<8x1xf32>
    %218 = tpu.reciprocal %217 {approx = true} : vector<8x1xf32> -> vector<8x1xf32>
    %219 = vector.broadcast %218 : vector<8x1xf32> to vector<8x64xf32>
    %220 = arith.mulf %215, %219 : vector<8x64xf32>
    %cst_149 = arith.constant dense<0.000000e+00> : vector<8x8xf32>
    %221 = tpu.matmul %220, %207, %cst_149 {dimension_numbers = #tpu.dot_dimension_numbers<[1], [0], [0], [1], [0, 0, 1, 1], [], []>} : vector<8x64xf32>, vector<64x8xf32>, vector<8x8xf32> -> vector<8x8xf32>
    %c0_150 = arith.constant 0 : index
    %c0_151 = arith.constant 0 : index
    %c0_152 = arith.constant 0 : index
    %222 = vector.load %arg11[%c0_150, %c0_151, %c0_152] : memref<4x8x32xf32, #tpu.memory_space<vmem>>, vector<1x8x32xf32>
    %223 = vector.shape_cast %222 : vector<1x8x32xf32> to vector<8x32xf32>
    %cst_153 = arith.constant dense<0.000000e+00> : vector<8x32xf32>
    %224 = tpu.matmul %221, %223, %cst_153 {dimension_numbers = #tpu.dot_dimension_numbers<[1], [0], [0], [1], [0, 0, 1, 1], [], []>} : vector<8x8xf32>, vector<8x32xf32>, vector<8x32xf32> -> vector<8x32xf32>
    %c1_154 = arith.constant 1 : index
    %c0_155 = arith.constant 0 : index
    %c0_156 = arith.constant 0 : index
    %225 = vector.load %arg9[%c1_154, %c0_155, %c0_156] : memref<12x32x8xf32, #tpu.memory_space<vmem>>, vector<1x32x8xf32>
    %226 = vector.shape_cast %225 : vector<1x32x8xf32> to vector<32x8xf32>
    %cst_157 = arith.constant dense<0.000000e+00> : vector<8x8xf32>
    %227 = tpu.matmul %186, %226, %cst_157 {dimension_numbers = #tpu.dot_dimension_numbers<[1], [0], [0], [1], [0, 0, 1, 1], [], []>} : vector<8x32xf32>, vector<32x8xf32>, vector<8x8xf32> -> vector<8x8xf32>
    %c1_158 = arith.constant 1 : index
    %c0_159 = arith.constant 0 : index
    %c0_160 = arith.constant 0 : index
    %228 = vector.load %arg10[%c1_158, %c0_159, %c0_160] : memref<12x1x8xf32, #tpu.memory_space<vmem>>, vector<1x1x8xf32>
    %229 = vector.shape_cast %228 : vector<1x1x8xf32> to vector<1x8xf32>
    %230 = vector.broadcast %229 : vector<1x8xf32> to vector<8x8xf32>
    %231 = arith.addf %227, %230 : vector<8x8xf32>
    %c5_161 = arith.constant 5 : index
    %c0_162 = arith.constant 0 : index
    %c0_163 = arith.constant 0 : index
    %232 = vector.load %arg9[%c5_161, %c0_162, %c0_163] : memref<12x32x8xf32, #tpu.memory_space<vmem>>, vector<1x32x8xf32>
    %233 = vector.shape_cast %232 : vector<1x32x8xf32> to vector<32x8xf32>
    %cst_164 = arith.constant dense<0.000000e+00> : vector<64x8xf32>
    %234 = tpu.matmul %3, %233, %cst_164 {dimension_numbers = #tpu.dot_dimension_numbers<[1], [0], [0], [1], [0, 0, 1, 1], [], []>} : vector<64x32xf32>, vector<32x8xf32>, vector<64x8xf32> -> vector<64x8xf32>
    %c5_165 = arith.constant 5 : index
    %c0_166 = arith.constant 0 : index
    %c0_167 = arith.constant 0 : index
    %235 = vector.load %arg10[%c5_165, %c0_166, %c0_167] : memref<12x1x8xf32, #tpu.memory_space<vmem>>, vector<1x1x8xf32>
    %236 = vector.shape_cast %235 : vector<1x1x8xf32> to vector<1x8xf32>
    %237 = vector.broadcast %236 : vector<1x8xf32> to vector<64x8xf32>
    %238 = arith.addf %234, %237 : vector<64x8xf32>
    %c9_168 = arith.constant 9 : index
    %c0_169 = arith.constant 0 : index
    %c0_170 = arith.constant 0 : index
    %239 = vector.load %arg9[%c9_168, %c0_169, %c0_170] : memref<12x32x8xf32, #tpu.memory_space<vmem>>, vector<1x32x8xf32>
    %240 = vector.shape_cast %239 : vector<1x32x8xf32> to vector<32x8xf32>
    %cst_171 = arith.constant dense<0.000000e+00> : vector<64x8xf32>
    %241 = tpu.matmul %3, %240, %cst_171 {dimension_numbers = #tpu.dot_dimension_numbers<[1], [0], [0], [1], [0, 0, 1, 1], [], []>} : vector<64x32xf32>, vector<32x8xf32>, vector<64x8xf32> -> vector<64x8xf32>
    %c9_172 = arith.constant 9 : index
    %c0_173 = arith.constant 0 : index
    %c0_174 = arith.constant 0 : index
    %242 = vector.load %arg10[%c9_172, %c0_173, %c0_174] : memref<12x1x8xf32, #tpu.memory_space<vmem>>, vector<1x1x8xf32>
    %243 = vector.shape_cast %242 : vector<1x1x8xf32> to vector<1x8xf32>
    %244 = vector.broadcast %243 : vector<1x8xf32> to vector<64x8xf32>
    %245 = arith.addf %241, %244 : vector<64x8xf32>
    %cst_175 = arith.constant dense<0.000000e+00> : vector<8x64xf32>
    %246 = tpu.matmul %231, %238, %cst_175 {dimension_numbers = #tpu.dot_dimension_numbers<[1], [1], [0], [0], [0, 0, 1, 0], [], []>} : vector<8x8xf32>, vector<64x8xf32>, vector<8x64xf32> -> vector<8x64xf32>
    %cst_176 = arith.constant 0.353553385 : f32
    %247 = vector.broadcast %cst_176 : f32 to vector<8x64xf32>
    %248 = arith.mulf %246, %247 : vector<8x64xf32>
    %cst_177 = arith.constant dense<0xFF800000> : vector<8xf32>
    %249 = vector.multi_reduction <maximumf>, %248, %cst_177 [1] : vector<8x64xf32> to vector<8xf32>
    %250 = vector.shape_cast %249 : vector<8xf32> to vector<8x1xf32>
    %251 = vector.broadcast %250 : vector<8x1xf32> to vector<8x64xf32>
    %252 = arith.subf %248, %251 : vector<8x64xf32>
    %253 = math.exp %252 : vector<8x64xf32>
    %cst_178 = arith.constant dense<0.000000e+00> : vector<8xf32>
    %254 = vector.multi_reduction <add>, %253, %cst_178 [1] : vector<8x64xf32> to vector<8xf32>
    %255 = vector.shape_cast %254 : vector<8xf32> to vector<8x1xf32>
    %256 = tpu.reciprocal %255 {approx = true} : vector<8x1xf32> -> vector<8x1xf32>
    %257 = vector.broadcast %256 : vector<8x1xf32> to vector<8x64xf32>
    %258 = arith.mulf %253, %257 : vector<8x64xf32>
    %cst_179 = arith.constant dense<0.000000e+00> : vector<8x8xf32>
    %259 = tpu.matmul %258, %245, %cst_179 {dimension_numbers = #tpu.dot_dimension_numbers<[1], [0], [0], [1], [0, 0, 1, 1], [], []>} : vector<8x64xf32>, vector<64x8xf32>, vector<8x8xf32> -> vector<8x8xf32>
    %c1_180 = arith.constant 1 : index
    %c0_181 = arith.constant 0 : index
    %c0_182 = arith.constant 0 : index
    %260 = vector.load %arg11[%c1_180, %c0_181, %c0_182] : memref<4x8x32xf32, #tpu.memory_space<vmem>>, vector<1x8x32xf32>
    %261 = vector.shape_cast %260 : vector<1x8x32xf32> to vector<8x32xf32>
    %cst_183 = arith.constant dense<0.000000e+00> : vector<8x32xf32>
    %262 = tpu.matmul %259, %261, %cst_183 {dimension_numbers = #tpu.dot_dimension_numbers<[1], [0], [0], [1], [0, 0, 1, 1], [], []>} : vector<8x8xf32>, vector<8x32xf32>, vector<8x32xf32> -> vector<8x32xf32>
    %263 = arith.addf %224, %262 : vector<8x32xf32>
    %c2_184 = arith.constant 2 : index
    %c0_185 = arith.constant 0 : index
    %c0_186 = arith.constant 0 : index
    %264 = vector.load %arg9[%c2_184, %c0_185, %c0_186] : memref<12x32x8xf32, #tpu.memory_space<vmem>>, vector<1x32x8xf32>
    %265 = vector.shape_cast %264 : vector<1x32x8xf32> to vector<32x8xf32>
    %cst_187 = arith.constant dense<0.000000e+00> : vector<8x8xf32>
    %266 = tpu.matmul %186, %265, %cst_187 {dimension_numbers = #tpu.dot_dimension_numbers<[1], [0], [0], [1], [0, 0, 1, 1], [], []>} : vector<8x32xf32>, vector<32x8xf32>, vector<8x8xf32> -> vector<8x8xf32>
    %c2_188 = arith.constant 2 : index
    %c0_189 = arith.constant 0 : index
    %c0_190 = arith.constant 0 : index
    %267 = vector.load %arg10[%c2_188, %c0_189, %c0_190] : memref<12x1x8xf32, #tpu.memory_space<vmem>>, vector<1x1x8xf32>
    %268 = vector.shape_cast %267 : vector<1x1x8xf32> to vector<1x8xf32>
    %269 = vector.broadcast %268 : vector<1x8xf32> to vector<8x8xf32>
    %270 = arith.addf %266, %269 : vector<8x8xf32>
    %c6_191 = arith.constant 6 : index
    %c0_192 = arith.constant 0 : index
    %c0_193 = arith.constant 0 : index
    %271 = vector.load %arg9[%c6_191, %c0_192, %c0_193] : memref<12x32x8xf32, #tpu.memory_space<vmem>>, vector<1x32x8xf32>
    %272 = vector.shape_cast %271 : vector<1x32x8xf32> to vector<32x8xf32>
    %cst_194 = arith.constant dense<0.000000e+00> : vector<64x8xf32>
    %273 = tpu.matmul %3, %272, %cst_194 {dimension_numbers = #tpu.dot_dimension_numbers<[1], [0], [0], [1], [0, 0, 1, 1], [], []>} : vector<64x32xf32>, vector<32x8xf32>, vector<64x8xf32> -> vector<64x8xf32>
    %c6_195 = arith.constant 6 : index
    %c0_196 = arith.constant 0 : index
    %c0_197 = arith.constant 0 : index
    %274 = vector.load %arg10[%c6_195, %c0_196, %c0_197] : memref<12x1x8xf32, #tpu.memory_space<vmem>>, vector<1x1x8xf32>
    %275 = vector.shape_cast %274 : vector<1x1x8xf32> to vector<1x8xf32>
    %276 = vector.broadcast %275 : vector<1x8xf32> to vector<64x8xf32>
    %277 = arith.addf %273, %276 : vector<64x8xf32>
    %c10_198 = arith.constant 10 : index
    %c0_199 = arith.constant 0 : index
    %c0_200 = arith.constant 0 : index
    %278 = vector.load %arg9[%c10_198, %c0_199, %c0_200] : memref<12x32x8xf32, #tpu.memory_space<vmem>>, vector<1x32x8xf32>
    %279 = vector.shape_cast %278 : vector<1x32x8xf32> to vector<32x8xf32>
    %cst_201 = arith.constant dense<0.000000e+00> : vector<64x8xf32>
    %280 = tpu.matmul %3, %279, %cst_201 {dimension_numbers = #tpu.dot_dimension_numbers<[1], [0], [0], [1], [0, 0, 1, 1], [], []>} : vector<64x32xf32>, vector<32x8xf32>, vector<64x8xf32> -> vector<64x8xf32>
    %c10_202 = arith.constant 10 : index
    %c0_203 = arith.constant 0 : index
    %c0_204 = arith.constant 0 : index
    %281 = vector.load %arg10[%c10_202, %c0_203, %c0_204] : memref<12x1x8xf32, #tpu.memory_space<vmem>>, vector<1x1x8xf32>
    %282 = vector.shape_cast %281 : vector<1x1x8xf32> to vector<1x8xf32>
    %283 = vector.broadcast %282 : vector<1x8xf32> to vector<64x8xf32>
    %284 = arith.addf %280, %283 : vector<64x8xf32>
    %cst_205 = arith.constant dense<0.000000e+00> : vector<8x64xf32>
    %285 = tpu.matmul %270, %277, %cst_205 {dimension_numbers = #tpu.dot_dimension_numbers<[1], [1], [0], [0], [0, 0, 1, 0], [], []>} : vector<8x8xf32>, vector<64x8xf32>, vector<8x64xf32> -> vector<8x64xf32>
    %cst_206 = arith.constant 0.353553385 : f32
    %286 = vector.broadcast %cst_206 : f32 to vector<8x64xf32>
    %287 = arith.mulf %285, %286 : vector<8x64xf32>
    %cst_207 = arith.constant dense<0xFF800000> : vector<8xf32>
    %288 = vector.multi_reduction <maximumf>, %287, %cst_207 [1] : vector<8x64xf32> to vector<8xf32>
    %289 = vector.shape_cast %288 : vector<8xf32> to vector<8x1xf32>
    %290 = vector.broadcast %289 : vector<8x1xf32> to vector<8x64xf32>
    %291 = arith.subf %287, %290 : vector<8x64xf32>
    %292 = math.exp %291 : vector<8x64xf32>
    %cst_208 = arith.constant dense<0.000000e+00> : vector<8xf32>
    %293 = vector.multi_reduction <add>, %292, %cst_208 [1] : vector<8x64xf32> to vector<8xf32>
    %294 = vector.shape_cast %293 : vector<8xf32> to vector<8x1xf32>
    %295 = tpu.reciprocal %294 {approx = true} : vector<8x1xf32> -> vector<8x1xf32>
    %296 = vector.broadcast %295 : vector<8x1xf32> to vector<8x64xf32>
    %297 = arith.mulf %292, %296 : vector<8x64xf32>
    %cst_209 = arith.constant dense<0.000000e+00> : vector<8x8xf32>
    %298 = tpu.matmul %297, %284, %cst_209 {dimension_numbers = #tpu.dot_dimension_numbers<[1], [0], [0], [1], [0, 0, 1, 1], [], []>} : vector<8x64xf32>, vector<64x8xf32>, vector<8x8xf32> -> vector<8x8xf32>
    %c2_210 = arith.constant 2 : index
    %c0_211 = arith.constant 0 : index
    %c0_212 = arith.constant 0 : index
    %299 = vector.load %arg11[%c2_210, %c0_211, %c0_212] : memref<4x8x32xf32, #tpu.memory_space<vmem>>, vector<1x8x32xf32>
    %300 = vector.shape_cast %299 : vector<1x8x32xf32> to vector<8x32xf32>
    %cst_213 = arith.constant dense<0.000000e+00> : vector<8x32xf32>
    %301 = tpu.matmul %298, %300, %cst_213 {dimension_numbers = #tpu.dot_dimension_numbers<[1], [0], [0], [1], [0, 0, 1, 1], [], []>} : vector<8x8xf32>, vector<8x32xf32>, vector<8x32xf32> -> vector<8x32xf32>
    %302 = arith.addf %263, %301 : vector<8x32xf32>
    %c3_214 = arith.constant 3 : index
    %c0_215 = arith.constant 0 : index
    %c0_216 = arith.constant 0 : index
    %303 = vector.load %arg9[%c3_214, %c0_215, %c0_216] : memref<12x32x8xf32, #tpu.memory_space<vmem>>, vector<1x32x8xf32>
    %304 = vector.shape_cast %303 : vector<1x32x8xf32> to vector<32x8xf32>
    %cst_217 = arith.constant dense<0.000000e+00> : vector<8x8xf32>
    %305 = tpu.matmul %186, %304, %cst_217 {dimension_numbers = #tpu.dot_dimension_numbers<[1], [0], [0], [1], [0, 0, 1, 1], [], []>} : vector<8x32xf32>, vector<32x8xf32>, vector<8x8xf32> -> vector<8x8xf32>
    %c3_218 = arith.constant 3 : index
    %c0_219 = arith.constant 0 : index
    %c0_220 = arith.constant 0 : index
    %306 = vector.load %arg10[%c3_218, %c0_219, %c0_220] : memref<12x1x8xf32, #tpu.memory_space<vmem>>, vector<1x1x8xf32>
    %307 = vector.shape_cast %306 : vector<1x1x8xf32> to vector<1x8xf32>
    %308 = vector.broadcast %307 : vector<1x8xf32> to vector<8x8xf32>
    %309 = arith.addf %305, %308 : vector<8x8xf32>
    %c7_221 = arith.constant 7 : index
    %c0_222 = arith.constant 0 : index
    %c0_223 = arith.constant 0 : index
    %310 = vector.load %arg9[%c7_221, %c0_222, %c0_223] : memref<12x32x8xf32, #tpu.memory_space<vmem>>, vector<1x32x8xf32>
    %311 = vector.shape_cast %310 : vector<1x32x8xf32> to vector<32x8xf32>
    %cst_224 = arith.constant dense<0.000000e+00> : vector<64x8xf32>
    %312 = tpu.matmul %3, %311, %cst_224 {dimension_numbers = #tpu.dot_dimension_numbers<[1], [0], [0], [1], [0, 0, 1, 1], [], []>} : vector<64x32xf32>, vector<32x8xf32>, vector<64x8xf32> -> vector<64x8xf32>
    %c7_225 = arith.constant 7 : index
    %c0_226 = arith.constant 0 : index
    %c0_227 = arith.constant 0 : index
    %313 = vector.load %arg10[%c7_225, %c0_226, %c0_227] : memref<12x1x8xf32, #tpu.memory_space<vmem>>, vector<1x1x8xf32>
    %314 = vector.shape_cast %313 : vector<1x1x8xf32> to vector<1x8xf32>
    %315 = vector.broadcast %314 : vector<1x8xf32> to vector<64x8xf32>
    %316 = arith.addf %312, %315 : vector<64x8xf32>
    %c11_228 = arith.constant 11 : index
    %c0_229 = arith.constant 0 : index
    %c0_230 = arith.constant 0 : index
    %317 = vector.load %arg9[%c11_228, %c0_229, %c0_230] : memref<12x32x8xf32, #tpu.memory_space<vmem>>, vector<1x32x8xf32>
    %318 = vector.shape_cast %317 : vector<1x32x8xf32> to vector<32x8xf32>
    %cst_231 = arith.constant dense<0.000000e+00> : vector<64x8xf32>
    %319 = tpu.matmul %3, %318, %cst_231 {dimension_numbers = #tpu.dot_dimension_numbers<[1], [0], [0], [1], [0, 0, 1, 1], [], []>} : vector<64x32xf32>, vector<32x8xf32>, vector<64x8xf32> -> vector<64x8xf32>
    %c11_232 = arith.constant 11 : index
    %c0_233 = arith.constant 0 : index
    %c0_234 = arith.constant 0 : index
    %320 = vector.load %arg10[%c11_232, %c0_233, %c0_234] : memref<12x1x8xf32, #tpu.memory_space<vmem>>, vector<1x1x8xf32>
    %321 = vector.shape_cast %320 : vector<1x1x8xf32> to vector<1x8xf32>
    %322 = vector.broadcast %321 : vector<1x8xf32> to vector<64x8xf32>
    %323 = arith.addf %319, %322 : vector<64x8xf32>
    %cst_235 = arith.constant dense<0.000000e+00> : vector<8x64xf32>
    %324 = tpu.matmul %309, %316, %cst_235 {dimension_numbers = #tpu.dot_dimension_numbers<[1], [1], [0], [0], [0, 0, 1, 0], [], []>} : vector<8x8xf32>, vector<64x8xf32>, vector<8x64xf32> -> vector<8x64xf32>
    %cst_236 = arith.constant 0.353553385 : f32
    %325 = vector.broadcast %cst_236 : f32 to vector<8x64xf32>
    %326 = arith.mulf %324, %325 : vector<8x64xf32>
    %cst_237 = arith.constant dense<0xFF800000> : vector<8xf32>
    %327 = vector.multi_reduction <maximumf>, %326, %cst_237 [1] : vector<8x64xf32> to vector<8xf32>
    %328 = vector.shape_cast %327 : vector<8xf32> to vector<8x1xf32>
    %329 = vector.broadcast %328 : vector<8x1xf32> to vector<8x64xf32>
    %330 = arith.subf %326, %329 : vector<8x64xf32>
    %331 = math.exp %330 : vector<8x64xf32>
    %cst_238 = arith.constant dense<0.000000e+00> : vector<8xf32>
    %332 = vector.multi_reduction <add>, %331, %cst_238 [1] : vector<8x64xf32> to vector<8xf32>
    %333 = vector.shape_cast %332 : vector<8xf32> to vector<8x1xf32>
    %334 = tpu.reciprocal %333 {approx = true} : vector<8x1xf32> -> vector<8x1xf32>
    %335 = vector.broadcast %334 : vector<8x1xf32> to vector<8x64xf32>
    %336 = arith.mulf %331, %335 : vector<8x64xf32>
    %cst_239 = arith.constant dense<0.000000e+00> : vector<8x8xf32>
    %337 = tpu.matmul %336, %323, %cst_239 {dimension_numbers = #tpu.dot_dimension_numbers<[1], [0], [0], [1], [0, 0, 1, 1], [], []>} : vector<8x64xf32>, vector<64x8xf32>, vector<8x8xf32> -> vector<8x8xf32>
    %c3_240 = arith.constant 3 : index
    %c0_241 = arith.constant 0 : index
    %c0_242 = arith.constant 0 : index
    %338 = vector.load %arg11[%c3_240, %c0_241, %c0_242] : memref<4x8x32xf32, #tpu.memory_space<vmem>>, vector<1x8x32xf32>
    %339 = vector.shape_cast %338 : vector<1x8x32xf32> to vector<8x32xf32>
    %cst_243 = arith.constant dense<0.000000e+00> : vector<8x32xf32>
    %340 = tpu.matmul %337, %339, %cst_243 {dimension_numbers = #tpu.dot_dimension_numbers<[1], [0], [0], [1], [0, 0, 1, 1], [], []>} : vector<8x8xf32>, vector<8x32xf32>, vector<8x32xf32> -> vector<8x32xf32>
    %341 = arith.addf %302, %340 : vector<8x32xf32>
    %c0_244 = arith.constant 0 : index
    %c0_245 = arith.constant 0 : index
    %342 = vector.load %arg12[%c0_244, %c0_245] : memref<1x32xf32, #tpu.memory_space<vmem>>, vector<1x32xf32>
    %343 = vector.broadcast %342 : vector<1x32xf32> to vector<8x32xf32>
    %344 = arith.addf %341, %343 : vector<8x32xf32>
    %345 = arith.addf %186, %344 : vector<8x32xf32>
    %cst_246 = arith.constant dense<0.000000e+00> : vector<8xf32>
    %346 = vector.multi_reduction <add>, %345, %cst_246 [1] : vector<8x32xf32> to vector<8xf32>
    %347 = vector.shape_cast %346 : vector<8xf32> to vector<8x1xf32>
    %cst_247 = arith.constant 3.200000e+01 : f32
    %348 = vector.broadcast %cst_247 : f32 to vector<8x1xf32>
    %349 = arith.divf %347, %348 : vector<8x1xf32>
    %350 = vector.broadcast %349 : vector<8x1xf32> to vector<8x32xf32>
    %351 = arith.subf %345, %350 : vector<8x32xf32>
    %352 = arith.mulf %351, %351 : vector<8x32xf32>
    %cst_248 = arith.constant dense<0.000000e+00> : vector<8xf32>
    %353 = vector.multi_reduction <add>, %352, %cst_248 [1] : vector<8x32xf32> to vector<8xf32>
    %354 = vector.shape_cast %353 : vector<8xf32> to vector<8x1xf32>
    %cst_249 = arith.constant 3.200000e+01 : f32
    %355 = vector.broadcast %cst_249 : f32 to vector<8x1xf32>
    %356 = arith.divf %354, %355 : vector<8x1xf32>
    %357 = vector.broadcast %349 : vector<8x1xf32> to vector<8x32xf32>
    %358 = arith.subf %345, %357 : vector<8x32xf32>
    %cst_250 = arith.constant 9.99999974E-6 : f32
    %359 = vector.broadcast %cst_250 : f32 to vector<8x1xf32>
    %360 = arith.addf %356, %359 : vector<8x1xf32>
    %361 = math.rsqrt %360 : vector<8x1xf32>
    %362 = vector.broadcast %361 : vector<8x1xf32> to vector<8x32xf32>
    %363 = arith.mulf %358, %362 : vector<8x32xf32>
    %c0_251 = arith.constant 0 : index
    %c0_252 = arith.constant 0 : index
    %364 = vector.load %arg13[%c0_251, %c0_252] : memref<1x32xf32, #tpu.memory_space<vmem>>, vector<1x32xf32>
    %365 = vector.broadcast %364 : vector<1x32xf32> to vector<8x32xf32>
    %366 = arith.mulf %363, %365 : vector<8x32xf32>
    %c0_253 = arith.constant 0 : index
    %c0_254 = arith.constant 0 : index
    %367 = vector.load %arg14[%c0_253, %c0_254] : memref<1x32xf32, #tpu.memory_space<vmem>>, vector<1x32xf32>
    %368 = vector.broadcast %367 : vector<1x32xf32> to vector<8x32xf32>
    %369 = arith.addf %366, %368 : vector<8x32xf32>
    %c0_255 = arith.constant 0 : index
    %c0_256 = arith.constant 0 : index
    %370 = vector.load %arg15[%c0_255, %c0_256] : memref<32x64xf32, #tpu.memory_space<vmem>>, vector<32x64xf32>
    %cst_257 = arith.constant dense<0.000000e+00> : vector<8x64xf32>
    %371 = tpu.matmul %369, %370, %cst_257 {dimension_numbers = #tpu.dot_dimension_numbers<[1], [0], [0], [1], [0, 0, 1, 1], [], []>} : vector<8x32xf32>, vector<32x64xf32>, vector<8x64xf32> -> vector<8x64xf32>
    %c0_258 = arith.constant 0 : index
    %c0_259 = arith.constant 0 : index
    %372 = vector.load %arg16[%c0_258, %c0_259] : memref<1x64xf32, #tpu.memory_space<vmem>>, vector<1x64xf32>
    %373 = vector.broadcast %372 : vector<1x64xf32> to vector<8x64xf32>
    %374 = arith.addf %371, %373 : vector<8x64xf32>
    %cst_260 = arith.constant 0.000000e+00 : f32
    %375 = vector.broadcast %cst_260 : f32 to vector<8x64xf32>
    %376 = arith.maximumf %374, %375 : vector<8x64xf32>
    %c0_261 = arith.constant 0 : index
    %c0_262 = arith.constant 0 : index
    %377 = vector.load %arg17[%c0_261, %c0_262] : memref<64x32xf32, #tpu.memory_space<vmem>>, vector<64x32xf32>
    %cst_263 = arith.constant dense<0.000000e+00> : vector<8x32xf32>
    %378 = tpu.matmul %376, %377, %cst_263 {dimension_numbers = #tpu.dot_dimension_numbers<[1], [0], [0], [1], [0, 0, 1, 1], [], []>} : vector<8x64xf32>, vector<64x32xf32>, vector<8x32xf32> -> vector<8x32xf32>
    %c0_264 = arith.constant 0 : index
    %c0_265 = arith.constant 0 : index
    %379 = vector.load %arg18[%c0_264, %c0_265] : memref<1x32xf32, #tpu.memory_space<vmem>>, vector<1x32xf32>
    %380 = vector.broadcast %379 : vector<1x32xf32> to vector<8x32xf32>
    %381 = arith.addf %378, %380 : vector<8x32xf32>
    %382 = arith.addf %369, %381 : vector<8x32xf32>
    %cst_266 = arith.constant dense<0.000000e+00> : vector<8xf32>
    %383 = vector.multi_reduction <add>, %382, %cst_266 [1] : vector<8x32xf32> to vector<8xf32>
    %384 = vector.shape_cast %383 : vector<8xf32> to vector<8x1xf32>
    %cst_267 = arith.constant 3.200000e+01 : f32
    %385 = vector.broadcast %cst_267 : f32 to vector<8x1xf32>
    %386 = arith.divf %384, %385 : vector<8x1xf32>
    %387 = vector.broadcast %386 : vector<8x1xf32> to vector<8x32xf32>
    %388 = arith.subf %382, %387 : vector<8x32xf32>
    %389 = arith.mulf %388, %388 : vector<8x32xf32>
    %cst_268 = arith.constant dense<0.000000e+00> : vector<8xf32>
    %390 = vector.multi_reduction <add>, %389, %cst_268 [1] : vector<8x32xf32> to vector<8xf32>
    %391 = vector.shape_cast %390 : vector<8xf32> to vector<8x1xf32>
    %cst_269 = arith.constant 3.200000e+01 : f32
    %392 = vector.broadcast %cst_269 : f32 to vector<8x1xf32>
    %393 = arith.divf %391, %392 : vector<8x1xf32>
    %394 = vector.broadcast %386 : vector<8x1xf32> to vector<8x32xf32>
    %395 = arith.subf %382, %394 : vector<8x32xf32>
    %cst_270 = arith.constant 9.99999974E-6 : f32
    %396 = vector.broadcast %cst_270 : f32 to vector<8x1xf32>
    %397 = arith.addf %393, %396 : vector<8x1xf32>
    %398 = math.rsqrt %397 : vector<8x1xf32>
    %399 = vector.broadcast %398 : vector<8x1xf32> to vector<8x32xf32>
    %400 = arith.mulf %395, %399 : vector<8x32xf32>
    %c0_271 = arith.constant 0 : index
    %c0_272 = arith.constant 0 : index
    %401 = vector.load %arg19[%c0_271, %c0_272] : memref<1x32xf32, #tpu.memory_space<vmem>>, vector<1x32xf32>
    %402 = vector.broadcast %401 : vector<1x32xf32> to vector<8x32xf32>
    %403 = arith.mulf %400, %402 : vector<8x32xf32>
    %c0_273 = arith.constant 0 : index
    %c0_274 = arith.constant 0 : index
    %404 = vector.load %arg20[%c0_273, %c0_274] : memref<1x32xf32, #tpu.memory_space<vmem>>, vector<1x32xf32>
    %405 = vector.broadcast %404 : vector<1x32xf32> to vector<8x32xf32>
    %406 = arith.addf %403, %405 : vector<8x32xf32>
    %c0_275 = arith.constant 0 : index
    %c0_276 = arith.constant 0 : index
    %c0_277 = arith.constant 0 : index
    %407 = vector.load %arg21[%c0_275, %c0_276, %c0_277] : memref<1x8x32xf32, #tpu.memory_space<vmem>>, vector<1x8x32xf32>
    %408 = vector.shape_cast %407 : vector<1x8x32xf32> to vector<8x32xf32>
    %409 = vector.shape_cast %406 : vector<8x32xf32> to vector<1x8x32xf32>
    tpu.vector_store %arg21[%c0_275, %c0_276, %c0_277], %409 {strides = array<i32>} : memref<1x8x32xf32, #tpu.memory_space<vmem>>, vector<1x8x32xf32>,
    return
  }
  func.func @transform_0(%arg0: i32) -> (i32, i32, i32) {
    %c0_i32 = arith.constant 0 : i32
    %c0_i32_0 = arith.constant 0 : i32
    %c0_i32_1 = arith.constant 0 : i32
    return %arg0, %c0_i32, %c0_i32_0 : i32, i32, i32
  }
  func.func @transform_1(%arg0: i32) -> (i32, i32, i32) {
    %c0_i32 = arith.constant 0 : i32
    %c0_i32_0 = arith.constant 0 : i32
    %c0_i32_1 = arith.constant 0 : i32
    return %arg0, %c0_i32, %c0_i32_0 : i32, i32, i32
  }
  func.func @transform_2(%arg0: i32) -> (i32, i32, i32) {
    %c0_i32 = arith.constant 0 : i32
    %c0_i32_0 = arith.constant 0 : i32
    %c0_i32_1 = arith.constant 0 : i32
    %c0_i32_2 = arith.constant 0 : i32
    return %c0_i32, %c0_i32_0, %c0_i32_1 : i32, i32, i32
  }
  func.func @transform_3(%arg0: i32) -> (i32, i32, i32) {
    %c0_i32 = arith.constant 0 : i32
    %c0_i32_0 = arith.constant 0 : i32
    %c0_i32_1 = arith.constant 0 : i32
    %c0_i32_2 = arith.constant 0 : i32
    return %c0_i32, %c0_i32_0, %c0_i32_1 : i32, i32, i32
  }
  func.func @transform_4(%arg0: i32) -> (i32, i32, i32) {
    %c0_i32 = arith.constant 0 : i32
    %c0_i32_0 = arith.constant 0 : i32
    %c0_i32_1 = arith.constant 0 : i32
    %c0_i32_2 = arith.constant 0 : i32
    return %c0_i32, %c0_i32_0, %c0_i32_1 : i32, i32, i32
  }
  func.func @transform_5(%arg0: i32) -> (i32, i32) {
    %c0_i32 = arith.constant 0 : i32
    %c0_i32_0 = arith.constant 0 : i32
    %c0_i32_1 = arith.constant 0 : i32
    return %c0_i32, %c0_i32_0 : i32, i32
  }
  func.func @transform_6(%arg0: i32) -> (i32, i32) {
    %c0_i32 = arith.constant 0 : i32
    %c0_i32_0 = arith.constant 0 : i32
    %c0_i32_1 = arith.constant 0 : i32
    return %c0_i32, %c0_i32_0 : i32, i32
  }
  func.func @transform_7(%arg0: i32) -> (i32, i32) {
    %c0_i32 = arith.constant 0 : i32
    %c0_i32_0 = arith.constant 0 : i32
    %c0_i32_1 = arith.constant 0 : i32
    return %c0_i32, %c0_i32_0 : i32, i32
  }
  func.func @transform_8(%arg0: i32) -> (i32, i32, i32) {
    %c0_i32 = arith.constant 0 : i32
    %c0_i32_0 = arith.constant 0 : i32
    %c0_i32_1 = arith.constant 0 : i32
    %c0_i32_2 = arith.constant 0 : i32
    return %c0_i32, %c0_i32_0, %c0_i32_1 : i32, i32, i32
  }
  func.func @transform_9(%arg0: i32) -> (i32, i32, i32) {
    %c0_i32 = arith.constant 0 : i32
    %c0_i32_0 = arith.constant 0 : i32
    %c0_i32_1 = arith.constant 0 : i32
    %c0_i32_2 = arith.constant 0 : i32
    return %c0_i32, %c0_i32_0, %c0_i32_1 : i32, i32, i32
  }
  func.func @transform_10(%arg0: i32) -> (i32, i32, i32) {
    %c0_i32 = arith.constant 0 : i32
    %c0_i32_0 = arith.constant 0 : i32
    %c0_i32_1 = arith.constant 0 : i32
    %c0_i32_2 = arith.constant 0 : i32
    return %c0_i32, %c0_i32_0, %c0_i32_1 : i32, i32, i32
  }
  func.func @transform_11(%arg0: i32) -> (i32, i32) {
    %c0_i32 = arith.constant 0 : i32
    %c0_i32_0 = arith.constant 0 : i32
    %c0_i32_1 = arith.constant 0 : i32
    return %c0_i32, %c0_i32_0 : i32, i32
  }
  func.func @transform_12(%arg0: i32) -> (i32, i32) {
    %c0_i32 = arith.constant 0 : i32
    %c0_i32_0 = arith.constant 0 : i32
    %c0_i32_1 = arith.constant 0 : i32
    return %c0_i32, %c0_i32_0 : i32, i32
  }
  func.func @transform_13(%arg0: i32) -> (i32, i32) {
    %c0_i32 = arith.constant 0 : i32
    %c0_i32_0 = arith.constant 0 : i32
    %c0_i32_1 = arith.constant 0 : i32
    return %c0_i32, %c0_i32_0 : i32, i32
  }
  func.func @transform_14(%arg0: i32) -> (i32, i32) {
    %c0_i32 = arith.constant 0 : i32
    %c0_i32_0 = arith.constant 0 : i32
    %c0_i32_1 = arith.constant 0 : i32
    return %c0_i32, %c0_i32_0 : i32, i32
  }
  func.func @transform_15(%arg0: i32) -> (i32, i32) {
    %c0_i32 = arith.constant 0 : i32
    %c0_i32_0 = arith.constant 0 : i32
    %c0_i32_1 = arith.constant 0 : i32
    return %c0_i32, %c0_i32_0 : i32, i32
  }
  func.func @transform_16(%arg0: i32) -> (i32, i32) {
    %c0_i32 = arith.constant 0 : i32
    %c0_i32_0 = arith.constant 0 : i32
    %c0_i32_1 = arith.constant 0 : i32
    return %c0_i32, %c0_i32_0 : i32, i32
  }
  func.func @transform_17(%arg0: i32) -> (i32, i32) {
    %c0_i32 = arith.constant 0 : i32
    %c0_i32_0 = arith.constant 0 : i32
    %c0_i32_1 = arith.constant 0 : i32
    return %c0_i32, %c0_i32_0 : i32, i32
  }
  func.func @transform_18(%arg0: i32) -> (i32, i32) {
    %c0_i32 = arith.constant 0 : i32
    %c0_i32_0 = arith.constant 0 : i32
    %c0_i32_1 = arith.constant 0 : i32
    return %c0_i32, %c0_i32_0 : i32, i32
  }
  func.func @transform_19(%arg0: i32) -> (i32, i32) {
    %c0_i32 = arith.constant 0 : i32
    %c0_i32_0 = arith.constant 0 : i32
    %c0_i32_1 = arith.constant 0 : i32
    return %c0_i32, %c0_i32_0 : i32, i32
  }
  func.func @transform_20(%arg0: i32) -> (i32, i32, i32) {
    %c0_i32 = arith.constant 0 : i32
    %c0_i32_0 = arith.constant 0 : i32
    %c0_i32_1 = arith.constant 0 : i32
    return %arg0, %c0_i32, %c0_i32_0 : i32, i32, i32
  }
}

</mosaic_0001>

<bundles_post_ra>
// kernel: model_forward.11
= control target key start
LH: loop header
LB: loop body
LE: loop exit
PB: predicated region body
PF: predicated region fallthrough
CT: control target
= control target key end

     0   :  { %10 = vsyncpa [#allocation3], 0  ;;  %s725_s0 = inlined_call_operand.vmem [shape: f32[2,8,32], index: 0, kind: input, shape index: {}]   ;;  %s726_s1 = inlined_call_operand.vmem [shape: f32[1,32], index: 1, kind: input, shape index: {}]   ;;  %s727_s2 = inlined_call_operand.vmem [shape: f32[1,32], index: 2, kind: input, shape index: {}]   ;;  %s728_s3 = inlined_call_operand.vmem [shape: f32[32,128], index: 3, kind: input, shape index: {}]   ;;  %s729_s4 = inlined_call_operand.vmem [shape: f32[1,128], index: 4, kind: input, shape index: {}]   ;;  %s730_s5 = inlined_call_operand.hbm [shape: f32[2,8,128], index: 5, kind: output, shape index: {}]  }
   0x1   :  { %12 = vsyncpa [#allocation3 + $0x1], 0  ;;  %s601_s18 = smov 0   ;;  %s603_s19 = smov 0  }
   0x2   :  { %s605_s20 = smov 0   ;;  %s607_s21 = smov 0  }
   0x3 LB: > { %s622_s22 = sadd.s32 4294967295, %s565_s21   ;;  %s419_s23 = sadd.s32 4294967294, %s565_s21   ;;  %s565_s21 = sphi %s607_s21, %s736_s21   ;;  %s561_s20 = sphi %s605_s20, %s735_s20   ;;  %s557_s19 = sphi %s603_s19, %s734_s19   ;;  %s553_s18 = sphi %s601_s18, %s733_s18  }
   0x4   : > { %s626_s24 = sadd.s32 1, %s565_s21   ;;  %s135_s25 = sadd.s32 1, %s561_s20 }
   0x5   : > { %s132_s26 = ssub.s32 %s565_s21, %s626_s24  ;;  %p145_p0 = scmp.ne.s32.totalorder %s561_s20, %s557_s19 }
   0x6   : > { %p133_p1 = scmp.eq.s32.totalorder %s132_s26, 0  ;;  %p146_p2 = scmp.eq.s32.totalorder %s622_s22, 1 }
   0x7   : > { %p151_p3 = scmp.ne.s32.totalorder %s557_s19, %s553_s18  ;;  %p152_p4 = scmp.eq.s32.totalorder %s419_s23, 1 }
   0x8   : > { %s637_s27 = scalar_select %p133_p1, %s561_s20, %s135_s25  }
   0x9   : > { %p639_p5 = por %p146_p2, %p145_p0  ;;  %p643_p6 = por %p152_p4, %p151_p3 }
   0xa   : > { %p422_p7 = scmp.ge.s32.totalorder %s565_s21, 1  ;;  %p189_p8 = scmp.lt.s32.totalorder %s565_s21, 3 }
   0xc   : > { %p190_p9 = pnand %p422_p7, %p189_p8 }
   0xd   : > { %p216_p10 = scmp.lt.s32.totalorder (!%p190_p9), %s622_s22, 1  ;;  %vm221_vm0 = vcmask (!%p190_p9), 261120   ;;  %v252_v7 = vld [vmem:[%s728_s3] sm:$0xff] (!%p190_p9)  ;;  %v253_v8 = vld [vmem:[%s728_s3 + $0x8] sm:$0xff] (!%p190_p9)  ;;  %v254_v9 = vld [vmem:[%s728_s3 + $0x10] sm:$0xff] (!%p190_p9)  ;;  %v567_v10 = vmov (!%p190_p9), 0.0|0.0  }
   0xe   : > { %193 = sbr.rel (%p190_p9) target bundleno = 879 (0x36f), region = 40  ;;  %449 = vmatprep.subr.bf16.mxu0 (!%p190_p9), %v567_v10  ;;  %v450_v11 = vpack.c.bf16 (!%p190_p9), %v253_v8, %v252_v7  ;;  %v255_v12 = vld [vmem:[%s728_s3 + $0x18] sm:$0xff] (!%p190_p9)  ;;  %vm568_vm1 = vmmov (!%p190_p9), 0   ;;  %v569_v13 = vmov (!%p190_p9), 0.0   ;;  %v425_v19 = vld [vmem:[%s726_s1] ss:$0 sm:$0xff] (!%p190_p9) }
   0xf   : > { %446 = vmatprep.mubr.msk.f32.mxu0 (!%p190_p9), %vm568_vm1, %v569_v13  ;;  %v453_v14 = vpack.c.bf16 (!%p190_p9), %v255_v12, %v254_v9  ;;  %v426_v21 = vld [vmem:[%s727_s2] ss:$0 sm:$0xff] (!%p190_p9)  ;;  %s213_s8 = sand.u32 (!%p190_p9), 1, %s557_s19   ;;  %s430_s10 = sshll.u32 (!%p190_p9), %s622_s22, 7 }
  0x10   : > { %451 = vmatpush3.bf16.msra.mxu0 (!%p190_p9), %v450_v11  ;;  %v427_v24 = vld [vmem:[%s729_s4] ss:$0 sm:$0xff] (!%p190_p9)  ;;  %s683_s15 = scalar_lea.hbm (!%p190_p9), %s730_s5, %s430_s10  ;;  %s347_s16 = scalar_lea.sflag (!%p190_p9), [#allocation3], %s213_s8 }
  0x11   : > { %452 = vmatprep.subr.bf16.mxu0 (!%p190_p9), %v567_v10 }
  0x14   : > { %454 = vmatpush3.bf16.msra.mxu0 (!%p190_p9), %v453_v14 }
  0x15   : > { %s217_s30 = scalar_select %p216_p10, %s622_s22, 1 }
  0x16   : > { %s570_s22 = smov [#allocation2]  }
  0x17   : > { %s424_s6 = sshll.u32 %s217_s30, 3  ;;  %s507_s23 = sshll.u32 %s570_s22, 4  ;;  %s508_s23 = int_to_ptr.vmem [resolvable:$false] %s507_s23 }
  0x18   : > { %s219_s9 = scalar_lea.vmem %s725_s0, %s424_s6  ;;  %s509_s25 = scalar_lea.vmem %s508_s23, 256 }
  0x19   : > { %v220_v0 = vld [vmem:[%s219_s9] sm:$0xff]  ;;  %s423_s9 = sshll.u32 %s213_s8, 3 }
  0x1a   : > { %v222_v1 = vsel %vm221_vm0, %v220_v0, 0.0  ;;  %s215_s11 = scalar_lea.vmem [#allocation2], %s423_s9 }
  0x1b   : > { %223 = vadd.xlane.f32.xlu0 %v222_v1  ;;  %s360_s12 = sshll.u32 %s215_s11, 4  ;;  %s685_s12 = int_to_ptr.vmem [resolvable:$true] %s360_s12 }
  0x1c   : > { %s503_s17 = scalar_lea.vmem %s685_s12, 128  ;;  %p510_p0 = scmp.lt.s32.totalorder %s685_s12, %s508_s23 }
  0x1d   : > { %p504_p11 = scmp.ne.s32.totalorder %s685_s12, %s503_s17  ;;  %p511_p1 = scmp.lt.s32.totalorder %s509_s25, %s503_s17 }
  0x1f   : > { %p505_p12 = pnand %p504_p11, %p639_p5  ;;  %p512_p2 = por %p511_p1, %p510_p0 }
  0x21   : > { %p506_p13 = pneg %p505_p12 }
  0x23   : > { %p513_p3 = pnand %p512_p2, %p506_p13 }
  0xa8   : > { %v224_v2 = vpop.xlane.xlu0 %223 }
  0xa9   : > { %v226_v3 = vmul.f32 0.03125, %v224_v2 }
  0xab   : > { %v227_v4 = vsub.f32 %v220_v0, %v226_v3 }
  0xad   : > { %v228_v5 = vmul.f32 %v227_v4, %v227_v4 }
  0xaf   : > { %v229_v6 = vsel %vm221_vm0, %v228_v5, 0.0 }
  0xb0   : > { %230 = vadd.xlane.f32.xlu0 %v229_v6 }
 0x13d   : > { %v231_v15 = vpop.xlane.xlu0 %230 }
 0x13e   : > { %v232_v16 = vmul.f32 0.03125, %v231_v15 }
 0x140   : > { %v233_v17 = vadd.f32 1e-05, %v232_v16 }
 0x142   : > { %497 = vrsqrt.f32 %v233_v17 }
 0x14c   : > { %v498_v18 = vpop.eup %497 }
 0x14d   : > { %v235_v20 = vmul.f32 %v498_v18, %v227_v4 }
 0x14f   : > { %v243_v22 = vmul.f32 %v425_v19, %v235_v20 }
 0x151   : > { %v251_v23 = vadd.f32 %v426_v21, %v243_v22 }
 0x153   : > { %447 = vmatmul.mubr.msk.f32.vlgmr.msra.gmra.mrb[0].mxu0 %vm221_vm0, %v251_v23 }
 0x226   : > { %v332_v25 = vpop.f32.mrb[0].mxu0 }
 0x227   : > { %v333_v26 = vadd.f32 %v427_v24, %v332_v25  ;;  %v448_v27 = vpop.f32.mrb[1].mxu0 }
 0x229   : > { %336 = vmax.xlane.f32.xlu1 %v333_v26 }
 0x2b6   : > { %v337_v28 = vpop.xlane.xlu1 %336 }
 0x2b7   : > { %v338_v29 = vsub.f32 %v333_v26, %v337_v28 }
 0x2b9   : > { %v339_v30 = vmul.f32 1.442695, %v338_v29 }
 0x2bb   : > { %499 = vpow2.f32 %v339_v30 }
 0x2c5   : > { %v500_v31 = vpop.eup %499 }
 0x2c6   : > { %341 = vadd.xlane.f32.xlu1 %v500_v31 }
 0x353   : > { %v342_v32 = vpop.xlane.xlu1 %341 }
 0x354   : > { %501 = vrcp.f32 %v342_v32 }
 0x35e   : > { %v502_v33 = vpop.eup %501 }
 0x35f   : > { %v344_v34 = vmul.f32 %v502_v33, %v500_v31 }
 0x361   : > { %345 = vst [vmem:[%s215_s11] sm:$0xff] %v344_v34 }
 0x362   : > { %516 = shalt.err (!%p513_p3)
}
 0x363   : > { %s517_s26 = scalar_lea.hbm %s683_s15, 128  ;;  %s521_s7 = scalar_lea.hbm %s730_s5, 256 }
 0x364   : > { %p518_p4 = scmp.ne.s32.totalorder %s683_s15, %s517_s26  ;;  %p522_p9 = scmp.lt.u32.totalorder %s683_s15, %s730_s5 }
 0x365   : > { %p523_p10 = scmp.lt.u32.totalorder %s521_s7, %s517_s26  ;;  %p525_p12 = scmp.lt.u32.totalorder %s517_s26, %s683_s15 }
 0x366   : > { %p519_p7 = pnand %p518_p4, %p639_p5 }
 0x367   : > { %p524_p11 = por %p523_p10, %p522_p9 }
 0x368   : > { %p520_p8 = pneg %p519_p7 }
 0x369   : > { %p526_p13 = por %p525_p12, %p524_p11 }
 0x36b   : > { %p527_p0 = pnand %p526_p13, %p520_p8 }
 0x36d   : > { %530 = shalt.err (!%p527_p0)
}
 0x36e   : > { %455 = dma.vmem_to_hbm [thread:$0]  (%p639_p5), %s685_s12, 128, %s683_s15, %s347_s16  }
 0x36f PF: > { %p461_p1 = scmp.ge.s32.totalorder %s565_s21, 2  ;;  %s372_s10 = sand.u32 1, %s553_s18  }
 0x370   : > { %s373_s11 = scalar_lea.sflag [#allocation3], %s372_s10 }
 0x371   : > { %p458_p2 = pnand %p461_p1, %p643_p6 }
 0x373   : > { %548 = dma.done.wait (!%p458_p2), %s373_s11, 128  }
 0x374   : > { %550 = vsyncadd (!%p458_p2), %s373_s11, 4294967168  ;;  %p15_p3 = scmp.ge.s32.totalorder %s626_s24, 4   ;;  %s733_s18 = smov %s557_s19 }
 0x375   : > { %s734_s19 = smov %s561_s20  ;;  %s735_s20 = smov %s637_s27 }
 0x376   : > { %s736_s21 = smov %s626_s24  ;;  %17 = sbr.rel (!%p15_p3) target bundleno = 3 (0x3), region = 75 }
 0x37d   :  { %378 = vsyncpa [#allocation3], 1 }
 0x37e   :  { %380 = vsyncpa [#allocation3 + $0x1], 1 }

// kernel: model_forward.8
= control target key start
LH: loop header
LB: loop body
LE: loop exit
PB: predicated region body
PF: predicated region fallthrough
CT: control target
= control target key end

     0   :  { %s445_s12 = smov 0   ;;  %s549_s0 = inlined_call_operand.vmem [shape: f32[2,64,32], index: 0, kind: input, shape index: {}]   ;;  %s550_s1 = inlined_call_operand.vmem [shape: f32[1,32], index: 1, kind: input, shape index: {}]   ;;  %s551_s2 = inlined_call_operand.vmem [shape: f32[1,32], index: 2, kind: input, shape index: {}]   ;;  %s552_s3 = inlined_call_operand.vmem [shape: f32[2,64,32], index: 3, kind: output, shape index: {}]  }
   0x1 LB: > { %s378_s13 = sadd.s32 4294967295, %s423_s12   ;;  %p382_p0 = scmp.ge.s32.totalorder %s423_s12, 1  ;;  %s423_s12 = sphi %s445_s12, %s13_s12  }
   0x2   : > { %p137_p1 = scmp.lt.s32.totalorder %s423_s12, 3 }
   0x4   : > { %p138_p2 = pnand %p382_p0, %p137_p1 }
   0x5   : > { %p161_p3 = scmp.lt.s32.totalorder (!%p138_p2), %s378_s13, 1  ;;  %vm179_vm0 = vcmask (!%p138_p2), 261120  }
   0x6   : > { %141 = sbr.rel (%p138_p2) target bundleno = 347 (0x15b), region = 32 }
   0xd   : > { %s554_s13 = smov (!%p161_p3, %s378_s13), 1 }
   0xe   : > { %s391_s14 = sshll.u32 %s554_s13, 6 }
   0xf   : > { %s165_s17 = scalar_lea.vmem %s549_s0, %s391_s14  ;;  %s521_s24 = scalar_lea.vmem %s552_s3, %s391_s14 }
  0x10   : > { %v171_v0 = vld [vmem:[%s165_s17] sm:$0xff]  ;;  %v173_v1 = vld [vmem:[%s165_s17 + $0x10] sm:$0xff]  ;;  %v172_v2 = vld [vmem:[%s165_s17 + $0x8] sm:$0xff] }
  0x11   : > { %v180_v3 = vsel %vm179_vm0, %v171_v0, 0.0  ;;  %v186_v4 = vsel %vm179_vm0, %v173_v1, 0.0  ;;  %v174_v5 = vld [vmem:[%s165_s17 + $0x18] sm:$0xff]  ;;  %v183_v6 = vsel %vm179_vm0, %v172_v2, 0.0  ;;  %v175_v8 = vld [vmem:[%s165_s17 + $0x20] sm:$0xff]  ;;  %v176_v9 = vld [vmem:[%s165_s17 + $0x28] sm:$0xff] }
  0x12   : > { %181 = vadd.xlane.f32.xlu0 %v180_v3  ;;  %187 = vadd.xlane.f32.xlu1 %v186_v4  ;;  %v189_v7 = vsel %vm179_vm0, %v174_v5, 0.0  ;;  %v192_v10 = vsel %vm179_vm0, %v175_v8, 0.0  ;;  %v195_v11 = vsel %vm179_vm0, %v176_v9, 0.0  ;;  %v177_v12 = vld [vmem:[%s165_s17 + $0x30] sm:$0xff]  ;;  %v178_v13 = vld [vmem:[%s165_s17 + $0x38] sm:$0xff] }
  0x13   : > { %v198_v14 = vsel %vm179_vm0, %v177_v12, 0.0  ;;  %v201_v15 = vsel %vm179_vm0, %v178_v13, 0.0 }
  0x16   : > { %184 = vadd.xlane.f32.xlu0 %v183_v6  ;;  %190 = vadd.xlane.f32.xlu1 %v189_v7 }
  0x1a   : > { %193 = vadd.xlane.f32.xlu0 %v192_v10  ;;  %196 = vadd.xlane.f32.xlu1 %v195_v11 }
  0x1e   : > { %199 = vadd.xlane.f32.xlu0 %v198_v14  ;;  %202 = vadd.xlane.f32.xlu1 %v201_v15 }
  0x9f   : > { %v182_v16 = vpop.xlane.xlu0 %181  ;;  %v188_v17 = vpop.xlane.xlu1 %187 }
  0xa0   : > { %v205_v18 = vmul.f32 0.03125, %v182_v16  ;;  %v207_v19 = vmul.f32 0.03125, %v188_v17  ;;  %v388_v17 = vld [vmem:[%s551_s2] ss:$0 sm:$0xff] }
  0xa2   : > { %v469_v20 = vsub.f32 %v171_v0, %v205_v18  ;;  %v471_v21 = vsub.f32 %v173_v1, %v207_v19 }
  0xa3   : > { %v185_v22 = vpop.xlane.xlu0 %184  ;;  %v191_v23 = vpop.xlane.xlu1 %190 }
  0xa4   : > { %v206_v24 = vmul.f32 0.03125, %v185_v22  ;;  %v208_v25 = vmul.f32 0.03125, %v191_v23  ;;  %v221_v26 = vmul.f32 %v469_v20, %v469_v20  ;;  %v223_v27 = vmul.f32 %v471_v21, %v471_v21 }
  0xa6   : > { %v477_v28 = vsub.f32 %v172_v2, %v206_v24  ;;  %v479_v29 = vsub.f32 %v174_v5, %v208_v25  ;;  %v229_v30 = vsel %vm179_vm0, %v221_v26, 0.0  ;;  %v235_v33 = vsel %vm179_vm0, %v223_v27, 0.0 }
  0xa7   : > { %230 = vadd.xlane.f32.xlu0 %v229_v30  ;;  %v194_v31 = vpop.xlane.xlu0 %193  ;;  %v197_v32 = vpop.xlane.xlu1 %196 }
  0xa8   : > { %v209_v34 = vmul.f32 0.03125, %v194_v31  ;;  %v210_v35 = vmul.f32 0.03125, %v197_v32  ;;  %v222_v36 = vmul.f32 %v477_v28, %v477_v28  ;;  %v224_v37 = vmul.f32 %v479_v29, %v479_v29 }
  0xaa   : > { %v487_v38 = vsub.f32 %v175_v8, %v209_v34  ;;  %v489_v39 = vsub.f32 %v176_v9, %v210_v35  ;;  %v232_v40 = vsel %vm179_vm0, %v222_v36, 0.0  ;;  %v238_v43 = vsel %vm179_vm0, %v224_v37, 0.0 }
  0xab   : > { %236 = vadd.xlane.f32.xlu0 %v235_v33  ;;  %233 = vadd.xlane.f32.xlu1 %v232_v40  ;;  %v200_v41 = vpop.xlane.xlu0 %199  ;;  %v203_v42 = vpop.xlane.xlu1 %202 }
  0xac   : > { %v211_v44 = vmul.f32 0.03125, %v200_v41  ;;  %v212_v45 = vmul.f32 0.03125, %v203_v42  ;;  %v225_v46 = vmul.f32 %v487_v38, %v487_v38  ;;  %v226_v47 = vmul.f32 %v489_v39, %v489_v39 }
  0xae   : > { %v497_v48 = vsub.f32 %v177_v12, %v211_v44  ;;  %v499_v49 = vsub.f32 %v178_v13, %v212_v45  ;;  %v241_v50 = vsel %vm179_vm0, %v225_v46, 0.0  ;;  %v244_v51 = vsel %vm179_vm0, %v226_v47, 0.0  ;;  %v387_v12 = vld [vmem:[%s550_s1] ss:$0 sm:$0xff] }
  0xaf   : > { %239 = vadd.xlane.f32.xlu1 %v238_v43  ;;  %242 = vadd.xlane.f32.xlu0 %v241_v50 }
  0xb0   : > { %v227_v52 = vmul.f32 %v497_v48, %v497_v48  ;;  %v228_v53 = vmul.f32 %v499_v49, %v499_v49 }
  0xb2   : > { %v247_v54 = vsel %vm179_vm0, %v227_v52, 0.0  ;;  %v250_v55 = vsel %vm179_vm0, %v228_v53, 0.0 }
  0xb3   : > { %245 = vadd.xlane.f32.xlu1 %v244_v51  ;;  %248 = vadd.xlane.f32.xlu0 %v247_v54 }
  0xb7   : > { %251 = vadd.xlane.f32.xlu1 %v250_v55 }
 0x134   : > { %v231_v56 = vpop.xlane.xlu0 %230 }
 0x135   : > { %v253_v57 = vmul.f32 0.03125, %v231_v56 }
 0x137   : > { %v261_v58 = vadd.f32 1e-05, %v253_v57 }
 0x138   : > { %v234_v59 = vpop.xlane.xlu1 %233  ;;  %v237_v60 = vpop.xlane.xlu0 %236 }
 0x139   : > { %401 = vrsqrt.f32 %v261_v58  ;;  %v254_v61 = vmul.f32 0.03125, %v234_v59  ;;  %v255_v62 = vmul.f32 0.03125, %v237_v60 }
 0x13b   : > { %v262_v63 = vadd.f32 1e-05, %v254_v61  ;;  %v263_v0 = vadd.f32 1e-05, %v255_v62 }
 0x13c   : > { %v240_v1 = vpop.xlane.xlu1 %239  ;;  %v243_v2 = vpop.xlane.xlu0 %242 }
 0x13d   : > { %403 = vrsqrt.f32 %v262_v63  ;;  %v256_v3 = vmul.f32 0.03125, %v240_v1  ;;  %v257_v4 = vmul.f32 0.03125, %v243_v2 }
 0x13e   : > { %405 = vrsqrt.f32 %v263_v0 }
 0x13f   : > { %v264_v5 = vadd.f32 1e-05, %v256_v3  ;;  %v265_v6 = vadd.f32 1e-05, %v257_v4 }
 0x140   : > { %v246_v7 = vpop.xlane.xlu1 %245  ;;  %v249_v8 = vpop.xlane.xlu0 %248 }
 0x141   : > { %407 = vrsqrt.f32 %v264_v5  ;;  %v258_v9 = vmul.f32 0.03125, %v246_v7  ;;  %v259_v10 = vmul.f32 0.03125, %v249_v8 }
 0x142   : > { %409 = vrsqrt.f32 %v265_v6 }
 0x143   : > { %v402_v11 = vpop.eup %401  ;;  %v266_v13 = vadd.f32 1e-05, %v258_v9  ;;  %v267_v14 = vadd.f32 1e-05, %v259_v10 }
 0x144   : > { %v277_v15 = vmul.f32 %v402_v11, %v469_v20  ;;  %v252_v16 = vpop.xlane.xlu1 %251 }
 0x145   : > { %411 = vrsqrt.f32 %v266_v13  ;;  %v260_v18 = vmul.f32 0.03125, %v252_v16 }
 0x146   : > { %v292_v19 = vmul.f32 %v387_v12, %v277_v15  ;;  %413 = vrsqrt.f32 %v267_v14 }
 0x147   : > { %v404_v22 = vpop.eup %403  ;;  %v268_v23 = vadd.f32 1e-05, %v260_v18 }
 0x148   : > { %v406_v20 = vpop.eup %405  ;;  %v307_v24 = vadd.f32 %v388_v17, %v292_v19  ;;  %v278_v25 = vmul.f32 %v404_v22, %v477_v28 }
 0x149   : > { %v279_v26 = vmul.f32 %v406_v20, %v471_v21  ;;  %415 = vrsqrt.f32 %v268_v23 }
 0x14a   : > { %315 = vst.msk [vmem:[%s521_s24] sm:$0xff] %vm179_vm0, %v307_v24  ;;  %v293_v27 = vmul.f32 %v387_v12, %v278_v25 }
 0x14b   : > { %v408_v30 = vpop.eup %407  ;;  %v294_v31 = vmul.f32 %v387_v12, %v279_v26 }
 0x14c   : > { %v410_v32 = vpop.eup %409  ;;  %v308_v33 = vadd.f32 %v388_v17, %v293_v27  ;;  %v280_v34 = vmul.f32 %v408_v30, %v479_v29 }
 0x14d   : > { %v309_v35 = vadd.f32 %v388_v17, %v294_v31  ;;  %v281_v36 = vmul.f32 %v410_v32, %v487_v38 }
 0x14e   : > { %316 = vst.msk [vmem:[%s521_s24 + $0x8] sm:$0xff] %vm179_vm0, %v308_v33  ;;  %v295_v28 = vmul.f32 %v387_v12, %v280_v34 }
 0x14f   : > { %v412_v37 = vpop.eup %411  ;;  %317 = vst.msk [vmem:[%s521_s24 + $0x10] sm:$0xff] %vm179_vm0, %v309_v35  ;;  %v296_v21 = vmul.f32 %v387_v12, %v281_v36 }
 0x150   : > { %v414_v40 = vpop.eup %413  ;;  %v310_v41 = vadd.f32 %v388_v17, %v295_v28  ;;  %v282_v42 = vmul.f32 %v412_v37, %v489_v39 }
 0x151   : > { %v311_v43 = vadd.f32 %v388_v17, %v296_v21  ;;  %v283_v29 = vmul.f32 %v414_v40, %v497_v48 }
 0x152   : > { %318 = vst.msk [vmem:[%s521_s24 + $0x18] sm:$0xff] %vm179_vm0, %v310_v41  ;;  %v297_v38 = vmul.f32 %v387_v12, %v282_v42 }
 0x153   : > { %v416_v44 = vpop.eup %415  ;;  %319 = vst.msk [vmem:[%s521_s24 + $0x20] sm:$0xff] %vm179_vm0, %v311_v43  ;;  %v298_v45 = vmul.f32 %v387_v12, %v283_v29 }
 0x154   : > { %v312_v46 = vadd.f32 %v388_v17, %v297_v38  ;;  %v284_v47 = vmul.f32 %v416_v44, %v499_v49 }
 0x155   : > { %v313_v50 = vadd.f32 %v388_v17, %v298_v45 }
 0x156   : > { %320 = vst.msk [vmem:[%s521_s24 + $0x28] sm:$0xff] %vm179_vm0, %v312_v46  ;;  %v299_v51 = vmul.f32 %v387_v12, %v284_v47 }
 0x157   : > { %321 = vst.msk [vmem:[%s521_s24 + $0x30] sm:$0xff] %vm179_vm0, %v313_v50 }
 0x158   : > { %v314_v39 = vadd.f32 %v388_v17, %v299_v51 }
 0x15a   : > { %322 = vst.msk [vmem:[%s521_s24 + $0x38] sm:$0xff] %vm179_vm0, %v314_v39 }
 0x15b PF: > { %s13_s12 = sadd.s32 1, %s423_s12  }
 0x15c   : > { %p10_p4 = scmp.ge.s32.totalorder %s13_s12, 4  }
 0x15e   :  { %12 = sbr.rel (!%p10_p4) target bundleno = 1 (0x1), region = 62 }

// kernel: model_forward.6
= control target key start
LH: loop header
LB: loop body
LE: loop exit
PB: predicated region body
PF: predicated region fallthrough
CT: control target
= control target key end

     0   :  { %s6388_s25 = smov 0   ;;  %s7569_s0 = inlined_call_operand.vmem [shape: f32[2,64,32], index: 0, kind: input, shape index: {}]   ;;  %s7570_s1 = inlined_call_operand.vmem [shape: f32[12,32,8], index: 1, kind: input, shape index: {}]   ;;  %s7571_s2 = inlined_call_operand.vmem [shape: f32[12,1,8], index: 2, kind: input, shape index: {}]   ;;  %s7572_s3 = inlined_call_operand.vmem [shape: f32[4,8,32], index: 3, kind: input, shape index: {}]   ;;  %s7573_s4 = inlined_call_operand.vmem [shape: f32[1,32], index: 4, kind: input, shape index: {}]   ;;  %s7574_s5 = inlined_call_operand.vmem [shape: f32[1,32], index: 5, kind: input, shape index: {}]   ;;  %s7575_s6 = inlined_call_operand.vmem [shape: f32[1,32], index: 6, kind: input, shape index: {}]   ;;  %s7576_s7 = inlined_call_operand.vmem [shape: f32[32,64], index: 7, kind: input, shape index: {}]   ;;  %s7577_s8 = inlined_call_operand.vmem [shape: f32[1,64], index: 8, kind: input, shape index: {}]   ;;  %s7578_s9 = inlined_call_operand.vmem [shape: f32[64,32], index: 9, kind: input, shape index: {}]   ;;  %s7579_s10 = inlined_call_operand.vmem [shape: f32[1,32], index: 10, kind: input, shape index: {}]   ;;  %s7580_s11 = inlined_call_operand.vmem [shape: f32[1,32], index: 11, kind: input, shape index: {}]   ;;  %s7581_s12 = inlined_call_operand.vmem [shape: f32[1,32], index: 12, kind: input, shape index: {}]   ;;  %s7582_s13 = inlined_call_operand.vmem [shape: f32[2,64,32], index: 13, kind: output, shape index: {}]  }
   0x1 LB: > { %s4596_s26 = sadd.s32 4294967295, %s6316_s25   ;;  %p4600_p0 = scmp.ge.s32.totalorder %s6316_s25, 1  ;;  %s6316_s25 = sphi %s6388_s25, %s23_s25  }
   0x2   : > { %p387_p1 = scmp.lt.s32.totalorder %s6316_s25, 3 }
   0x4   : > { %p388_p2 = pnand %p4600_p0, %p387_p1 }
   0x5   : > { %v4614_v0 = vld [vmem:[%s7570_s1 + $0x80] sm:$0xff] (!%p388_p2)  ;;  %v4615_v1 = vld [vmem:[%s7570_s1 + $0x88] sm:$0xff] (!%p388_p2)  ;;  %v4616_v2 = vld [vmem:[%s7570_s1 + $0x90] sm:$0xff] (!%p388_p2)  ;;  %p431_p3 = scmp.lt.s32.totalorder (!%p388_p2), %s4596_s26, 1  ;;  %vm460_vm0 = vcmask (!%p388_p2), 261120   ;;  %vm826_vm1 = vcmask (!%p388_p2), 64512  }
   0x6   : > { %391 = sbr.rel (%p388_p2) target bundleno = 4556 (0x11cc), region = 72  ;;  %v5838_v3 = vpack.c.bf16 (!%p388_p2), %v4615_v1, %v4614_v0  ;;  %v4617_v4 = vld [vmem:[%s7570_s1 + $0x98] sm:$0xff] (!%p388_p2)  ;;  %v449_v5 = vld [vmem:[%s7570_s1] sm:$0xff] (!%p388_p2)  ;;  %v450_v6 = vld [vmem:[%s7570_s1 + $0x8] sm:$0xff] (!%p388_p2)  ;;  %vm988_vm3 = vcmask (!%p388_p2), 523264  }
   0x7   : > { %v5842_v7 = vpack.c.bf16 (!%p388_p2), %v4617_v4, %v4616_v2  ;;  %v5830_v8 = vpack.c.bf16 (!%p388_p2), %v450_v6, %v449_v5  ;;  %v451_v9 = vld [vmem:[%s7570_s1 + $0x10] sm:$0xff] (!%p388_p2)  ;;  %v452_v10 = vld [vmem:[%s7570_s1 + $0x18] sm:$0xff] (!%p388_p2)  ;;  %v4619_v20 = vld [vmem:[%s7571_s2 + $0x4] ss:$0 sm:$0xff] (!%p388_p2) }
   0x8   : > { %5839 = vmatprep.subr.bf16.mxu1 (!%p388_p2), %v5838_v3  ;;  %v5834_v11 = vpack.c.bf16 (!%p388_p2), %v452_v10, %v451_v9  ;;  %v4605_v22 = vld [vmem:[%s7571_s2] ss:$0 sm:$0xff] (!%p388_p2)  ;;  %vm6496_vm2 = vmpackc.low (!%p388_p2), %vm826_vm1, %vm826_vm1  ;;  %v4629_v60 = vld [vmem:[%s7570_s1 + $0x108] sm:$0xff] (!%p388_p2) }
   0x9   : > { %5841 = vmatpush3.bf16.msra.mxu1 (!%p388_p2), %v5838_v3  ;;  %5831 = vmatprep.subr.bf16.mxu0 (!%p388_p2), %v5830_v8  ;;  %v4628_v59 = vld [vmem:[%s7570_s1 + $0x100] sm:$0xff] (!%p388_p2)  ;;  %v4630_v61 = vld [vmem:[%s7570_s1 + $0x110] sm:$0xff] (!%p388_p2)  ;;  %v4631_v63 = vld [vmem:[%s7570_s1 + $0x118] sm:$0xff] (!%p388_p2) }
   0xa   : > { %5843 = vmatprep.subr.bf16.mxu1 (!%p388_p2), %v5842_v7  ;;  %5833 = vmatpush3.bf16.msra.mxu0 (!%p388_p2), %v5830_v8  ;;  %v5846_v62 = vpack.c.bf16 (!%p388_p2), %v4629_v60, %v4628_v59  ;;  %v5850_v0 = vpack.c.bf16 (!%p388_p2), %v4631_v63, %v4630_v61  ;;  %v4853_v28 = vld [vmem:[%s7570_s1 + $0x168] sm:$0xff] (!%p388_p2) }
   0xb   : > { %5835 = vmatprep.subr.bf16.mxu0 (!%p388_p2), %v5834_v11 }
   0xd   : > { %s7586_s26 = smov (!%p431_p3, %s4596_s26), 1  ;;  %5845 = vmatpush3.bf16.msra.mxu1 %v5842_v7 }
   0xe   : > { %s4924_s28 = sshll.u32 %s7586_s26, 6  ;;  %5837 = vmatpush3.bf16.msra.mxu0 %v5834_v11 }
   0xf   : > { %s6428_s14 = scalar_lea.vmem %s7569_s0, %s4924_s28  ;;  %5847 = vmatprep.subr.bf16.mxu0 %v5846_v62  ;;  %s7542_s18 = scalar_lea.vmem %s7582_s13, %s4924_s28 }
  0x10   : > { %v6431_v12 = vld [vmem:[%s6428_s14] sm:$0xff]  ;;  %v6438_v13 = vld [vmem:[%s6428_s14 + $0x8] sm:$0xff]  ;;  %v6441_v14 = vld [vmem:[%s6428_s14 + $0x10] sm:$0xff] }
  0x11   : > { %5290 = vmatprep.mubr.msk.f32.mxu1 %vm460_vm0, %v6431_v12  ;;  %5270 = vmatprep.mubr.msk.f32.mxu0 %vm460_vm0, %v6431_v12  ;;  %v6448_v15 = vld [vmem:[%s6428_s14 + $0x18] sm:$0xff]  ;;  %v6453_v16 = vld [vmem:[%s6428_s14 + $0x20] sm:$0xff]  ;;  %v6462_v17 = vld [vmem:[%s6428_s14 + $0x28] sm:$0xff] }
  0x12   : > { %5291 = vmatmul.mubr.msk.f32.vlgmr.msra.gmra.mrb[0].mxu1 %vm460_vm0, %v6438_v13  ;;  %5271 = vmatmul.mubr.msk.f32.vlgmr.msra.gmra.mrb[0].mxu0 %vm460_vm0, %v6438_v13  ;;  %v6467_v18 = vld [vmem:[%s6428_s14 + $0x30] sm:$0xff]  ;;  %v6476_v19 = vld [vmem:[%s6428_s14 + $0x38] sm:$0xff] }
  0x13   : > { %5293 = vmatprep.mubr.msk.f32.mxu1 %vm460_vm0, %v6441_v14  ;;  %5273 = vmatprep.mubr.msk.f32.mxu0 %vm460_vm0, %v6441_v14 }
  0x14   : > { %5849 = vmatpush3.bf16.msra.mxu0 %v5846_v62 }
  0x15   : > { %5851 = vmatprep.subr.bf16.mxu0 %v5850_v0 }
  0x16   : > { %5294 = vmatmul.mubr.msk.f32.gmra.mrb[2].mxu1 %vm460_vm0, %v6448_v15  ;;  %5274 = vmatmul.mubr.msk.f32.gmra.mrb[2].mxu0 %vm460_vm0, %v6448_v15 }
  0x17   : > { %5296 = vmatprep.mubr.msk.f32.mxu1 %vm460_vm0, %v6453_v16  ;;  %5276 = vmatprep.mubr.msk.f32.mxu0 %vm460_vm0, %v6453_v16 }
  0x18   : > { %5853 = vmatpush3.bf16.msra.mxu0 %v5850_v0 }
  0x1a   : > { %5297 = vmatmul.mubr.msk.f32.gmra.mrb[4].mxu1 %vm460_vm0, %v6462_v17  ;;  %5277 = vmatmul.mubr.msk.f32.gmra.mrb[4].mxu0 %vm460_vm0, %v6462_v17 }
  0x1b   : > { %5299 = vmatprep.mubr.msk.f32.mxu1 %vm460_vm0, %v6467_v18  ;;  %5279 = vmatprep.mubr.msk.f32.mxu0 %vm460_vm0, %v6467_v18 }
  0x1e   : > { %5300 = vmatmul.mubr.msk.f32.gmra.mrb[6].mxu1 %vm460_vm0, %v6476_v19  ;;  %5280 = vmatmul.mubr.msk.f32.gmra.mrb[6].mxu0 %vm460_vm0, %v6476_v19 }
  0x1f   : > { %5310 = vmatprep.mubr.msk.f32.mxu0 %vm460_vm0, %v6431_v12 }
  0x22   : > { %5311 = vmatmul.mubr.msk.f32.vlgmr.msra.gmra.mrb[8].mxu0 %vm460_vm0, %v6438_v13 }
  0x23   : > { %5313 = vmatprep.mubr.msk.f32.mxu0 %vm460_vm0, %v6441_v14 }
  0x26   : > { %5314 = vmatmul.mubr.msk.f32.gmra.mrb[10].mxu0 %vm460_vm0, %v6448_v15 }
  0x27   : > { %5316 = vmatprep.mubr.msk.f32.mxu0 %vm460_vm0, %v6453_v16 }
  0x2a   : > { %5317 = vmatmul.mubr.msk.f32.gmra.mrb[12].mxu0 %vm460_vm0, %v6462_v17 }
  0x2b   : > { %5319 = vmatprep.mubr.msk.f32.mxu0 %vm460_vm0, %v6467_v18 }
  0x2e   : > { %5320 = vmatmul.mubr.msk.f32.gmra.mrb[14].mxu0 %vm460_vm0, %v6476_v19 }
  0xe5   : > { %v5292_v21 = vpop.f32.mrb[0].mxu1  ;;  %v5272_v25 = vpop.f32.mrb[0].mxu0 }
  0xe6   : > { %v675_v23 = vadd.f32 %v5292_v21, %v4619_v20  ;;  %v669_v24 = vpop.f32.mrb[1].mxu1  ;;  %v551_v27 = vpop.f32.mrb[1].mxu0  ;;  %v557_v53 = vadd.f32 %v5272_v25, %v4605_v22 }
  0xe7   : > { %v670_v26 = vadd.f32 %v4619_v20, %v669_v24  ;;  %v552_v29 = vadd.f32 %v4605_v22, %v551_v27 }
  0xe9   : > { %v5854_v30 = vpack.c.bf16 %v675_v23, %v670_v26  ;;  %v5295_v31 = vpop.f32.mrb[2].mxu1  ;;  %v5275_v34 = vpop.f32.mrb[2].mxu0  ;;  %5338 = vmatprep.mubr.msk.f32.mxu1 %vm826_vm1, %v552_v29 }
  0xea   : > { %v685_v32 = vadd.f32 %v5295_v31, %v4619_v20  ;;  %v679_v33 = vpop.f32.mrb[3].mxu1  ;;  %v561_v36 = vpop.f32.mrb[3].mxu0  ;;  %v567_v55 = vadd.f32 %v5275_v34, %v4605_v22  ;;  %v4680_v34 = vld [vmem:[%s7570_s1 + $0xa0] sm:$0xff] }
  0xeb   : > { %5856 = vmatprep.subr.msk.bf16.mxu1 %vm6496_vm2, %v5854_v30  ;;  %v680_v35 = vadd.f32 %v4619_v20, %v679_v33  ;;  %v562_v52 = vadd.f32 %v4605_v22, %v561_v36  ;;  %v4682_v36 = vld [vmem:[%s7570_s1 + $0xb0] sm:$0xff] }
  0xec   : > { %5859 = vmatpush3.bf16.xpose.msk.msra.mxu1 %vm6496_vm2, %v5854_v30 }
  0xed   : > { %v5860_v37 = vpack.c.bf16 %v685_v32, %v680_v35  ;;  %v5298_v38 = vpop.f32.mrb[4].mxu1  ;;  %v5278_v41 = vpop.f32.mrb[4].mxu0  ;;  %v4681_v35 = vld [vmem:[%s7570_s1 + $0xa8] sm:$0xff] }
  0xee   : > { %v695_v39 = vadd.f32 %v5298_v38, %v4619_v20  ;;  %v689_v40 = vpop.f32.mrb[5].mxu1  ;;  %v571_v43 = vpop.f32.mrb[5].mxu0  ;;  %v577_v56 = vadd.f32 %v5278_v41, %v4605_v22  ;;  %v4683_v38 = vld [vmem:[%s7570_s1 + $0xb8] sm:$0xff] }
  0xef   : > { %5862 = vmatprep.subr.msk.bf16.mxu1 %vm6496_vm2, %v5860_v37  ;;  %v690_v42 = vadd.f32 %v4619_v20, %v689_v40  ;;  %v572_v54 = vadd.f32 %v4605_v22, %v571_v43  ;;  %v6613_v40 = vld [vmem:[%s7571_s2 + $0x8] ss:$0 sm:$0xff] }
  0xf1   : > { %v5866_v44 = vpack.c.bf16 %v695_v39, %v690_v42  ;;  %v5301_v45 = vpop.f32.mrb[6].mxu1  ;;  %v5281_v48 = vpop.f32.mrb[6].mxu0  ;;  %v5906_v39 = vpack.c.bf16 %v4683_v38, %v4682_v36 }
  0xf2   : > { %v705_v46 = vadd.f32 %v5301_v45, %v4619_v20  ;;  %v699_v47 = vpop.f32.mrb[7].mxu1  ;;  %v581_v50 = vpop.f32.mrb[7].mxu0  ;;  %v587_v58 = vadd.f32 %v5281_v48, %v4605_v22 }
  0xf3   : > { %v700_v49 = vadd.f32 %v4619_v20, %v699_v47  ;;  %v582_v57 = vadd.f32 %v4605_v22, %v581_v50 }
  0xf4   : > { %5865 = vmatpush3.bf16.xpose.msk.msra.mxu1 %vm6496_vm2, %v5860_v37  ;;  %v5902_v37 = vpack.c.bf16 %v4681_v35, %v4680_v34 }
  0xf5   : > { %5868 = vmatprep.subr.msk.bf16.mxu1 %vm6496_vm2, %v5866_v44  ;;  %v5872_v51 = vpack.c.bf16 %v705_v46, %v700_v49  ;;  %v5312_v41 = vpop.f32.mrb[8].mxu0 }
  0xf6   : > { %v793_v42 = vadd.f32 %v5312_v41, %v6613_v40  ;;  %v787_v43 = vpop.f32.mrb[9].mxu0 }
  0xf9   : > { %v5315_v46 = vpop.f32.mrb[10].mxu0 }
  0xfa   : > { %v803_v47 = vadd.f32 %v5315_v46, %v6613_v40  ;;  %v797_v48 = vpop.f32.mrb[11].mxu0 }
  0xfb   : > { %v798_v49 = vadd.f32 %v6613_v40, %v797_v48  ;;  %v4667_v48 = vld [vmem:[%s7570_s1 + $0x28] sm:$0xff] }
  0xfc   : > { %5871 = vmatpush3.bf16.xpose.msk.msra.mxu1 %vm6496_vm2, %v5866_v44  ;;  %v788_v44 = vadd.f32 %v6613_v40, %v787_v43 }
  0xfd   : > { %5874 = vmatprep.subr.msk.bf16.mxu1 %vm6496_vm2, %v5872_v51  ;;  %v5882_v50 = vpack.c.bf16 %v803_v47, %v798_v49  ;;  %v5318_v35 = vpop.f32.mrb[12].mxu0  ;;  %v4666_v47 = vld [vmem:[%s7570_s1 + $0x20] sm:$0xff] }
  0xfe   : > { %v5878_v45 = vpack.c.bf16 %v793_v42, %v788_v44  ;;  %v807_v38 = vpop.f32.mrb[13].mxu0  ;;  %v5894_v49 = vpack.c.bf16 %v4667_v48, %v4666_v47 }
 0x100   : > { %5879 = vmatprep.subr.bf16.mxu0 %v5878_v45 }
 0x101   : > { %5881 = vmatpush3.bf16.msra.mxu0 %v5878_v45  ;;  %v5321_v42 = vpop.f32.mrb[14].mxu0 }
 0x102   : > { %5883 = vmatprep.subr.bf16.mxu0 %v5882_v50  ;;  %v817_v43 = vpop.f32.mrb[15].mxu0  ;;  %v823_v44 = vadd.f32 %v5321_v42, %v6613_v40 }
 0x103   : > { %v818_v45 = vadd.f32 %v6613_v40, %v817_v43  ;;  %v4749_v43 = vld [vmem:[%s7570_s1 + $0x40] sm:$0xff] }
 0x104   : > { %5877 = vmatpush3.bf16.xpose.msk.msra.mxu1 %vm6496_vm2, %v5872_v51 }
 0x105   : > { %5903 = vmatprep.subr.bf16.mxu1 %v5902_v37  ;;  %5885 = vmatpush3.bf16.msra.mxu0 %v5882_v50  ;;  %v5890_v46 = vpack.c.bf16 %v823_v44, %v818_v45  ;;  %v6672_v50 = vld [vmem:[%s7571_s2 + $0x5] ss:$0 sm:$0xff]  ;;  %v4750_v44 = vld [vmem:[%s7570_s1 + $0x48] sm:$0xff] }
 0x106   : > { %v5958_v45 = vpack.c.bf16 %v4750_v44, %v4749_v43 }
 0x10b   : > { %5339 = vmatmul.mubr.msk.f32.vlgmr.msra.gmra.mrb[8].mxu1 %vm826_vm1, %v557_v53 }
 0x10c   : > { %5341 = vmatprep.mubr.msk.f32.mxu1 %vm826_vm1, %v562_v52  ;;  %5905 = vmatpush3.bf16.msra.mxu1 %v5902_v37  ;;  %v813_v37 = vadd.f32 %v5318_v35, %v6613_v40 }
 0x10d   : > { %5907 = vmatprep.subr.bf16.mxu1 %v5906_v39 }
 0x10f   : > { %5342 = vmatmul.mubr.msk.f32.gmra.mrb[10].mxu1 %vm826_vm1, %v567_v55 }
 0x110   : > { %5344 = vmatprep.mubr.msk.f32.mxu1 %vm826_vm1, %v572_v54  ;;  %5909 = vmatpush3.bf16.msra.mxu1 %v5906_v39  ;;  %v808_v39 = vadd.f32 %v6613_v40, %v807_v38 }
 0x112   : > { %v5886_v41 = vpack.c.bf16 %v813_v37, %v808_v39 }
 0x113   : > { %5345 = vmatmul.mubr.msk.f32.gmra.mrb[12].mxu1 %vm826_vm1, %v577_v56 }
 0x114   : > { %5347 = vmatprep.mubr.msk.f32.mxu1 %vm826_vm1, %v582_v57  ;;  %5887 = vmatprep.subr.bf16.mxu0 %v5886_v41 }
 0x115   : > { %5889 = vmatpush3.bf16.msra.mxu0 %v5886_v41 }
 0x116   : > { %5891 = vmatprep.subr.bf16.mxu0 %v5890_v46 }
 0x117   : > { %5348 = vmatmul.mubr.msk.f32.gmra.mrb[14].mxu1 %vm826_vm1, %v587_v58 }
 0x118   : > { %5406 = vmatprep.mubr.msk.f32.mxu1 %vm460_vm0, %v6431_v12 }
 0x119   : > { %5893 = vmatpush3.bf16.msra.mxu0 %v5890_v46 }
 0x11a   : > { %5895 = vmatprep.subr.bf16.mxu0 %v5894_v49 }
 0x11b   : > { %5407 = vmatmul.mubr.msk.f32.vlgmr.msra.gmra.mrb[16].mxu1 %vm460_vm0, %v6438_v13 }
 0x11c   : > { %5409 = vmatprep.mubr.msk.f32.mxu1 %vm460_vm0, %v6441_v14 }
 0x11f   : > { %5410 = vmatmul.mubr.msk.f32.gmra.mrb[18].mxu1 %vm460_vm0, %v6448_v15 }
 0x120   : > { %5412 = vmatprep.mubr.msk.f32.mxu1 %vm460_vm0, %v6453_v16 }
 0x123   : > { %5413 = vmatmul.mubr.msk.f32.gmra.mrb[20].mxu1 %vm460_vm0, %v6462_v17 }
 0x124   : > { %5415 = vmatprep.mubr.msk.f32.mxu1 %vm460_vm0, %v6467_v18 }
 0x127   : > { %5416 = vmatmul.mubr.msk.f32.gmra.mrb[22].mxu1 %vm460_vm0, %v6476_v19 }
 0x1de   : > { %v5340_v1 = vpop.f32.mrb[8].mxu1 }
 0x1df   : > { %v941_v2 = vpop.f32.mrb[9].mxu1  ;;  %v6554_v4 = vmul.f32 0.35355338, %v5340_v1 }
 0x1e0   : > { %v6552_v3 = vmul.f32 0.35355338, %v941_v2 }
 0x1e1   : > { %v992_v11 = vsel %vm988_vm3, %v6554_v4, -inf }
 0x1e2   : > { %v5343_v5 = vpop.f32.mrb[10].mxu1  ;;  %v989_v6 = vsel %vm988_vm3, %v6552_v3, -inf }
 0x1e3   : > { %990 = vmax.xlane.f32.xlu0 %v989_v6  ;;  %v951_v7 = vpop.f32.mrb[11].mxu1  ;;  %v6560_v9 = vmul.f32 0.35355338, %v5343_v5 }
 0x1e4   : > { %v6558_v8 = vmul.f32 0.35355338, %v951_v7 }
 0x1e5   : > { %v998_v25 = vsel %vm988_vm3, %v6560_v9, -inf }
 0x1e6   : > { %v5346_v10 = vpop.f32.mrb[12].mxu1  ;;  %v995_v20 = vsel %vm988_vm3, %v6558_v8, -inf }
 0x1e7   : > { %993 = vmax.xlane.f32.xlu0 %v992_v11  ;;  %996 = vmax.xlane.f32.xlu1 %v995_v20  ;;  %v961_v21 = vpop.f32.mrb[13].mxu1  ;;  %v6568_v23 = vmul.f32 0.35355338, %v5346_v10 }
 0x1e8   : > { %v6566_v22 = vmul.f32 0.35355338, %v961_v21 }
 0x1e9   : > { %v1004_v31 = vsel %vm988_vm3, %v6568_v23, -inf }
 0x1ea   : > { %v5349_v24 = vpop.f32.mrb[14].mxu1  ;;  %v1001_v26 = vsel %vm988_vm3, %v6566_v22, -inf }
 0x1eb   : > { %999 = vmax.xlane.f32.xlu1 %v998_v25  ;;  %1002 = vmax.xlane.f32.xlu0 %v1001_v26  ;;  %v971_v27 = vpop.f32.mrb[15].mxu1  ;;  %v6576_v30 = vmul.f32 0.35355338, %v5349_v24 }
 0x1ec   : > { %v6574_v29 = vmul.f32 0.35355338, %v971_v27 }
 0x1ed   : > { %v1010_v33 = vsel %vm988_vm3, %v6576_v30, -inf }
 0x1ee   : > { %v1007_v32 = vsel %vm988_vm3, %v6574_v29, -inf }
 0x1ef   : > { %1005 = vmax.xlane.f32.xlu1 %v1004_v31  ;;  %1008 = vmax.xlane.f32.xlu0 %v1007_v32 }
 0x1f3   : > { %1011 = vmax.xlane.f32.xlu1 %v1010_v33 }
 0x270   : > { %v991_v51 = vpop.xlane.xlu0 %990 }
 0x271   : > { %v1013_v52 = vsub.f32 %v6552_v3, %v991_v51  ;;  %v5408_v51 = vpop.f32.mrb[16].mxu1 }
 0x272   : > { %v1410_v40 = vadd.f32 %v5408_v51, %v6672_v50 }
 0x273   : > { %v1021_v53 = vmul.f32 1.442695, %v1013_v52  ;;  %v1404_v52 = vpop.f32.mrb[17].mxu1 }
 0x274   : > { %v994_v54 = vpop.xlane.xlu0 %993  ;;  %v997_v55 = vpop.xlane.xlu1 %996 }
 0x275   : > { %6142 = vpow2.f32 %v1021_v53  ;;  %v1014_v56 = vsub.f32 %v6554_v4, %v994_v54  ;;  %v1015_v57 = vsub.f32 %v6558_v8, %v997_v55  ;;  %v1405_v53 = vadd.f32 %v6672_v50, %v1404_v52  ;;  %v5411_v55 = vpop.f32.mrb[18].mxu1 }
 0x277   : > { %v1023_v58 = vmul.f32 1.442695, %v1014_v56  ;;  %v1025_v59 = vmul.f32 1.442695, %v1015_v57  ;;  %v5918_v54 = vpack.c.bf16 %v1410_v40, %v1405_v53  ;;  %v1420_v56 = vadd.f32 %v5411_v55, %v6672_v50  ;;  %v1414_v57 = vpop.f32.mrb[19].mxu1  ;;  %v4751_v55 = vld [vmem:[%s7570_s1 + $0x50] sm:$0xff] }
 0x278   : > { %v1000_v60 = vpop.xlane.xlu1 %999  ;;  %v1003_v61 = vpop.xlane.xlu0 %1002  ;;  %v4671_v53 = vld [vmem:[%s7571_s2 + $0x1] ss:$0 sm:$0xff] }
 0x279   : > { %6144 = vpow2.f32 %v1023_v58  ;;  %v1016_v62 = vsub.f32 %v6560_v9, %v1000_v60  ;;  %v1017_v63 = vsub.f32 %v6566_v22, %v1003_v61  ;;  %5920 = vmatprep.subr.msk.bf16.mxu1 %vm6496_vm2, %v5918_v54  ;;  %v1415_v58 = vadd.f32 %v6672_v50, %v1414_v57  ;;  %v5414_v60 = vpop.f32.mrb[20].mxu1 }
 0x27a   : > { %6146 = vpow2.f32 %v1025_v59  ;;  %5923 = vmatpush3.bf16.xpose.msk.msra.mxu1 %vm6496_vm2, %v5918_v54  ;;  %v1430_v61 = vadd.f32 %v5414_v60, %v6672_v50 }
 0x27b   : > { %v1027_v0 = vmul.f32 1.442695, %v1016_v62  ;;  %v1029_v1 = vmul.f32 1.442695, %v1017_v63  ;;  %v5924_v59 = vpack.c.bf16 %v1420_v56, %v1415_v58  ;;  %v1424_v62 = vpop.f32.mrb[21].mxu1  ;;  %v4752_v56 = vld [vmem:[%s7570_s1 + $0x58] sm:$0xff] }
 0x27c   : > { %v1006_v2 = vpop.xlane.xlu1 %1005  ;;  %v1009_v3 = vpop.xlane.xlu0 %1008  ;;  %v1425_v63 = vadd.f32 %v6672_v50, %v1424_v62  ;;  %v5962_v60 = vpack.c.bf16 %v4752_v56, %v4751_v55  ;;  %v4763_v62 = vld [vmem:[%s7570_s1 + $0xc0] sm:$0xff] }
 0x27d   : > { %6148 = vpow2.f32 %v1027_v0  ;;  %v1018_v5 = vsub.f32 %v6568_v23, %v1006_v2  ;;  %v1019_v4 = vsub.f32 %v6574_v29, %v1009_v3  ;;  %5926 = vmatprep.subr.msk.bf16.mxu1 %vm6496_vm2, %v5924_v59 }
 0x27e   : > { %6150 = vpow2.f32 %v1029_v1  ;;  %v5930_v0 = vpack.c.bf16 %v1430_v61, %v1425_v63  ;;  %v4764_v63 = vld [vmem:[%s7570_s1 + $0xc8] sm:$0xff] }
 0x27f   : > { %v6626_v6 = vpop.eup %6142  ;;  %v1031_v7 = vmul.f32 1.442695, %v1018_v5  ;;  %v1033_v8 = vmul.f32 1.442695, %v1019_v4 }
 0x280   : > { %v1012_v10 = vpop.xlane.xlu1 %1011  ;;  %v1037_v9 = vsel %vm988_vm3, %v6626_v6, 0.0 }
 0x281   : > { %6152 = vpow2.f32 %v1031_v7  ;;  %v1020_v11 = vsub.f32 %v6576_v30, %v1012_v10  ;;  %1038 = vadd.xlane.f32.xlu0 %v1037_v9 }
 0x282   : > { %6154 = vpow2.f32 %v1033_v8  ;;  %5929 = vmatpush3.bf16.xpose.msk.msra.mxu1 %vm6496_vm2, %v5924_v59 }
 0x283   : > { %v6631_v20 = vpop.eup %6144  ;;  %v1035_v21 = vmul.f32 1.442695, %v1020_v11  ;;  %5932 = vmatprep.subr.msk.bf16.mxu1 %vm6496_vm2, %v5930_v0  ;;  %v4668_v11 = vld [vmem:[%s7570_s1 + $0x30] sm:$0xff] }
 0x284   : > { %v6633_v22 = vpop.eup %6146  ;;  %v1040_v23 = vsel %vm988_vm3, %v6631_v20, 0.0 }
 0x285   : > { %6156 = vpow2.f32 %v1035_v21  ;;  %1041 = vadd.xlane.f32.xlu1 %v1040_v23  ;;  %v1043_v24 = vsel %vm988_vm3, %v6633_v22, 0.0  ;;  %v4669_v21 = vld [vmem:[%s7570_s1 + $0x38] sm:$0xff] }
 0x286   : > { %1044 = vadd.xlane.f32.xlu0 %v1043_v24 }
 0x287   : > { %v6639_v25 = vpop.eup %6148 }
 0x288   : > { %v6641_v26 = vpop.eup %6150  ;;  %v1046_v27 = vsel %vm988_vm3, %v6639_v25, 0.0 }
 0x289   : > { %1047 = vadd.xlane.f32.xlu1 %v1046_v27  ;;  %v1049_v29 = vsel %vm988_vm3, %v6641_v26, 0.0 }
 0x28a   : > { %1050 = vadd.xlane.f32.xlu0 %v1049_v29  ;;  %5935 = vmatpush3.bf16.xpose.msk.msra.mxu1 %vm6496_vm2, %v5930_v0 }
 0x28b   : > { %v6647_v30 = vpop.eup %6152 }
 0x28c   : > { %v6649_v31 = vpop.eup %6154  ;;  %v1052_v32 = vsel %vm988_vm3, %v6647_v30, 0.0 }
 0x28d   : > { %1053 = vadd.xlane.f32.xlu1 %v1052_v32  ;;  %v1055_v33 = vsel %vm988_vm3, %v6649_v31, 0.0  ;;  %v5898_v32 = vpack.c.bf16 %v4669_v21, %v4668_v11 }
 0x28e   : > { %1056 = vadd.xlane.f32.xlu0 %v1055_v33 }
 0x28f   : > { %v6655_v34 = vpop.eup %6156 }
 0x290   : > { %v1058_v36 = vsel %vm988_vm3, %v6655_v34, 0.0 }
 0x291   : > { %1059 = vadd.xlane.f32.xlu1 %v1058_v36 }
 0x30e   : > { %v1039_v1 = vpop.xlane.xlu0 %1038 }
 0x30f   : > { %6158 = vrcp.f32 %v1039_v1 }
 0x312   : > { %v1042_v2 = vpop.xlane.xlu1 %1041 }
 0x313   : > { %6160 = vrcp.f32 %v1042_v2  ;;  %v1045_v3 = vpop.xlane.xlu0 %1044 }
 0x314   : > { %6162 = vrcp.f32 %v1045_v3  ;;  %v5966_v3 = vpack.c.bf16 %v4764_v63, %v4763_v62 }
 0x316   : > { %v1048_v5 = vpop.xlane.xlu1 %1047 }
 0x317   : > { %6164 = vrcp.f32 %v1048_v5  ;;  %v1051_v4 = vpop.xlane.xlu0 %1050 }
 0x318   : > { %6166 = vrcp.f32 %v1051_v4 }
 0x319   : > { %v6159_v7 = vpop.eup %6158 }
 0x31a   : > { %v1054_v8 = vpop.xlane.xlu1 %1053  ;;  %v1069_v10 = vmul.f32 %v6159_v7, %v6626_v6 }
 0x31b   : > { %6168 = vrcp.f32 %v1054_v8  ;;  %v1057_v9 = vpop.xlane.xlu0 %1056 }
 0x31c   : > { %6170 = vrcp.f32 %v1057_v9  ;;  %5366 = vmatprep.mubr.msk.f32.mxu0 %vm988_vm3, %v1069_v10 }
 0x31d   : > { %v6161_v23 = vpop.eup %6160 }
 0x31e   : > { %v6163_v24 = vpop.eup %6162  ;;  %v1070_v27 = vmul.f32 %v6161_v23, %v6631_v20  ;;  %v1060_v29 = vpop.xlane.xlu1 %1059  ;;  %v4765_v23 = vld [vmem:[%s7570_s1 + $0xd0] sm:$0xff] }
 0x31f   : > { %6172 = vrcp.f32 %v1060_v29  ;;  %v1071_v6 = vmul.f32 %v6163_v24, %v6633_v22  ;;  %v4766_v24 = vld [vmem:[%s7570_s1 + $0xd8] sm:$0xff]  ;;  %v4694_v29 = vld [vmem:[%s7570_s1 + $0x120] sm:$0xff] }
 0x320   : > { %5367 = vmatmul.mubr.msk.f32.vlgmr.msra.gmra.mrb[16].mxu0 %vm988_vm3, %v1070_v27  ;;  %v5970_v27 = vpack.c.bf16 %v4766_v24, %v4765_v23 }
 0x321   : > { %v6165_v33 = vpop.eup %6164  ;;  %5369 = vmatprep.mubr.msk.f32.mxu0 %vm988_vm3, %v1071_v6  ;;  %5897 = vmatpush3.bf16.msra.mxu0 %v5894_v49 }
 0x322   : > { %v6167_v35 = vpop.eup %6166  ;;  %v1072_v36 = vmul.f32 %v6165_v33, %v6639_v25  ;;  %5899 = vmatprep.subr.bf16.mxu0 %v5898_v32  ;;  %v4696_v33 = vld [vmem:[%s7570_s1 + $0x130] sm:$0xff] }
 0x323   : > { %v1073_v37 = vmul.f32 %v6167_v35, %v6641_v26  ;;  %v5417_v26 = vpop.f32.mrb[22].mxu1  ;;  %v4697_v35 = vld [vmem:[%s7570_s1 + $0x138] sm:$0xff] }
 0x324   : > { %5370 = vmatmul.mubr.msk.f32.gmra.mrb[18].mxu0 %vm988_vm3, %v1072_v36  ;;  %v5914_v36 = vpack.c.bf16 %v4697_v35, %v4696_v33 }
 0x325   : > { %v6169_v20 = vpop.eup %6168  ;;  %5372 = vmatprep.mubr.msk.f32.mxu0 %vm988_vm3, %v1073_v37  ;;  %5901 = vmatpush3.bf16.msra.mxu0 %v5898_v32  ;;  %v4695_v32 = vld [vmem:[%s7570_s1 + $0x128] sm:$0xff] }
 0x326   : > { %v6171_v38 = vpop.eup %6170  ;;  %v1074_v22 = vmul.f32 %v6169_v20, %v6647_v30  ;;  %v1440_v30 = vadd.f32 %v5417_v26, %v6672_v50  ;;  %v5910_v6 = vpack.c.bf16 %v4695_v32, %v4694_v29 }
 0x327   : > { %v1075_v39 = vmul.f32 %v6171_v38, %v6649_v31  ;;  %v1434_v31 = vpop.f32.mrb[23].mxu1 }
 0x328   : > { %5373 = vmatmul.mubr.msk.f32.gmra.mrb[20].mxu0 %vm988_vm3, %v1074_v22  ;;  %5911 = vmatprep.subr.bf16.mxu0 %v5910_v6 }
 0x329   : > { %v6173_v41 = vpop.eup %6172  ;;  %5375 = vmatprep.mubr.msk.f32.mxu0 %vm988_vm3, %v1075_v39 }
 0x32a   : > { %v1076_v25 = vmul.f32 %v6173_v41, %v6655_v34  ;;  %v1435_v34 = vadd.f32 %v6672_v50, %v1434_v31 }
 0x32c   : > { %5376 = vmatmul.mubr.msk.f32.gmra.mrb[22].mxu0 %vm988_vm3, %v1076_v25  ;;  %v5936_v42 = vpack.c.bf16 %v1440_v30, %v1435_v34 }
 0x32d   : > { %5386 = vmatprep.mubr.msk.f32.mxu0 %vm460_vm0, %v6431_v12 }
 0x32e   : > { %5938 = vmatprep.subr.msk.bf16.mxu1 %vm6496_vm2, %v5936_v42 }
 0x32f   : > { %5941 = vmatpush3.bf16.xpose.msk.msra.mxu1 %vm6496_vm2, %v5936_v42 }
 0x330   : > { %5387 = vmatmul.mubr.msk.f32.vlgmr.msra.gmra.mrb[24].mxu0 %vm460_vm0, %v6438_v13  ;;  %5959 = vmatprep.subr.bf16.mxu1 %v5958_v45 }
 0x331   : > { %5389 = vmatprep.mubr.msk.f32.mxu0 %vm460_vm0, %v6441_v14  ;;  %5913 = vmatpush3.bf16.msra.mxu0 %v5910_v6 }
 0x332   : > { %5915 = vmatprep.subr.bf16.mxu0 %v5914_v36 }
 0x334   : > { %5390 = vmatmul.mubr.msk.f32.gmra.mrb[26].mxu0 %vm460_vm0, %v6448_v15 }
 0x335   : > { %5392 = vmatprep.mubr.msk.f32.mxu0 %vm460_vm0, %v6453_v16  ;;  %5917 = vmatpush3.bf16.msra.mxu0 %v5914_v36 }
 0x338   : > { %5393 = vmatmul.mubr.msk.f32.gmra.mrb[28].mxu0 %vm460_vm0, %v6462_v17 }
 0x339   : > { %5395 = vmatprep.mubr.msk.f32.mxu0 %vm460_vm0, %v6467_v18 }
 0x33c   : > { %5396 = vmatmul.mubr.msk.f32.gmra.mrb[30].mxu0 %vm460_vm0, %v6476_v19 }
 0x33d   : > { %5426 = vmatprep.mubr.msk.f32.mxu0 %vm460_vm0, %v6431_v12 }
 0x340   : > { %5427 = vmatmul.mubr.msk.f32.vlgmr.msra.gmra.mrb[32].mxu0 %vm460_vm0, %v6438_v13 }
 0x341   : > { %5429 = vmatprep.mubr.msk.f32.mxu0 %vm460_vm0, %v6441_v14 }
 0x344   : > { %5430 = vmatmul.mubr.msk.f32.gmra.mrb[34].mxu0 %vm460_vm0, %v6448_v15 }
 0x345   : > { %5432 = vmatprep.mubr.msk.f32.mxu0 %vm460_vm0, %v6453_v16 }
 0x348   : > { %5433 = vmatmul.mubr.msk.f32.gmra.mrb[36].mxu0 %vm460_vm0, %v6462_v17 }
 0x349   : > { %5435 = vmatprep.mubr.msk.f32.mxu0 %vm460_vm0, %v6467_v18 }
 0x34c   : > { %5436 = vmatmul.mubr.msk.f32.gmra.mrb[38].mxu0 %vm460_vm0, %v6476_v19 }
 0x3f3   : > { %v6744_v46 = vpop.f32.mrb[16].mxu0 }
 0x3f4   : > { %v6746_v47 = vpop.f32.mrb[17].mxu0 }
 0x3f7   : > { %v6748_v48 = vpop.f32.mrb[18].mxu0 }
 0x3f8   : > { %v6750_v49 = vpop.f32.mrb[19].mxu0 }
 0x3fb   : > { %v6752_v50 = vpop.f32.mrb[20].mxu0 }
 0x3fc   : > { %v6754_v51 = vpop.f32.mrb[21].mxu0 }
 0x3ff   : > { %v6756_v40 = vpop.f32.mrb[22].mxu0 }
 0x400   : > { %v6758_v52 = vpop.f32.mrb[23].mxu0 }
 0x403   : > { %v5388_v54 = vpop.f32.mrb[24].mxu0 }
 0x404   : > { %v1286_v57 = vpop.f32.mrb[25].mxu0  ;;  %v1292_v59 = vadd.f32 %v5388_v54, %v4671_v53  ;;  %v4754_v54 = vld [vmem:[%s7571_s2 + $0x2] ss:$0 sm:$0xff] }
 0x405   : > { %v1287_v58 = vadd.f32 %v4671_v53, %v1286_v57 }
 0x407   : > { %v5391_v61 = vpop.f32.mrb[26].mxu0  ;;  %5454 = vmatprep.mubr.msk.f32.mxu1 %vm826_vm1, %v1287_v58 }
 0x408   : > { %v1296_v0 = vpop.f32.mrb[27].mxu0  ;;  %5455 = vmatmul.mubr.msk.f32.vlgmr.msra.gmra.mrb[24].mxu1 %vm826_vm1, %v1292_v59  ;;  %v1302_v2 = vadd.f32 %v5391_v61, %v4671_v53 }
 0x409   : > { %v1297_v1 = vadd.f32 %v4671_v53, %v1296_v0  ;;  %5961 = vmatpush3.bf16.msra.mxu1 %v5958_v45 }
 0x40a   : > { %5963 = vmatprep.subr.bf16.mxu1 %v5962_v60 }
 0x40b   : > { %v5394_v5 = vpop.f32.mrb[28].mxu0  ;;  %5457 = vmatprep.mubr.msk.f32.mxu1 %vm826_vm1, %v1297_v1  ;;  %v4768_v1 = vld [vmem:[%s7571_s2 + $0x6] ss:$0 sm:$0xff] }
 0x40c   : > { %v1306_v4 = vpop.f32.mrb[29].mxu0  ;;  %5458 = vmatmul.mubr.msk.f32.gmra.mrb[26].mxu1 %vm826_vm1, %v1302_v2  ;;  %v1312_v8 = vadd.f32 %v5394_v5, %v4671_v53 }
 0x40d   : > { %v1307_v7 = vadd.f32 %v4671_v53, %v1306_v4  ;;  %5965 = vmatpush3.bf16.msra.mxu1 %v5962_v60 }
 0x40e   : > { %5967 = vmatprep.subr.bf16.mxu1 %v5966_v3 }
 0x40f   : > { %v5397_v10 = vpop.f32.mrb[30].mxu0  ;;  %5460 = vmatprep.mubr.msk.f32.mxu1 %vm826_vm1, %v1307_v7 }
 0x410   : > { %v1316_v9 = vpop.f32.mrb[31].mxu0  ;;  %5461 = vmatmul.mubr.msk.f32.gmra.mrb[28].mxu1 %vm826_vm1, %v1312_v8  ;;  %v1322_v21 = vadd.f32 %v5397_v10, %v4671_v53 }
 0x411   : > { %v1317_v11 = vadd.f32 %v4671_v53, %v1316_v9 }
 0x413   : > { %5463 = vmatprep.mubr.msk.f32.mxu1 %vm826_vm1, %v1317_v11 }
 0x414   : > { %5464 = vmatmul.mubr.msk.f32.gmra.mrb[30].mxu1 %vm826_vm1, %v1322_v21 }
 0x415   : > { %5530 = vmatprep.mubr.msk.f32.mxu1 %vm460_vm0, %v6431_v12 }
 0x418   : > { %5531 = vmatmul.mubr.msk.f32.vlgmr.msra.gmra.mrb[32].mxu1 %vm460_vm0, %v6438_v13 }
 0x419   : > { %5533 = vmatprep.mubr.msk.f32.mxu1 %vm460_vm0, %v6441_v14  ;;  %5969 = vmatpush3.bf16.msra.mxu1 %v5966_v3 }
 0x41a   : > { %5971 = vmatprep.subr.bf16.mxu1 %v5970_v27 }
 0x41c   : > { %5534 = vmatmul.mubr.msk.f32.gmra.mrb[34].mxu1 %vm460_vm0, %v6448_v15 }
 0x41d   : > { %5536 = vmatprep.mubr.msk.f32.mxu1 %vm460_vm0, %v6453_v16  ;;  %5973 = vmatpush3.bf16.msra.mxu1 %v5970_v27 }
 0x420   : > { %5537 = vmatmul.mubr.msk.f32.gmra.mrb[36].mxu1 %vm460_vm0, %v6462_v17 }
 0x421   : > { %5539 = vmatprep.mubr.msk.f32.mxu1 %vm460_vm0, %v6467_v18 }
 0x424   : > { %5540 = vmatmul.mubr.msk.f32.gmra.mrb[38].mxu1 %vm460_vm0, %v6476_v19 }
 0x425   : > { %5550 = vmatprep.mubr.msk.f32.mxu1 %vm460_vm0, %v6431_v12 }
 0x428   : > { %5551 = vmatmul.mubr.msk.f32.vlgmr.msra.gmra.mrb[40].mxu1 %vm460_vm0, %v6438_v13 }
 0x429   : > { %5553 = vmatprep.mubr.msk.f32.mxu1 %vm460_vm0, %v6441_v14 }
 0x42c   : > { %5554 = vmatmul.mubr.msk.f32.gmra.mrb[42].mxu1 %vm460_vm0, %v6448_v15 }
 0x42d   : > { %5556 = vmatprep.mubr.msk.f32.mxu1 %vm460_vm0, %v6453_v16 }
 0x430   : > { %5557 = vmatmul.mubr.msk.f32.gmra.mrb[44].mxu1 %vm460_vm0, %v6462_v17 }
 0x431   : > { %5559 = vmatprep.mubr.msk.f32.mxu1 %vm460_vm0, %v6467_v18 }
 0x434   : > { %5560 = vmatmul.mubr.msk.f32.gmra.mrb[46].mxu1 %vm460_vm0, %v6476_v19 }
 0x4db   : > { %v5456_v37 = vpop.f32.mrb[24].mxu1 }
 0x4dc   : > { %v6847_v13 = vmul.f32 0.35355338, %v5456_v37  ;;  %v1675_v20 = vpop.f32.mrb[25].mxu1 }
 0x4dd   : > { %v6849_v14 = vmul.f32 0.35355338, %v1675_v20 }
 0x4de   : > { %v1725_v15 = vsel %vm988_vm3, %v6847_v13, -inf }
 0x4df   : > { %1726 = vmax.xlane.f32.xlu1 %v1725_v15  ;;  %v5459_v16 = vpop.f32.mrb[26].mxu1  ;;  %v1722_v17 = vsel %vm988_vm3, %v6849_v14, -inf }
 0x4e0   : > { %v6855_v38 = vmul.f32 0.35355338, %v5459_v16  ;;  %1723 = vmax.xlane.f32.xlu0 %v1722_v17  ;;  %v1685_v18 = vpop.f32.mrb[27].mxu1 }
 0x4e1   : > { %v6857_v22 = vmul.f32 0.35355338, %v1685_v18 }
 0x4e2   : > { %v1731_v19 = vsel %vm988_vm3, %v6855_v38, -inf }
 0x4e3   : > { %1732 = vmax.xlane.f32.xlu1 %v1731_v19  ;;  %v5462_v39 = vpop.f32.mrb[28].mxu1  ;;  %v1728_v41 = vsel %vm988_vm3, %v6857_v22, -inf }
 0x4e4   : > { %v6863_v25 = vmul.f32 0.35355338, %v5462_v39  ;;  %1729 = vmax.xlane.f32.xlu0 %v1728_v41  ;;  %v1695_v26 = vpop.f32.mrb[29].mxu1 }
 0x4e5   : > { %v6865_v30 = vmul.f32 0.35355338, %v1695_v26 }
 0x4e6   : > { %v1737_v31 = vsel %vm988_vm3, %v6863_v25, -inf }
 0x4e7   : > { %1738 = vmax.xlane.f32.xlu1 %v1737_v31  ;;  %v5465_v34 = vpop.f32.mrb[30].mxu1  ;;  %v1734_v42 = vsel %vm988_vm3, %v6865_v30, -inf }
 0x4e8   : > { %v6871_v43 = vmul.f32 0.35355338, %v5465_v34  ;;  %1735 = vmax.xlane.f32.xlu0 %v1734_v42  ;;  %v1705_v44 = vpop.f32.mrb[31].mxu1 }
 0x4e9   : > { %v6873_v45 = vmul.f32 0.35355338, %v1705_v44 }
 0x4ea   : > { %v1743_v53 = vsel %vm988_vm3, %v6871_v43, -inf }
 0x4eb   : > { %1744 = vmax.xlane.f32.xlu1 %v1743_v53  ;;  %v1740_v55 = vsel %vm988_vm3, %v6873_v45, -inf  ;;  %v5532_v56 = vpop.f32.mrb[32].mxu1 }
 0x4ec   : > { %1741 = vmax.xlane.f32.xlu0 %v1740_v55  ;;  %v2278_v57 = vpop.f32.mrb[33].mxu1  ;;  %v2284_v20 = vadd.f32 %v5532_v56, %v4754_v54 }
 0x4ed   : > { %v2279_v58 = vadd.f32 %v4754_v54, %v2278_v57 }
 0x4ef   : > { %v5535_v59 = vpop.f32.mrb[34].mxu1  ;;  %5598 = vmatprep.mubr.msk.f32.mxu1 %vm826_vm1, %v2279_v58 }
 0x4f0   : > { %v2288_v60 = vpop.f32.mrb[35].mxu1  ;;  %v2294_v16 = vadd.f32 %v5535_v59, %v4754_v54 }
 0x4f1   : > { %v2289_v15 = vadd.f32 %v4754_v54, %v2288_v60 }
 0x4f3   : > { %v5538_v61 = vpop.f32.mrb[36].mxu1 }
 0x4f4   : > { %v2298_v62 = vpop.f32.mrb[37].mxu1  ;;  %v2304_v18 = vadd.f32 %v5538_v61, %v4754_v54 }
 0x4f5   : > { %v2299_v17 = vadd.f32 %v4754_v54, %v2298_v62 }
 0x4f7   : > { %v5541_v63 = vpop.f32.mrb[38].mxu1 }
 0x4f8   : > { %v2308_v0 = vpop.f32.mrb[39].mxu1  ;;  %v2314_v39 = vadd.f32 %v5541_v63, %v4754_v54 }
 0x4f9   : > { %v2309_v19 = vadd.f32 %v4754_v54, %v2308_v0 }
 0x4fb   : > { %v5552_v2 = vpop.f32.mrb[40].mxu1 }
 0x4fc   : > { %v2402_v3 = vadd.f32 %v5552_v2, %v4768_v1  ;;  %v2396_v5 = vpop.f32.mrb[41].mxu1 }
 0x4fd   : > { %v2397_v4 = vadd.f32 %v4768_v1, %v2396_v5 }
 0x4ff   : > { %v5982_v7 = vpack.c.bf16 %v2402_v3, %v2397_v4  ;;  %v5555_v8 = vpop.f32.mrb[42].mxu1 }
 0x500   : > { %v2412_v10 = vadd.f32 %v5555_v8, %v4768_v1  ;;  %v2406_v9 = vpop.f32.mrb[43].mxu1  ;;  %v4699_v8 = vld [vmem:[%s7571_s2 + $0x9] ss:$0 sm:$0xff] }
 0x501   : > { %5984 = vmatprep.subr.msk.bf16.mxu1 %vm6496_vm2, %v5982_v7  ;;  %v2407_v11 = vadd.f32 %v4768_v1, %v2406_v9 }
 0x502   : > { %5987 = vmatpush3.bf16.xpose.msk.msra.mxu1 %vm6496_vm2, %v5982_v7  ;;  %v5428_v7 = vpop.f32.mrb[32].mxu0 }
 0x503   : > { %v5988_v21 = vpack.c.bf16 %v2412_v10, %v2407_v11  ;;  %v5558_v23 = vpop.f32.mrb[44].mxu1  ;;  %v1528_v9 = vadd.f32 %v5428_v7, %v4699_v8  ;;  %v1522_v11 = vpop.f32.mrb[33].mxu0 }
 0x504   : > { %v2422_v24 = vadd.f32 %v5558_v23, %v4768_v1  ;;  %v2416_v27 = vpop.f32.mrb[45].mxu1 }
 0x505   : > { %5990 = vmatprep.subr.msk.bf16.mxu1 %vm6496_vm2, %v5988_v21  ;;  %v2417_v29 = vadd.f32 %v4768_v1, %v2416_v27 }
 0x507   : > { %v5994_v32 = vpack.c.bf16 %v2422_v24, %v2417_v29  ;;  %v5561_v6 = vpop.f32.mrb[46].mxu1  ;;  %v1523_v24 = vadd.f32 %v4699_v8, %v1522_v11  ;;  %v5431_v29 = vpop.f32.mrb[34].mxu0 }
 0x508   : > { %v2432_v33 = vadd.f32 %v5561_v6, %v4768_v1  ;;  %v2426_v35 = vpop.f32.mrb[47].mxu1  ;;  %v1538_v6 = vadd.f32 %v5431_v29, %v4699_v8 }
 0x509   : > { %v2427_v36 = vadd.f32 %v4768_v1, %v2426_v35 }
 0x50a   : > { %5993 = vmatpush3.bf16.xpose.msk.msra.mxu1 %vm6496_vm2, %v5988_v21 }
 0x50b   : > { %5996 = vmatprep.subr.msk.bf16.mxu1 %vm6496_vm2, %v5994_v32  ;;  %v6000_v37 = vpack.c.bf16 %v2432_v33, %v2427_v36  ;;  %v1532_v33 = vpop.f32.mrb[35].mxu0 }
 0x50c   : > { %v1533_v36 = vadd.f32 %v4699_v8, %v1532_v33 }
 0x512   : > { %5999 = vmatpush3.bf16.xpose.msk.msra.mxu1 %vm6496_vm2, %v5994_v32  ;;  %v5942_v32 = vpack.c.bf16 %v1528_v9, %v1523_v24 }
 0x513   : > { %6002 = vmatprep.subr.msk.bf16.mxu1 %vm6496_vm2, %v6000_v37 }
 0x514   : > { %5943 = vmatprep.subr.bf16.mxu0 %v5942_v32 }
 0x515   : > { %5945 = vmatpush3.bf16.msra.mxu0 %v5942_v32 }
 0x51a   : > { %6005 = vmatpush3.bf16.xpose.msk.msra.mxu1 %vm6496_vm2, %v6000_v37 }
 0x521   : > { %5599 = vmatmul.mubr.msk.f32.vlgmr.msra.gmra.mrb[48].mxu1 %vm826_vm1, %v2284_v20 }
 0x522   : > { %5601 = vmatprep.mubr.msk.f32.mxu1 %vm826_vm1, %v2289_v15  ;;  %v5434_v15 = vpop.f32.mrb[36].mxu0 }
 0x525   : > { %5602 = vmatmul.mubr.msk.f32.gmra.mrb[50].mxu1 %vm826_vm1, %v2294_v16 }
 0x526   : > { %5604 = vmatprep.mubr.msk.f32.mxu1 %vm826_vm1, %v2299_v17  ;;  %v5946_v17 = vpack.c.bf16 %v1538_v6, %v1533_v36 }
 0x528   : > { %5947 = vmatprep.subr.bf16.mxu0 %v5946_v17 }
 0x529   : > { %5605 = vmatmul.mubr.msk.f32.gmra.mrb[52].mxu1 %vm826_vm1, %v2304_v18  ;;  %v1548_v18 = vadd.f32 %v5434_v15, %v4699_v8  ;;  %5949 = vmatpush3.bf16.msra.mxu0 %v5946_v17 }
 0x52a   : > { %5607 = vmatprep.mubr.msk.f32.mxu1 %vm826_vm1, %v2309_v19  ;;  %v1542_v19 = vpop.f32.mrb[37].mxu0 }
 0x52d   : > { %5608 = vmatmul.mubr.msk.f32.gmra.mrb[54].mxu1 %vm826_vm1, %v2314_v39  ;;  %v1543_v39 = vadd.f32 %v4699_v8, %v1542_v19 }
 0x52e   : > { %5660 = vmatprep.mubr.msk.f32.mxu1 %vm460_vm0, %v6431_v12 }
 0x56c   : > { %v1727_v41 = vpop.xlane.xlu1 %1726 }
 0x56d   : > { %v1747_v26 = vsub.f32 %v6847_v13, %v1727_v41  ;;  %v1724_v31 = vpop.xlane.xlu0 %1723  ;;  %v5950_v41 = vpack.c.bf16 %v1548_v18, %v1543_v39 }
 0x56e   : > { %v1746_v34 = vsub.f32 %v6849_v14, %v1724_v31 }
 0x56f   : > { %v1756_v42 = vmul.f32 1.442695, %v1747_v26  ;;  %v5437_v26 = vpop.f32.mrb[38].mxu0  ;;  %5951 = vmatprep.subr.bf16.mxu0 %v5950_v41 }
 0x570   : > { %v1754_v44 = vmul.f32 1.442695, %v1746_v34  ;;  %v1733_v53 = vpop.xlane.xlu1 %1732  ;;  %v1552_v31 = vpop.f32.mrb[39].mxu0  ;;  %v1558_v34 = vadd.f32 %v5437_v26, %v4699_v8  ;;  %5953 = vmatpush3.bf16.msra.mxu0 %v5950_v41 }
 0x571   : > { %6174 = vpow2.f32 %v1756_v42  ;;  %v1749_v54 = vsub.f32 %v6855_v38, %v1733_v53  ;;  %v1730_v55 = vpop.xlane.xlu0 %1729  ;;  %v1553_v42 = vadd.f32 %v4699_v8, %v1552_v31 }
 0x572   : > { %6176 = vpow2.f32 %v1754_v44  ;;  %v1748_v56 = vsub.f32 %v6857_v22, %v1730_v55 }
 0x573   : > { %v1760_v57 = vmul.f32 1.442695, %v1749_v54  ;;  %v5954_v44 = vpack.c.bf16 %v1558_v34, %v1553_v42 }
 0x574   : > { %v1758_v58 = vmul.f32 1.442695, %v1748_v56  ;;  %v1739_v59 = vpop.xlane.xlu1 %1738 }
 0x575   : > { %6178 = vpow2.f32 %v1760_v57  ;;  %v1751_v12 = vsub.f32 %v6863_v25, %v1739_v59  ;;  %v1736_v13 = vpop.xlane.xlu0 %1735  ;;  %5955 = vmatprep.subr.bf16.mxu0 %v5954_v44 }
 0x576   : > { %6180 = vpow2.f32 %v1758_v58  ;;  %v1750_v14 = vsub.f32 %v6865_v30, %v1736_v13  ;;  %5957 = vmatpush3.bf16.msra.mxu0 %v5954_v44 }
 0x577   : > { %v1764_v60 = vmul.f32 1.442695, %v1751_v12 }
 0x578   : > { %v1762_v61 = vmul.f32 1.442695, %v1750_v14  ;;  %v1745_v62 = vpop.xlane.xlu1 %1744 }
 0x579   : > { %6182 = vpow2.f32 %v1764_v60  ;;  %v1753_v38 = vsub.f32 %v6871_v43, %v1745_v62  ;;  %v1742_v63 = vpop.xlane.xlu0 %1741 }
 0x57a   : > { %6184 = vpow2.f32 %v1762_v61  ;;  %v1752_v22 = vsub.f32 %v6873_v45, %v1742_v63 }
 0x57b   : > { %v6919_v0 = vpop.eup %6174  ;;  %v1768_v1 = vmul.f32 1.442695, %v1753_v38 }
 0x57c   : > { %v6921_v2 = vpop.eup %6176  ;;  %v1766_v25 = vmul.f32 1.442695, %v1752_v22  ;;  %v1773_v3 = vsel %vm988_vm3, %v6919_v0, 0.0 }
 0x57d   : > { %6186 = vpow2.f32 %v1768_v1  ;;  %1774 = vadd.xlane.f32.xlu1 %v1773_v3  ;;  %v1770_v30 = vsel %vm988_vm3, %v6921_v2, 0.0 }
 0x57e   : > { %6188 = vpow2.f32 %v1766_v25  ;;  %1771 = vadd.xlane.f32.xlu0 %v1770_v30 }
 0x57f   : > { %v6927_v43 = vpop.eup %6178 }
 0x580   : > { %v6929_v5 = vpop.eup %6180  ;;  %v1779_v45 = vsel %vm988_vm3, %v6927_v43, 0.0 }
 0x581   : > { %1780 = vadd.xlane.f32.xlu1 %v1779_v45  ;;  %v1776_v4 = vsel %vm988_vm3, %v6929_v5, 0.0 }
 0x582   : > { %1777 = vadd.xlane.f32.xlu0 %v1776_v4 }
 0x583   : > { %v6938_v10 = vpop.eup %6182 }
 0x584   : > { %v6940_v21 = vpop.eup %6184  ;;  %v1785_v23 = vsel %vm988_vm3, %v6938_v10, 0.0 }
 0x585   : > { %1786 = vadd.xlane.f32.xlu1 %v1785_v23  ;;  %v1782_v27 = vsel %vm988_vm3, %v6940_v21, 0.0 }
 0x586   : > { %1783 = vadd.xlane.f32.xlu0 %v1782_v27 }
 0x587   : > { %v6946_v35 = vpop.eup %6186 }
 0x588   : > { %v6948_v37 = vpop.eup %6188  ;;  %v1791_v20 = vsel %vm988_vm3, %v6946_v35, 0.0 }
 0x589   : > { %1792 = vadd.xlane.f32.xlu1 %v1791_v20  ;;  %v1788_v16 = vsel %vm988_vm3, %v6948_v37, 0.0 }
 0x58a   : > { %1789 = vadd.xlane.f32.xlu0 %v1788_v16 }
 0x5f4   : > { %v5600_v53 = vpop.f32.mrb[48].mxu1 }
 0x5f5   : > { %v6954_v54 = vmul.f32 0.35355338, %v5600_v53  ;;  %v2667_v55 = vpop.f32.mrb[49].mxu1 }
 0x5f6   : > { %v6956_v56 = vmul.f32 0.35355338, %v2667_v55 }
 0x5f7   : > { %v2717_v57 = vsel %vm988_vm3, %v6954_v54, -inf }
 0x5f8   : > { %2718 = vmax.xlane.f32.xlu1 %v2717_v57  ;;  %v5603_v58 = vpop.f32.mrb[50].mxu1  ;;  %v2714_v59 = vsel %vm988_vm3, %v6956_v56, -inf }
 0x5f9   : > { %v6962_v12 = vmul.f32 0.35355338, %v5603_v58  ;;  %v2677_v13 = vpop.f32.mrb[51].mxu1  ;;  %2715 = vmax.xlane.f32.xlu0 %v2714_v59 }
 0x5fa   : > { %v6964_v14 = vmul.f32 0.35355338, %v2677_v13 }
 0x5fb   : > { %v2723_v60 = vsel %vm988_vm3, %v6962_v12, -inf }
 0x5fc   : > { %2724 = vmax.xlane.f32.xlu1 %v2723_v60  ;;  %v5606_v61 = vpop.f32.mrb[52].mxu1  ;;  %v2720_v62 = vsel %vm988_vm3, %v6964_v14, -inf }
 0x5fd   : > { %v6970_v38 = vmul.f32 0.35355338, %v5606_v61  ;;  %v2687_v63 = vpop.f32.mrb[53].mxu1  ;;  %2721 = vmax.xlane.f32.xlu0 %v2720_v62 }
 0x5fe   : > { %v6972_v22 = vmul.f32 0.35355338, %v2687_v63 }
 0x5ff   : > { %v2729_v1 = vsel %vm988_vm3, %v6970_v38, -inf }
 0x600   : > { %2730 = vmax.xlane.f32.xlu1 %v2729_v1  ;;  %v5609_v25 = vpop.f32.mrb[54].mxu1  ;;  %v2726_v3 = vsel %vm988_vm3, %v6972_v22, -inf }
 0x601   : > { %v6978_v30 = vmul.f32 0.35355338, %v5609_v25  ;;  %v2697_v45 = vpop.f32.mrb[55].mxu1  ;;  %2727 = vmax.xlane.f32.xlu0 %v2726_v3 }
 0x602   : > { %v6980_v4 = vmul.f32 0.35355338, %v2697_v45 }
 0x603   : > { %v2735_v7 = vsel %vm988_vm3, %v6978_v30, -inf }
 0x604   : > { %2736 = vmax.xlane.f32.xlu1 %v2735_v7  ;;  %v2732_v8 = vsel %vm988_vm3, %v6980_v4, -inf }
 0x605   : > { %2733 = vmax.xlane.f32.xlu0 %v2732_v8 }
 0x60a   : > { %v1775_v9 = vpop.xlane.xlu1 %1774 }
 0x60b   : > { %6190 = vrcp.f32 %v1775_v9  ;;  %v1772_v11 = vpop.xlane.xlu0 %1771 }
 0x60c   : > { %6192 = vrcp.f32 %v1772_v11 }
 0x60e   : > { %v1781_v23 = vpop.xlane.xlu1 %1780 }
 0x60f   : > { %6194 = vrcp.f32 %v1781_v23  ;;  %v1778_v24 = vpop.xlane.xlu0 %1777 }
 0x610   : > { %6196 = vrcp.f32 %v1778_v24 }
 0x612   : > { %v1787_v27 = vpop.xlane.xlu1 %1786 }
 0x613   : > { %6198 = vrcp.f32 %v1787_v27  ;;  %v1784_v29 = vpop.xlane.xlu0 %1783 }
 0x614   : > { %6200 = vrcp.f32 %v1784_v29 }
 0x615   : > { %v6191_v32 = vpop.eup %6190 }
 0x616   : > { %v6193_v6 = vpop.eup %6192  ;;  %v1793_v33 = vpop.xlane.xlu1 %1792  ;;  %v1803_v15 = vmul.f32 %v6191_v32, %v6919_v0 }
 0x617   : > { %6202 = vrcp.f32 %v1793_v33  ;;  %v1790_v36 = vpop.xlane.xlu0 %1789  ;;  %v1802_v20 = vmul.f32 %v6193_v6, %v6921_v2 }
 0x618   : > { %6204 = vrcp.f32 %v1790_v36 }
 0x619   : > { %v6195_v16 = vpop.eup %6194  ;;  %5482 = vmatprep.mubr.msk.f32.mxu0 %vm988_vm3, %v1802_v20 }
 0x61a   : > { %v6197_v17 = vpop.eup %6196  ;;  %5483 = vmatmul.mubr.msk.f32.vlgmr.msra.gmra.mrb[40].mxu0 %vm988_vm3, %v1803_v15  ;;  %v1805_v19 = vmul.f32 %v6195_v16, %v6927_v43  ;;  %v4732_v43 = vld [vmem:[%s7572_s3 + $0x8] sm:$0xff]  ;;  %v4777_v15 = vld [vmem:[%s7570_s1 + $0x140] sm:$0xff] }
 0x61b   : > { %v1804_v18 = vmul.f32 %v6197_v17, %v6929_v5  ;;  %5494 = vmatprep.subr.mxu0 %v4732_v43  ;;  %v4778_v16 = vld [vmem:[%s7570_s1 + $0x148] sm:$0xff] }
 0x61c   : > { %5495 = vmatpush3.msra.mxu0 %v4732_v43  ;;  %v4780_v43 = vld [vmem:[%s7570_s1 + $0x158] sm:$0xff] }
 0x61d   : > { %v6199_v39 = vpop.eup %6198  ;;  %5485 = vmatprep.mubr.msk.f32.mxu0 %vm988_vm3, %v1804_v18 }
 0x61e   : > { %v6201_v41 = vpop.eup %6200  ;;  %5486 = vmatmul.mubr.msk.f32.gmra.mrb[42].mxu0 %vm988_vm3, %v1805_v19  ;;  %v1807_v0 = vmul.f32 %v6199_v39, %v6938_v10  ;;  %v7008_v10 = vld [vmem:[%s7572_s3] sm:$0xff]  ;;  %v5974_v19 = vpack.c.bf16 %v4778_v16, %v4777_v15 }
 0x61f   : > { %v1806_v2 = vmul.f32 %v6201_v41, %v6940_v21  ;;  %5508 = vmatprep.subr.mxu0 %v7008_v10 }
 0x621   : > { %v6203_v26 = vpop.eup %6202  ;;  %5488 = vmatprep.mubr.msk.f32.mxu0 %vm988_vm3, %v1806_v2 }
 0x622   : > { %v6205_v31 = vpop.eup %6204  ;;  %5489 = vmatmul.mubr.msk.f32.gmra.mrb[44].mxu0 %vm988_vm3, %v1807_v0  ;;  %v1809_v34 = vmul.f32 %v6203_v26, %v6946_v35 }
 0x623   : > { %v1808_v5 = vmul.f32 %v6205_v31, %v6948_v37 }
 0x625   : > { %5491 = vmatprep.mubr.msk.f32.mxu0 %vm988_vm3, %v1808_v5  ;;  %v4779_v5 = vld [vmem:[%s7570_s1 + $0x150] sm:$0xff] }
 0x626   : > { %5492 = vmatmul.mubr.msk.f32.gmra.mrb[46].mxu0 %vm988_vm3, %v1809_v34  ;;  %v5978_v34 = vpack.c.bf16 %v4780_v43, %v4779_v5  ;;  %v4826_v5 = vld [vmem:[%s7570_s1 + $0x70] sm:$0xff]  ;;  %v4827_v43 = vld [vmem:[%s7570_s1 + $0x78] sm:$0xff] }
 0x685   : > { %v2719_v21 = vpop.xlane.xlu1 %2718 }
 0x686   : > { %v2739_v37 = vsub.f32 %v6954_v54, %v2719_v21  ;;  %v2716_v42 = vpop.xlane.xlu0 %2715 }
 0x687   : > { %v2738_v44 = vsub.f32 %v6956_v56, %v2716_v42 }
 0x688   : > { %v2748_v35 = vmul.f32 1.442695, %v2739_v37 }
 0x689   : > { %v2746_v53 = vmul.f32 1.442695, %v2738_v44  ;;  %v2725_v55 = vpop.xlane.xlu1 %2724  ;;  %v4782_v44 = vld [vmem:[%s7571_s2 + $0xa] ss:$0 sm:$0xff] }
 0x68a   : > { %6206 = vpow2.f32 %v2748_v35  ;;  %v2741_v57 = vsub.f32 %v6962_v12, %v2725_v55  ;;  %v2722_v58 = vpop.xlane.xlu0 %2721 }
 0x68b   : > { %6208 = vpow2.f32 %v2746_v53  ;;  %v2740_v59 = vsub.f32 %v6964_v14, %v2722_v58 }
 0x68c   : > { %v2752_v13 = vmul.f32 1.442695, %v2741_v57 }
 0x68d   : > { %v2750_v60 = vmul.f32 1.442695, %v2740_v59  ;;  %v2731_v61 = vpop.xlane.xlu1 %2730 }
 0x68e   : > { %6210 = vpow2.f32 %v2752_v13  ;;  %v2743_v62 = vsub.f32 %v6970_v38, %v2731_v61  ;;  %v2728_v54 = vpop.xlane.xlu0 %2727 }
 0x68f   : > { %6212 = vpow2.f32 %v2750_v60  ;;  %v2742_v56 = vsub.f32 %v6972_v22, %v2728_v54 }
 0x690   : > { %v2756_v63 = vmul.f32 1.442695, %v2743_v62 }
 0x691   : > { %v2754_v1 = vmul.f32 1.442695, %v2742_v56  ;;  %v2737_v25 = vpop.xlane.xlu1 %2736 }
 0x692   : > { %6214 = vpow2.f32 %v2756_v63  ;;  %v2745_v12 = vsub.f32 %v6978_v30, %v2737_v25  ;;  %v2734_v3 = vpop.xlane.xlu0 %2733 }
 0x693   : > { %6216 = vpow2.f32 %v2754_v1  ;;  %v2744_v14 = vsub.f32 %v6980_v4, %v2734_v3 }
 0x694   : > { %v7019_v45 = vpop.eup %6206  ;;  %v2760_v7 = vmul.f32 1.442695, %v2745_v12 }
 0x695   : > { %v7021_v8 = vpop.eup %6208  ;;  %v2758_v38 = vmul.f32 1.442695, %v2744_v14  ;;  %v2765_v9 = vsel %vm988_vm3, %v7019_v45, 0.0 }
 0x696   : > { %6218 = vpow2.f32 %v2760_v7  ;;  %2766 = vadd.xlane.f32.xlu1 %v2765_v9  ;;  %v2762_v22 = vsel %vm988_vm3, %v7021_v8, 0.0 }
 0x697   : > { %6220 = vpow2.f32 %v2758_v38  ;;  %2763 = vadd.xlane.f32.xlu0 %v2762_v22 }
 0x698   : > { %v7027_v30 = vpop.eup %6210 }
 0x699   : > { %v7029_v11 = vpop.eup %6212  ;;  %v2771_v4 = vsel %vm988_vm3, %v7027_v30, 0.0 }
 0x69a   : > { %2772 = vadd.xlane.f32.xlu1 %v2771_v4  ;;  %v2768_v23 = vsel %vm988_vm3, %v7029_v11, 0.0 }
 0x69b   : > { %2769 = vadd.xlane.f32.xlu0 %v2768_v23 }
 0x69c   : > { %v7035_v24 = vpop.eup %6214 }
 0x69d   : > { %v7037_v27 = vpop.eup %6216  ;;  %v2777_v29 = vsel %vm988_vm3, %v7035_v24, 0.0 }
 0x69e   : > { %2778 = vadd.xlane.f32.xlu1 %v2777_v29  ;;  %v2774_v32 = vsel %vm988_vm3, %v7037_v27, 0.0 }
 0x69f   : > { %2775 = vadd.xlane.f32.xlu0 %v2774_v32 }
 0x6a0   : > { %v7043_v6 = vpop.eup %6218 }
 0x6a1   : > { %v7045_v33 = vpop.eup %6220  ;;  %v2783_v36 = vsel %vm988_vm3, %v7043_v6, 0.0 }
 0x6a2   : > { %2784 = vadd.xlane.f32.xlu1 %v2783_v36  ;;  %v2780_v20 = vsel %vm988_vm3, %v7045_v33, 0.0  ;;  %v4815_v36 = vld [vmem:[%s7572_s3 + $0x10] sm:$0xff] }
 0x6a3   : > { %2781 = vadd.xlane.f32.xlu0 %v2780_v20 }
 0x6ed   : > { %v5484_v17 = vpop.f32.mrb[40].mxu0 }
 0x6ee   : > { %v1900_v18 = vpop.f32.mrb[41].mxu0 }
 0x6ef   : > { %5496 = vmatprep.mubr.msk.f32.mxu0 %vm826_vm1, %v1900_v18 }
 0x6f0   : > { %5497 = vmatmul.mubr.msk.f32.vlgmr.msra.gmra.mrb[48].mxu0 %vm826_vm1, %v5484_v17 }
 0x6f1   : > { %v5487_v39 = vpop.f32.mrb[42].mxu0  ;;  %5509 = vmatpush3.msra.mxu0 %v7008_v10 }
 0x6f2   : > { %v1910_v41 = vpop.f32.mrb[43].mxu0  ;;  %5975 = vmatprep.subr.bf16.mxu0 %v5974_v19 }
 0x6f3   : > { %5499 = vmatprep.mubr.msk.f32.mxu0 %vm826_vm1, %v1910_v41 }
 0x6f4   : > { %5500 = vmatmul.mubr.msk.f32.gmra.mrb[50].mxu0 %vm826_vm1, %v5487_v39 }
 0x6f5   : > { %v5490_v2 = vpop.f32.mrb[44].mxu0 }
 0x6f6   : > { %v1920_v0 = vpop.f32.mrb[45].mxu0 }
 0x6f7   : > { %5502 = vmatprep.mubr.msk.f32.mxu0 %vm826_vm1, %v1920_v0 }
 0x6f8   : > { %5503 = vmatmul.mubr.msk.f32.gmra.mrb[52].mxu0 %vm826_vm1, %v5490_v2 }
 0x6f9   : > { %v5493_v26 = vpop.f32.mrb[46].mxu0 }
 0x6fa   : > { %v1930_v31 = vpop.f32.mrb[47].mxu0 }
 0x6fb   : > { %5505 = vmatprep.mubr.msk.f32.mxu0 %vm826_vm1, %v1930_v31 }
 0x6fc   : > { %5506 = vmatmul.mubr.msk.f32.gmra.mrb[54].mxu0 %vm826_vm1, %v5493_v26 }
 0x6fd   : > { %5510 = vmatprep.mubr.msk.f32.mxu0 %vm826_vm1, %v6746_v47  ;;  %v7094_v47 = vld [vmem:[%s6428_s14 + $0x8] sm:$0xff] }
 0x700   : > { %5511 = vmatmul.mubr.msk.f32.vlgmr.msra.gmra.mrb[48].mxu0 %vm826_vm1, %v6744_v46  ;;  %v7089_v46 = vld [vmem:[%s6428_s14] sm:$0xff] }
 0x701   : > { %5513 = vmatprep.mubr.msk.f32.mxu0 %vm826_vm1, %v6750_v49  ;;  %5977 = vmatpush3.bf16.msra.mxu0 %v5974_v19  ;;  %v7104_v49 = vld [vmem:[%s6428_s14 + $0x18] sm:$0xff] }
 0x702   : > { %5979 = vmatprep.subr.bf16.mxu0 %v5978_v34 }
 0x704   : > { %5514 = vmatmul.mubr.msk.f32.gmra.mrb[50].mxu0 %vm826_vm1, %v6748_v48  ;;  %v7099_v48 = vld [vmem:[%s6428_s14 + $0x10] sm:$0xff] }
 0x705   : > { %5516 = vmatprep.mubr.msk.f32.mxu0 %vm826_vm1, %v6754_v51  ;;  %5981 = vmatpush3.bf16.msra.mxu0 %v5978_v34  ;;  %v7114_v51 = vld [vmem:[%s6428_s14 + $0x28] sm:$0xff]  ;;  %v6026_v34 = vpack.c.bf16 %v4827_v43, %v4826_v5  ;;  %v4855_v5 = vld [vmem:[%s7570_s1 + $0x178] sm:$0xff] }
 0x708   : > { %5517 = vmatmul.mubr.msk.f32.gmra.mrb[52].mxu0 %vm826_vm1, %v6752_v50  ;;  %v7109_v50 = vld [vmem:[%s6428_s14 + $0x20] sm:$0xff] }
 0x709   : > { %5519 = vmatprep.mubr.msk.f32.mxu0 %vm826_vm1, %v6758_v52  ;;  %v7124_v52 = vld [vmem:[%s6428_s14 + $0x38] sm:$0xff] }
 0x70c   : > { %5520 = vmatmul.mubr.msk.f32.gmra.mrb[54].mxu0 %vm826_vm1, %v6756_v40  ;;  %v7119_v40 = vld [vmem:[%s6428_s14 + $0x30] sm:$0xff] }
 0x70d   : > { %5570 = vmatprep.mubr.msk.f32.mxu0 %vm460_vm0, %v7089_v46 }
 0x710   : > { %5571 = vmatmul.mubr.msk.f32.vlgmr.msra.gmra.mrb[56].mxu0 %vm460_vm0, %v7094_v47 }
 0x711   : > { %5573 = vmatprep.mubr.msk.f32.mxu0 %vm460_vm0, %v7099_v48 }
 0x714   : > { %5574 = vmatmul.mubr.msk.f32.gmra.mrb[58].mxu0 %vm460_vm0, %v7104_v49 }
 0x715   : > { %5576 = vmatprep.mubr.msk.f32.mxu0 %vm460_vm0, %v7109_v50 }
 0x718   : > { %5577 = vmatmul.mubr.msk.f32.gmra.mrb[60].mxu0 %vm460_vm0, %v7114_v51 }
 0x719   : > { %5579 = vmatprep.mubr.msk.f32.mxu0 %vm460_vm0, %v7119_v40 }
 0x71c   : > { %5580 = vmatmul.mubr.msk.f32.gmra.mrb[62].mxu0 %vm460_vm0, %v7124_v52 }
 0x723   : > { %v2767_v42 = vpop.xlane.xlu1 %2766 }
 0x724   : > { %v2764_v10 = vpop.xlane.xlu0 %2763 }
 0x725   : > { %6222 = vrcp.f32 %v2764_v10  ;;  %v4840_v10 = vld [vmem:[%s7570_s1 + $0xf0] sm:$0xff] }
 0x726   : > { %6224 = vrcp.f32 %v2767_v42 }
 0x727   : > { %v2773_v59 = vpop.xlane.xlu1 %2772 }
 0x728   : > { %v2770_v53 = vpop.xlane.xlu0 %2769 }
 0x729   : > { %6226 = vrcp.f32 %v2770_v53 }
 0x72a   : > { %6228 = vrcp.f32 %v2773_v59 }
 0x72b   : > { %v2779_v3 = vpop.xlane.xlu1 %2778 }
 0x72c   : > { %v2776_v56 = vpop.xlane.xlu0 %2775 }
 0x72d   : > { %6230 = vrcp.f32 %v2776_v56 }
 0x72e   : > { %6232 = vrcp.f32 %v2779_v3 }
 0x72f   : > { %v6223_v21 = vpop.eup %6222  ;;  %v2785_v23 = vpop.xlane.xlu1 %2784 }
 0x730   : > { %v2794_v37 = vmul.f32 %v6223_v21, %v7021_v8  ;;  %v2782_v38 = vpop.xlane.xlu0 %2781  ;;  %v6225_v32 = vpop.eup %6224  ;;  %v4841_v21 = vld [vmem:[%s7570_s1 + $0xf8] sm:$0xff] }
 0x731   : > { %6234 = vrcp.f32 %v2782_v38  ;;  %v2795_v15 = vmul.f32 %v6225_v32, %v7019_v45 }
 0x732   : > { %5626 = vmatprep.mubr.msk.f32.mxu0 %vm988_vm3, %v2794_v37  ;;  %6236 = vrcp.f32 %v2785_v23 }
 0x733   : > { %v6227_v20 = vpop.eup %6226 }
 0x734   : > { %v6229_v16 = vpop.eup %6228  ;;  %v2796_v17 = vmul.f32 %v6227_v20, %v7029_v11 }
 0x735   : > { %v2797_v19 = vmul.f32 %v6229_v16, %v7027_v30  ;;  %v4838_v30 = vld [vmem:[%s7570_s1 + $0xe0] sm:$0xff] }
 0x737   : > { %v6231_v18 = vpop.eup %6230 }
 0x738   : > { %v6233_v39 = vpop.eup %6232  ;;  %v2798_v41 = vmul.f32 %v6231_v18, %v7037_v27  ;;  %v4839_v27 = vld [vmem:[%s7570_s1 + $0xe8] sm:$0xff] }
 0x739   : > { %v2799_v45 = vmul.f32 %v6233_v39, %v7035_v24  ;;  %v6030_v24 = vpack.c.bf16 %v4839_v27, %v4838_v30 }
 0x73b   : > { %v6235_v2 = vpop.eup %6234 }
 0x73c   : > { %v6237_v0 = vpop.eup %6236  ;;  %v2800_v11 = vmul.f32 %v6235_v2, %v7045_v33  ;;  %v4824_v33 = vld [vmem:[%s7570_s1 + $0x60] sm:$0xff] }
 0x73d   : > { %v2801_v26 = vmul.f32 %v6237_v0, %v7043_v6  ;;  %v4825_v6 = vld [vmem:[%s7570_s1 + $0x68] sm:$0xff] }
 0x73e   : > { %v6022_v31 = vpack.c.bf16 %v4825_v6, %v4824_v33  ;;  %v4852_v33 = vld [vmem:[%s7570_s1 + $0x160] sm:$0xff]  ;;  %v4854_v6 = vld [vmem:[%s7570_s1 + $0x170] sm:$0xff] }
 0x73f   : > { %v6042_v43 = vpack.c.bf16 %v4855_v5, %v4854_v6 }
 0x740   : > { %6023 = vmatprep.subr.bf16.mxu1 %v6022_v31 }
 0x741   : > { %6025 = vmatpush3.bf16.msra.mxu1 %v6022_v31  ;;  %v6038_v31 = vpack.c.bf16 %v4853_v28, %v4852_v33 }
 0x742   : > { %6027 = vmatprep.subr.bf16.mxu1 %v6026_v34 }
 0x745   : > { %6029 = vmatpush3.bf16.msra.mxu1 %v6026_v34 }
 0x746   : > { %6039 = vmatprep.subr.bf16.mxu1 %v6038_v31 }
 0x748   : > { %5661 = vmatmul.mubr.msk.f32.vlgmr.msra.gmra.mrb[56].mxu1 %vm460_vm0, %v7094_v47 }
 0x749   : > { %5663 = vmatprep.mubr.msk.f32.mxu1 %vm460_vm0, %v7099_v48  ;;  %6041 = vmatpush3.bf16.msra.mxu1 %v6038_v31 }
 0x74a   : > { %6043 = vmatprep.subr.bf16.mxu1 %v6042_v43 }
 0x74c   : > { %5664 = vmatmul.mubr.msk.f32.gmra.mrb[58].mxu1 %vm460_vm0, %v7104_v49 }
 0x74d   : > { %5666 = vmatprep.mubr.msk.f32.mxu1 %vm460_vm0, %v7109_v50  ;;  %6045 = vmatpush3.bf16.msra.mxu1 %v6042_v43 }
 0x750   : > { %5667 = vmatmul.mubr.msk.f32.gmra.mrb[60].mxu1 %vm460_vm0, %v7114_v51 }
 0x751   : > { %5669 = vmatprep.mubr.msk.f32.mxu1 %vm460_vm0, %v7119_v40 }
 0x754   : > { %5670 = vmatmul.mubr.msk.f32.gmra.mrb[62].mxu1 %vm460_vm0, %v7124_v52 }
 0x755   : > { %5700 = vmatprep.mubr.msk.f32.mxu1 %vm460_vm0, %v7089_v46 }
 0x758   : > { %5701 = vmatmul.mubr.msk.f32.vlgmr.msra.gmra.mrb[64].mxu1 %vm460_vm0, %v7094_v47 }
 0x759   : > { %5703 = vmatprep.mubr.msk.f32.mxu1 %vm460_vm0, %v7099_v48 }
 0x75c   : > { %5704 = vmatmul.mubr.msk.f32.gmra.mrb[66].mxu1 %vm460_vm0, %v7104_v49 }
 0x75d   : > { %5706 = vmatprep.mubr.msk.f32.mxu1 %vm460_vm0, %v7109_v50 }
 0x760   : > { %5707 = vmatmul.mubr.msk.f32.gmra.mrb[68].mxu1 %vm460_vm0, %v7114_v51 }
 0x761   : > { %5709 = vmatprep.mubr.msk.f32.mxu1 %vm460_vm0, %v7119_v40 }
 0x764   : > { %5710 = vmatmul.mubr.msk.f32.gmra.mrb[70].mxu1 %vm460_vm0, %v7124_v52 }
 0x7e3   : > { %v5572_v35 = vpop.f32.mrb[56].mxu0 }
 0x7e4   : > { %v2520_v55 = vadd.f32 %v5572_v35, %v4782_v44  ;;  %v2514_v57 = vpop.f32.mrb[57].mxu0 }
 0x7e5   : > { %v2515_v58 = vadd.f32 %v4782_v44, %v2514_v57 }
 0x7e7   : > { %v6006_v13 = vpack.c.bf16 %v2520_v55, %v2515_v58  ;;  %v5575_v60 = vpop.f32.mrb[58].mxu0 }
 0x7e8   : > { %v2530_v61 = vadd.f32 %v5575_v60, %v4782_v44  ;;  %v2524_v62 = vpop.f32.mrb[59].mxu0  ;;  %v4829_v60 = vld [vmem:[%s7571_s2 + $0x3] ss:$0 sm:$0xff] }
 0x7e9   : > { %v2525_v54 = vadd.f32 %v4782_v44, %v2524_v62  ;;  %6007 = vmatprep.subr.bf16.mxu0 %v6006_v13 }
 0x7ea   : > { %6009 = vmatpush3.bf16.msra.mxu0 %v6006_v13 }
 0x7eb   : > { %v6010_v63 = vpack.c.bf16 %v2530_v61, %v2525_v54  ;;  %v5578_v1 = vpop.f32.mrb[60].mxu0 }
 0x7ec   : > { %v2540_v25 = vadd.f32 %v5578_v1, %v4782_v44  ;;  %v2534_v12 = vpop.f32.mrb[61].mxu0 }
 0x7ed   : > { %v2535_v14 = vadd.f32 %v4782_v44, %v2534_v12  ;;  %6011 = vmatprep.subr.bf16.mxu0 %v6010_v63 }
 0x7ee   : > { %6013 = vmatpush3.bf16.msra.mxu0 %v6010_v63 }
 0x7ef   : > { %v6014_v7 = vpack.c.bf16 %v2540_v25, %v2535_v14  ;;  %v5581_v8 = vpop.f32.mrb[62].mxu0 }
 0x7f0   : > { %v2550_v9 = vadd.f32 %v5581_v8, %v4782_v44  ;;  %v2544_v22 = vpop.f32.mrb[63].mxu0 }
 0x7f1   : > { %v2545_v4 = vadd.f32 %v4782_v44, %v2544_v22  ;;  %6015 = vmatprep.subr.bf16.mxu0 %v6014_v7  ;;  %v6034_v44 = vpack.c.bf16 %v4841_v21, %v4840_v10 }
 0x7f2   : > { %6017 = vmatpush3.bf16.msra.mxu0 %v6014_v7 }
 0x7f3   : > { %v6018_v29 = vpack.c.bf16 %v2550_v9, %v2545_v4  ;;  %v4843_v4 = vld [vmem:[%s7571_s2 + $0x7] ss:$0 sm:$0xff] }
 0x7f5   : > { %6019 = vmatprep.subr.bf16.mxu0 %v6018_v29 }
 0x7f6   : > { %6021 = vmatpush3.bf16.msra.mxu0 %v6018_v29 }
 0x7f7   : > { %5638 = vmatprep.subr.mxu0 %v4815_v36 }
 0x7f9   : > { %5627 = vmatmul.mubr.msk.f32.vlgmr.msra.gmra.mrb[64].mxu0 %vm988_vm3, %v2795_v15 }
 0x7fa   : > { %5629 = vmatprep.mubr.msk.f32.mxu0 %vm988_vm3, %v2796_v17  ;;  %5639 = vmatpush3.msra.mxu0 %v4815_v36 }
 0x7fb   : > { %6031 = vmatprep.subr.bf16.mxu0 %v6030_v24 }
 0x7fd   : > { %5630 = vmatmul.mubr.msk.f32.gmra.mrb[66].mxu0 %vm988_vm3, %v2797_v19 }
 0x7fe   : > { %5632 = vmatprep.mubr.msk.f32.mxu0 %vm988_vm3, %v2798_v41 }
 0x801   : > { %5633 = vmatmul.mubr.msk.f32.gmra.mrb[68].mxu0 %vm988_vm3, %v2799_v45 }
 0x802   : > { %5635 = vmatprep.mubr.msk.f32.mxu0 %vm988_vm3, %v2800_v11 }
 0x805   : > { %5636 = vmatmul.mubr.msk.f32.gmra.mrb[70].mxu0 %vm988_vm3, %v2801_v26 }
 0x81b   : > { %v5662_v13 = vpop.f32.mrb[56].mxu1 }
 0x81c   : > { %v3155_v61 = vadd.f32 %v5662_v13, %v4829_v60  ;;  %v3149_v62 = vpop.f32.mrb[57].mxu1 }
 0x81d   : > { %v3150_v54 = vadd.f32 %v4829_v60, %v3149_v62 }
 0x81f   : > { %v5665_v56 = vpop.f32.mrb[58].mxu1 }
 0x820   : > { %v3165_v63 = vadd.f32 %v5665_v56, %v4829_v60  ;;  %v3159_v1 = vpop.f32.mrb[59].mxu1 }
 0x821   : > { %v3160_v25 = vadd.f32 %v4829_v60, %v3159_v1 }
 0x823   : > { %v5668_v12 = vpop.f32.mrb[60].mxu1 }
 0x824   : > { %v3175_v3 = vadd.f32 %v5668_v12, %v4829_v60  ;;  %v3169_v14 = vpop.f32.mrb[61].mxu1 }
 0x825   : > { %v3170_v7 = vadd.f32 %v4829_v60, %v3169_v14 }
 0x827   : > { %v5671_v8 = vpop.f32.mrb[62].mxu1 }
 0x828   : > { %v3185_v38 = vadd.f32 %v5671_v8, %v4829_v60  ;;  %v3179_v9 = vpop.f32.mrb[63].mxu1 }
 0x829   : > { %v3180_v22 = vadd.f32 %v4829_v60, %v3179_v9 }
 0x82b   : > { %v5702_v8 = vpop.f32.mrb[64].mxu1 }
 0x82c   : > { %v3385_v9 = vpop.f32.mrb[65].mxu1 }
 0x8cc   : > { %v5628_v37 = vpop.f32.mrb[64].mxu0 }
 0x8cd   : > { %v2892_v42 = vpop.f32.mrb[65].mxu0 }
 0x8ce   : > { %5640 = vmatprep.mubr.msk.f32.mxu0 %vm826_vm1, %v2892_v42 }
 0x8cf   : > { %5641 = vmatmul.mubr.msk.f32.vlgmr.msra.gmra.mrb[48].mxu0 %vm826_vm1, %v5628_v37 }
 0x8d0   : > { %v5631_v35 = vpop.f32.mrb[66].mxu0  ;;  %6033 = vmatpush3.bf16.msra.mxu0 %v6030_v24 }
 0x8d1   : > { %v2902_v53 = vpop.f32.mrb[67].mxu0  ;;  %6035 = vmatprep.subr.bf16.mxu0 %v6034_v44 }
 0x8d2   : > { %5643 = vmatprep.mubr.msk.f32.mxu0 %vm826_vm1, %v2902_v53 }
 0x8d3   : > { %5644 = vmatmul.mubr.msk.f32.gmra.mrb[50].mxu0 %vm826_vm1, %v5631_v35 }
 0x8d4   : > { %v5634_v55 = vpop.f32.mrb[68].mxu0  ;;  %6037 = vmatpush3.bf16.msra.mxu0 %v6034_v44 }
 0x8d5   : > { %v2912_v57 = vpop.f32.mrb[69].mxu0 }
 0x8d6   : > { %5646 = vmatprep.mubr.msk.f32.mxu0 %vm826_vm1, %v2912_v57 }
 0x8d7   : > { %5647 = vmatmul.mubr.msk.f32.gmra.mrb[52].mxu0 %vm826_vm1, %v5634_v55 }
 0x8d8   : > { %v5637_v58 = vpop.f32.mrb[70].mxu0 }
 0x8d9   : > { %v2922_v59 = vpop.f32.mrb[71].mxu0 }
 0x8da   : > { %5649 = vmatprep.mubr.msk.f32.mxu0 %vm826_vm1, %v2922_v59 }
 0x8db   : > { %5650 = vmatmul.mubr.msk.f32.gmra.mrb[54].mxu0 %vm826_vm1, %v5637_v58 }
 0x8dc   : > { %5680 = vmatprep.mubr.msk.f32.mxu0 %vm460_vm0, %v7089_v46 }
 0x8df   : > { %5681 = vmatmul.mubr.msk.f32.vlgmr.msra.gmra.mrb[72].mxu0 %vm460_vm0, %v7094_v47 }
 0x8e0   : > { %5683 = vmatprep.mubr.msk.f32.mxu0 %vm460_vm0, %v7099_v48 }
 0x8e3   : > { %5684 = vmatmul.mubr.msk.f32.gmra.mrb[74].mxu0 %vm460_vm0, %v7104_v49 }
 0x8e4   : > { %5686 = vmatprep.mubr.msk.f32.mxu0 %vm460_vm0, %v7109_v50 }
 0x8e7   : > { %5687 = vmatmul.mubr.msk.f32.gmra.mrb[76].mxu0 %vm460_vm0, %v7114_v51 }
 0x8e8   : > { %5689 = vmatprep.mubr.msk.f32.mxu0 %vm460_vm0, %v7119_v40 }
 0x8eb   : > { %5690 = vmatmul.mubr.msk.f32.gmra.mrb[78].mxu0 %vm460_vm0, %v7124_v52 }
 0x8ec   : > { %5728 = vmatprep.mubr.msk.f32.mxu0 %vm826_vm1, %v3150_v54 }
 0x9b2   : > { %v5682_v23 = vpop.f32.mrb[72].mxu0 }
 0x9b3   : > { %v3273_v29 = vadd.f32 %v5682_v23, %v4843_v4  ;;  %v3267_v32 = vpop.f32.mrb[73].mxu0  ;;  %v5705_v23 = vpop.f32.mrb[66].mxu1 }
 0x9b4   : > { %v3268_v36 = vadd.f32 %v4843_v4, %v3267_v32  ;;  %v3395_v32 = vpop.f32.mrb[67].mxu1 }
 0x9b6   : > { %v6046_v20 = vpack.c.bf16 %v3273_v29, %v3268_v36  ;;  %v5685_v15 = vpop.f32.mrb[74].mxu0 }
 0x9b7   : > { %v3283_v16 = vadd.f32 %v5685_v15, %v4843_v4  ;;  %v3277_v17 = vpop.f32.mrb[75].mxu0  ;;  %v5708_v15 = vpop.f32.mrb[68].mxu1 }
 0x9b8   : > { %6048 = vmatprep.subr.msk.bf16.mxu0 %vm6496_vm2, %v6046_v20  ;;  %v3278_v18 = vadd.f32 %v4843_v4, %v3277_v17 }
 0x9b9   : > { %6051 = vmatpush3.bf16.xpose.msk.msra.mxu0 %vm6496_vm2, %v6046_v20 }
 0x9ba   : > { %v6052_v19 = vpack.c.bf16 %v3283_v16, %v3278_v18  ;;  %v5688_v39 = vpop.f32.mrb[76].mxu0 }
 0x9bb   : > { %v3293_v41 = vadd.f32 %v5688_v39, %v4843_v4  ;;  %v3287_v2 = vpop.f32.mrb[77].mxu0 }
 0x9bc   : > { %6054 = vmatprep.subr.msk.bf16.mxu0 %vm6496_vm2, %v6052_v19  ;;  %v3288_v45 = vadd.f32 %v4843_v4, %v3287_v2 }
 0x9be   : > { %v6058_v0 = vpack.c.bf16 %v3293_v41, %v3288_v45  ;;  %v5691_v11 = vpop.f32.mrb[78].mxu0 }
 0x9bf   : > { %v3303_v26 = vadd.f32 %v5691_v11, %v4843_v4  ;;  %v3297_v30 = vpop.f32.mrb[79].mxu0 }
 0x9c0   : > { %v3298_v27 = vadd.f32 %v4843_v4, %v3297_v30 }
 0x9c1   : > { %6057 = vmatpush3.bf16.xpose.msk.msra.mxu0 %vm6496_vm2, %v6052_v19 }
 0x9c2   : > { %6060 = vmatprep.subr.msk.bf16.mxu0 %vm6496_vm2, %v6058_v0  ;;  %v6064_v24 = vpack.c.bf16 %v3303_v26, %v3298_v27 }
 0x9c9   : > { %6063 = vmatpush3.bf16.xpose.msk.msra.mxu0 %vm6496_vm2, %v6058_v0 }
 0x9ca   : > { %6066 = vmatprep.subr.msk.bf16.mxu0 %vm6496_vm2, %v6064_v24 }
 0x9d1   : > { %6069 = vmatpush3.bf16.xpose.msk.msra.mxu0 %vm6496_vm2, %v6064_v24 }
 0x9d8   : > { %5729 = vmatmul.mubr.msk.f32.vlgmr.msra.gmra.mrb[80].mxu0 %vm826_vm1, %v3155_v61 }
 0x9d9   : > { %5731 = vmatprep.mubr.msk.f32.mxu0 %vm826_vm1, %v3160_v25 }
 0x9dc   : > { %5732 = vmatmul.mubr.msk.f32.gmra.mrb[82].mxu0 %vm826_vm1, %v3165_v63 }
 0x9dd   : > { %5734 = vmatprep.mubr.msk.f32.mxu0 %vm826_vm1, %v3170_v7  ;;  %v7281_v7 = vld [vmem:[%s7571_s2 + $0xb] ss:$0 sm:$0xff] }
 0x9de   : > { %v3401_v29 = vadd.f32 %v5705_v23, %v7281_v7  ;;  %v3396_v36 = vadd.f32 %v7281_v7, %v3395_v32  ;;  %v4890_v23 = vld [vmem:[%s7572_s3 + $0x18] sm:$0xff] }
 0x9df   : > { %5768 = vmatprep.subr.mxu0 %v4890_v23 }
 0x9e0   : > { %5735 = vmatmul.mubr.msk.f32.gmra.mrb[84].mxu0 %vm826_vm1, %v3175_v3  ;;  %v6074_v20 = vpack.c.bf16 %v3401_v29, %v3396_v36 }
 0x9e1   : > { %5737 = vmatprep.mubr.msk.f32.mxu0 %vm826_vm1, %v3180_v22  ;;  %v3386_v22 = vadd.f32 %v7281_v7, %v3385_v9  ;;  %5769 = vmatpush3.msra.mxu0 %v4890_v23 }
 0x9e4   : > { %5738 = vmatmul.mubr.msk.f32.gmra.mrb[86].mxu0 %vm826_vm1, %v3185_v38  ;;  %v3391_v38 = vadd.f32 %v5702_v8, %v7281_v7 }
 0x9e6   : > { %v6070_v4 = vpack.c.bf16 %v3391_v38, %v3386_v22 }
 0x9e8   : > { %6071 = vmatprep.subr.bf16.mxu1 %v6070_v4 }
 0x9e9   : > { %6073 = vmatpush3.bf16.msra.mxu1 %v6070_v4 }
 0x9ea   : > { %6075 = vmatprep.subr.bf16.mxu1 %v6074_v20 }
 0x9ed   : > { %6077 = vmatpush3.bf16.msra.mxu1 %v6074_v20 }
 0xaab   : > { %v5730_v34 = vpop.f32.mrb[80].mxu0 }
 0xaac   : > { %v3578_v10 = vmul.f32 0.35355338, %v5730_v34  ;;  %v3538_v21 = vpop.f32.mrb[81].mxu0 }
 0xaad   : > { %v3577_v37 = vmul.f32 0.35355338, %v3538_v21 }
 0xaae   : > { %v3588_v42 = vsel %vm988_vm3, %v3578_v10, -inf }
 0xaaf   : > { %3589 = vmax.xlane.f32.xlu1 %v3588_v42  ;;  %v5733_v44 = vpop.f32.mrb[82].mxu0  ;;  %v3585_v35 = vsel %vm988_vm3, %v3577_v37, -inf }
 0xab0   : > { %v3580_v53 = vmul.f32 0.35355338, %v5733_v44  ;;  %3586 = vmax.xlane.f32.xlu0 %v3585_v35  ;;  %v3548_v55 = vpop.f32.mrb[83].mxu0 }
 0xab1   : > { %v3579_v57 = vmul.f32 0.35355338, %v3548_v55 }
 0xab2   : > { %v3594_v58 = vsel %vm988_vm3, %v3580_v53, -inf }
 0xab3   : > { %3595 = vmax.xlane.f32.xlu1 %v3594_v58  ;;  %v5736_v59 = vpop.f32.mrb[84].mxu0  ;;  %v3591_v13 = vsel %vm988_vm3, %v3579_v57, -inf }
 0xab4   : > { %v3582_v60 = vmul.f32 0.35355338, %v5736_v59  ;;  %3592 = vmax.xlane.f32.xlu0 %v3591_v13  ;;  %v3558_v61 = vpop.f32.mrb[85].mxu0 }
 0xab5   : > { %v3581_v62 = vmul.f32 0.35355338, %v3558_v61 }
 0xab6   : > { %v3600_v54 = vsel %vm988_vm3, %v3582_v60, -inf }
 0xab7   : > { %3601 = vmax.xlane.f32.xlu1 %v3600_v54  ;;  %v5739_v56 = vpop.f32.mrb[86].mxu0  ;;  %v3597_v63 = vsel %vm988_vm3, %v3581_v62, -inf }
 0xab8   : > { %v3584_v1 = vmul.f32 0.35355338, %v5739_v56  ;;  %3598 = vmax.xlane.f32.xlu0 %v3597_v63  ;;  %v3568_v25 = vpop.f32.mrb[87].mxu0 }
 0xab9   : > { %v3583_v12 = vmul.f32 0.35355338, %v3568_v25  ;;  %v3411_v25 = vadd.f32 %v5708_v15, %v7281_v7 }
 0xaba   : > { %v3606_v3 = vsel %vm988_vm3, %v3584_v1, -inf }
 0xabb   : > { %3607 = vmax.xlane.f32.xlu1 %v3606_v3  ;;  %v3603_v14 = vsel %vm988_vm3, %v3583_v12, -inf }
 0xabc   : > { %3604 = vmax.xlane.f32.xlu0 %v3603_v14 }
 0xb3c   : > { %v3590_v16 = vpop.xlane.xlu1 %3589 }
 0xb3d   : > { %v3610_v17 = vsub.f32 %v3578_v10, %v3590_v16  ;;  %v3587_v18 = vpop.xlane.xlu0 %3586 }
 0xb3e   : > { %v3609_v19 = vsub.f32 %v3577_v37, %v3587_v18 }
 0xb3f   : > { %v3619_v39 = vmul.f32 1.442695, %v3610_v17 }
 0xb40   : > { %v3617_v41 = vmul.f32 1.442695, %v3609_v19  ;;  %v3596_v2 = vpop.xlane.xlu1 %3595 }
 0xb41   : > { %6238 = vpow2.f32 %v3619_v39  ;;  %v3612_v45 = vsub.f32 %v3580_v53, %v3596_v2  ;;  %v3593_v0 = vpop.xlane.xlu0 %3592 }
 0xb42   : > { %6240 = vpow2.f32 %v3617_v41  ;;  %v3611_v11 = vsub.f32 %v3579_v57, %v3593_v0 }
 0xb43   : > { %v3623_v26 = vmul.f32 1.442695, %v3612_v45 }
 0xb44   : > { %v3621_v30 = vmul.f32 1.442695, %v3611_v11  ;;  %v3602_v27 = vpop.xlane.xlu1 %3601 }
 0xb45   : > { %6242 = vpow2.f32 %v3623_v26  ;;  %v3614_v24 = vsub.f32 %v3582_v60, %v3602_v27  ;;  %v3599_v33 = vpop.xlane.xlu0 %3598 }
 0xb46   : > { %6244 = vpow2.f32 %v3621_v30  ;;  %v3613_v28 = vsub.f32 %v3581_v62, %v3599_v33 }
 0xb47   : > { %v3627_v6 = vmul.f32 1.442695, %v3614_v24 }
 0xb48   : > { %v3625_v31 = vmul.f32 1.442695, %v3613_v28  ;;  %v3608_v5 = vpop.xlane.xlu1 %3607 }
 0xb49   : > { %6246 = vpow2.f32 %v3627_v6  ;;  %v3616_v43 = vsub.f32 %v3584_v1, %v3608_v5  ;;  %v3605_v34 = vpop.xlane.xlu0 %3604 }
 0xb4a   : > { %6248 = vpow2.f32 %v3625_v31  ;;  %v3615_v10 = vsub.f32 %v3583_v12, %v3605_v34  ;;  %v3405_v12 = vpop.f32.mrb[69].mxu1 }
 0xb4b   : > { %v6239_v21 = vpop.eup %6238  ;;  %v3631_v37 = vmul.f32 1.442695, %v3616_v43  ;;  %v3406_v3 = vadd.f32 %v7281_v7, %v3405_v12  ;;  %v5711_v8 = vpop.f32.mrb[70].mxu1 }
 0xb4c   : > { %v6241_v42 = vpop.eup %6240  ;;  %v3629_v44 = vmul.f32 1.442695, %v3615_v10  ;;  %v3636_v35 = vsel %vm988_vm3, %v6239_v21, 0.0  ;;  %v3415_v38 = vpop.f32.mrb[71].mxu1  ;;  %v3421_v9 = vadd.f32 %v5711_v8, %v7281_v7 }
 0xb4d   : > { %6250 = vpow2.f32 %v3631_v37  ;;  %3637 = vadd.xlane.f32.xlu1 %v3636_v35  ;;  %v3633_v53 = vsel %vm988_vm3, %v6241_v42, 0.0  ;;  %v6078_v14 = vpack.c.bf16 %v3411_v25, %v3406_v3  ;;  %v3416_v22 = vadd.f32 %v7281_v7, %v3415_v38  ;;  %v4899_v35 = vld [vmem:[%s7573_s4] ss:$0 sm:$0xff] }
 0xb4e   : > { %6252 = vpow2.f32 %v3629_v44  ;;  %3634 = vadd.xlane.f32.xlu0 %v3633_v53 }
 0xb4f   : > { %v6243_v55 = vpop.eup %6242  ;;  %6079 = vmatprep.subr.bf16.mxu1 %v6078_v14  ;;  %v6082_v4 = vpack.c.bf16 %v3421_v9, %v3416_v22 }
 0xb50   : > { %v6245_v57 = vpop.eup %6244  ;;  %v3642_v58 = vsel %vm988_vm3, %v6243_v55, 0.0  ;;  %6081 = vmatpush3.bf16.msra.mxu1 %v6078_v14 }
 0xb51   : > { %3643 = vadd.xlane.f32.xlu1 %v3642_v58  ;;  %v3639_v59 = vsel %vm988_vm3, %v6245_v57, 0.0  ;;  %6083 = vmatprep.subr.bf16.mxu1 %v6082_v4 }
 0xb52   : > { %3640 = vadd.xlane.f32.xlu0 %v3639_v59 }
 0xb53   : > { %v6247_v13 = vpop.eup %6246 }
 0xb54   : > { %v6249_v60 = vpop.eup %6248  ;;  %v3648_v61 = vsel %vm988_vm3, %v6247_v13, 0.0  ;;  %6085 = vmatpush3.bf16.msra.mxu1 %v6082_v4 }
 0xb55   : > { %3649 = vadd.xlane.f32.xlu1 %v3648_v61  ;;  %v3645_v62 = vsel %vm988_vm3, %v6249_v60, 0.0 }
 0xb56   : > { %3646 = vadd.xlane.f32.xlu0 %v3645_v62 }
 0xb57   : > { %v6251_v54 = vpop.eup %6250 }
 0xb58   : > { %v6253_v56 = vpop.eup %6252  ;;  %v3654_v63 = vsel %vm988_vm3, %v6251_v54, 0.0 }
 0xb59   : > { %3655 = vadd.xlane.f32.xlu1 %v3654_v63  ;;  %v3651_v1 = vsel %vm988_vm3, %v6253_v56, 0.0 }
 0xb5a   : > { %3652 = vadd.xlane.f32.xlu0 %v3651_v1 }
 0xbda   : > { %v3638_v29 = vpop.xlane.xlu1 %3637 }
 0xbdb   : > { %6254 = vrcp.f32 %v3638_v29  ;;  %v3635_v32 = vpop.xlane.xlu0 %3634 }
 0xbdc   : > { %6256 = vrcp.f32 %v3635_v32 }
 0xbde   : > { %v3644_v36 = vpop.xlane.xlu1 %3643 }
 0xbdf   : > { %6258 = vrcp.f32 %v3644_v36  ;;  %v3641_v20 = vpop.xlane.xlu0 %3640 }
 0xbe0   : > { %6260 = vrcp.f32 %v3641_v20 }
 0xbe2   : > { %v3650_v7 = vpop.xlane.xlu1 %3649 }
 0xbe3   : > { %6262 = vrcp.f32 %v3650_v7  ;;  %v3647_v15 = vpop.xlane.xlu0 %3646 }
 0xbe4   : > { %6264 = vrcp.f32 %v3647_v15 }
 0xbe5   : > { %v6255_v16 = vpop.eup %6254 }
 0xbe6   : > { %v6257_v17 = vpop.eup %6256  ;;  %v3656_v18 = vpop.xlane.xlu1 %3655  ;;  %v3666_v41 = vmul.f32 %v6255_v16, %v6239_v21 }
 0xbe7   : > { %6266 = vrcp.f32 %v3656_v18  ;;  %v3653_v19 = vpop.xlane.xlu0 %3652  ;;  %v3665_v39 = vmul.f32 %v6257_v17, %v6241_v42 }
 0xbe8   : > { %6268 = vrcp.f32 %v3653_v19 }
 0xbe9   : > { %v6259_v2 = vpop.eup %6258  ;;  %5756 = vmatprep.mubr.msk.f32.mxu1 %vm988_vm3, %v3665_v39 }
 0xbea   : > { %v6261_v45 = vpop.eup %6260  ;;  %5757 = vmatmul.mubr.msk.f32.vlgmr.msra.gmra.mrb[72].mxu1 %vm988_vm3, %v3666_v41  ;;  %v3668_v11 = vmul.f32 %v6259_v2, %v6243_v55 }
 0xbeb   : > { %v3667_v0 = vmul.f32 %v6261_v45, %v6245_v57 }
 0xbed   : > { %v6263_v26 = vpop.eup %6262  ;;  %5759 = vmatprep.mubr.msk.f32.mxu1 %vm988_vm3, %v3667_v0 }
 0xbee   : > { %v6265_v30 = vpop.eup %6264  ;;  %5760 = vmatmul.mubr.msk.f32.gmra.mrb[74].mxu1 %vm988_vm3, %v3668_v11  ;;  %v3670_v24 = vmul.f32 %v6263_v26, %v6247_v13 }
 0xbef   : > { %v3669_v27 = vmul.f32 %v6265_v30, %v6249_v60 }
 0xbf1   : > { %v6267_v33 = vpop.eup %6266  ;;  %5762 = vmatprep.mubr.msk.f32.mxu1 %vm988_vm3, %v3669_v27 }
 0xbf2   : > { %v6269_v28 = vpop.eup %6268  ;;  %5763 = vmatmul.mubr.msk.f32.gmra.mrb[76].mxu1 %vm988_vm3, %v3670_v24  ;;  %v3672_v31 = vmul.f32 %v6267_v33, %v6251_v54 }
 0xbf3   : > { %v3671_v6 = vmul.f32 %v6269_v28, %v6253_v56 }
 0xbf5   : > { %5765 = vmatprep.mubr.msk.f32.mxu1 %vm988_vm3, %v3671_v6 }
 0xbf6   : > { %5766 = vmatmul.mubr.msk.f32.gmra.mrb[78].mxu1 %vm988_vm3, %v3672_v31 }
 0xcbd   : > { %v5758_v5 = vpop.f32.mrb[72].mxu1 }
 0xcbe   : > { %v3763_v43 = vpop.f32.mrb[73].mxu1 }
 0xcbf   : > { %5770 = vmatprep.mubr.msk.f32.mxu0 %vm826_vm1, %v3763_v43 }
 0xcc0   : > { %5771 = vmatmul.mubr.msk.f32.vlgmr.msra.gmra.mrb[48].mxu0 %vm826_vm1, %v5758_v5 }
 0xcc1   : > { %v5761_v34 = vpop.f32.mrb[74].mxu1 }
 0xcc2   : > { %v3773_v10 = vpop.f32.mrb[75].mxu1 }
 0xcc3   : > { %5773 = vmatprep.mubr.msk.f32.mxu0 %vm826_vm1, %v3773_v10 }
 0xcc4   : > { %5774 = vmatmul.mubr.msk.f32.gmra.mrb[50].mxu0 %vm826_vm1, %v5761_v34 }
 0xcc5   : > { %v5764_v21 = vpop.f32.mrb[76].mxu1 }
 0xcc6   : > { %v3783_v37 = vpop.f32.mrb[77].mxu1 }
 0xcc7   : > { %5776 = vmatprep.mubr.msk.f32.mxu0 %vm826_vm1, %v3783_v37 }
 0xcc8   : > { %5777 = vmatmul.mubr.msk.f32.gmra.mrb[52].mxu0 %vm826_vm1, %v5764_v21 }
 0xcc9   : > { %v5767_v42 = vpop.f32.mrb[78].mxu1 }
 0xcca   : > { %v3793_v44 = vpop.f32.mrb[79].mxu1 }
 0xccb   : > { %5779 = vmatprep.mubr.msk.f32.mxu0 %vm826_vm1, %v3793_v44 }
 0xccc   : > { %5780 = vmatmul.mubr.msk.f32.gmra.mrb[54].mxu0 %vm826_vm1, %v5767_v42 }
 0xd93   : > { %v5772_v53 = vpop.f32.mrb[48].mxu0 }
 0xd94   : > { %v3949_v55 = vadd.f32 %v5772_v53, %v4899_v35  ;;  %v3894_v57 = vpop.f32.mrb[49].mxu0 }
 0xd95   : > { %v3948_v58 = vadd.f32 %v4899_v35, %v3894_v57 }
 0xd96   : > { %v3957_v59 = vadd.f32 %v7094_v47, %v3949_v55 }
 0xd97   : > { %v5775_v13 = vpop.f32.mrb[50].mxu0  ;;  %v3956_v60 = vadd.f32 %v7089_v46, %v3948_v58 }
 0xd98   : > { %v3951_v61 = vadd.f32 %v5775_v13, %v4899_v35  ;;  %v3904_v62 = vpop.f32.mrb[51].mxu0  ;;  %v3967_v54 = vsel %vm460_vm0, %v3957_v59, 0.0 }
 0xd99   : > { %v3950_v56 = vadd.f32 %v4899_v35, %v3904_v62  ;;  %3968 = vadd.xlane.f32.xlu1 %v3967_v54  ;;  %v3964_v63 = vsel %vm460_vm0, %v3956_v60, 0.0  ;;  %v4099_v62 = vld [vmem:[%s7576_s7] sm:$0xff]  ;;  %v4100_v54 = vld [vmem:[%s7576_s7 + $0x8] sm:$0xff] }
 0xd9a   : > { %3965 = vadd.xlane.f32.xlu0 %v3964_v63  ;;  %v3959_v1 = vadd.f32 %v7104_v49, %v3951_v61  ;;  %v4101_v63 = vld [vmem:[%s7576_s7 + $0x10] sm:$0xff] }
 0xd9b   : > { %v5778_v25 = vpop.f32.mrb[52].mxu0  ;;  %v3958_v12 = vadd.f32 %v7099_v48, %v3950_v56  ;;  %v6086_v56 = vpack.c.bf16 %v4100_v54, %v4099_v62 }
 0xd9c   : > { %v3953_v3 = vadd.f32 %v5778_v25, %v4899_v35  ;;  %v3914_v14 = vpop.f32.mrb[53].mxu0  ;;  %v3973_v47 = vsel %vm460_vm0, %v3959_v1, 0.0 }
 0xd9d   : > { %v3952_v8 = vadd.f32 %v4899_v35, %v3914_v14  ;;  %3974 = vadd.xlane.f32.xlu1 %v3973_v47  ;;  %v3970_v46 = vsel %vm460_vm0, %v3958_v12, 0.0  ;;  %6087 = vmatprep.subr.bf16.mxu1 %v6086_v56 }
 0xd9e   : > { %3971 = vadd.xlane.f32.xlu0 %v3970_v46  ;;  %v3961_v38 = vadd.f32 %v7114_v51, %v3953_v3  ;;  %6089 = vmatpush3.bf16.msra.mxu1 %v6086_v56  ;;  %v4248_v3 = vld [vmem:[%s7578_s9 + $0x8] sm:$0xff] }
 0xd9f   : > { %v5781_v9 = vpop.f32.mrb[54].mxu0  ;;  %v3960_v22 = vadd.f32 %v7109_v50, %v3952_v8 }
 0xda0   : > { %v3955_v4 = vadd.f32 %v5781_v9, %v4899_v35  ;;  %v3924_v23 = vpop.f32.mrb[55].mxu0  ;;  %v3979_v49 = vsel %vm460_vm0, %v3961_v38, 0.0 }
 0xda1   : > { %v3954_v29 = vadd.f32 %v4899_v35, %v3924_v23  ;;  %3980 = vadd.xlane.f32.xlu1 %v3979_v49  ;;  %v3976_v48 = vsel %vm460_vm0, %v3960_v22, 0.0 }
 0xda2   : > { %3977 = vadd.xlane.f32.xlu0 %v3976_v48  ;;  %v3963_v32 = vadd.f32 %v7124_v52, %v3955_v4 }
 0xda3   : > { %v3962_v36 = vadd.f32 %v7119_v40, %v3954_v29 }
 0xda4   : > { %v3985_v20 = vsel %vm460_vm0, %v3963_v32, 0.0 }
 0xda5   : > { %3986 = vadd.xlane.f32.xlu1 %v3985_v20  ;;  %v3982_v51 = vsel %vm460_vm0, %v3962_v36, 0.0 }
 0xda6   : > { %3983 = vadd.xlane.f32.xlu0 %v3982_v51 }
 0xe26   : > { %v3969_v50 = vpop.xlane.xlu1 %3968 }
 0xe27   : > { %v3990_v7 = vmul.f32 0.03125, %v3969_v50  ;;  %v3966_v15 = vpop.xlane.xlu0 %3965 }
 0xe28   : > { %v3989_v16 = vmul.f32 0.03125, %v3966_v15 }
 0xe29   : > { %v7337_v17 = vsub.f32 %v3957_v59, %v3990_v7 }
 0xe2a   : > { %v7339_v18 = vsub.f32 %v3956_v60, %v3989_v16  ;;  %v3975_v19 = vpop.xlane.xlu1 %3974 }
 0xe2b   : > { %v3992_v39 = vmul.f32 0.03125, %v3975_v19  ;;  %v3972_v41 = vpop.xlane.xlu0 %3971  ;;  %v4006_v40 = vmul.f32 %v7337_v17, %v7337_v17 }
 0xe2c   : > { %v3991_v52 = vmul.f32 0.03125, %v3972_v41  ;;  %v4005_v2 = vmul.f32 %v7339_v18, %v7339_v18 }
 0xe2d   : > { %v7345_v45 = vsub.f32 %v3959_v1, %v3992_v39  ;;  %v4016_v0 = vsel %vm460_vm0, %v4006_v40, 0.0  ;;  %v4102_v1 = vld [vmem:[%s7576_s7 + $0x18] sm:$0xff] }
 0xe2e   : > { %v7348_v11 = vsub.f32 %v3958_v12, %v3991_v52  ;;  %v3981_v26 = vpop.xlane.xlu1 %3980  ;;  %4017 = vadd.xlane.f32.xlu1 %v4016_v0  ;;  %v4013_v30 = vsel %vm460_vm0, %v4005_v2, 0.0  ;;  %v6090_v25 = vpack.c.bf16 %v4102_v1, %v4101_v63  ;;  %v4247_v12 = vld [vmem:[%s7578_s9] sm:$0xff] }
 0xe2f   : > { %v3994_v27 = vmul.f32 0.03125, %v3981_v26  ;;  %4014 = vadd.xlane.f32.xlu0 %v4013_v30  ;;  %v3978_v24 = vpop.xlane.xlu0 %3977  ;;  %v4008_v33 = vmul.f32 %v7345_v45, %v7345_v45  ;;  %v6094_v14 = vpack.c.bf16 %v4248_v3, %v4247_v12  ;;  %v4900_v52 = vld [vmem:[%s7574_s5] ss:$0 sm:$0xff] }
 0xe30   : > { %v3993_v28 = vmul.f32 0.03125, %v3978_v24  ;;  %v4007_v6 = vmul.f32 %v7348_v11, %v7348_v11  ;;  %6091 = vmatprep.subr.bf16.mxu1 %v6090_v25  ;;  %v4901_v24 = vld [vmem:[%s7575_s6] ss:$0 sm:$0xff] }
 0xe31   : > { %v7355_v31 = vsub.f32 %v3961_v38, %v3994_v27  ;;  %v4022_v5 = vsel %vm460_vm0, %v4008_v33, 0.0  ;;  %6093 = vmatpush3.bf16.msra.mxu1 %v6090_v25 }
 0xe32   : > { %v7358_v43 = vsub.f32 %v3960_v22, %v3993_v28  ;;  %4023 = vadd.xlane.f32.xlu1 %v4022_v5  ;;  %v3987_v34 = vpop.xlane.xlu1 %3986  ;;  %v4019_v10 = vsel %vm460_vm0, %v4007_v6, 0.0  ;;  %6095 = vmatprep.subr.bf16.mxu1 %v6094_v14  ;;  %v4249_v5 = vld [vmem:[%s7578_s9 + $0x10] sm:$0xff] }
 0xe33   : > { %v3996_v21 = vmul.f32 0.03125, %v3987_v34  ;;  %4020 = vadd.xlane.f32.xlu0 %v4019_v10  ;;  %v3984_v37 = vpop.xlane.xlu0 %3983  ;;  %v4010_v42 = vmul.f32 %v7355_v31, %v7355_v31 }
 0xe34   : > { %v3995_v44 = vmul.f32 0.03125, %v3984_v37  ;;  %v4009_v35 = vmul.f32 %v7358_v43, %v7358_v43 }
 0xe35   : > { %v7365_v53 = vsub.f32 %v3963_v32, %v3996_v21  ;;  %v4028_v55 = vsel %vm460_vm0, %v4010_v42, 0.0 }
 0xe36   : > { %v7368_v57 = vsub.f32 %v3962_v36, %v3995_v44  ;;  %4029 = vadd.xlane.f32.xlu1 %v4028_v55  ;;  %v4025_v58 = vsel %vm460_vm0, %v4009_v35, 0.0 }
 0xe37   : > { %4026 = vadd.xlane.f32.xlu0 %v4025_v58  ;;  %v4012_v59 = vmul.f32 %v7365_v53, %v7365_v53  ;;  %v4251_v58 = vld [vmem:[%s7578_s9 + $0x20] sm:$0xff] }
 0xe38   : > { %v4011_v13 = vmul.f32 %v7368_v57, %v7368_v57 }
 0xe39   : > { %v4034_v60 = vsel %vm460_vm0, %v4012_v59, 0.0 }
 0xe3a   : > { %4035 = vadd.xlane.f32.xlu1 %v4034_v60  ;;  %v4031_v61 = vsel %vm460_vm0, %v4011_v13, 0.0 }
 0xe3b   : > { %4032 = vadd.xlane.f32.xlu0 %v4031_v61 }
 0xebb   : > { %v4018_v47 = vpop.xlane.xlu1 %4017 }
 0xebc   : > { %v4038_v8 = vmul.f32 0.03125, %v4018_v47  ;;  %v4015_v46 = vpop.xlane.xlu0 %4014 }
 0xebd   : > { %v4037_v38 = vmul.f32 0.03125, %v4015_v46 }
 0xebe   : > { %v4046_v9 = vadd.f32 1e-05, %v4038_v8  ;;  %v4254_v8 = vld [vmem:[%s7578_s9 + $0x38] sm:$0xff] }
 0xebf   : > { %v4045_v22 = vadd.f32 1e-05, %v4037_v38  ;;  %v4024_v4 = vpop.xlane.xlu1 %4023  ;;  %v4902_v38 = vld [vmem:[%s7577_s8] ss:$0 sm:$0xff] }
 0xec0   : > { %6270 = vrsqrt.f32 %v4046_v9  ;;  %v4040_v23 = vmul.f32 0.03125, %v4024_v4  ;;  %v4021_v49 = vpop.xlane.xlu0 %4020 }
 0xec1   : > { %6272 = vrsqrt.f32 %v4045_v22  ;;  %v4039_v29 = vmul.f32 0.03125, %v4021_v49 }
 0xec2   : > { %v4048_v48 = vadd.f32 1e-05, %v4040_v23 }
 0xec3   : > { %v4047_v32 = vadd.f32 1e-05, %v4039_v29  ;;  %v4030_v36 = vpop.xlane.xlu1 %4029 }
 0xec4   : > { %6274 = vrsqrt.f32 %v4048_v48  ;;  %v4042_v20 = vmul.f32 0.03125, %v4030_v36  ;;  %v4027_v51 = vpop.xlane.xlu0 %4026 }
 0xec5   : > { %6276 = vrsqrt.f32 %v4047_v32  ;;  %v4041_v50 = vmul.f32 0.03125, %v4027_v51 }
 0xec6   : > { %v4050_v7 = vadd.f32 1e-05, %v4042_v20 }
 0xec7   : > { %v4049_v15 = vadd.f32 1e-05, %v4041_v50  ;;  %v4036_v16 = vpop.xlane.xlu1 %4035 }
 0xec8   : > { %6278 = vrsqrt.f32 %v4050_v7  ;;  %v4044_v19 = vmul.f32 0.03125, %v4036_v16  ;;  %v4033_v39 = vpop.xlane.xlu0 %4032 }
 0xec9   : > { %6280 = vrsqrt.f32 %v4049_v15  ;;  %v4043_v41 = vmul.f32 0.03125, %v4033_v39 }
 0xeca   : > { %v6271_v40 = vpop.eup %6270  ;;  %v4052_v2 = vadd.f32 1e-05, %v4044_v19 }
 0xecb   : > { %v6273_v0 = vpop.eup %6272  ;;  %v4062_v26 = vmul.f32 %v6271_v40, %v7337_v17  ;;  %v4051_v30 = vadd.f32 1e-05, %v4043_v41  ;;  %v4250_v17 = vld [vmem:[%s7578_s9 + $0x18] sm:$0xff] }
 0xecc   : > { %6282 = vrsqrt.f32 %v4052_v2  ;;  %v4061_v27 = vmul.f32 %v6273_v0, %v7339_v18  ;;  %v6098_v44 = vpack.c.bf16 %v4250_v17, %v4249_v5 }
 0xecd   : > { %v4077_v33 = vmul.f32 %v4900_v52, %v4062_v26  ;;  %6284 = vrsqrt.f32 %v4051_v30 }
 0xece   : > { %v6275_v28 = vpop.eup %6274  ;;  %v4076_v6 = vmul.f32 %v4900_v52, %v4061_v27  ;;  %v4911_v27 = vld [vmem:[%s7579_s10] ss:$0 sm:$0xff] }
 0xecf   : > { %v6277_v34 = vpop.eup %6276  ;;  %v4064_v10 = vmul.f32 %v6275_v28, %v7345_v45  ;;  %v7413_v37 = vadd.f32 %v4901_v24, %v4077_v33  ;;  %v4252_v45 = vld [vmem:[%s7578_s9 + $0x28] sm:$0xff] }
 0xed0   : > { %v7410_v18 = vadd.f32 %v4901_v24, %v4076_v6  ;;  %v4063_v21 = vmul.f32 %v6277_v34, %v7348_v11  ;;  %v6102_v54 = vpack.c.bf16 %v4252_v45, %v4251_v58 }
 0xed1   : > { %v4079_v42 = vmul.f32 %v4900_v52, %v4064_v10 }
 0xed2   : > { %v6279_v35 = vpop.eup %6278  ;;  %5790 = vmatprep.mubr.msk.f32.mxu1 %vm460_vm0, %v7410_v18  ;;  %v4078_v55 = vmul.f32 %v4900_v52, %v4063_v21 }
 0xed3   : > { %v6281_v59 = vpop.eup %6280  ;;  %5791 = vmatmul.mubr.msk.f32.vlgmr.msra.gmra.mrb[80].mxu1 %vm460_vm0, %v7413_v37  ;;  %v4066_v11 = vmul.f32 %v6279_v35, %v7355_v31  ;;  %v7429_v61 = vadd.f32 %v4901_v24, %v4079_v42 }
 0xed4   : > { %v7426_v13 = vadd.f32 %v4901_v24, %v4078_v55  ;;  %v4065_v60 = vmul.f32 %v6281_v59, %v7358_v43  ;;  %6097 = vmatpush3.bf16.msra.mxu1 %v6094_v14 }
 0xed5   : > { %v4081_v62 = vmul.f32 %v4900_v52, %v4066_v11  ;;  %6099 = vmatprep.subr.bf16.mxu1 %v6098_v44 }
 0xed6   : > { %v6283_v56 = vpop.eup %6282  ;;  %5793 = vmatprep.mubr.msk.f32.mxu1 %vm460_vm0, %v7426_v13  ;;  %v4080_v63 = vmul.f32 %v4900_v52, %v4065_v60 }
 0xed7   : > { %v6285_v1 = vpop.eup %6284  ;;  %5794 = vmatmul.mubr.msk.f32.gmra.mrb[82].mxu1 %vm460_vm0, %v7429_v61  ;;  %v4068_v31 = vmul.f32 %v6283_v56, %v7365_v53  ;;  %v7439_v12 = vadd.f32 %v4901_v24, %v4081_v62 }
 0xed8   : > { %v7436_v25 = vadd.f32 %v4901_v24, %v4080_v63  ;;  %v4067_v43 = vmul.f32 %v6285_v1, %v7368_v57  ;;  %6101 = vmatpush3.bf16.msra.mxu1 %v6098_v44  ;;  %v4253_v57 = vld [vmem:[%s7578_s9 + $0x30] sm:$0xff] }
 0xed9   : > { %v4083_v3 = vmul.f32 %v4900_v52, %v4068_v31  ;;  %6103 = vmatprep.subr.bf16.mxu1 %v6102_v54  ;;  %v6106_v46 = vpack.c.bf16 %v4254_v8, %v4253_v57 }
 0xeda   : > { %5796 = vmatprep.mubr.msk.f32.mxu1 %vm460_vm0, %v7436_v25  ;;  %v4082_v14 = vmul.f32 %v4900_v52, %v4067_v43 }
 0xedb   : > { %5797 = vmatmul.mubr.msk.f32.gmra.mrb[84].mxu1 %vm460_vm0, %v7439_v12  ;;  %v7447_v53 = vadd.f32 %v4901_v24, %v4083_v3 }
 0xedc   : > { %v7445_v47 = vadd.f32 %v4901_v24, %v4082_v14  ;;  %6105 = vmatpush3.bf16.msra.mxu1 %v6102_v54 }
 0xedd   : > { %6107 = vmatprep.subr.bf16.mxu1 %v6106_v46 }
 0xede   : > { %5799 = vmatprep.mubr.msk.f32.mxu1 %vm460_vm0, %v7445_v47 }
 0xedf   : > { %5800 = vmatmul.mubr.msk.f32.gmra.mrb[86].mxu1 %vm460_vm0, %v7447_v53 }
 0xee0   : > { %6109 = vmatpush3.bf16.msra.mxu1 %v6106_v46 }
 0xfa6   : > { %v5792_v9 = vpop.f32.mrb[80].mxu1 }
 0xfa7   : > { %v4206_v22 = vadd.f32 %v5792_v9, %v4902_v38  ;;  %v4200_v4 = vpop.f32.mrb[81].mxu1 }
 0xfa8   : > { %v4201_v23 = vadd.f32 %v4902_v38, %v4200_v4 }
 0xfa9   : > { %v4240_v48 = vmax.f32 %v4206_v22, 0.0 }
 0xfaa   : > { %v4239_v49 = vmax.f32 %v4201_v23, 0.0  ;;  %v5795_v29 = vpop.f32.mrb[82].mxu1 }
 0xfab   : > { %v4216_v32 = vadd.f32 %v5795_v29, %v4902_v38  ;;  %v4210_v36 = vpop.f32.mrb[83].mxu1 }
 0xfac   : > { %v4211_v20 = vadd.f32 %v4902_v38, %v4210_v36  ;;  %5818 = vmatprep.mubr.msk.f32.mxu1 %vm988_vm3, %v4239_v49 }
 0xfad   : > { %5819 = vmatmul.mubr.msk.f32.vlgmr.msra.gmra.mrb[88].mxu1 %vm988_vm3, %v4240_v48  ;;  %v4242_v7 = vmax.f32 %v4216_v32, 0.0 }
 0xfae   : > { %v4241_v51 = vmax.f32 %v4211_v20, 0.0  ;;  %v5798_v50 = vpop.f32.mrb[84].mxu1 }
 0xfaf   : > { %v4226_v15 = vadd.f32 %v5798_v50, %v4902_v38  ;;  %v4220_v16 = vpop.f32.mrb[85].mxu1 }
 0xfb0   : > { %v4221_v19 = vadd.f32 %v4902_v38, %v4220_v16  ;;  %5821 = vmatprep.mubr.msk.f32.mxu1 %vm988_vm3, %v4241_v51 }
 0xfb1   : > { %5822 = vmatmul.mubr.msk.f32.gmra.mrb[90].mxu1 %vm988_vm3, %v4242_v7  ;;  %v4244_v40 = vmax.f32 %v4226_v15, 0.0 }
 0xfb2   : > { %v4243_v39 = vmax.f32 %v4221_v19, 0.0  ;;  %v5801_v41 = vpop.f32.mrb[86].mxu1 }
 0xfb3   : > { %v4236_v52 = vadd.f32 %v5801_v41, %v4902_v38  ;;  %v4230_v2 = vpop.f32.mrb[87].mxu1 }
 0xfb4   : > { %v4231_v0 = vadd.f32 %v4902_v38, %v4230_v2  ;;  %5824 = vmatprep.mubr.msk.f32.mxu1 %vm988_vm3, %v4243_v39 }
 0xfb5   : > { %5825 = vmatmul.mubr.msk.f32.gmra.mrb[92].mxu1 %vm988_vm3, %v4244_v40  ;;  %v4246_v30 = vmax.f32 %v4236_v52, 0.0 }
 0xfb6   : > { %v4245_v26 = vmax.f32 %v4231_v0, 0.0 }
 0xfb8   : > { %5827 = vmatprep.mubr.msk.f32.mxu1 %vm988_vm3, %v4245_v26 }
 0xfb9   : > { %5828 = vmatmul.mubr.msk.f32.gmra.mrb[94].mxu1 %vm988_vm3, %v4246_v30 }
0x1080   : > { %v5820_v24 = vpop.f32.mrb[88].mxu1 }
0x1081   : > { %v4358_v33 = vadd.f32 %v5820_v24, %v4911_v27  ;;  %v4352_v28 = vpop.f32.mrb[89].mxu1 }
0x1082   : > { %v4353_v6 = vadd.f32 %v4911_v27, %v4352_v28 }
0x1083   : > { %v4392_v5 = vadd.f32 %v4358_v33, %v7413_v37 }
0x1084   : > { %v5823_v17 = vpop.f32.mrb[90].mxu1  ;;  %v4391_v34 = vadd.f32 %v4353_v6, %v7410_v18 }
0x1085   : > { %v4368_v10 = vadd.f32 %v5823_v17, %v4911_v27  ;;  %v4362_v21 = vpop.f32.mrb[91].mxu1  ;;  %v4402_v42 = vsel %vm460_vm0, %v4392_v5, 0.0 }
0x1086   : > { %v4363_v44 = vadd.f32 %v4911_v27, %v4362_v21  ;;  %4403 = vadd.xlane.f32.xlu1 %v4402_v42  ;;  %v4399_v35 = vsel %vm460_vm0, %v4391_v34, 0.0 }
0x1087   : > { %4400 = vadd.xlane.f32.xlu0 %v4399_v35  ;;  %v4394_v55 = vadd.f32 %v4368_v10, %v7429_v61 }
0x1088   : > { %v5826_v58 = vpop.f32.mrb[92].mxu1  ;;  %v4393_v45 = vadd.f32 %v4363_v44, %v7426_v13 }
0x1089   : > { %v4378_v59 = vadd.f32 %v5826_v58, %v4911_v27  ;;  %v4372_v11 = vpop.f32.mrb[93].mxu1  ;;  %v4408_v37 = vsel %vm460_vm0, %v4394_v55, 0.0 }
0x108a   : > { %v4373_v60 = vadd.f32 %v4911_v27, %v4372_v11  ;;  %4409 = vadd.xlane.f32.xlu1 %v4408_v37  ;;  %v4405_v18 = vsel %vm460_vm0, %v4393_v45, 0.0 }
0x108b   : > { %4406 = vadd.xlane.f32.xlu0 %v4405_v18  ;;  %v4396_v62 = vadd.f32 %v4378_v59, %v7439_v12 }
0x108c   : > { %v5829_v54 = vpop.f32.mrb[94].mxu1  ;;  %v4395_v56 = vadd.f32 %v4373_v60, %v7436_v25 }
0x108d   : > { %v4388_v63 = vadd.f32 %v5829_v54, %v4911_v27  ;;  %v4382_v1 = vpop.f32.mrb[95].mxu1  ;;  %v4414_v61 = vsel %vm460_vm0, %v4396_v62, 0.0 }
0x108e   : > { %v4383_v31 = vadd.f32 %v4911_v27, %v4382_v1  ;;  %4415 = vadd.xlane.f32.xlu1 %v4414_v61  ;;  %v4411_v13 = vsel %vm460_vm0, %v4395_v56, 0.0 }
0x108f   : > { %4412 = vadd.xlane.f32.xlu0 %v4411_v13  ;;  %v4398_v43 = vadd.f32 %v4388_v63, %v7447_v53 }
0x1090   : > { %v4397_v3 = vadd.f32 %v4383_v31, %v7445_v47 }
0x1091   : > { %v4420_v14 = vsel %vm460_vm0, %v4398_v43, 0.0 }
0x1092   : > { %4421 = vadd.xlane.f32.xlu1 %v4420_v14  ;;  %v4417_v12 = vsel %vm460_vm0, %v4397_v3, 0.0 }
0x1093   : > { %4418 = vadd.xlane.f32.xlu0 %v4417_v12  ;;  %v4920_v12 = vld [vmem:[%s7580_s11] ss:$0 sm:$0xff] }
0x1113   : > { %v4404_v25 = vpop.xlane.xlu1 %4403 }
0x1114   : > { %v4424_v57 = vmul.f32 0.03125, %v4404_v25  ;;  %v4401_v8 = vpop.xlane.xlu0 %4400 }
0x1115   : > { %v4423_v46 = vmul.f32 0.03125, %v4401_v8 }
0x1116   : > { %v7489_v38 = vsub.f32 %v4392_v5, %v4424_v57 }
0x1117   : > { %v7491_v9 = vsub.f32 %v4391_v34, %v4423_v46  ;;  %v4410_v22 = vpop.xlane.xlu1 %4409 }
0x1118   : > { %v4426_v4 = vmul.f32 0.03125, %v4410_v22  ;;  %v4407_v23 = vpop.xlane.xlu0 %4406  ;;  %v4440_v47 = vmul.f32 %v7489_v38, %v7489_v38  ;;  %v4921_v22 = vld [vmem:[%s7581_s12] ss:$0 sm:$0xff] }
0x1119   : > { %v4425_v53 = vmul.f32 0.03125, %v4407_v23  ;;  %v4439_v49 = vmul.f32 %v7491_v9, %v7491_v9 }
0x111a   : > { %v7497_v29 = vsub.f32 %v4394_v55, %v4426_v4  ;;  %v4450_v48 = vsel %vm460_vm0, %v4440_v47, 0.0 }
0x111b   : > { %v7500_v32 = vsub.f32 %v4393_v45, %v4425_v53  ;;  %v4416_v36 = vpop.xlane.xlu1 %4415  ;;  %4451 = vadd.xlane.f32.xlu1 %v4450_v48  ;;  %v4447_v20 = vsel %vm460_vm0, %v4439_v49, 0.0 }
0x111c   : > { %v4428_v51 = vmul.f32 0.03125, %v4416_v36  ;;  %v4413_v50 = vpop.xlane.xlu0 %4412  ;;  %4448 = vadd.xlane.f32.xlu0 %v4447_v20  ;;  %v4442_v7 = vmul.f32 %v7497_v29, %v7497_v29 }
0x111d   : > { %v4427_v15 = vmul.f32 0.03125, %v4413_v50  ;;  %v4441_v16 = vmul.f32 %v7500_v32, %v7500_v32 }
0x111e   : > { %v7507_v19 = vsub.f32 %v4396_v62, %v4428_v51  ;;  %v4456_v39 = vsel %vm460_vm0, %v4442_v7, 0.0 }
0x111f   : > { %v7510_v41 = vsub.f32 %v4395_v56, %v4427_v15  ;;  %4457 = vadd.xlane.f32.xlu1 %v4456_v39  ;;  %v4422_v40 = vpop.xlane.xlu1 %4421  ;;  %v4453_v52 = vsel %vm460_vm0, %v4441_v16, 0.0 }
0x1120   : > { %v4430_v2 = vmul.f32 0.03125, %v4422_v40  ;;  %4454 = vadd.xlane.f32.xlu0 %v4453_v52  ;;  %v4419_v0 = vpop.xlane.xlu0 %4418  ;;  %v4444_v26 = vmul.f32 %v7507_v19, %v7507_v19 }
0x1121   : > { %v4429_v30 = vmul.f32 0.03125, %v4419_v0  ;;  %v4443_v27 = vmul.f32 %v7510_v41, %v7510_v41 }
0x1122   : > { %v7517_v24 = vsub.f32 %v4398_v43, %v4430_v2  ;;  %v4462_v33 = vsel %vm460_vm0, %v4444_v26, 0.0 }
0x1123   : > { %v7520_v28 = vsub.f32 %v4397_v3, %v4429_v30  ;;  %4463 = vadd.xlane.f32.xlu1 %v4462_v33  ;;  %v4459_v6 = vsel %vm460_vm0, %v4443_v27, 0.0 }
0x1124   : > { %4460 = vadd.xlane.f32.xlu0 %v4459_v6  ;;  %v4446_v5 = vmul.f32 %v7517_v24, %v7517_v24 }
0x1125   : > { %v4445_v17 = vmul.f32 %v7520_v28, %v7520_v28 }
0x1126   : > { %v4468_v34 = vsel %vm460_vm0, %v4446_v5, 0.0 }
0x1127   : > { %4469 = vadd.xlane.f32.xlu1 %v4468_v34  ;;  %v4465_v10 = vsel %vm460_vm0, %v4445_v17, 0.0 }
0x1128   : > { %4466 = vadd.xlane.f32.xlu0 %v4465_v10 }
0x11a8   : > { %v4452_v21 = vpop.xlane.xlu1 %4451 }
0x11a9   : > { %v4472_v42 = vmul.f32 0.03125, %v4452_v21  ;;  %v4449_v44 = vpop.xlane.xlu0 %4448 }
0x11aa   : > { %v4471_v35 = vmul.f32 0.03125, %v4449_v44 }
0x11ab   : > { %v4480_v55 = vadd.f32 1e-05, %v4472_v42 }
0x11ac   : > { %v4479_v58 = vadd.f32 1e-05, %v4471_v35  ;;  %v4458_v45 = vpop.xlane.xlu1 %4457 }
0x11ad   : > { %6286 = vrsqrt.f32 %v4480_v55  ;;  %v4474_v59 = vmul.f32 0.03125, %v4458_v45  ;;  %v4455_v11 = vpop.xlane.xlu0 %4454 }
0x11ae   : > { %6288 = vrsqrt.f32 %v4479_v58  ;;  %v4473_v37 = vmul.f32 0.03125, %v4455_v11 }
0x11af   : > { %v4482_v60 = vadd.f32 1e-05, %v4474_v59 }
0x11b0   : > { %v4481_v18 = vadd.f32 1e-05, %v4473_v37  ;;  %v4464_v62 = vpop.xlane.xlu1 %4463 }
0x11b1   : > { %6290 = vrsqrt.f32 %v4482_v60  ;;  %v4476_v54 = vmul.f32 0.03125, %v4464_v62  ;;  %v4461_v56 = vpop.xlane.xlu0 %4460 }
0x11b2   : > { %6292 = vrsqrt.f32 %v4481_v18  ;;  %v4475_v63 = vmul.f32 0.03125, %v4461_v56 }
0x11b3   : > { %v4484_v1 = vadd.f32 1e-05, %v4476_v54 }
0x11b4   : > { %v4483_v61 = vadd.f32 1e-05, %v4475_v63  ;;  %v4470_v31 = vpop.xlane.xlu1 %4469 }
0x11b5   : > { %6294 = vrsqrt.f32 %v4484_v1  ;;  %v4478_v13 = vmul.f32 0.03125, %v4470_v31  ;;  %v4467_v43 = vpop.xlane.xlu0 %4466 }
0x11b6   : > { %6296 = vrsqrt.f32 %v4483_v61  ;;  %v4477_v3 = vmul.f32 0.03125, %v4467_v43 }
0x11b7   : > { %v6287_v14 = vpop.eup %6286  ;;  %v4486_v25 = vadd.f32 1e-05, %v4478_v13 }
0x11b8   : > { %v6289_v57 = vpop.eup %6288  ;;  %v4496_v8 = vmul.f32 %v6287_v14, %v7489_v38  ;;  %v4485_v46 = vadd.f32 1e-05, %v4477_v3 }
0x11b9   : > { %v4495_v4 = vmul.f32 %v6289_v57, %v7491_v9  ;;  %6298 = vrsqrt.f32 %v4486_v25 }
0x11ba   : > { %v4511_v23 = vmul.f32 %v4920_v12, %v4496_v8  ;;  %6300 = vrsqrt.f32 %v4485_v46 }
0x11bb   : > { %v6291_v47 = vpop.eup %6290  ;;  %v4510_v38 = vmul.f32 %v4920_v12, %v4495_v4 }
0x11bc   : > { %v6293_v53 = vpop.eup %6292  ;;  %v4526_v49 = vadd.f32 %v4921_v22, %v4511_v23  ;;  %v4498_v48 = vmul.f32 %v6291_v47, %v7497_v29 }
0x11bd   : > { %v4525_v9 = vadd.f32 %v4921_v22, %v4510_v38  ;;  %v4497_v36 = vmul.f32 %v6293_v53, %v7500_v32 }
0x11be   : > { %4534 = vst.msk [vmem:[%s7542_s18 + $0x8] sm:$0xff] %vm460_vm0, %v4526_v49  ;;  %v4513_v20 = vmul.f32 %v4920_v12, %v4498_v48 }
0x11bf   : > { %v6295_v51 = vpop.eup %6294  ;;  %4533 = vst.msk [vmem:[%s7542_s18] sm:$0xff] %vm460_vm0, %v4525_v9  ;;  %v4512_v50 = vmul.f32 %v4920_v12, %v4497_v36 }
0x11c0   : > { %v6297_v7 = vpop.eup %6296  ;;  %v4528_v15 = vadd.f32 %v4921_v22, %v4513_v20  ;;  %v4500_v16 = vmul.f32 %v6295_v51, %v7507_v19 }
0x11c1   : > { %v4527_v39 = vadd.f32 %v4921_v22, %v4512_v50  ;;  %v4499_v29 = vmul.f32 %v6297_v7, %v7510_v41 }
0x11c2   : > { %4536 = vst.msk [vmem:[%s7542_s18 + $0x18] sm:$0xff] %vm460_vm0, %v4528_v15  ;;  %v4515_v32 = vmul.f32 %v4920_v12, %v4500_v16 }
0x11c3   : > { %v6299_v40 = vpop.eup %6298  ;;  %4535 = vst.msk [vmem:[%s7542_s18 + $0x10] sm:$0xff] %vm460_vm0, %v4527_v39  ;;  %v4514_v52 = vmul.f32 %v4920_v12, %v4499_v29 }
0x11c4   : > { %v6301_v2 = vpop.eup %6300  ;;  %v4530_v0 = vadd.f32 %v4921_v22, %v4515_v32  ;;  %v4502_v26 = vmul.f32 %v6299_v40, %v7517_v24 }
0x11c5   : > { %v4529_v30 = vadd.f32 %v4921_v22, %v4514_v52  ;;  %v4501_v27 = vmul.f32 %v6301_v2, %v7520_v28 }
0x11c6   : > { %4538 = vst.msk [vmem:[%s7542_s18 + $0x28] sm:$0xff] %vm460_vm0, %v4530_v0  ;;  %v4517_v19 = vmul.f32 %v4920_v12, %v4502_v26 }
0x11c7   : > { %4537 = vst.msk [vmem:[%s7542_s18 + $0x20] sm:$0xff] %vm460_vm0, %v4529_v30  ;;  %v4516_v41 = vmul.f32 %v4920_v12, %v4501_v27 }
0x11c8   : > { %v4532_v33 = vadd.f32 %v4921_v22, %v4517_v19 }
0x11c9   : > { %v4531_v6 = vadd.f32 %v4921_v22, %v4516_v41 }
0x11ca   : > { %4540 = vst.msk [vmem:[%s7542_s18 + $0x38] sm:$0xff] %vm460_vm0, %v4532_v33 }
0x11cb   : > { %4539 = vst.msk [vmem:[%s7542_s18 + $0x30] sm:$0xff] %vm460_vm0, %v4531_v6 }
0x11cc PF: > { %s23_s25 = sadd.s32 1, %s6316_s25  }
0x11cd   : > { %p20_p4 = scmp.ge.s32.totalorder %s23_s25, 4  }
0x11cf   :  { %22 = sbr.rel (!%p20_p4) target bundleno = 1 (0x1), region = 127 }

// kernel: model_forward.9
= control target key start
LH: loop header
LB: loop body
LE: loop exit
PB: predicated region body
PF: predicated region fallthrough
CT: control target
= control target key end

     0   :  { %s7859_s0 = inlined_call_operand.vmem [shape: f32[2,8,32], index: 0, kind: input, shape index: {}]   ;;  %s7860_s1 = inlined_call_operand.vmem [shape: f32[2,64,32], index: 1, kind: input, shape index: {}]   ;;  %s7861_s2 = inlined_call_operand.vmem [shape: f32[12,32,8], index: 2, kind: input, shape index: {}]   ;;  %s7862_s3 = inlined_call_operand.vmem [shape: f32[12,1,8], index: 3, kind: input, shape index: {}]   ;;  %s7863_s4 = inlined_call_operand.vmem [shape: f32[4,8,32], index: 4, kind: input, shape index: {}]   ;;  %s7864_s5 = inlined_call_operand.vmem [shape: f32[1,32], index: 5, kind: input, shape index: {}]   ;;  %s7865_s6 = inlined_call_operand.vmem [shape: f32[1,32], index: 6, kind: input, shape index: {}]   ;;  %s7866_s7 = inlined_call_operand.vmem [shape: f32[1,32], index: 7, kind: input, shape index: {}]   ;;  %s7867_s8 = inlined_call_operand.vmem [shape: f32[12,32,8], index: 8, kind: input, shape index: {}]   ;;  %s7868_s9 = inlined_call_operand.vmem [shape: f32[12,1,8], index: 9, kind: input, shape index: {}]   ;;  %s7869_s10 = inlined_call_operand.vmem [shape: f32[4,8,32], index: 10, kind: input, shape index: {}]   ;;  %s7870_s11 = inlined_call_operand.vmem [shape: f32[1,32], index: 11, kind: input, shape index: {}]   ;;  %s7871_s12 = inlined_call_operand.vmem [shape: f32[1,32], index: 12, kind: input, shape index: {}]   ;;  %s7872_s13 = inlined_call_operand.vmem [shape: f32[1,32], index: 13, kind: input, shape index: {}]   ;;  %s7873_s14 = inlined_call_operand.vmem [shape: f32[32,64], index: 14, kind: input, shape index: {}]   ;;  %s7874_s15 = inlined_call_operand.vmem [shape: f32[1,64], index: 15, kind: input, shape index: {}]   ;;  %s7875_s16 = inlined_call_operand.vmem [shape: f32[64,32], index: 16, kind: input, shape index: {}]   ;;  %s7876_s17 = inlined_call_operand.vmem [shape: f32[1,32], index: 17, kind: input, shape index: {}]   ;;  %s7877_s18 = inlined_call_operand.vmem [shape: f32[1,32], index: 18, kind: input, shape index: {}]   ;;  %s7878_s19 = inlined_call_operand.vmem [shape: f32[1,32], index: 19, kind: input, shape index: {}]   ;;  %s7879_s20 = inlined_call_operand.vmem [shape: f32[2,8,32], index: 20, kind: output, shape index: {}]  }
   0x1   :  { %7886 = sst [smem:[#allocation2_spill]] %s7859_s0 }
   0x2   :  { %7887 = sst [smem:[#allocation3_spill]] %s7860_s1  ;;  %s6926_s1 = smov 0  }
   0x3   :  { %7888 = sst [smem:[#allocation4_spill]] %s7861_s2 }
   0x4   :  { %7889 = sst [smem:[#allocation5_spill]] %s7862_s3 }
   0x5   :  { %7890 = sst [smem:[#allocation6_spill]] %s7863_s4 }
   0x6   :  { %7891 = sst [smem:[#allocation7_spill]] %s7864_s5 }
   0x7 LB: > { %s5275_s22 = sadd.s32 4294967295, %s6816_s1   ;;  %p5279_p0 = scmp.ge.s32.totalorder %s6816_s1, 1  ;;  %s6816_s1 = sphi %s6926_s1, %s30_s1  }
   0x8   : > { %p571_p1 = scmp.lt.s32.totalorder %s6816_s1, 3 }
   0xa   : > { %p572_p2 = pnand %p5279_p0, %p571_p1 }
   0xb   : > { %s7892_s2 = sld [smem:[#allocation4_spill]] (!%p572_p2)  ;;  %v6818_v3 = vmov (!%p572_p2), 0.0|0.0   ;;  %vm6819_vm0 = vmmov (!%p572_p2), 0   ;;  %v6820_v6 = vmov (!%p572_p2), 0.0   ;;  %p632_p3 = scmp.lt.s32.totalorder (!%p572_p2), %s5275_s22, 1  ;;  %vm665_vm1 = vcmask (!%p572_p2), 261120  }
   0xc   : > { %575 = sbr.rel (%p572_p2) target bundleno = 9196 (0x23ec), region = 100  ;;  %6471 = vmatprep.subr.bf16.mxu1 (!%p572_p2), %v6818_v3  ;;  %5881 = vmatprep.mubr.msk.f32.mxu1 (!%p572_p2), %vm6819_vm0, %v6820_v6  ;;  %s7893_s3 = sld [smem:[#allocation2_spill]] (!%p572_p2)  ;;  %vm905_vm2 = vcmask (!%p572_p2), 64512   ;;  %vm3079_vm4 = vcmask (!%p572_p2), 523264  }
   0xd   : > { %6483 = vmatprep.subr.bf16.mxu0 (!%p572_p2), %v6818_v3  ;;  %5903 = vmatprep.mubr.msk.f32.mxu0 (!%p572_p2), %vm6819_vm0, %v6820_v6  ;;  %s7894_s21 = sld [smem:[#allocation5_spill]] (!%p572_p2)  ;;  %s7895_s27 = sld [smem:[#allocation6_spill]] (!%p572_p2)  ;;  %vm7349_vm3 = vmpackc.low (!%p572_p2), %vm905_vm2, %vm905_vm2 }
   0xe   : > { %s7896_s5 = sld [smem:[#allocation7_spill]] (!%p572_p2) }
  0x11   : > { %v654_v0 = vld [vmem:[%s7892_s2] sm:$0xff] (!%p572_p2)  ;;  %v655_v1 = vld [vmem:[%s7892_s2 + $0x8] sm:$0xff] (!%p572_p2)  ;;  %v656_v2 = vld [vmem:[%s7892_s2 + $0x10] sm:$0xff] (!%p572_p2) }
  0x12   : > { %v6472_v4 = vpack.c.bf16 (!%p572_p2), %v655_v1, %v654_v0  ;;  %v657_v5 = vld [vmem:[%s7892_s2 + $0x18] sm:$0xff] (!%p572_p2)  ;;  %v5286_v8 = vld [vmem:[%s7892_s2 + $0x80] sm:$0xff] (!%p572_p2)  ;;  %v5287_v9 = vld [vmem:[%s7892_s2 + $0x88] sm:$0xff] (!%p572_p2) }
  0x13   : > { %v6475_v7 = vpack.c.bf16 %v657_v5, %v656_v2  ;;  %s7902_s22 = smov (!%p632_p3, %s5275_s22), 1  ;;  %v6478_v11 = vpack.c.bf16 %v5287_v9, %v5286_v8  ;;  %v5288_v12 = vld [vmem:[%s7892_s2 + $0x90] sm:$0xff]  ;;  %v5289_v13 = vld [vmem:[%s7892_s2 + $0x98] sm:$0xff]  ;;  %v5291_v17 = vld [vmem:[%s7894_s21 + $0x4] ss:$0 sm:$0xff] }
  0x14   : > { %6473 = vmatpush3.bf16.msra.mxu1 %v6472_v4  ;;  %s7883_s23 = sshll.u32 %s7902_s22, 3  ;;  %v6481_v14 = vpack.c.bf16 %v5289_v13, %v5288_v12  ;;  %v5284_v19 = vld [vmem:[%s7894_s21] ss:$0 sm:$0xff]  ;;  %v5294_v24 = vld [vmem:[%s7892_s2 + $0x108] sm:$0xff]  ;;  %v5295_v25 = vld [vmem:[%s7892_s2 + $0x110] sm:$0xff]  ;;  %s5578_s29 = sshll.u32 %s7902_s22, 6 }
  0x15   : > { %6474 = vmatprep.subr.bf16.mxu1 %v6818_v3  ;;  %s635_s26 = scalar_lea.vmem %s7893_s3, %s7883_s23  ;;  %v5293_v23 = vld [vmem:[%s7892_s2 + $0x100] sm:$0xff]  ;;  %v5296_v27 = vld [vmem:[%s7892_s2 + $0x118] sm:$0xff]  ;;  %v5298_v39 = vld [vmem:[%s7894_s21 + $0x8] ss:$0 sm:$0xff]  ;;  %s7900_s3 = sshll.u32 %s7902_s22, 3 }
  0x16   : > { %v6967_v10 = vld [vmem:[%s635_s26] sm:$0xff]  ;;  %v6484_v26 = vpack.c.bf16 %v5294_v24, %v5293_v23  ;;  %v6487_v28 = vpack.c.bf16 %v5296_v27, %v5295_v25  ;;  %v5304_v43 = vld [vmem:[%s7892_s2 + $0x28] sm:$0xff]  ;;  %v5305_v45 = vld [vmem:[%s7892_s2 + $0x30] sm:$0xff]  ;;  %s644_s4 = scalar_lea.vmem %s7879_s20, %s7900_s3 }
  0x17   : > { %v5303_v42 = vld [vmem:[%s7892_s2 + $0x20] sm:$0xff]  ;;  %v5306_v46 = vld [vmem:[%s7892_s2 + $0x38] sm:$0xff]  ;;  %v5311_v50 = vld [vmem:[%s7892_s2 + $0xa8] sm:$0xff] }
  0x18   : > { %6476 = vmatpush3.bf16.msra.mxu1 %v6475_v7  ;;  %6485 = vmatpush3.bf16.msra.mxu0 %v6484_v26  ;;  %v6490_v44 = vpack.c.bf16 %v5304_v43, %v5303_v42  ;;  %v6493_v47 = vpack.c.bf16 %v5306_v46, %v5305_v45  ;;  %v5310_v49 = vld [vmem:[%s7892_s2 + $0xa0] sm:$0xff]  ;;  %v5312_v54 = vld [vmem:[%s7892_s2 + $0xb0] sm:$0xff]  ;;  %v5313_v55 = vld [vmem:[%s7892_s2 + $0xb8] sm:$0xff] }
  0x19   : > { %6477 = vmatprep.subr.bf16.mxu1 %v6818_v3  ;;  %6486 = vmatprep.subr.bf16.mxu0 %v6818_v3  ;;  %v6496_v52 = vpack.c.bf16 %v5311_v50, %v5310_v49  ;;  %v6499_v56 = vpack.c.bf16 %v5313_v55, %v5312_v54  ;;  %v5315_v61 = vld [vmem:[%s7894_s21 + $0x5] ss:$0 sm:$0xff]  ;;  %v5308_v62 = vld [vmem:[%s7894_s21 + $0x1] ss:$0 sm:$0xff]  ;;  %v5318_v5 = vld [vmem:[%s7892_s2 + $0x128] sm:$0xff] }
  0x1a   : > { %v5317_v4 = vld [vmem:[%s7892_s2 + $0x120] sm:$0xff]  ;;  %v5319_v7 = vld [vmem:[%s7892_s2 + $0x130] sm:$0xff]  ;;  %v5320_v9 = vld [vmem:[%s7892_s2 + $0x138] sm:$0xff] }
  0x1b   : > { %5882 = vmatmul.mubr.msk.f32.vlgmr.msra.gmra.mrb[0].mxu1 %vm665_vm1, %v6967_v10  ;;  %v6502_v8 = vpack.c.bf16 %v5318_v5, %v5317_v4  ;;  %v5327_v25 = vld [vmem:[%s7895_s27 + $0x8] sm:$0xff]  ;;  %v5342_v46 = vld [vmem:[%s7894_s21 + $0x6] ss:$0 sm:$0xff] }
  0x1c   : > { %6479 = vmatpush3.bf16.msra.mxu1 %v6478_v11  ;;  %5892 = vmatprep.mubr.msk.f32.mxu1 %vm6819_vm0, %v6820_v6  ;;  %v6505_v11 = vpack.c.bf16 %v5320_v9, %v5319_v7 }
  0x1d   : > { %6480 = vmatprep.subr.bf16.mxu1 %v6818_v3  ;;  %6488 = vmatpush3.bf16.msra.mxu0 %v6487_v28 }
  0x1e   : > { %6489 = vmatprep.subr.bf16.mxu0 %v6818_v3 }
  0x20   : > { %6482 = vmatpush3.bf16.msra.mxu1 %v6481_v14  ;;  %5904 = vmatmul.mubr.msk.f32.vlgmr.msra.gmra.mrb[0].mxu0 %vm665_vm1, %v6967_v10 }
  0x21   : > { %5906 = vmatprep.subr.mxu1 %v6820_v6  ;;  %5924 = vmatprep.mubr.msk.f32.mxu0 %vm6819_vm0, %v6820_v6 }
  0x22   : > { %6491 = vmatpush3.bf16.msra.mxu0 %v6490_v44 }
  0x23   : > { %5893 = vmatmul.mubr.msk.f32.vlgmr.msra.gmra.mrb[2].mxu1 %vm665_vm1, %v6967_v10  ;;  %6492 = vmatprep.subr.bf16.mxu0 %v6818_v3 }
  0x24   : > { %5908 = vmatprep.mubr.msk.f32.mxu1 %vm6819_vm0, %v6820_v6 }
  0x26   : > { %6494 = vmatpush3.bf16.msra.mxu0 %v6493_v47 }
  0x27   : > { %6501 = vmatprep.subr.bf16.mxu0 %v6818_v3 }
  0x29   : > { %5925 = vmatmul.mubr.msk.f32.vlgmr.msra.gmra.mrb[2].mxu0 %vm665_vm1, %v6967_v10 }
  0x2a   : > { %5946 = vmatprep.mubr.msk.f32.mxu0 %vm6819_vm0, %v6820_v6  ;;  %6503 = vmatpush3.bf16.msra.mxu0 %v6502_v8 }
  0x2b   : > { %6504 = vmatprep.subr.bf16.mxu0 %v6818_v3 }
  0x2e   : > { %6506 = vmatpush3.bf16.msra.mxu0 %v6505_v11 }
  0x2f   : > { %5959 = vmatprep.subr.mxu0 %v6820_v6 }
  0x31   : > { %5947 = vmatmul.mubr.msk.f32.vlgmr.msra.gmra.mrb[4].mxu0 %vm665_vm1, %v6967_v10 }
  0x32   : > { %5961 = vmatprep.mubr.msk.f32.mxu0 %vm6819_vm0, %v6820_v6  ;;  %5960 = vmatpush3.msra.mxu0 %v5327_v25  ;;  %v5363_v25 = vld [vmem:[%s7892_s2 + $0xe0] sm:$0xff] }
  0x33   : > { %6507 = vmatprep.subr.bf16.mxu0 %v6818_v3 }
  0xee   : > { %v735_v15 = vpop.f32.mrb[0].mxu1 }
  0xef   : > { %v5883_v16 = vpop.f32.mrb[1].mxu1  ;;  %v736_v22 = vadd.f32 %v5284_v19, %v735_v15 }
  0xf3   : > { %v901_v38 = vpop.f32.mrb[0].mxu0 }
  0xf4   : > { %v5905_v40 = vpop.f32.mrb[1].mxu0  ;;  %v902_v41 = vadd.f32 %v5298_v39, %v901_v38  ;;  %v5332_v39 = vld [vmem:[%s7892_s2 + $0x50] sm:$0xff] }
  0xf5   : > { %v5333_v40 = vld [vmem:[%s7892_s2 + $0x58] sm:$0xff] }
  0xf6   : > { %v818_v18 = vpop.f32.mrb[2].mxu1  ;;  %v6511_v43 = vpack.c.bf16 %v5333_v40, %v5332_v39  ;;  %v5361_v39 = vld [vmem:[%s7894_s21 + $0x3] ss:$0 sm:$0xff] }
  0xf7   : > { %v819_v20 = vadd.f32 %v5291_v17, %v818_v18  ;;  %v5894_v21 = vpop.f32.mrb[3].mxu1 }
  0xf9   : > { %5907 = vmatpush3.xpose.msk.msra.mxu1 %vm905_vm2, %v819_v20 }
  0xfa   : > { %5911 = vmatprep.subr.mxu1 %v6820_v6 }
  0xfc   : > { %5909 = vmatmul.mubr.msk.f32.vlgmr.msra.gmra.mrb[4].mxu1 %vm905_vm2, %v736_v22  ;;  %v1147_v57 = vpop.f32.mrb[2].mxu0  ;;  %v5322_v22 = vld [vmem:[%s7894_s21 + $0x9] ss:$0 sm:$0xff] }
  0xfd   : > { %5913 = vmatprep.mubr.msk.f32.mxu1 %vm6819_vm0, %v6820_v6  ;;  %5912 = vmatpush3.msra.mxu1 %v902_v41  ;;  %v5926_v58 = vpop.f32.mrb[3].mxu0  ;;  %v1148_v2 = vadd.f32 %v5308_v62, %v1147_v57  ;;  %v5344_v57 = vld [vmem:[%s7892_s2 + $0x140] sm:$0xff] }
  0xfe   : > { %6495 = vmatprep.subr.bf16.mxu1 %v6818_v3  ;;  %v5345_v58 = vld [vmem:[%s7892_s2 + $0x148] sm:$0xff] }
 0x104   : > { %v1313_v21 = vpop.f32.mrb[4].mxu0 }
 0x105   : > { %v5948_v23 = vpop.f32.mrb[5].mxu0  ;;  %v1314_v24 = vadd.f32 %v5322_v22, %v1313_v21  ;;  %v5358_v22 = vld [vmem:[%s7892_s2 + $0x70] sm:$0xff] }
 0x106   : > { %v5359_v23 = vld [vmem:[%s7892_s2 + $0x78] sm:$0xff] }
 0x1cf   : > { %v978_v29 = vpop.f32.mrb[4].mxu1 }
 0x1d0   : > { %v982_v30 = vmul.f32 0.35355338, %v978_v29  ;;  %v5910_v31 = vpop.f32.mrb[5].mxu1  ;;  %v1067_v29 = vld [vmem:[%s7895_s27] sm:$0xff] }
 0x1d1   : > { %v5338_v31 = vld [vmem:[%s7892_s2 + $0xc8] sm:$0xff] }
 0x1d2   : > { %v983_v32 = vsel %vm905_vm2, %v982_v30, -inf }
 0x1d3   : > { %984 = vmax.xlane.f32.xlu0 %v983_v32 }
 0x260   : > { %v985_v33 = vpop.xlane.xlu0 %984 }
 0x261   : > { %v986_v34 = vsub.f32 %v982_v30, %v985_v33  ;;  %v5337_v30 = vld [vmem:[%s7892_s2 + $0xc0] sm:$0xff]  ;;  %v5339_v33 = vld [vmem:[%s7892_s2 + $0xd0] sm:$0xff] }
 0x262   : > { %v6514_v32 = vpack.c.bf16 %v5338_v31, %v5337_v30 }
 0x263   : > { %v987_v35 = vmul.f32 1.442695, %v986_v34  ;;  %v5340_v34 = vld [vmem:[%s7892_s2 + $0xd8] sm:$0xff] }
 0x265   : > { %6772 = vpow2.f32 %v987_v35  ;;  %v6517_v35 = vpack.c.bf16 %v5340_v34, %v5339_v33 }
 0x26f   : > { %v6773_v36 = vpop.eup %6772 }
 0x270   : > { %v989_v37 = vsel %vm905_vm2, %v6773_v36, 0.0 }
 0x271   : > { %990 = vadd.xlane.f32.xlu0 %v989_v37  ;;  %v5331_v37 = vld [vmem:[%s7892_s2 + $0x48] sm:$0xff] }
 0x2fe   : > { %v991_v48 = vpop.xlane.xlu0 %990 }
 0x2ff   : > { %6774 = vrcp.f32 %v991_v48 }
 0x309   : > { %v6775_v51 = vpop.eup %6774 }
 0x30a   : > { %v993_v53 = vmul.f32 %v6775_v51, %v6773_v36  ;;  %v5330_v36 = vld [vmem:[%s7892_s2 + $0x40] sm:$0xff] }
 0x30b   : > { %v6508_v38 = vpack.c.bf16 %v5331_v37, %v5330_v36 }
 0x30c   : > { %5914 = vmatmul.mubr.msk.f32.vlgmr.msra.gmra.mrb[6].mxu1 %vm905_vm2, %v993_v53  ;;  %v5335_v53 = vld [vmem:[%s7894_s21 + $0x2] ss:$0 sm:$0xff] }
 0x30d   : > { %6497 = vmatpush3.bf16.msra.mxu1 %v6496_v52  ;;  %5935 = vmatprep.mubr.msk.f32.mxu1 %vm6819_vm0, %v6820_v6 }
 0x30e   : > { %6498 = vmatprep.subr.bf16.mxu1 %v6818_v3 }
 0x311   : > { %6500 = vmatpush3.bf16.msra.mxu1 %v6499_v56 }
 0x312   : > { %5949 = vmatprep.subr.mxu1 %v6820_v6 }
 0x314   : > { %5936 = vmatmul.mubr.msk.f32.vlgmr.msra.gmra.mrb[8].mxu1 %vm665_vm1, %v6967_v10 }
 0x315   : > { %5951 = vmatprep.mubr.msk.f32.mxu1 %vm6819_vm0, %v6820_v6 }
 0x3df   : > { %v1063_v59 = vpop.f32.mrb[6].mxu1 }
 0x3e0   : > { %v5915_v60 = vpop.f32.mrb[7].mxu1 }
 0x3e1   : > { %v6520_v60 = vpack.c.bf16 %v5345_v58, %v5344_v57 }
 0x3e7   : > { %v1230_v63 = vpop.f32.mrb[8].mxu1 }
 0x3e8   : > { %v1231_v0 = vadd.f32 %v5315_v61, %v1230_v63  ;;  %v5937_v1 = vpop.f32.mrb[9].mxu1  ;;  %v5347_v61 = vld [vmem:[%s7892_s2 + $0x158] sm:$0xff] }
 0x3ea   : > { %5950 = vmatpush3.xpose.msk.msra.mxu1 %vm905_vm2, %v1231_v0 }
 0x3eb   : > { %5954 = vmatprep.subr.mxu1 %v6820_v6 }
 0x3ed   : > { %5952 = vmatmul.mubr.msk.f32.vlgmr.msra.gmra.mrb[10].mxu1 %vm905_vm2, %v1148_v2 }
 0x3ee   : > { %5956 = vmatprep.mubr.msk.f32.mxu1 %vm6819_vm0, %v6820_v6  ;;  %5955 = vmatpush3.msra.mxu1 %v1314_v24  ;;  %v6529_v24 = vpack.c.bf16 %v5359_v23, %v5358_v22 }
 0x3ef   : > { %5964 = vmatprep.subr.mxu1 %v6820_v6 }
 0x4c0   : > { %v1389_v12 = vpop.f32.mrb[10].mxu1 }
 0x4c1   : > { %v1393_v13 = vmul.f32 0.35355338, %v1389_v12  ;;  %v5953_v14 = vpop.f32.mrb[11].mxu1  ;;  %v5349_v12 = vld [vmem:[%s7894_s21 + $0xa] ss:$0 sm:$0xff] }
 0x4c3   : > { %v1394_v15 = vsel %vm905_vm2, %v1393_v13, -inf }
 0x4c4   : > { %1395 = vmax.xlane.f32.xlu1 %v1394_v15  ;;  %v5354_v15 = vld [vmem:[%s7895_s27 + $0x10] sm:$0xff] }
 0x551   : > { %v1396_v16 = vpop.xlane.xlu1 %1395 }
 0x552   : > { %v1397_v17 = vsub.f32 %v1393_v13, %v1396_v16 }
 0x554   : > { %v1398_v18 = vmul.f32 1.442695, %v1397_v17 }
 0x556   : > { %6776 = vpow2.f32 %v1398_v18 }
 0x560   : > { %v6777_v19 = vpop.eup %6776 }
 0x561   : > { %v1400_v20 = vsel %vm905_vm2, %v6777_v19, 0.0 }
 0x562   : > { %1401 = vadd.xlane.f32.xlu1 %v1400_v20  ;;  %v5357_v20 = vld [vmem:[%s7892_s2 + $0x68] sm:$0xff] }
 0x5ef   : > { %v1402_v26 = vpop.xlane.xlu1 %1401 }
 0x5f0   : > { %6778 = vrcp.f32 %v1402_v26  ;;  %v5364_v26 = vld [vmem:[%s7892_s2 + $0xe8] sm:$0xff] }
 0x5fa   : > { %v6779_v27 = vpop.eup %6778 }
 0x5fb   : > { %v1404_v28 = vmul.f32 %v6779_v27, %v6777_v19  ;;  %v5356_v19 = vld [vmem:[%s7892_s2 + $0x60] sm:$0xff]  ;;  %v6532_v27 = vpack.c.bf16 %v5364_v26, %v5363_v25 }
 0x5fc   : > { %v6526_v21 = vpack.c.bf16 %v5357_v20, %v5356_v19 }
 0x5fd   : > { %5957 = vmatmul.mubr.msk.f32.vlgmr.msra.gmra.mrb[12].mxu1 %vm905_vm2, %v1404_v28  ;;  %v5365_v28 = vld [vmem:[%s7892_s2 + $0xf0] sm:$0xff] }
 0x5fe   : > { %5965 = vmatpush3.msra.mxu1 %v1067_v29  ;;  %5966 = vmatprep.mubr.msk.f32.mxu1 %vm6819_vm0, %v6820_v6  ;;  %v5366_v29 = vld [vmem:[%s7892_s2 + $0xf8] sm:$0xff] }
 0x5ff   : > { %6513 = vmatprep.subr.bf16.mxu1 %v6818_v3 }
 0x601   : > { %5967 = vmatmul.mubr.msk.f32.vlgmr.msra.gmra.mrb[14].mxu1 %vm905_vm2, %v1063_v59  ;;  %v5346_v59 = vld [vmem:[%s7892_s2 + $0x150] sm:$0xff] }
 0x602   : > { %6515 = vmatpush3.bf16.msra.mxu1 %v6514_v32  ;;  %5988 = vmatprep.mubr.msk.f32.mxu1 %vm6819_vm0, %v6820_v6  ;;  %v6523_v62 = vpack.c.bf16 %v5347_v61, %v5346_v59  ;;  %v6535_v32 = vpack.c.bf16 %v5366_v29, %v5365_v28 }
 0x603   : > { %6516 = vmatprep.subr.bf16.mxu1 %v6818_v3 }
 0x606   : > { %6518 = vmatpush3.bf16.msra.mxu1 %v6517_v35 }
 0x607   : > { %6002 = vmatprep.subr.mxu1 %v6820_v6 }
 0x609   : > { %5989 = vmatmul.mubr.msk.f32.vlgmr.msra.gmra.mrb[16].mxu1 %vm665_vm1, %v6967_v10 }
 0x60a   : > { %6004 = vmatprep.mubr.msk.f32.mxu1 %vm6819_vm0, %v6820_v6 }
 0x6d0   : > { %v1474_v41 = vpop.f32.mrb[12].mxu1 }
 0x6d1   : > { %v5958_v42 = vpop.f32.mrb[13].mxu1  ;;  %5962 = vmatmul.mubr.msk.f32.vlgmr.msra.gmra.mrb[6].mxu0 %vm905_vm2, %v1474_v41 }
 0x6d2   : > { %6509 = vmatpush3.bf16.msra.mxu0 %v6508_v38  ;;  %5977 = vmatprep.mubr.msk.f32.mxu0 %vm6819_vm0, %v6820_v6  ;;  %v5368_v38 = vld [vmem:[%s7894_s21 + $0x7] ss:$0 sm:$0xff] }
 0x6d3   : > { %6510 = vmatprep.subr.bf16.mxu0 %v6818_v3 }
 0x6d4   : > { %v1622_v44 = vpop.f32.mrb[14].mxu1 }
 0x6d5   : > { %v5968_v45 = vpop.f32.mrb[15].mxu1 }
 0x6d6   : > { %6512 = vmatpush3.bf16.msra.mxu0 %v6511_v43  ;;  %v5371_v45 = vld [vmem:[%s7892_s2 + $0x168] sm:$0xff] }
 0x6d7   : > { %6519 = vmatprep.subr.bf16.mxu0 %v6818_v3 }
 0x6d9   : > { %5978 = vmatmul.mubr.msk.f32.vlgmr.msra.gmra.mrb[8].mxu0 %vm665_vm1, %v6967_v10 }
 0x6da   : > { %5999 = vmatprep.mubr.msk.f32.mxu0 %vm6819_vm0, %v6820_v6  ;;  %6521 = vmatpush3.bf16.msra.mxu0 %v6520_v60  ;;  %v5375_v60 = vld [vmem:[%s7894_s21 + $0xb] ss:$0 sm:$0xff] }
 0x6db   : > { %6522 = vmatprep.subr.bf16.mxu0 %v6818_v3 }
 0x6dc   : > { %v1788_v47 = vpop.f32.mrb[16].mxu1 }
 0x6dd   : > { %v1789_v48 = vadd.f32 %v5342_v46, %v1788_v47  ;;  %v5990_v49 = vpop.f32.mrb[17].mxu1  ;;  %v5372_v46 = vld [vmem:[%s7892_s2 + $0x170] sm:$0xff] }
 0x6de   : > { %6524 = vmatpush3.bf16.msra.mxu0 %v6523_v62 }
 0x6df   : > { %6003 = vmatpush3.xpose.msk.msra.mxu1 %vm905_vm2, %v1789_v48  ;;  %6012 = vmatprep.subr.mxu0 %v6820_v6  ;;  %v5373_v48 = vld [vmem:[%s7892_s2 + $0x178] sm:$0xff] }
 0x6e0   : > { %6007 = vmatprep.subr.mxu1 %v6820_v6  ;;  %v6541_v49 = vpack.c.bf16 %v5373_v48, %v5372_v46 }
 0x6e1   : > { %6000 = vmatmul.mubr.msk.f32.vlgmr.msra.gmra.mrb[10].mxu0 %vm665_vm1, %v6967_v10 }
 0x6e2   : > { %6014 = vmatprep.mubr.msk.f32.mxu0 %vm6819_vm0, %v6820_v6  ;;  %6013 = vmatpush3.msra.mxu0 %v5354_v15  ;;  %v5387_v15 = vld [vmem:[%s7867_s8 + $0x80] sm:$0xff] }
 0x6e3   : > { %6531 = vmatprep.subr.bf16.mxu0 %v6818_v3 }
 0x7a4   : > { %v1549_v50 = vpop.f32.mrb[6].mxu0 }
 0x7a5   : > { %v7153_v51 = vadd.f32 %v1622_v44, %v1549_v50  ;;  %v5963_v52 = vpop.f32.mrb[7].mxu0  ;;  %v5370_v44 = vld [vmem:[%s7892_s2 + $0x160] sm:$0xff] }
 0x7a6   : > { %v6538_v47 = vpack.c.bf16 %v5371_v45, %v5370_v44  ;;  %v5543_v44 = vld [vmem:[%s7867_s8 + $0x170] sm:$0xff] }
 0x7ac   : > { %v1705_v54 = vpop.f32.mrb[8].mxu0 }
 0x7ad   : > { %v1706_v55 = vadd.f32 %v5335_v53, %v1705_v54  ;;  %v5979_v56 = vpop.f32.mrb[9].mxu0 }
 0x7af   : > { %6005 = vmatmul.mubr.msk.f32.vlgmr.msra.gmra.mrb[18].mxu1 %vm905_vm2, %v1706_v55 }
 0x7b0   : > { %6009 = vmatprep.mubr.msk.f32.mxu1 %vm6819_vm0, %v6820_v6 }
 0x7b4   : > { %v1871_v11 = vpop.f32.mrb[10].mxu0 }
 0x7b5   : > { %v6001_v13 = vpop.f32.mrb[11].mxu0  ;;  %v1872_v14 = vadd.f32 %v5349_v12, %v1871_v11 }
 0x7b7   : > { %6008 = vmatpush3.msra.mxu1 %v1872_v14 }
 0x7b8   : > { %6525 = vmatprep.subr.bf16.mxu1 %v6818_v3 }
 0x882   : > { %v1947_v63 = vpop.f32.mrb[18].mxu1 }
 0x883   : > { %v1951_v0 = vmul.f32 0.35355338, %v1947_v63  ;;  %v6006_v1 = vpop.f32.mrb[19].mxu1  ;;  %v5380_v63 = vld [vmem:[%s7895_s27 + $0x18] sm:$0xff] }
 0x885   : > { %v1952_v2 = vsel %vm905_vm2, %v1951_v0, -inf }
 0x886   : > { %1953 = vmax.xlane.f32.xlu0 %v1952_v2 }
 0x913   : > { %v1954_v4 = vpop.xlane.xlu0 %1953 }
 0x914   : > { %v1955_v5 = vsub.f32 %v1951_v0, %v1954_v4 }
 0x916   : > { %v1956_v7 = vmul.f32 1.442695, %v1955_v5 }
 0x918   : > { %6780 = vpow2.f32 %v1956_v7 }
 0x922   : > { %v6781_v8 = vpop.eup %6780 }
 0x923   : > { %v1958_v9 = vsel %vm905_vm2, %v6781_v8, 0.0 }
 0x924   : > { %1959 = vadd.xlane.f32.xlu1 %v1958_v9 }
 0x9b1   : > { %v1960_v16 = vpop.xlane.xlu1 %1959 }
 0x9b2   : > { %6782 = vrcp.f32 %v1960_v16  ;;  %v5388_v16 = vld [vmem:[%s7867_s8 + $0x88] sm:$0xff] }
 0x9bc   : > { %v6783_v17 = vpop.eup %6782 }
 0x9bd   : > { %v1962_v18 = vmul.f32 %v6783_v17, %v6781_v8  ;;  %v5382_v8 = vld [vmem:[%s7896_s5] ss:$0 sm:$0xff]  ;;  %v5389_v17 = vld [vmem:[%s7867_s8 + $0x90] sm:$0xff]  ;;  %s7897_s5 = sld [smem:[#allocation3_spill]] }
 0x9bf   : > { %6010 = vmatmul.mubr.msk.f32.vlgmr.msra.gmra.mrb[20].mxu1 %vm905_vm2, %v1962_v18  ;;  %v6549_v18 = vpack.c.bf16 %v5388_v16, %v5387_v15  ;;  %v5403_v15 = vld [vmem:[%s7867_s8 + $0x110] sm:$0xff] }
 0x9c0   : > { %6025 = vmatprep.mubr.msk.f32.mxu1 %vm6819_vm0, %v6820_v6  ;;  %6527 = vmatpush3.bf16.msra.mxu1 %v6526_v21 }
 0x9c1   : > { %6528 = vmatprep.subr.bf16.mxu1 %v6818_v3 }
 0x9c3   : > { %s640_s21 = scalar_lea.vmem %s7897_s5, %s5578_s29 }
 0x9c4   : > { %6530 = vmatpush3.bf16.msra.mxu1 %v6529_v24  ;;  %v7295_v20 = vld [vmem:[%s640_s21] sm:$0xff]  ;;  %v7299_v21 = vld [vmem:[%s640_s21 + $0x8] sm:$0xff]  ;;  %v7301_v22 = vld [vmem:[%s640_s21 + $0x10] sm:$0xff] }
 0x9c5   : > { %6537 = vmatprep.subr.bf16.mxu1 %v6818_v3  ;;  %v7308_v23 = vld [vmem:[%s640_s21 + $0x18] sm:$0xff]  ;;  %v7313_v29 = vld [vmem:[%s640_s21 + $0x20] sm:$0xff] }
 0x9c7   : > { %6026 = vmatmul.mubr.msk.f32.vlgmr.msra.gmra.mrb[22].mxu1 %vm665_vm1, %v6967_v10 }
 0x9c8   : > { %6047 = vmatprep.mubr.msk.f32.mxu1 %vm6819_vm0, %v6820_v6  ;;  %6539 = vmatpush3.bf16.msra.mxu1 %v6538_v47 }
 0x9c9   : > { %6540 = vmatprep.subr.bf16.mxu1 %v6818_v3 }
 0x9cc   : > { %6542 = vmatpush3.bf16.msra.mxu1 %v6541_v49 }
 0x9cd   : > { %6060 = vmatprep.subr.mxu1 %v6820_v6 }
 0x9cf   : > { %6048 = vmatmul.mubr.msk.f32.vlgmr.msra.gmra.mrb[24].mxu1 %vm665_vm1, %v6967_v10 }
 0x9d0   : > { %6062 = vmatprep.mubr.msk.f32.mxu1 %vm6819_vm0, %v6820_v6  ;;  %6061 = vmatpush3.msra.mxu1 %v5380_v63 }
 0x9d1   : > { %6550 = vmatprep.subr.bf16.mxu1 %v6549_v18 }
 0xa92   : > { %v2032_v30 = vpop.f32.mrb[20].mxu1 }
 0xa93   : > { %v6011_v31 = vpop.f32.mrb[21].mxu1  ;;  %6015 = vmatmul.mubr.msk.f32.vlgmr.msra.gmra.mrb[12].mxu0 %vm905_vm2, %v2032_v30  ;;  %v7317_v30 = vld [vmem:[%s640_s21 + $0x28] sm:$0xff] }
 0xa94   : > { %6533 = vmatpush3.bf16.msra.mxu0 %v6532_v27  ;;  %6036 = vmatprep.mubr.msk.f32.mxu0 %vm6819_vm0, %v6820_v6  ;;  %v7321_v31 = vld [vmem:[%s640_s21 + $0x30] sm:$0xff] }
 0xa95   : > { %6534 = vmatprep.subr.bf16.mxu0 %v6818_v3 }
 0xa98   : > { %6536 = vmatpush3.bf16.msra.mxu0 %v6535_v32  ;;  %v7325_v32 = vld [vmem:[%s640_s21 + $0x38] sm:$0xff] }
 0xa99   : > { %6050 = vmatprep.subr.mxu0 %v6820_v6 }
 0xa9a   : > { %v2191_v33 = vpop.f32.mrb[22].mxu1 }
 0xa9b   : > { %6037 = vmatmul.mubr.msk.f32.vlgmr.msra.gmra.mrb[14].mxu0 %vm665_vm1, %v6967_v10  ;;  %v6027_v34 = vpop.f32.mrb[23].mxu1  ;;  %v2192_v43 = vadd.f32 %v5361_v39, %v2191_v33  ;;  %v2637_v33 = vld [vmem:[%s7867_s8] sm:$0xff] }
 0xa9c   : > { %6052 = vmatprep.mubr.msk.f32.mxu0 %vm6819_vm0, %v6820_v6  ;;  %v2638_v34 = vld [vmem:[%s7867_s8 + $0x8] sm:$0xff]  ;;  %v5392_v39 = vld [vmem:[%s7868_s9 + $0x4] ss:$0 sm:$0xff] }
 0xaa2   : > { %v2357_v59 = vpop.f32.mrb[24].mxu1 }
 0xaa3   : > { %v6049_v61 = vpop.f32.mrb[25].mxu1  ;;  %v2358_v62 = vadd.f32 %v5375_v60, %v2357_v59 }
 0xb66   : > { %v2107_v35 = vpop.f32.mrb[12].mxu0 }
 0xb67   : > { %v2111_v36 = vadd.f32 %v2107_v35, %v7153_v51  ;;  %v6016_v37 = vpop.f32.mrb[13].mxu0  ;;  %v6544_v35 = vpack.c.bf16 %v2638_v34, %v2637_v33 }
 0xb68   : > { %v2640_v37 = vld [vmem:[%s7867_s8 + $0x18] sm:$0xff] }
 0xb6e   : > { %v2274_v40 = vpop.f32.mrb[14].mxu0 }
 0xb6f   : > { %v2275_v41 = vadd.f32 %v5368_v38, %v2274_v40  ;;  %v6038_v42 = vpop.f32.mrb[15].mxu0 }
 0xb71   : > { %6051 = vmatpush3.xpose.msk.msra.mxu0 %vm905_vm2, %v2275_v41 }
 0xb72   : > { %6055 = vmatprep.subr.mxu0 %v6820_v6 }
 0xb74   : > { %6053 = vmatmul.mubr.msk.f32.vlgmr.msra.gmra.mrb[16].mxu0 %vm905_vm2, %v2192_v43 }
 0xb75   : > { %6057 = vmatprep.mubr.msk.f32.mxu0 %vm6819_vm0, %v6820_v6  ;;  %6056 = vmatpush3.msra.mxu0 %v2358_v62 }
 0xb76   : > { %6543 = vmatprep.subr.bf16.mxu0 %v6818_v3 }
 0xc47   : > { %v2433_v50 = vpop.f32.mrb[16].mxu0 }
 0xc48   : > { %v2437_v51 = vmul.f32 0.35355338, %v2433_v50  ;;  %v6054_v52 = vpop.f32.mrb[17].mxu0 }
 0xc4a   : > { %v2438_v53 = vsel %vm905_vm2, %v2437_v51, -inf }
 0xc4b   : > { %2439 = vmax.xlane.f32.xlu0 %v2438_v53 }
 0xcd8   : > { %v2440_v54 = vpop.xlane.xlu0 %2439 }
 0xcd9   : > { %v2441_v55 = vsub.f32 %v2437_v51, %v2440_v54 }
 0xcdb   : > { %v2442_v56 = vmul.f32 1.442695, %v2441_v55  ;;  %v5383_v55 = vld [vmem:[%s7865_s6] ss:$0 sm:$0xff] }
 0xcdd   : > { %6784 = vpow2.f32 %v2442_v56 }
 0xce7   : > { %v6785_v57 = vpop.eup %6784 }
 0xce8   : > { %v2444_v58 = vsel %vm905_vm2, %v6785_v57, 0.0 }
 0xce9   : > { %2445 = vadd.xlane.f32.xlu1 %v2444_v58 }
 0xd76   : > { %v2446_v0 = vpop.xlane.xlu1 %2445 }
 0xd77   : > { %6786 = vrcp.f32 %v2446_v0 }
 0xd81   : > { %v6787_v1 = vpop.eup %6786 }
 0xd82   : > { %v2448_v2 = vmul.f32 %v6787_v1, %v6785_v57  ;;  %v5384_v57 = vld [vmem:[%s7866_s7] ss:$0 sm:$0xff] }
 0xd84   : > { %6058 = vmatmul.mubr.msk.f32.vlgmr.msra.gmra.mrb[18].mxu0 %vm905_vm2, %v2448_v2 }
 0xd85   : > { %6073 = vmatprep.mubr.msk.f32.mxu0 %vm6819_vm0, %v6820_v6  ;;  %6545 = vmatpush3.bf16.msra.mxu0 %v6544_v35 }
 0xd86   : > { %6546 = vmatprep.subr.bf16.mxu0 %v6818_v3 }
 0xe57   : > { %v2518_v4 = vpop.f32.mrb[18].mxu0 }
 0xe58   : > { %v6059_v5 = vpop.f32.mrb[19].mxu0  ;;  %6063 = vmatmul.mubr.msk.f32.vlgmr.msra.gmra.mrb[26].mxu1 %vm905_vm2, %v2518_v4 }
 0xe59   : > { %6084 = vmatprep.mubr.msk.f32.mxu1 %vm665_vm1, %v7295_v20  ;;  %6552 = vmatpush3.bf16.msra.mxu1 %v6549_v18 }
 0xf2b   : > { %v2593_v7 = vpop.f32.mrb[26].mxu1 }
 0xf2c   : > { %v2597_v9 = vadd.f32 %v2593_v7, %v2111_v36  ;;  %v6064_v11 = vpop.f32.mrb[27].mxu1  ;;  %v2639_v36 = vld [vmem:[%s7867_s8 + $0x10] sm:$0xff] }
 0xf2d   : > { %v6547_v38 = vpack.c.bf16 %v2640_v37, %v2639_v36 }
 0xf2e   : > { %v2605_v12 = vadd.f32 %v5382_v8, %v2597_v9  ;;  %v5385_v8 = vld [vmem:[%s7868_s9] ss:$0 sm:$0xff] }
 0xf2f   : > { %6548 = vmatpush3.bf16.msra.mxu0 %v6547_v38 }
 0xf30   : > { %v2606_v13 = vadd.f32 %v2605_v12, %v6967_v10  ;;  %v5390_v10 = vld [vmem:[%s7867_s8 + $0x98] sm:$0xff] }
 0xf31   : > { %v6553_v19 = vpack.c.bf16 %v5390_v10, %v5389_v17  ;;  %v5404_v17 = vld [vmem:[%s7867_s8 + $0x118] sm:$0xff] }
 0xf32   : > { %v2607_v14 = vsel %vm665_vm1, %v2606_v13, 0.0  ;;  %v6561_v18 = vpack.c.bf16 %v5404_v17, %v5403_v15 }
 0xf33   : > { %2608 = vadd.xlane.f32.xlu0 %v2607_v14  ;;  %6554 = vmatprep.subr.bf16.mxu1 %v6553_v19  ;;  %v5402_v14 = vld [vmem:[%s7867_s8 + $0x108] sm:$0xff] }
 0xf34   : > { %6556 = vmatpush3.bf16.msra.mxu1 %v6553_v19 }
 0xf35   : > { %6565 = vmatprep.subr.bf16.mxu1 %v6818_v3 }
 0xf37   : > { %6085 = vmatmul.mubr.msk.f32.vlgmr.msra.gmra.mrb[28].mxu1 %vm665_vm1, %v7299_v21 }
 0xf38   : > { %6087 = vmatprep.mubr.msk.f32.mxu1 %vm665_vm1, %v7301_v22 }
 0xf3b   : > { %6088 = vmatmul.mubr.msk.f32.gmra.mrb[30].mxu1 %vm665_vm1, %v7308_v23 }
 0xf3c   : > { %6090 = vmatprep.mubr.msk.f32.mxu1 %vm665_vm1, %v7313_v29 }
 0xf3f   : > { %6091 = vmatmul.mubr.msk.f32.gmra.mrb[32].mxu1 %vm665_vm1, %v7317_v30 }
 0xf40   : > { %6093 = vmatprep.mubr.msk.f32.mxu1 %vm665_vm1, %v7321_v31 }
 0xf43   : > { %6094 = vmatmul.mubr.msk.f32.gmra.mrb[34].mxu1 %vm665_vm1, %v7325_v32 }
 0xf44   : > { %6132 = vmatprep.mubr.msk.f32.mxu1 %vm6819_vm0, %v6820_v6 }
 0xfc0   : > { %v2609_v24 = vpop.xlane.xlu0 %2608 }
 0xfc1   : > { %v2611_v25 = vmul.f32 0.03125, %v2609_v24 }
 0xfc3   : > { %v2612_v26 = vsub.f32 %v2606_v13, %v2611_v25  ;;  %v5401_v13 = vld [vmem:[%s7867_s8 + $0x100] sm:$0xff] }
 0xfc4   : > { %v6557_v16 = vpack.c.bf16 %v5402_v14, %v5401_v13 }
 0xfc5   : > { %v2613_v27 = vmul.f32 %v2612_v26, %v2612_v26 }
 0xfc6   : > { %6558 = vmatprep.subr.bf16.mxu0 %v6557_v16 }
 0xfc7   : > { %v2614_v28 = vsel %vm665_vm1, %v2613_v27, 0.0 }
 0xfc8   : > { %2615 = vadd.xlane.f32.xlu1 %v2614_v28 }
0x100a   : > { %v6086_v40 = vpop.f32.mrb[28].mxu1 }
0x100b   : > { %v2830_v41 = vadd.f32 %v6086_v40, %v5392_v39  ;;  %v2824_v42 = vpop.f32.mrb[29].mxu1 }
0x100c   : > { %v2825_v43 = vadd.f32 %v5392_v39, %v2824_v42 }
0x100e   : > { %v6566_v45 = vpack.c.bf16 %v2830_v41, %v2825_v43  ;;  %v6089_v46 = vpop.f32.mrb[30].mxu1 }
0x100f   : > { %v2840_v47 = vadd.f32 %v6089_v46, %v5392_v39  ;;  %v2834_v48 = vpop.f32.mrb[31].mxu1 }
0x1010   : > { %6568 = vmatpush3.bf16.xpose.msk.msra.mxu1 %vm7349_vm3, %v6566_v45  ;;  %v2835_v49 = vadd.f32 %v5392_v39, %v2834_v48 }
0x1011   : > { %6569 = vmatprep.subr.bf16.mxu1 %v6818_v3 }
0x1012   : > { %v6570_v50 = vpack.c.bf16 %v2840_v47, %v2835_v49  ;;  %v6092_v60 = vpop.f32.mrb[32].mxu1 }
0x1013   : > { %v2850_v61 = vadd.f32 %v6092_v60, %v5392_v39  ;;  %v2844_v62 = vpop.f32.mrb[33].mxu1  ;;  %v5426_v60 = vld [vmem:[%s7867_s8 + $0x28] sm:$0xff] }
0x1014   : > { %v2845_v63 = vadd.f32 %v5392_v39, %v2844_v62 }
0x1016   : > { %v6574_v0 = vpack.c.bf16 %v2850_v61, %v2845_v63  ;;  %v6095_v1 = vpop.f32.mrb[34].mxu1 }
0x1017   : > { %v2860_v2 = vadd.f32 %v6095_v1, %v5392_v39  ;;  %v2854_v4 = vpop.f32.mrb[35].mxu1  ;;  %v5428_v1 = vld [vmem:[%s7867_s8 + $0x38] sm:$0xff] }
0x1018   : > { %6572 = vmatpush3.bf16.xpose.msk.msra.mxu1 %vm7349_vm3, %v6570_v50  ;;  %v2855_v5 = vadd.f32 %v5392_v39, %v2854_v4  ;;  %v5433_v4 = vld [vmem:[%s7867_s8 + $0xa8] sm:$0xff] }
0x1019   : > { %6573 = vmatprep.subr.bf16.mxu1 %v6818_v3 }
0x101a   : > { %v6578_v7 = vpack.c.bf16 %v2860_v2, %v2855_v5  ;;  %v5432_v2 = vld [vmem:[%s7867_s8 + $0xa0] sm:$0xff] }
0x1020   : > { %6576 = vmatpush3.bf16.xpose.msk.msra.mxu1 %vm7349_vm3, %v6574_v0  ;;  %v5427_v0 = vld [vmem:[%s7867_s8 + $0x30] sm:$0xff] }
0x1021   : > { %6577 = vmatprep.subr.bf16.mxu1 %v6818_v3  ;;  %v6597_v5 = vpack.c.bf16 %v5428_v1, %v5427_v0 }
0x1028   : > { %6580 = vmatpush3.bf16.xpose.msk.msra.mxu1 %vm7349_vm3, %v6578_v7  ;;  %v6599_v7 = vpack.c.bf16 %v5433_v4, %v5432_v2 }
0x1055   : > { %v2616_v51 = vpop.xlane.xlu1 %2615 }
0x1056   : > { %v2617_v52 = vmul.f32 0.03125, %v2616_v51 }
0x1058   : > { %v2618_v53 = vadd.f32 1e-05, %v2617_v52 }
0x105a   : > { %6788 = vrsqrt.f32 %v2618_v53 }
0x1064   : > { %v6789_v54 = vpop.eup %6788 }
0x1065   : > { %v2620_v56 = vmul.f32 %v6789_v54, %v2612_v26  ;;  %v5406_v26 = vld [vmem:[%s7868_s9 + $0x8] ss:$0 sm:$0xff] }
0x1067   : > { %v2628_v58 = vmul.f32 %v5383_v55, %v2620_v56 }
0x1069   : > { %v7365_v59 = vadd.f32 %v5384_v57, %v2628_v58  ;;  %v5425_v58 = vld [vmem:[%s7867_s8 + $0x20] sm:$0xff] }
0x106a   : > { %v6594_v62 = vpack.c.bf16 %v5426_v60, %v5425_v58 }
0x106b   : > { %6074 = vmatmul.mubr.msk.f32.vlgmr.msra.gmra.mrb[20].mxu0 %vm665_vm1, %v7365_v59 }
0x106c   : > { %6104 = vmatprep.mubr.msk.f32.mxu0 %vm665_vm1, %v7295_v20  ;;  %6560 = vmatpush3.bf16.msra.mxu0 %v6557_v16  ;;  %v5437_v16 = vld [vmem:[%s7868_s9 + $0x5] ss:$0 sm:$0xff] }
0x106d   : > { %6562 = vmatprep.subr.bf16.mxu0 %v6561_v18 }
0x1070   : > { %6564 = vmatpush3.bf16.msra.mxu0 %v6561_v18 }
0x1071   : > { %6581 = vmatprep.subr.bf16.mxu0 %v6818_v3 }
0x1073   : > { %6105 = vmatmul.mubr.msk.f32.vlgmr.msra.gmra.mrb[22].mxu0 %vm665_vm1, %v7299_v21 }
0x1074   : > { %6107 = vmatprep.mubr.msk.f32.mxu0 %vm665_vm1, %v7301_v22 }
0x1077   : > { %6108 = vmatmul.mubr.msk.f32.gmra.mrb[24].mxu0 %vm665_vm1, %v7308_v23 }
0x1078   : > { %6110 = vmatprep.mubr.msk.f32.mxu0 %vm665_vm1, %v7313_v29 }
0x107b   : > { %6111 = vmatmul.mubr.msk.f32.gmra.mrb[26].mxu0 %vm665_vm1, %v7317_v30 }
0x107c   : > { %6113 = vmatprep.mubr.msk.f32.mxu0 %vm665_vm1, %v7321_v31 }
0x107f   : > { %6114 = vmatmul.mubr.msk.f32.gmra.mrb[28].mxu0 %vm665_vm1, %v7325_v32 }
0x1080   : > { %6151 = vmatprep.mubr.msk.f32.mxu0 %vm6819_vm0, %v6820_v6 }
0x113e   : > { %v2717_v9 = vpop.f32.mrb[20].mxu0 }
0x113f   : > { %v2718_v11 = vadd.f32 %v5385_v8, %v2717_v9  ;;  %v6075_v12 = vpop.f32.mrb[21].mxu0  ;;  %v5434_v8 = vld [vmem:[%s7867_s8 + $0xb0] sm:$0xff]  ;;  %v5435_v9 = vld [vmem:[%s7867_s8 + $0xb8] sm:$0xff] }
0x1141   : > { %6133 = vmatmul.mubr.msk.f32.vlgmr.msra.gmra.mrb[36].mxu1 %vm905_vm2, %v2718_v11  ;;  %v6603_v11 = vpack.c.bf16 %v5435_v9, %v5434_v8 }
0x1142   : > { %6193 = vmatprep.mubr.msk.f32.mxu1 %vm665_vm1, %v7295_v20 }
0x1146   : > { %v6106_v27 = vpop.f32.mrb[22].mxu0 }
0x1147   : > { %v2948_v28 = vadd.f32 %v6106_v27, %v5406_v26  ;;  %v2942_v33 = vpop.f32.mrb[23].mxu0 }
0x1148   : > { %v2943_v34 = vadd.f32 %v5406_v26, %v2942_v33 }
0x114a   : > { %v6582_v35 = vpack.c.bf16 %v2948_v28, %v2943_v34  ;;  %v6109_v36 = vpop.f32.mrb[24].mxu0 }
0x114b   : > { %v2958_v37 = vadd.f32 %v6109_v36, %v5406_v26  ;;  %v2952_v38 = vpop.f32.mrb[25].mxu0 }
0x114c   : > { %v2953_v39 = vadd.f32 %v5406_v26, %v2952_v38  ;;  %6583 = vmatpush3.bf16.msra.mxu0 %v6582_v35 }
0x114d   : > { %6584 = vmatprep.subr.bf16.mxu0 %v6818_v3 }
0x114e   : > { %v6585_v40 = vpack.c.bf16 %v2958_v37, %v2953_v39  ;;  %v6112_v41 = vpop.f32.mrb[26].mxu0 }
0x114f   : > { %v2968_v48 = vadd.f32 %v6112_v41, %v5406_v26  ;;  %v2962_v49 = vpop.f32.mrb[27].mxu0 }
0x1150   : > { %6586 = vmatpush3.bf16.msra.mxu0 %v6585_v40  ;;  %v2963_v50 = vadd.f32 %v5406_v26, %v2962_v49  ;;  %v5448_v49 = vld [vmem:[%s7867_s8 + $0x130] sm:$0xff] }
0x1151   : > { %6587 = vmatprep.subr.bf16.mxu0 %v6818_v3 }
0x1152   : > { %v6588_v51 = vpack.c.bf16 %v2968_v48, %v2963_v50  ;;  %v6115_v52 = vpop.f32.mrb[28].mxu0  ;;  %v5447_v48 = vld [vmem:[%s7867_s8 + $0x128] sm:$0xff] }
0x1153   : > { %v2972_v53 = vpop.f32.mrb[29].mxu0  ;;  %v2978_v54 = vadd.f32 %v6115_v52, %v5406_v26 }
0x1154   : > { %v2973_v55 = vadd.f32 %v5406_v26, %v2972_v53  ;;  %6589 = vmatpush3.bf16.msra.mxu0 %v6588_v51  ;;  %v5449_v51 = vld [vmem:[%s7867_s8 + $0x138] sm:$0xff] }
0x1155   : > { %6590 = vmatprep.subr.bf16.mxu0 %v6818_v3  ;;  %v6611_v52 = vpack.c.bf16 %v5449_v51, %v5448_v49 }
0x1156   : > { %v6591_v56 = vpack.c.bf16 %v2978_v54, %v2973_v55 }
0x1158   : > { %6592 = vmatpush3.bf16.msra.mxu0 %v6591_v56 }
0x1159   : > { %6593 = vmatprep.subr.bf16.mxu0 %v6818_v3 }
0x1214   : > { %v3074_v10 = vpop.f32.mrb[36].mxu1 }
0x1215   : > { %v3078_v19 = vmul.f32 0.35355338, %v3074_v10  ;;  %v6134_v24 = vpop.f32.mrb[37].mxu1 }
0x1217   : > { %v3080_v25 = vsel %vm3079_vm4, %v3078_v19, -inf }
0x1218   : > { %3081 = vmax.xlane.f32.xlu0 %v3080_v25 }
0x12a5   : > { %v3082_v42 = vpop.xlane.xlu0 %3081 }
0x12a6   : > { %v3083_v43 = vsub.f32 %v3078_v19, %v3082_v42 }
0x12a8   : > { %v3084_v45 = vmul.f32 1.442695, %v3083_v43 }
0x12aa   : > { %6790 = vpow2.f32 %v3084_v45  ;;  %v5430_v45 = vld [vmem:[%s7868_s9 + $0x1] ss:$0 sm:$0xff] }
0x12b4   : > { %v6791_v46 = vpop.eup %6790 }
0x12b5   : > { %v3086_v47 = vsel %vm3079_vm4, %v6791_v46, 0.0 }
0x12b6   : > { %3087 = vadd.xlane.f32.xlu1 %v3086_v47  ;;  %v5446_v47 = vld [vmem:[%s7867_s8 + $0x120] sm:$0xff] }
0x12b7   : > { %v6607_v50 = vpack.c.bf16 %v5447_v48, %v5446_v47 }
0x12b9   : > { %6608 = vmatprep.subr.bf16.mxu1 %v6607_v50 }
0x12ba   : > { %6610 = vmatpush3.bf16.msra.mxu1 %v6607_v50 }
0x12bb   : > { %6612 = vmatprep.subr.bf16.mxu1 %v6611_v52 }
0x12be   : > { %6614 = vmatpush3.bf16.msra.mxu1 %v6611_v52 }
0x12bf   : > { %6631 = vmatprep.subr.bf16.mxu1 %v6818_v3 }
0x12c1   : > { %6194 = vmatmul.mubr.msk.f32.vlgmr.msra.gmra.mrb[38].mxu1 %vm665_vm1, %v7299_v21 }
0x12c2   : > { %6196 = vmatprep.mubr.msk.f32.mxu1 %vm665_vm1, %v7301_v22 }
0x12c5   : > { %6197 = vmatmul.mubr.msk.f32.gmra.mrb[40].mxu1 %vm665_vm1, %v7308_v23 }
0x12c6   : > { %6199 = vmatprep.mubr.msk.f32.mxu1 %vm665_vm1, %v7313_v29 }
0x12c9   : > { %6200 = vmatmul.mubr.msk.f32.gmra.mrb[42].mxu1 %vm665_vm1, %v7317_v30 }
0x12ca   : > { %6202 = vmatprep.mubr.msk.f32.mxu1 %vm665_vm1, %v7321_v31 }
0x12cd   : > { %6203 = vmatmul.mubr.msk.f32.gmra.mrb[44].mxu1 %vm665_vm1, %v7325_v32 }
0x12ce   : > { %6240 = vmatprep.mubr.msk.f32.mxu1 %vm6819_vm0, %v6820_v6 }
0x1343   : > { %v3088_v57 = vpop.xlane.xlu1 %3087 }
0x1344   : > { %6792 = vrcp.f32 %v3088_v57  ;;  %v5451_v57 = vld [vmem:[%s7868_s9 + $0x9] ss:$0 sm:$0xff] }
0x134e   : > { %v6793_v61 = vpop.eup %6792 }
0x134f   : > { %v3090_v63 = vmul.f32 %v6793_v61, %v6791_v46 }
0x1351   : > { %6152 = vmatmul.mubr.msk.f32.vlgmr.msra.gmra.mrb[30].mxu0 %vm3079_vm4, %v3090_v63 }
0x1352   : > { %6595 = vmatpush3.bf16.msra.mxu0 %v6594_v62  ;;  %6162 = vmatprep.mubr.msk.f32.mxu0 %vm6819_vm0, %v6820_v6 }
0x1353   : > { %6596 = vmatprep.subr.bf16.mxu0 %v6818_v3 }
0x1356   : > { %6598 = vmatpush3.bf16.msra.mxu0 %v6597_v5 }
0x1357   : > { %6600 = vmatprep.subr.bf16.mxu0 %v6599_v7 }
0x1359   : > { %6163 = vmatmul.mubr.msk.f32.vlgmr.msra.gmra.mrb[32].mxu0 %vm665_vm1, %v7365_v59 }
0x135a   : > { %6602 = vmatpush3.bf16.msra.mxu0 %v6599_v7  ;;  %6173 = vmatprep.mubr.msk.f32.mxu0 %vm665_vm1, %v7295_v20 }
0x135b   : > { %6604 = vmatprep.subr.bf16.mxu0 %v6603_v11 }
0x135e   : > { %6606 = vmatpush3.bf16.msra.mxu0 %v6603_v11 }
0x135f   : > { %6615 = vmatprep.subr.bf16.mxu0 %v6818_v3 }
0x1361   : > { %6174 = vmatmul.mubr.msk.f32.vlgmr.msra.gmra.mrb[34].mxu0 %vm665_vm1, %v7299_v21 }
0x1362   : > { %6176 = vmatprep.mubr.msk.f32.mxu0 %vm665_vm1, %v7301_v22 }
0x1365   : > { %6177 = vmatmul.mubr.msk.f32.gmra.mrb[36].mxu0 %vm665_vm1, %v7308_v23 }
0x1366   : > { %6179 = vmatprep.mubr.msk.f32.mxu0 %vm665_vm1, %v7313_v29 }
0x1369   : > { %6180 = vmatmul.mubr.msk.f32.gmra.mrb[38].mxu0 %vm665_vm1, %v7317_v30 }
0x136a   : > { %6182 = vmatprep.mubr.msk.f32.mxu0 %vm665_vm1, %v7321_v31 }
0x136d   : > { %6183 = vmatmul.mubr.msk.f32.gmra.mrb[40].mxu0 %vm665_vm1, %v7325_v32 }
0x136e   : > { %6221 = vmatprep.mubr.msk.f32.mxu0 %vm6819_vm0, %v6820_v6 }
0x1394   : > { %v6195_v58 = vpop.f32.mrb[38].mxu1 }
0x1395   : > { %v3451_v60 = vadd.f32 %v6195_v58, %v5451_v57  ;;  %v3445_v61 = vpop.f32.mrb[39].mxu1  ;;  %v3164_v58 = vld [vmem:[%s7869_s10] sm:$0xff] }
0x1396   : > { %v3446_v62 = vadd.f32 %v5451_v57, %v3445_v61  ;;  %v5474_v61 = vld [vmem:[%s7867_s8 + $0x48] sm:$0xff] }
0x1398   : > { %v6632_v63 = vpack.c.bf16 %v3451_v60, %v3446_v62  ;;  %v6198_v0 = vpop.f32.mrb[40].mxu1  ;;  %v5473_v60 = vld [vmem:[%s7867_s8 + $0x40] sm:$0xff] }
0x1399   : > { %v3461_v1 = vadd.f32 %v6198_v0, %v5451_v57  ;;  %v3455_v2 = vpop.f32.mrb[41].mxu1  ;;  %v6644_v0 = vpack.c.bf16 %v5474_v61, %v5473_v60 }
0x139a   : > { %v3456_v4 = vadd.f32 %v5451_v57, %v3455_v2  ;;  %6633 = vmatpush3.bf16.msra.mxu1 %v6632_v63  ;;  %v5476_v2 = vld [vmem:[%s7867_s8 + $0x58] sm:$0xff] }
0x139b   : > { %6634 = vmatprep.subr.bf16.mxu1 %v6818_v3 }
0x139c   : > { %v6635_v5 = vpack.c.bf16 %v3461_v1, %v3456_v4  ;;  %v5475_v1 = vld [vmem:[%s7867_s8 + $0x50] sm:$0xff] }
0x139d   : > { %v6647_v4 = vpack.c.bf16 %v5476_v2, %v5475_v1 }
0x139e   : > { %6636 = vmatpush3.bf16.msra.mxu1 %v6635_v5 }
0x139f   : > { %6637 = vmatprep.subr.bf16.mxu1 %v6818_v3 }
0x1424   : > { %v7469_v12 = vpop.f32.mrb[30].mxu0 }
0x1425   : > { %v6153_v13 = vpop.f32.mrb[31].mxu0 }
0x142c   : > { %v3244_v14 = vpop.f32.mrb[32].mxu0 }
0x142d   : > { %v6164_v15 = vpop.f32.mrb[33].mxu0  ;;  %v3245_v46 = vadd.f32 %v5430_v45, %v3244_v14  ;;  %v6201_v14 = vpop.f32.mrb[42].mxu1 }
0x142e   : > { %v3465_v15 = vpop.f32.mrb[43].mxu1 }
0x1434   : > { %v6175_v17 = vpop.f32.mrb[34].mxu0 }
0x1435   : > { %v3333_v18 = vadd.f32 %v6175_v17, %v5437_v16  ;;  %v3327_v10 = vpop.f32.mrb[35].mxu0  ;;  %v3466_v17 = vadd.f32 %v5451_v57, %v3465_v15 }
0x1436   : > { %v3328_v19 = vadd.f32 %v5437_v16, %v3327_v10  ;;  %v6204_v10 = vpop.f32.mrb[44].mxu1 }
0x1438   : > { %v6616_v24 = vpack.c.bf16 %v3333_v18, %v3328_v19  ;;  %v6178_v25 = vpop.f32.mrb[36].mxu0  ;;  %v3475_v19 = vpop.f32.mrb[45].mxu1 }
0x1439   : > { %v3343_v26 = vadd.f32 %v6178_v25, %v5437_v16  ;;  %v3337_v27 = vpop.f32.mrb[37].mxu0  ;;  %v3476_v25 = vadd.f32 %v5451_v57, %v3475_v19 }
0x143a   : > { %6618 = vmatpush3.bf16.xpose.msk.msra.mxu0 %vm7349_vm3, %v6616_v24  ;;  %v3338_v28 = vadd.f32 %v5437_v16, %v3337_v27  ;;  %v3481_v24 = vadd.f32 %v6204_v10, %v5451_v57  ;;  %v5480_v27 = vld [vmem:[%s7867_s8 + $0xc0] sm:$0xff] }
0x143b   : > { %6619 = vmatprep.subr.bf16.mxu0 %v6818_v3 }
0x143c   : > { %v6620_v33 = vpack.c.bf16 %v3343_v26, %v3338_v28  ;;  %v6181_v34 = vpop.f32.mrb[38].mxu0  ;;  %v6641_v26 = vpack.c.bf16 %v3481_v24, %v3476_v25  ;;  %v5481_v28 = vld [vmem:[%s7867_s8 + $0xc8] sm:$0xff]  ;;  %v5494_v24 = vld [vmem:[%s7867_s8 + $0x140] sm:$0xff] }
0x143d   : > { %v3353_v35 = vadd.f32 %v6181_v34, %v5437_v16  ;;  %v3347_v36 = vpop.f32.mrb[39].mxu0  ;;  %v6649_v34 = vpack.c.bf16 %v5481_v28, %v5480_v27  ;;  %v5495_v25 = vld [vmem:[%s7867_s8 + $0x148] sm:$0xff]  ;;  %v5497_v28 = vld [vmem:[%s7867_s8 + $0x158] sm:$0xff] }
0x143e   : > { %v3348_v37 = vadd.f32 %v5437_v16, %v3347_v36  ;;  %v6657_v27 = vpack.c.bf16 %v5495_v25, %v5494_v24  ;;  %v5529_v24 = vld [vmem:[%s7867_s8 + $0xf0] sm:$0xff]  ;;  %v5530_v25 = vld [vmem:[%s7867_s8 + $0xf8] sm:$0xff] }
0x1440   : > { %v6624_v38 = vpack.c.bf16 %v3353_v35, %v3348_v37  ;;  %v6184_v39 = vpop.f32.mrb[40].mxu0  ;;  %v5483_v35 = vld [vmem:[%s7867_s8 + $0xd8] sm:$0xff] }
0x1441   : > { %v3363_v40 = vadd.f32 %v6184_v39, %v5437_v16  ;;  %v3357_v41 = vpop.f32.mrb[41].mxu0 }
0x1442   : > { %6622 = vmatpush3.bf16.xpose.msk.msra.mxu0 %vm7349_vm3, %v6620_v33  ;;  %v3358_v42 = vadd.f32 %v5437_v16, %v3357_v41  ;;  %v3471_v16 = vadd.f32 %v6201_v14, %v5451_v57  ;;  %v5482_v33 = vld [vmem:[%s7867_s8 + $0xd0] sm:$0xff] }
0x1443   : > { %6623 = vmatprep.subr.bf16.mxu0 %v6818_v3  ;;  %v6653_v36 = vpack.c.bf16 %v5483_v35, %v5482_v33 }
0x1444   : > { %v6628_v43 = vpack.c.bf16 %v3363_v40, %v3358_v42  ;;  %v6638_v18 = vpack.c.bf16 %v3471_v16, %v3466_v17  ;;  %v5470_v40 = vld [vmem:[%s7869_s10 + $0x8] sm:$0xff]  ;;  %v5485_v42 = vld [vmem:[%s7868_s9 + $0x6] ss:$0 sm:$0xff]  ;;  %v5478_v17 = vld [vmem:[%s7868_s9 + $0x2] ss:$0 sm:$0xff] }
0x1446   : > { %6639 = vmatpush3.bf16.msra.mxu1 %v6638_v18 }
0x1447   : > { %6640 = vmatprep.subr.bf16.mxu1 %v6818_v3 }
0x144a   : > { %6626 = vmatpush3.bf16.xpose.msk.msra.mxu0 %vm7349_vm3, %v6624_v38  ;;  %6642 = vmatpush3.bf16.msra.mxu1 %v6641_v26  ;;  %v5496_v26 = vld [vmem:[%s7867_s8 + $0x150] sm:$0xff] }
0x144b   : > { %6627 = vmatprep.subr.bf16.mxu0 %v6818_v3  ;;  %6243 = vmatprep.subr.mxu1 %v6820_v6  ;;  %v6661_v33 = vpack.c.bf16 %v5497_v28, %v5496_v26  ;;  %v6703_v26 = vpack.c.bf16 %v5530_v25, %v5529_v24 }
0x1452   : > { %6630 = vmatpush3.bf16.xpose.msk.msra.mxu0 %vm7349_vm3, %v6628_v43 }
0x1453   : > { %6650 = vmatprep.subr.bf16.mxu0 %v6649_v34 }
0x1459   : > { %6222 = vmatmul.mubr.msk.f32.vlgmr.msra.gmra.mrb[42].mxu0 %vm905_vm2, %v3245_v46 }
0x145a   : > { %6272 = vmatprep.mubr.msk.f32.mxu0 %vm665_vm1, %v7295_v20  ;;  %6652 = vmatpush3.bf16.msra.mxu0 %v6649_v34 }
0x145b   : > { %6654 = vmatprep.subr.bf16.mxu0 %v6653_v36 }
0x145e   : > { %6656 = vmatpush3.bf16.msra.mxu0 %v6653_v36 }
0x145f   : > { %6665 = vmatprep.subr.bf16.mxu0 %v6818_v3 }
0x1461   : > { %6273 = vmatmul.mubr.msk.f32.vlgmr.msra.gmra.mrb[44].mxu0 %vm665_vm1, %v7299_v21 }
0x1462   : > { %6275 = vmatprep.mubr.msk.f32.mxu0 %vm665_vm1, %v7301_v22 }
0x1465   : > { %6276 = vmatmul.mubr.msk.f32.gmra.mrb[46].mxu0 %vm665_vm1, %v7308_v23 }
0x1466   : > { %6278 = vmatprep.mubr.msk.f32.mxu0 %vm665_vm1, %v7313_v29 }
0x1469   : > { %6279 = vmatmul.mubr.msk.f32.gmra.mrb[48].mxu0 %vm665_vm1, %v7317_v30 }
0x146a   : > { %6281 = vmatprep.mubr.msk.f32.mxu0 %vm665_vm1, %v7321_v31 }
0x146d   : > { %6282 = vmatmul.mubr.msk.f32.gmra.mrb[50].mxu0 %vm665_vm1, %v7325_v32 }
0x146e   : > { %6320 = vmatprep.mubr.msk.f32.mxu0 %vm6819_vm0, %v6820_v6 }
0x152c   : > { %v3577_v53 = vpop.f32.mrb[42].mxu0 }
0x152d   : > { %v3581_v54 = vmul.f32 0.35355338, %v3577_v53  ;;  %v6223_v55 = vpop.f32.mrb[43].mxu0 }
0x152f   : > { %v3582_v56 = vsel %vm3079_vm4, %v3581_v54, -inf }
0x1530   : > { %3583 = vmax.xlane.f32.xlu0 %v3582_v56 }
0x1534   : > { %v6274_v41 = vpop.f32.mrb[44].mxu0 }
0x1535   : > { %v3982_v43 = vadd.f32 %v6274_v41, %v5485_v42  ;;  %v3976_v45 = vpop.f32.mrb[45].mxu0 }
0x1536   : > { %v3977_v46 = vadd.f32 %v5485_v42, %v3976_v45 }
0x1538   : > { %v6277_v47 = vpop.f32.mrb[46].mxu0  ;;  %v6666_v50 = vpack.c.bf16 %v3982_v43, %v3977_v46 }
0x1539   : > { %v3992_v48 = vadd.f32 %v6277_v47, %v5485_v42  ;;  %v3986_v49 = vpop.f32.mrb[47].mxu0 }
0x153a   : > { %v3987_v51 = vadd.f32 %v5485_v42, %v3986_v49  ;;  %6668 = vmatpush3.bf16.xpose.msk.msra.mxu0 %vm7349_vm3, %v6666_v50 }
0x153b   : > { %6669 = vmatprep.subr.bf16.mxu0 %v6818_v3 }
0x153c   : > { %v6670_v52 = vpack.c.bf16 %v3992_v48, %v3987_v51  ;;  %v6280_v53 = vpop.f32.mrb[48].mxu0 }
0x153d   : > { %v3996_v55 = vpop.f32.mrb[49].mxu0 }
0x153e   : > { %v3997_v56 = vadd.f32 %v5485_v42, %v3996_v55 }
0x1540   : > { %v6283_v5 = vpop.f32.mrb[50].mxu0 }
0x1542   : > { %6672 = vmatpush3.bf16.xpose.msk.msra.mxu0 %vm7349_vm3, %v6670_v52 }
0x1543   : > { %6673 = vmatprep.subr.bf16.mxu0 %v6818_v3 }
0x15bd   : > { %v3584_v7 = vpop.xlane.xlu0 %3583 }
0x15be   : > { %v3585_v8 = vsub.f32 %v3581_v54, %v3584_v7  ;;  %v4002_v54 = vadd.f32 %v6280_v53, %v5485_v42  ;;  %v4012_v7 = vadd.f32 %v6283_v5, %v5485_v42 }
0x15c0   : > { %v3586_v9 = vmul.f32 1.442695, %v3585_v8  ;;  %v6674_v57 = vpack.c.bf16 %v4002_v54, %v3997_v56  ;;  %v4006_v8 = vpop.f32.mrb[51].mxu0 }
0x15c2   : > { %6794 = vpow2.f32 %v3586_v9  ;;  %6676 = vmatpush3.bf16.xpose.msk.msra.mxu0 %vm7349_vm3, %v6674_v57  ;;  %v4007_v9 = vadd.f32 %v5485_v42, %v4006_v8  ;;  %v5520_v8 = vld [vmem:[%s7867_s8 + $0x60] sm:$0xff] }
0x15c3   : > { %6677 = vmatprep.subr.bf16.mxu0 %v6818_v3 }
0x15cc   : > { %v6795_v11 = vpop.eup %6794 }
0x15cd   : > { %v3588_v13 = vsel %vm3079_vm4, %v6795_v11, 0.0 }
0x15ce   : > { %3589 = vadd.xlane.f32.xlu1 %v3588_v13 }
0x165b   : > { %v3590_v37 = vpop.xlane.xlu1 %3589 }
0x165c   : > { %6796 = vrcp.f32 %v3590_v37 }
0x1666   : > { %v6797_v38 = vpop.eup %6796 }
0x1667   : > { %v3592_v39 = vmul.f32 %v6797_v38, %v6795_v11  ;;  %v6678_v11 = vpack.c.bf16 %v4012_v7, %v4007_v9  ;;  %v5499_v38 = vld [vmem:[%s7868_s9 + $0xa] ss:$0 sm:$0xff]  ;;  %v5518_v7 = vld [vmem:[%s7869_s10 + $0x10] sm:$0xff] }
0x1668   : > { %v5521_v9 = vld [vmem:[%s7867_s8 + $0x68] sm:$0xff] }
0x1669   : > { %6241 = vmatmul.mubr.msk.f32.vlgmr.msra.gmra.mrb[46].mxu1 %vm3079_vm4, %v3592_v39  ;;  %6680 = vmatpush3.bf16.xpose.msk.msra.mxu0 %vm7349_vm3, %v6678_v11  ;;  %v6694_v11 = vpack.c.bf16 %v5521_v9, %v5520_v8 }
0x166a   : > { %6244 = vmatpush3.msra.mxu1 %v5470_v40  ;;  %6245 = vmatprep.mubr.msk.f32.mxu1 %vm6819_vm0, %v6820_v6 }
0x166b   : > { %6248 = vmatprep.subr.mxu1 %v6820_v6 }
0x173c   : > { %v3662_v62 = vpop.f32.mrb[46].mxu1 }
0x173d   : > { %v6242_v63 = vpop.f32.mrb[47].mxu1  ;;  %6246 = vmatmul.mubr.msk.f32.vlgmr.msra.gmra.mrb[48].mxu1 %vm905_vm2, %v3662_v62 }
0x173e   : > { %6249 = vmatpush3.msra.mxu1 %v3164_v58  ;;  %6250 = vmatprep.mubr.msk.f32.mxu1 %vm6819_vm0, %v6820_v6 }
0x173f   : > { %6643 = vmatprep.subr.bf16.mxu1 %v6818_v3 }
0x1741   : > { %6251 = vmatmul.mubr.msk.f32.vlgmr.msra.gmra.mrb[50].mxu1 %vm905_vm2, %v7469_v12 }
0x1742   : > { %6645 = vmatpush3.bf16.msra.mxu1 %v6644_v0  ;;  %6261 = vmatprep.mubr.msk.f32.mxu1 %vm6819_vm0, %v6820_v6 }
0x1743   : > { %6646 = vmatprep.subr.bf16.mxu1 %v6818_v3 }
0x1746   : > { %6648 = vmatpush3.bf16.msra.mxu1 %v6647_v4 }
0x1747   : > { %6658 = vmatprep.subr.bf16.mxu1 %v6657_v27 }
0x1749   : > { %6262 = vmatmul.mubr.msk.f32.vlgmr.msra.gmra.mrb[52].mxu1 %vm665_vm1, %v7365_v59 }
0x174a   : > { %6292 = vmatprep.mubr.msk.f32.mxu1 %vm665_vm1, %v7295_v20  ;;  %6660 = vmatpush3.bf16.msra.mxu1 %v6657_v27 }
0x174b   : > { %6662 = vmatprep.subr.bf16.mxu1 %v6661_v33 }
0x174e   : > { %6664 = vmatpush3.bf16.msra.mxu1 %v6661_v33 }
0x174f   : > { %6681 = vmatprep.subr.bf16.mxu1 %v6818_v3 }
0x1751   : > { %6293 = vmatmul.mubr.msk.f32.vlgmr.msra.gmra.mrb[54].mxu1 %vm665_vm1, %v7299_v21 }
0x1752   : > { %6295 = vmatprep.mubr.msk.f32.mxu1 %vm665_vm1, %v7301_v22 }
0x1755   : > { %6296 = vmatmul.mubr.msk.f32.gmra.mrb[56].mxu1 %vm665_vm1, %v7308_v23 }
0x1756   : > { %6298 = vmatprep.mubr.msk.f32.mxu1 %vm665_vm1, %v7313_v29 }
0x1759   : > { %6299 = vmatmul.mubr.msk.f32.gmra.mrb[58].mxu1 %vm665_vm1, %v7317_v30 }
0x175a   : > { %6301 = vmatprep.mubr.msk.f32.mxu1 %vm665_vm1, %v7321_v31 }
0x175d   : > { %6302 = vmatmul.mubr.msk.f32.gmra.mrb[60].mxu1 %vm665_vm1, %v7325_v32 }
0x175e   : > { %6339 = vmatprep.mubr.msk.f32.mxu1 %vm6819_vm0, %v6820_v6 }
0x1810   : > { %v3737_v12 = vpop.f32.mrb[48].mxu1 }
0x1811   : > { %v6247_v13 = vpop.f32.mrb[49].mxu1 }
0x1812   : > { %v5523_v13 = vld [vmem:[%s7867_s8 + $0x78] sm:$0xff] }
0x1814   : > { %v3810_v14 = vpop.f32.mrb[50].mxu1 }
0x1815   : > { %v7607_v15 = vadd.f32 %v3810_v14, %v3737_v12  ;;  %v6252_v16 = vpop.f32.mrb[51].mxu1  ;;  %v5522_v12 = vld [vmem:[%s7867_s8 + $0x70] sm:$0xff] }
0x1816   : > { %v5527_v16 = vld [vmem:[%s7867_s8 + $0xe0] sm:$0xff] }
0x181c   : > { %v3893_v18 = vpop.f32.mrb[52].mxu1 }
0x181d   : > { %v3894_v10 = vadd.f32 %v5478_v17, %v3893_v18  ;;  %v6263_v19 = vpop.f32.mrb[53].mxu1  ;;  %v5528_v17 = vld [vmem:[%s7867_s8 + $0xe8] sm:$0xff] }
0x181e   : > { %v6699_v19 = vpack.c.bf16 %v5528_v17, %v5527_v16 }
0x181f   : > { %6321 = vmatmul.mubr.msk.f32.vlgmr.msra.gmra.mrb[52].mxu0 %vm905_vm2, %v3894_v10  ;;  %v6697_v10 = vpack.c.bf16 %v5523_v13, %v5522_v12 }
0x1820   : > { %6386 = vmatprep.mubr.msk.f32.mxu0 %vm665_vm1, %v7295_v20 }
0x1824   : > { %v6294_v39 = vpop.f32.mrb[54].mxu1 }
0x1825   : > { %v4100_v40 = vadd.f32 %v6294_v39, %v5499_v38  ;;  %v4094_v41 = vpop.f32.mrb[55].mxu1 }
0x1826   : > { %v4095_v42 = vadd.f32 %v5499_v38, %v4094_v41 }
0x1828   : > { %v6682_v43 = vpack.c.bf16 %v4100_v40, %v4095_v42  ;;  %v6297_v45 = vpop.f32.mrb[56].mxu1 }
0x1829   : > { %v4110_v46 = vadd.f32 %v6297_v45, %v5499_v38  ;;  %v4104_v47 = vpop.f32.mrb[57].mxu1 }
0x182a   : > { %v4105_v48 = vadd.f32 %v5499_v38, %v4104_v47  ;;  %6683 = vmatpush3.bf16.msra.mxu1 %v6682_v43 }
0x182b   : > { %6684 = vmatprep.subr.bf16.mxu1 %v6818_v3 }
0x182c   : > { %v6685_v49 = vpack.c.bf16 %v4110_v46, %v4105_v48  ;;  %v6300_v55 = vpop.f32.mrb[58].mxu1 }
0x182d   : > { %v4114_v56 = vpop.f32.mrb[59].mxu1  ;;  %v4120_v57 = vadd.f32 %v6300_v55, %v5499_v38 }
0x182e   : > { %6686 = vmatpush3.bf16.msra.mxu1 %v6685_v49  ;;  %v4115_v58 = vadd.f32 %v5499_v38, %v4114_v56  ;;  %v5525_v56 = vld [vmem:[%s7868_s9 + $0x3] ss:$0 sm:$0xff] }
0x182f   : > { %6687 = vmatprep.subr.bf16.mxu1 %v6818_v3 }
0x1830   : > { %v6688_v60 = vpack.c.bf16 %v4120_v57, %v4115_v58  ;;  %v6303_v61 = vpop.f32.mrb[60].mxu1  ;;  %v5541_v58 = vld [vmem:[%s7867_s8 + $0x160] sm:$0xff] }
0x1831   : > { %v4124_v62 = vpop.f32.mrb[61].mxu1  ;;  %v4130_v63 = vadd.f32 %v6303_v61, %v5499_v38 }
0x1832   : > { %v4125_v0 = vadd.f32 %v5499_v38, %v4124_v62  ;;  %6689 = vmatpush3.bf16.msra.mxu1 %v6688_v60  ;;  %v5542_v60 = vld [vmem:[%s7867_s8 + $0x168] sm:$0xff]  ;;  %v5544_v62 = vld [vmem:[%s7867_s8 + $0x178] sm:$0xff] }
0x1833   : > { %6690 = vmatprep.subr.bf16.mxu1 %v6818_v3  ;;  %v6707_v61 = vpack.c.bf16 %v5542_v60, %v5541_v58 }
0x1834   : > { %v6691_v1 = vpack.c.bf16 %v4130_v63, %v4125_v0  ;;  %v6711_v63 = vpack.c.bf16 %v5544_v62, %v5543_v44  ;;  %v5568_v44 = vld [vmem:[%s7871_s12] ss:$0 sm:$0xff] }
0x1835   : > { %6708 = vmatprep.subr.bf16.mxu0 %v6707_v61  ;;  %v5091_v62 = vld [vmem:[%s7875_s16] sm:$0xff] }
0x1836   : > { %6692 = vmatpush3.bf16.msra.mxu1 %v6691_v1  ;;  %6710 = vmatpush3.bf16.msra.mxu0 %v6707_v61 }
0x1837   : > { %6342 = vmatprep.subr.mxu1 %v6820_v6  ;;  %6712 = vmatprep.subr.bf16.mxu0 %v6711_v63 }
0x183a   : > { %6714 = vmatpush3.bf16.msra.mxu0 %v6711_v63  ;;  %v5092_v63 = vld [vmem:[%s7875_s16 + $0x8] sm:$0xff] }
0x183b   : > { %6731 = vmatprep.subr.bf16.mxu0 %v6818_v3 }
0x183d   : > { %6387 = vmatmul.mubr.msk.f32.vlgmr.msra.gmra.mrb[54].mxu0 %vm665_vm1, %v7299_v21 }
0x183e   : > { %6389 = vmatprep.mubr.msk.f32.mxu0 %vm665_vm1, %v7301_v22 }
0x1841   : > { %6390 = vmatmul.mubr.msk.f32.gmra.mrb[56].mxu0 %vm665_vm1, %v7308_v23 }
0x1842   : > { %6392 = vmatprep.mubr.msk.f32.mxu0 %vm665_vm1, %v7313_v29 }
0x1845   : > { %6393 = vmatmul.mubr.msk.f32.gmra.mrb[58].mxu0 %vm665_vm1, %v7317_v30 }
0x1846   : > { %6395 = vmatprep.mubr.msk.f32.mxu0 %vm665_vm1, %v7321_v31 }
0x1849   : > { %6396 = vmatmul.mubr.msk.f32.gmra.mrb[60].mxu0 %vm665_vm1, %v7325_v32 }
0x184a   : > { %6433 = vmatprep.mubr.msk.f32.mxu0 %vm6819_vm0, %v6820_v6 }
0x18f2   : > { %v4226_v34 = vpop.f32.mrb[52].mxu0 }
0x18f3   : > { %v4230_v35 = vmul.f32 0.35355338, %v4226_v34  ;;  %v6322_v36 = vpop.f32.mrb[53].mxu0 }
0x18f5   : > { %v4231_v37 = vsel %vm3079_vm4, %v4230_v35, -inf }
0x18f6   : > { %4232 = vmax.xlane.f32.xlu0 %v4231_v37 }
0x1983   : > { %v4233_v50 = vpop.xlane.xlu0 %4232 }
0x1984   : > { %v4234_v51 = vsub.f32 %v4230_v35, %v4233_v50  ;;  %v5532_v35 = vld [vmem:[%s7868_s9 + $0x7] ss:$0 sm:$0xff] }
0x1986   : > { %v4235_v52 = vmul.f32 1.442695, %v4234_v51 }
0x1988   : > { %6798 = vpow2.f32 %v4235_v52 }
0x1992   : > { %v6799_v53 = vpop.eup %6798 }
0x1993   : > { %v4237_v54 = vsel %vm3079_vm4, %v6799_v53, 0.0 }
0x1994   : > { %4238 = vadd.xlane.f32.xlu1 %v4237_v54 }
0x1a21   : > { %v4239_v2 = vpop.xlane.xlu1 %4238 }
0x1a22   : > { %6800 = vrcp.f32 %v4239_v2 }
0x1a2c   : > { %v6801_v4 = vpop.eup %6800 }
0x1a2d   : > { %v4241_v5 = vmul.f32 %v6801_v4, %v6799_v53 }
0x1a2f   : > { %6340 = vmatmul.mubr.msk.f32.vlgmr.msra.gmra.mrb[62].mxu1 %vm3079_vm4, %v4241_v5 }
0x1a30   : > { %6343 = vmatpush3.msra.mxu1 %v5518_v7  ;;  %6344 = vmatprep.mubr.msk.f32.mxu1 %vm6819_vm0, %v6820_v6 }
0x1a31   : > { %6693 = vmatprep.subr.bf16.mxu1 %v6818_v3 }
0x1b02   : > { %v4311_v14 = vpop.f32.mrb[62].mxu1 }
0x1b03   : > { %v6341_v18 = vpop.f32.mrb[63].mxu1  ;;  %6345 = vmatmul.mubr.msk.f32.vlgmr.msra.gmra.mrb[64].mxu1 %vm905_vm2, %v4311_v14 }
0x1b04   : > { %6695 = vmatpush3.bf16.msra.mxu1 %v6694_v11  ;;  %6355 = vmatprep.mubr.msk.f32.mxu1 %vm6819_vm0, %v6820_v6 }
0x1b05   : > { %6696 = vmatprep.subr.bf16.mxu1 %v6818_v3 }
0x1b08   : > { %6698 = vmatpush3.bf16.msra.mxu1 %v6697_v10 }
0x1b09   : > { %6700 = vmatprep.subr.bf16.mxu1 %v6699_v19 }
0x1b0b   : > { %6356 = vmatmul.mubr.msk.f32.vlgmr.msra.gmra.mrb[66].mxu1 %vm665_vm1, %v7365_v59 }
0x1b0c   : > { %6702 = vmatpush3.bf16.msra.mxu1 %v6699_v19  ;;  %6366 = vmatprep.mubr.msk.f32.mxu1 %vm665_vm1, %v7295_v20 }
0x1b0d   : > { %6704 = vmatprep.subr.bf16.mxu1 %v6703_v26 }
0x1b10   : > { %6706 = vmatpush3.bf16.msra.mxu1 %v6703_v26 }
0x1b11   : > { %6715 = vmatprep.subr.bf16.mxu1 %v6818_v3 }
0x1b13   : > { %6367 = vmatmul.mubr.msk.f32.vlgmr.msra.gmra.mrb[68].mxu1 %vm665_vm1, %v7299_v21 }
0x1b14   : > { %6369 = vmatprep.mubr.msk.f32.mxu1 %vm665_vm1, %v7301_v22 }
0x1b17   : > { %6370 = vmatmul.mubr.msk.f32.gmra.mrb[70].mxu1 %vm665_vm1, %v7308_v23 }
0x1b18   : > { %6372 = vmatprep.mubr.msk.f32.mxu1 %vm665_vm1, %v7313_v29  ;;  %v5546_v29 = vld [vmem:[%s7868_s9 + $0xb] ss:$0 sm:$0xff] }
0x1b1b   : > { %6373 = vmatmul.mubr.msk.f32.gmra.mrb[72].mxu1 %vm665_vm1, %v7317_v30  ;;  %v6388_v30 = vpop.f32.mrb[54].mxu0 }
0x1b1c   : > { %6375 = vmatprep.mubr.msk.f32.mxu1 %vm665_vm1, %v7321_v31  ;;  %v4677_v1 = vadd.f32 %v6388_v30, %v5546_v29  ;;  %v4671_v2 = vpop.f32.mrb[55].mxu0  ;;  %v5094_v30 = vld [vmem:[%s7875_s16 + $0x18] sm:$0xff] }
0x1b1d   : > { %v4672_v31 = vadd.f32 %v5546_v29, %v4671_v2  ;;  %v6391_v5 = vpop.f32.mrb[56].mxu0  ;;  %v5095_v2 = vld [vmem:[%s7875_s16 + $0x20] sm:$0xff] }
0x1b1e   : > { %v4681_v7 = vpop.f32.mrb[57].mxu0 }
0x1b1f   : > { %6376 = vmatmul.mubr.msk.f32.gmra.mrb[74].mxu1 %vm665_vm1, %v7325_v32  ;;  %v6732_v4 = vpack.c.bf16 %v4677_v1, %v4672_v31  ;;  %v4687_v32 = vadd.f32 %v6391_v5, %v5546_v29  ;;  %v4682_v8 = vadd.f32 %v5546_v29, %v4681_v7  ;;  %v6394_v11 = vpop.f32.mrb[58].mxu0  ;;  %v5096_v31 = vld [vmem:[%s7875_s16 + $0x28] sm:$0xff]  ;;  %v5098_v5 = vld [vmem:[%s7875_s16 + $0x38] sm:$0xff]  ;;  %v5570_v7 = vld [vmem:[%s7874_s15] ss:$0 sm:$0xff] }
0x1b20   : > { %6414 = vmatprep.mubr.msk.f32.mxu1 %vm6819_vm0, %v6820_v6  ;;  %v4697_v18 = vadd.f32 %v6394_v11, %v5546_v29  ;;  %v4691_v10 = vpop.f32.mrb[59].mxu0 }
0x1b21   : > { %6733 = vmatpush3.bf16.msra.mxu0 %v6732_v4  ;;  %v6735_v9 = vpack.c.bf16 %v4687_v32, %v4682_v8  ;;  %v4692_v19 = vadd.f32 %v5546_v29, %v4691_v10  ;;  %v6397_v25 = vpop.f32.mrb[60].mxu0  ;;  %v6756_v4 = vpack.c.bf16 %v5096_v31, %v5095_v2 }
0x1b22   : > { %6734 = vmatprep.subr.bf16.mxu0 %v6818_v3  ;;  %v4701_v26 = vpop.f32.mrb[61].mxu0 }
0x1b23   : > { %v6738_v24 = vpack.c.bf16 %v4697_v18, %v4692_v19 }
0x1b25   : > { %6736 = vmatpush3.bf16.msra.mxu0 %v6735_v9 }
0x1b26   : > { %6737 = vmatprep.subr.bf16.mxu0 %v6818_v3 }
0x1b29   : > { %6739 = vmatpush3.bf16.msra.mxu0 %v6738_v24 }
0x1b2a   : > { %6740 = vmatprep.subr.bf16.mxu0 %v6818_v3 }
0x1bd6   : > { %v4386_v20 = vpop.f32.mrb[64].mxu1 }
0x1bd7   : > { %v7710_v27 = vadd.f32 %v4386_v20, %v7607_v15  ;;  %v6346_v28 = vpop.f32.mrb[65].mxu1  ;;  %v4707_v20 = vadd.f32 %v6397_v25, %v5546_v29 }
0x1bd8   : > { %v4702_v28 = vadd.f32 %v5546_v29, %v4701_v26  ;;  %v5093_v29 = vld [vmem:[%s7875_s16 + $0x10] sm:$0xff] }
0x1bd9   : > { %v6753_v1 = vpack.c.bf16 %v5094_v30, %v5093_v29 }
0x1bde   : > { %v4470_v33 = vpop.f32.mrb[66].mxu1 }
0x1bdf   : > { %v6357_v34 = vpop.f32.mrb[67].mxu1  ;;  %v4471_v57 = vadd.f32 %v5525_v56, %v4470_v33  ;;  %v6741_v33 = vpack.c.bf16 %v4707_v20, %v4702_v28 }
0x1be1   : > { %6742 = vmatpush3.bf16.msra.mxu0 %v6741_v33 }
0x1be2   : > { %6436 = vmatprep.subr.mxu0 %v6820_v6 }
0x1be6   : > { %v6368_v36 = vpop.f32.mrb[68].mxu1 }
0x1be7   : > { %v4559_v37 = vadd.f32 %v6368_v36, %v5532_v35  ;;  %v4553_v38 = vpop.f32.mrb[69].mxu1 }
0x1be8   : > { %v4554_v39 = vadd.f32 %v5532_v35, %v4553_v38 }
0x1bea   : > { %v6716_v40 = vpack.c.bf16 %v4559_v37, %v4554_v39  ;;  %v6371_v41 = vpop.f32.mrb[70].mxu1  ;;  %v5565_v37 = vld [vmem:[%s7869_s10 + $0x18] sm:$0xff] }
0x1beb   : > { %v4569_v42 = vadd.f32 %v6371_v41, %v5532_v35  ;;  %v4563_v43 = vpop.f32.mrb[71].mxu1  ;;  %v5567_v41 = vld [vmem:[%s7870_s11] ss:$0 sm:$0xff] }
0x1bec   : > { %6718 = vmatpush3.bf16.xpose.msk.msra.mxu1 %vm7349_vm3, %v6716_v40  ;;  %v4564_v15 = vadd.f32 %v5532_v35, %v4563_v43 }
0x1bed   : > { %6719 = vmatprep.subr.bf16.mxu1 %v6818_v3 }
0x1bee   : > { %v6720_v45 = vpack.c.bf16 %v4569_v42, %v4564_v15  ;;  %v6374_v46 = vpop.f32.mrb[72].mxu1 }
0x1bef   : > { %v4579_v47 = vadd.f32 %v6374_v46, %v5532_v35  ;;  %v4573_v48 = vpop.f32.mrb[73].mxu1 }
0x1bf0   : > { %v4574_v49 = vadd.f32 %v5532_v35, %v4573_v48 }
0x1bf2   : > { %v6724_v50 = vpack.c.bf16 %v4579_v47, %v4574_v49  ;;  %v6377_v51 = vpop.f32.mrb[74].mxu1 }
0x1bf3   : > { %v4589_v52 = vadd.f32 %v6377_v51, %v5532_v35  ;;  %v4583_v53 = vpop.f32.mrb[75].mxu1 }
0x1bf4   : > { %6722 = vmatpush3.bf16.xpose.msk.msra.mxu1 %vm7349_vm3, %v6720_v45  ;;  %v4584_v54 = vadd.f32 %v5532_v35, %v4583_v53 }
0x1bf5   : > { %6723 = vmatprep.subr.bf16.mxu1 %v6818_v3 }
0x1bf6   : > { %v6728_v55 = vpack.c.bf16 %v4589_v52, %v4584_v54  ;;  %v5006_v52 = vld [vmem:[%s7873_s14] sm:$0xff]  ;;  %v5009_v54 = vld [vmem:[%s7873_s14 + $0x18] sm:$0xff] }
0x1bfc   : > { %6726 = vmatpush3.bf16.xpose.msk.msra.mxu1 %vm7349_vm3, %v6724_v50 }
0x1bfd   : > { %6727 = vmatprep.subr.bf16.mxu1 %v6818_v3 }
0x1c04   : > { %6730 = vmatpush3.bf16.xpose.msk.msra.mxu1 %vm7349_vm3, %v6728_v55 }
0x1c0b   : > { %6415 = vmatmul.mubr.msk.f32.vlgmr.msra.gmra.mrb[76].mxu1 %vm905_vm2, %v4471_v57 }
0x1cde   : > { %v4803_v21 = vpop.f32.mrb[76].mxu1 }
0x1cdf   : > { %v4807_v22 = vmul.f32 0.35355338, %v4803_v21  ;;  %v6416_v0 = vpop.f32.mrb[77].mxu1  ;;  %v5569_v21 = vld [vmem:[%s7872_s13] ss:$0 sm:$0xff] }
0x1ce0   : > { %v6750_v0 = vpack.c.bf16 %v5092_v63, %v5091_v62 }
0x1ce1   : > { %v4808_v23 = vsel %vm3079_vm4, %v4807_v22, -inf }
0x1ce2   : > { %4809 = vmax.xlane.f32.xlu0 %v4808_v23 }
0x1d6f   : > { %v4810_v12 = vpop.xlane.xlu0 %4809 }
0x1d70   : > { %v4811_v13 = vsub.f32 %v4807_v22, %v4810_v12 }
0x1d72   : > { %v4812_v14 = vmul.f32 1.442695, %v4811_v13 }
0x1d74   : > { %6802 = vpow2.f32 %v4812_v14 }
0x1d7e   : > { %v6803_v16 = vpop.eup %6802 }
0x1d7f   : > { %v4814_v17 = vsel %vm3079_vm4, %v6803_v16, 0.0 }
0x1d80   : > { %4815 = vadd.xlane.f32.xlu1 %v4814_v17 }
0x1e0d   : > { %v4816_v34 = vpop.xlane.xlu1 %4815 }
0x1e0e   : > { %6804 = vrcp.f32 %v4816_v34 }
0x1e18   : > { %v6805_v35 = vpop.eup %6804 }
0x1e19   : > { %v4818_v36 = vmul.f32 %v6805_v35, %v6803_v16  ;;  %v5574_v35 = vld [vmem:[%s7877_s18] ss:$0 sm:$0xff] }
0x1e1b   : > { %6434 = vmatmul.mubr.msk.f32.vlgmr.msra.gmra.mrb[62].mxu0 %vm3079_vm4, %v4818_v36 }
0x1e1c   : > { %6437 = vmatpush3.msra.mxu0 %v5565_v37  ;;  %6438 = vmatprep.mubr.msk.f32.mxu0 %vm6819_vm0, %v6820_v6  ;;  %v5575_v37 = vld [vmem:[%s7878_s19] ss:$0 sm:$0xff] }
0x1e1d   : > { %6743 = vmatprep.subr.bf16.mxu0 %v6818_v3 }
0x1eee   : > { %v4888_v38 = vpop.f32.mrb[62].mxu0 }
0x1eef   : > { %v6435_v39 = vpop.f32.mrb[63].mxu0  ;;  %6439 = vmatmul.mubr.msk.f32.vlgmr.msra.gmra.mrb[64].mxu0 %vm905_vm2, %v4888_v38 }
0x1ef0   : > { %6449 = vmatprep.mubr.msk.f32.mxu0 %vm6819_vm0, %v6820_v6 }
0x1fc2   : > { %v4963_v40 = vpop.f32.mrb[64].mxu0 }
0x1fc3   : > { %v4967_v42 = vadd.f32 %v4963_v40, %v7710_v27  ;;  %v6440_v43 = vpop.f32.mrb[65].mxu0  ;;  %v5007_v27 = vld [vmem:[%s7873_s14 + $0x8] sm:$0xff] }
0x1fc4   : > { %v6744_v53 = vpack.c.bf16 %v5007_v27, %v5006_v52 }
0x1fc5   : > { %v4975_v15 = vadd.f32 %v5567_v41, %v4967_v42 }
0x1fc6   : > { %6745 = vmatpush3.bf16.msra.mxu0 %v6744_v53 }
0x1fc7   : > { %v4976_v45 = vadd.f32 %v4975_v15, %v7365_v59  ;;  %6746 = vmatprep.subr.bf16.mxu0 %v6818_v3  ;;  %v5008_v59 = vld [vmem:[%s7873_s14 + $0x10] sm:$0xff] }
0x1fc8   : > { %v6747_v55 = vpack.c.bf16 %v5009_v54, %v5008_v59 }
0x1fc9   : > { %v4977_v46 = vsel %vm665_vm1, %v4976_v45, 0.0 }
0x1fca   : > { %4978 = vadd.xlane.f32.xlu0 %v4977_v46  ;;  %6748 = vmatpush3.bf16.msra.mxu0 %v6747_v55 }
0x1fcb   : > { %6749 = vmatprep.subr.bf16.mxu0 %v6818_v3 }
0x2057   : > { %v4979_v47 = vpop.xlane.xlu0 %4978 }
0x2058   : > { %v4980_v48 = vmul.f32 0.03125, %v4979_v47 }
0x205a   : > { %v4981_v49 = vsub.f32 %v4976_v45, %v4980_v48 }
0x205c   : > { %v4982_v50 = vmul.f32 %v4981_v49, %v4981_v49 }
0x205e   : > { %v4983_v51 = vsel %vm665_vm1, %v4982_v50, 0.0 }
0x205f   : > { %4984 = vadd.xlane.f32.xlu1 %v4983_v51 }
0x20ec   : > { %v4985_v56 = vpop.xlane.xlu1 %4984 }
0x20ed   : > { %v4986_v57 = vmul.f32 0.03125, %v4985_v56 }
0x20ef   : > { %v4987_v58 = vadd.f32 1e-05, %v4986_v57 }
0x20f1   : > { %6806 = vrsqrt.f32 %v4987_v58 }
0x20fb   : > { %v6807_v60 = vpop.eup %6806 }
0x20fc   : > { %v4989_v61 = vmul.f32 %v6807_v60, %v4981_v49 }
0x20fe   : > { %v4997_v22 = vmul.f32 %v5568_v44, %v4989_v61 }
0x2100   : > { %v5005_v23 = vadd.f32 %v5569_v21, %v4997_v22 }
0x2102   : > { %6450 = vmatmul.mubr.msk.f32.vlgmr.msra.gmra.mrb[66].mxu0 %vm665_vm1, %v5005_v23 }
0x2103   : > { %6751 = vmatpush3.bf16.msra.mxu0 %v6750_v0  ;;  %6468 = vmatprep.mubr.msk.f32.mxu0 %vm6819_vm0, %v6820_v6  ;;  %v5097_v6 = vld [vmem:[%s7875_s16 + $0x30] sm:$0xff] }
0x2104   : > { %6752 = vmatprep.subr.bf16.mxu0 %v6818_v3  ;;  %v6759_v32 = vpack.c.bf16 %v5098_v5, %v5097_v6 }
0x2107   : > { %6754 = vmatpush3.bf16.msra.mxu0 %v6753_v1 }
0x2108   : > { %6755 = vmatprep.subr.bf16.mxu0 %v6818_v3 }
0x210b   : > { %6757 = vmatpush3.bf16.msra.mxu0 %v6756_v4 }
0x210c   : > { %6758 = vmatprep.subr.bf16.mxu0 %v6818_v3  ;;  %v5572_v3 = vld [vmem:[%s7876_s17] ss:$0 sm:$0xff] }
0x210f   : > { %6760 = vmatpush3.bf16.msra.mxu0 %v6759_v32 }
0x21d5   : > { %v5086_v8 = vpop.f32.mrb[66].mxu0 }
0x21d6   : > { %v5087_v9 = vadd.f32 %v5570_v7, %v5086_v8  ;;  %v6451_v11 = vpop.f32.mrb[67].mxu0 }
0x21d8   : > { %v5090_v12 = vmax.f32 %v5087_v9, 0.0 }
0x21da   : > { %6469 = vmatmul.mubr.msk.f32.vlgmr.msra.gmra.mrb[68].mxu0 %vm3079_vm4, %v5090_v12 }
0x22ad   : > { %v5175_v13 = vpop.f32.mrb[68].mxu0 }
0x22ae   : > { %v5176_v14 = vadd.f32 %v5572_v3, %v5175_v13  ;;  %v6470_v16 = vpop.f32.mrb[69].mxu0 }
0x22b0   : > { %v5179_v17 = vadd.f32 %v5176_v14, %v5005_v23 }
0x22b2   : > { %v5180_v18 = vsel %vm665_vm1, %v5179_v17, 0.0 }
0x22b3   : > { %5181 = vadd.xlane.f32.xlu0 %v5180_v18 }
0x2340   : > { %v5182_v10 = vpop.xlane.xlu0 %5181 }
0x2341   : > { %v5183_v19 = vmul.f32 0.03125, %v5182_v10 }
0x2343   : > { %v5184_v24 = vsub.f32 %v5179_v17, %v5183_v19 }
0x2345   : > { %v5185_v25 = vmul.f32 %v5184_v24, %v5184_v24 }
0x2347   : > { %v5186_v26 = vsel %vm665_vm1, %v5185_v25, 0.0 }
0x2348   : > { %5187 = vadd.xlane.f32.xlu1 %v5186_v26 }
0x23d5   : > { %v5188_v20 = vpop.xlane.xlu1 %5187 }
0x23d6   : > { %v5189_v28 = vmul.f32 0.03125, %v5188_v20 }
0x23d8   : > { %v5190_v33 = vadd.f32 1e-05, %v5189_v28 }
0x23da   : > { %6808 = vrsqrt.f32 %v5190_v33 }
0x23e4   : > { %v6809_v34 = vpop.eup %6808 }
0x23e5   : > { %v5192_v36 = vmul.f32 %v6809_v34, %v5184_v24 }
0x23e7   : > { %v5200_v38 = vmul.f32 %v5574_v35, %v5192_v36 }
0x23e9   : > { %v5208_v39 = vadd.f32 %v5575_v37, %v5200_v38 }
0x23eb   : > { %5209 = vst.msk [vmem:[%s644_s4] sm:$0xff] %vm665_vm1, %v5208_v39 }
0x23ec PF: > { %s30_s1 = sadd.s32 1, %s6816_s1  }
0x23ed   : > { %p27_p4 = scmp.ge.s32.totalorder %s30_s1, 4  }
0x23ef   :  { %29 = sbr.rel (!%p27_p4) target bundleno = 7 (0x7), region = 183 }

</bundles_post_ra>
